<compile_context>
chip_gen: v7x
topology: tpu7x:2x2x1
jax: 0.10.0
libtpu: 0.0.40
codegen_flags: <defaults>
</compile_context>

<pallas_src>
import jax
import jax.numpy as jnp
from jax.experimental import pallas as pl
from jax.experimental.pallas import tpu as pltpu

LANES = 128   # TPU lane width; channel dims are padded up to this
_W_OFF = 8    # sublane-aligned column offset of the conv2 halo scratch


def _round_up(x, m):
    return (x + m - 1) // m * m


# --------------------- kernel 1: fused conv block (hot path) -----------------
# dropout -> conv1(3x3, pad 1) + b1 -> conv2(3x3, pad 1) + b2 -> ReLU,
# plus per-block partial BN statistics. One grid step = one batch element.

def _fused_conv_kernel(x_ref, m_ref, w1_ref, b1_ref, w2_ref, b2_ref,
                       o_ref, sum_ref, ssq_ref, y1p_ref):
    _, H, W, Cq = o_ref.shape           # static block shapes
    Cp = x_ref.shape[-1]

    # conv1 as 9 shifted (H*W, Cp) @ (Cp, Cq) MXU matmuls; dropout fused into
    # the input read (mask is pre-scaled by 1/(1-p) in the wrapper).
    acc1 = jnp.zeros((H * W, Cq), jnp.float32)
    for k in range(9):
        dh, dw = k // 3, k % 3
        xp = (x_ref[0, dh:dh + H, dw:dw + W, :]
              * m_ref[0, dh:dh + H, dw:dw + W, :])
        acc1 += jnp.dot(xp.reshape(H * W, Cp), w1_ref[k],
                        preferred_element_type=jnp.float32)
    y1 = acc1 + b1_ref[...]                                    # (H*W, Cq)

    # Zero-pad conv1's output (conv2's padding=1) in a VMEM halo scratch.
    # Interior is stored at sublane-aligned column _W_OFF so the store is
    # unmasked; the +/-1 shifted reads below tolerate unaligned offsets.
    y1p_ref[...] = jnp.zeros_like(y1p_ref)
    y1p_ref[1:H + 1, _W_OFF:_W_OFF + W, :] = y1.reshape(H, W, Cq)

    # conv2 + bias + ReLU
    acc2 = jnp.zeros((H * W, Cq), jnp.float32)
    for k in range(9):
        dh, dw = k // 3, k % 3
        yp = y1p_ref[dh:dh + H, _W_OFF - 1 + dw:_W_OFF - 1 + dw + W, :]
        acc2 += jnp.dot(yp.reshape(H * W, Cq), w2_ref[k],
                        preferred_element_type=jnp.float32)
    y2 = jnp.maximum(acc2 + b2_ref[...], 0.0)                  # ReLU, (H*W, Cq)

    o_ref[0] = y2.reshape(H, W, Cq)
    # Per-batch-element partial BN stats (finalized outside; exact over N*H*W).
    sum_ref[0] = jnp.sum(y2, axis=0, keepdims=True)
    ssq_ref[0] = jnp.sum(y2 * y2, axis=0, keepdims=True)


# ------------------- kernel 2: BN normalize (+ 2x2 max pool) -----------------

def _bn_pool_kernel(x_ref, mean_ref, rstd_ref, o_ref):
    # x_ref block: (1, Hh, 2, Wh, 2, Cq) -- pool-window offsets on axes 2 and 4
    # (the reshape that exposes them is a free dim-split done in the wrapper).
    x = x_ref[0]
    hmax = jnp.max(x, axis=1)            # (Hh, Wh, 2, Cq): leading-axis reduce
    m = jnp.max(hmax, axis=2)            # (Hh, Wh, Cq):    sublane-pair reduce
    # BN is a positive-scale affine map, so pooling first is equivalent.
    o_ref[0] = (m - mean_ref[...]) * rstd_ref[...]


def _bn_kernel(x_ref, mean_ref, rstd_ref, o_ref):
    o_ref[0] = (x_ref[0] - mean_ref[...]) * rstd_ref[...]


# --------------------------------- wrapper -----------------------------------

def conv_block_forward(x_nchw, mask_nchw, w1, b1, w2, b2,
                       dropout_prob, do_maxpool, eps=1e-5):
    N, Cin, H, W = x_nchw.shape
    Cout = w1.shape[0]
    Cp = _round_up(Cin, LANES)
    Cq = _round_up(Cout, LANES)

    # NHWC, channels padded to full lanes, +1 spatial zero ring (conv1 padding).
    scale = 1.0 / (1.0 - dropout_prob)
    x = jnp.transpose(x_nchw, (0, 2, 3, 1))
    m = jnp.transpose(mask_nchw, (0, 2, 3, 1)).astype(x.dtype) * scale
    x_pad = jnp.pad(x, ((0, 0), (1, 1), (1, 1), (0, Cp - Cin)))
    m_pad = jnp.pad(m, ((0, 0), (1, 1), (1, 1), (0, Cp - Cin)))

    # Weights as (9, Cin_pad, Cout_pad) tap-major matrices; biases (1, Cout_pad).
    w1m = jnp.pad(jnp.transpose(w1, (2, 3, 1, 0)).reshape(9, Cin, Cout),
                  ((0, 0), (0, Cp - Cin), (0, Cq - Cout)))
    w2m = jnp.pad(jnp.transpose(w2, (2, 3, 1, 0)).reshape(9, Cout, Cout),
                  ((0, 0), (0, Cq - Cout), (0, Cq - Cout)))
    b1r = jnp.pad(b1.reshape(1, Cout), ((0, 0), (0, Cq - Cout)))
    b2r = jnp.pad(b2.reshape(1, Cout), ((0, 0), (0, Cq - Cout)))

    y2, sums, ssqs = pl.pallas_call(
        _fused_conv_kernel,
        out_shape=(jax.ShapeDtypeStruct((N, H, W, Cq), jnp.float32),
                   jax.ShapeDtypeStruct((N, 1, Cq), jnp.float32),
                   jax.ShapeDtypeStruct((N, 1, Cq), jnp.float32)),
        grid=(N,),
        in_specs=[pl.BlockSpec((1, H + 2, W + 2, Cp), lambda i: (i, 0, 0, 0)),
                  pl.BlockSpec((1, H + 2, W + 2, Cp), lambda i: (i, 0, 0, 0)),
                  pl.BlockSpec((9, Cp, Cq), lambda i: (0, 0, 0)),
                  pl.BlockSpec((1, Cq), lambda i: (0, 0)),
                  pl.BlockSpec((9, Cq, Cq), lambda i: (0, 0, 0)),
                  pl.BlockSpec((1, Cq), lambda i: (0, 0))],
        out_specs=(pl.BlockSpec((1, H, W, Cq), lambda i: (i, 0, 0, 0)),
                   pl.BlockSpec((1, 1, Cq), lambda i: (i, 0, 0)),
                   pl.BlockSpec((1, 1, Cq), lambda i: (i, 0, 0))),
        scratch_shapes=[pltpu.VMEM((H + 2, W + 2 * _W_OFF, Cq), jnp.float32)],
        compiler_params=pltpu.CompilerParams(dimension_semantics=("parallel",)),
    )(x_pad, m_pad, w1m, b1r, w2m, b2r)

    # Finalize BN batch statistics (tiny (N,128) arrays; cheap XLA glue).
    cnt = float(N * H * W)
    mean = jnp.sum(sums, axis=0) / cnt                       # (1, Cq)
    var = jnp.maximum(jnp.sum(ssqs, axis=0) / cnt - mean * mean, 0.0)
    rstd = jax.lax.rsqrt(var + eps)

    if do_maxpool:
        Hh, Wh = H // 2, W // 2
        y2r = y2.reshape(N, Hh, 2, Wh, 2, Cq)                # free dim split
        out = pl.pallas_call(
            _bn_pool_kernel,
            out_shape=jax.ShapeDtypeStruct((N, Hh, Wh, Cq), jnp.float32),
            grid=(N,),
            in_specs=[pl.BlockSpec((1, Hh, 2, Wh, 2, Cq),
                                   lambda i: (i, 0, 0, 0, 0, 0)),
                      pl.BlockSpec((1, Cq), lambda i: (0, 0)),
                      pl.BlockSpec((1, Cq), lambda i: (0, 0))],
            out_specs=pl.BlockSpec((1, Hh, Wh, Cq), lambda i: (i, 0, 0, 0)),
            compiler_params=pltpu.CompilerParams(
                dimension_semantics=("parallel",)),
        )(y2r, mean, rstd)
    else:
        out = pl.pallas_call(
            _bn_kernel,
            out_shape=jax.ShapeDtypeStruct((N, H, W, Cq), jnp.float32),
            grid=(N,),
            in_specs=[pl.BlockSpec((1, H, W, Cq), lambda i: (i, 0, 0, 0)),
                      pl.BlockSpec((1, Cq), lambda i: (0, 0)),
                      pl.BlockSpec((1, Cq), lambda i: (0, 0))],
            out_specs=pl.BlockSpec((1, H, W, Cq), lambda i: (i, 0, 0, 0)),
            compiler_params=pltpu.CompilerParams(
                dimension_semantics=("parallel",)),
        )(y2, mean, rstd)

    out = out[..., :Cout]                                    # drop lane padding
    return jnp.transpose(out, (0, 3, 1, 2))                  # -> NCHW


# ---------------------------- pure-JAX reference ------------------------------

def _reference(x_nchw, mask_nchw, w1, b1, w2, b2, p, do_maxpool, eps=1e-5):
    dn = ("NCHW", "OIHW", "NCHW")
    x = x_nchw * mask_nchw * (1.0 / (1.0 - p))
    y = jax.lax.conv_general_dilated(x, w1, (1, 1), ((1, 1), (1, 1)),
                                     dimension_numbers=dn) + b1[None, :, None, None]
    y = jax.lax.conv_general_dilated(y, w2, (1, 1), ((1, 1), (1, 1)),
                                     dimension_numbers=dn) + b2[None, :, None, None]
    y = jnp.maximum(y, 0.0)
    mean = y.mean(axis=(0, 2, 3), keepdims=True)
    var = ((y - mean) ** 2).mean(axis=(0, 2, 3), keepdims=True)
    y = (y - mean) / jnp.sqrt(var + eps)
    if do_maxpool:
        Nb, C, Hh, Ww = y.shape
        y = y.reshape(Nb, C, Hh // 2, 2, Ww // 2, 2).max(axis=(3, 5))
    return y


# ----------------------------------- main --------------------------------------

if __name__ == "__main__":
    N, Cin, Cout, H, W = 2, 4, 8, 16, 16
    dropout_prob = 0.25

    key = jax.random.PRNGKey(0)
    kx, km, k1, k2, k3, k4 = jax.random.split(key, 6)

    x = jax.random.normal(kx, (N, Cin, H, W), dtype=jnp.float32)
    # deterministic dropout keep-mask (training-mode F.dropout)
    mask = jax.random.bernoulli(km, 1.0 - dropout_prob,
                                (N, Cin, H, W)).astype(jnp.float32)

    # deterministic parameter init (uniform +/- 1/sqrt(fan_in), Conv2d-like scale)
    k_in1 = 1.0 / jnp.sqrt(Cin * 9.0)
    w1 = jax.random.uniform(k1, (Cout, Cin, 3, 3), jnp.float32, -k_in1, k_in1)
    b1 = jax.random.uniform(k2, (Cout,), jnp.float32, -k_in1, k_in1)
    k_in2 = 1.0 / jnp.sqrt(Cout * 9.0)
    w2 = jax.random.uniform(k3, (Cout, Cout, 3, 3), jnp.float32, -k_in2, k_in2)
    b2 = jax.random.uniform(k4, (Cout,), jnp.float32, -k_in2, k_in2)

    fwd = jax.jit(conv_block_forward, static_argnums=(7,))   # do_maxpool static

    # with max-pool
    out = jax.block_until_ready(fwd(x, mask, w1, b1, w2, b2, dropout_prob, True))
    ref = _reference(x, mask, w1, b1, w2, b2, dropout_prob, True)
    assert out.shape == (N, Cout, H // 2, W // 2), out.shape
    assert jnp.allclose(out, ref, atol=1e-4, rtol=1e-4), \
        float(jnp.max(jnp.abs(out - ref)))

    # without max-pool
    out2 = jax.block_until_ready(fwd(x, mask, w1, b1, w2, b2, dropout_prob, False))
    ref2 = _reference(x, mask, w1, b1, w2, b2, dropout_prob, False)
    assert out2.shape == (N, Cout, H, W), out2.shape
    assert jnp.allclose(out2, ref2, atol=1e-4, rtol=1e-4), \
        float(jnp.max(jnp.abs(out2 - ref2)))

    print("KERNEL_OK")
</pallas_src>

<mosaic_0001>
module attributes {stable_mosaic.version = 11 : i64} {
  func.func @_bn_pool_kernel(%arg0: i32, %arg1: memref<1x8x2x8x2x128xf32, #tpu.memory_space<vmem>>, %arg2: memref<1x128xf32, #tpu.memory_space<vmem>>, %arg3: memref<1x128xf32, #tpu.memory_space<vmem>>, %arg4: memref<1x8x8x128xf32, #tpu.memory_space<vmem>>) attributes {dimension_semantics = [#tpu.dimension_semantics<parallel>], iteration_bounds = array<i64: 2>, scalar_prefetch = 0 : i64, scratch_operands = 0 : i64, tpu.core_type = #tpu.core_type<tc>, window_params = [{transform_indices = @transform_0, window_bounds = array<i64: 1, 8, 2, 8, 2, 128>}, {pipeline_mode = #tpu.pipeline_mode<synchronous>, transform_indices = @transform_1, window_bounds = array<i64: 1, 128>}, {pipeline_mode = #tpu.pipeline_mode<synchronous>, transform_indices = @transform_2, window_bounds = array<i64: 1, 128>}, {transform_indices = @transform_3, window_bounds = array<i64: 1, 8, 8, 128>}]} {
    %c0 = arith.constant 0 : index
    %c0_0 = arith.constant 0 : index
    %c0_1 = arith.constant 0 : index
    %c0_2 = arith.constant 0 : index
    %c0_3 = arith.constant 0 : index
    %c0_4 = arith.constant 0 : index
    %0 = vector.load %arg1[%c0, %c0_0, %c0_1, %c0_2, %c0_3, %c0_4] : memref<1x8x2x8x2x128xf32, #tpu.memory_space<vmem>>, vector<1x8x2x8x2x128xf32>
    %1 = vector.shape_cast %0 : vector<1x8x2x8x2x128xf32> to vector<8x2x8x2x128xf32>
    %cst = arith.constant dense<0xFF800000> : vector<8x8x2x128xf32>
    %2 = vector.multi_reduction <maximumf>, %1, %cst [1] : vector<8x2x8x2x128xf32> to vector<8x8x2x128xf32>
    %cst_5 = arith.constant dense<0xFF800000> : vector<8x8x128xf32>
    %3 = vector.multi_reduction <maximumf>, %2, %cst_5 [2] : vector<8x8x2x128xf32> to vector<8x8x128xf32>
    %c0_6 = arith.constant 0 : index
    %c0_7 = arith.constant 0 : index
    %4 = vector.load %arg2[%c0_6, %c0_7] : memref<1x128xf32, #tpu.memory_space<vmem>>, vector<1x128xf32>
    %5 = vector.shape_cast %4 : vector<1x128xf32> to vector<1x1x128xf32>
    %6 = vector.broadcast %5 : vector<1x1x128xf32> to vector<8x8x128xf32>
    %7 = arith.subf %3, %6 : vector<8x8x128xf32>
    %c0_8 = arith.constant 0 : index
    %c0_9 = arith.constant 0 : index
    %8 = vector.load %arg3[%c0_8, %c0_9] : memref<1x128xf32, #tpu.memory_space<vmem>>, vector<1x128xf32>
    %9 = vector.shape_cast %8 : vector<1x128xf32> to vector<1x1x128xf32>
    %10 = vector.broadcast %9 : vector<1x1x128xf32> to vector<8x8x128xf32>
    %11 = arith.mulf %7, %10 : vector<8x8x128xf32>
    %c0_10 = arith.constant 0 : index
    %c0_11 = arith.constant 0 : index
    %c0_12 = arith.constant 0 : index
    %c0_13 = arith.constant 0 : index
    %12 = vector.load %arg4[%c0_10, %c0_11, %c0_12, %c0_13] : memref<1x8x8x128xf32, #tpu.memory_space<vmem>>, vector<1x8x8x128xf32>
    %13 = vector.shape_cast %12 : vector<1x8x8x128xf32> to vector<8x8x128xf32>
    %14 = vector.shape_cast %11 : vector<8x8x128xf32> to vector<1x8x8x128xf32>
    tpu.vector_store %arg4[%c0_10, %c0_11, %c0_12, %c0_13], %14 {strides = array<i32>} : memref<1x8x8x128xf32, #tpu.memory_space<vmem>>, vector<1x8x8x128xf32>,
    return
  }
  func.func @transform_0(%arg0: i32) -> (i32, i32, i32, i32, i32, i32) {
    %c0_i32 = arith.constant 0 : i32
    %c0_i32_0 = arith.constant 0 : i32
    %c0_i32_1 = arith.constant 0 : i32
    %c0_i32_2 = arith.constant 0 : i32
    %c0_i32_3 = arith.constant 0 : i32
    %c0_i32_4 = arith.constant 0 : i32
    return %arg0, %c0_i32, %c0_i32_0, %c0_i32_1, %c0_i32_2, %c0_i32_3 : i32, i32, i32, i32, i32, i32
  }
  func.func @transform_1(%arg0: i32) -> (i32, i32) {
    %c0_i32 = arith.constant 0 : i32
    %c0_i32_0 = arith.constant 0 : i32
    %c0_i32_1 = arith.constant 0 : i32
    return %c0_i32, %c0_i32_0 : i32, i32
  }
  func.func @transform_2(%arg0: i32) -> (i32, i32) {
    %c0_i32 = arith.constant 0 : i32
    %c0_i32_0 = arith.constant 0 : i32
    %c0_i32_1 = arith.constant 0 : i32
    return %c0_i32, %c0_i32_0 : i32, i32
  }
  func.func @transform_3(%arg0: i32) -> (i32, i32, i32, i32) {
    %c0_i32 = arith.constant 0 : i32
    %c0_i32_0 = arith.constant 0 : i32
    %c0_i32_1 = arith.constant 0 : i32
    %c0_i32_2 = arith.constant 0 : i32
    return %arg0, %c0_i32, %c0_i32_0, %c0_i32_1 : i32, i32, i32, i32
  }
}

module attributes {stable_mosaic.version = 11 : i64} {
  func.func @_fused_conv_kernel(%arg0: i32, %arg1: memref<1x18x18x128xf32, #tpu.memory_space<vmem>>, %arg2: memref<1x18x18x128xf32, #tpu.memory_space<vmem>>, %arg3: memref<9x128x128xf32, #tpu.memory_space<vmem>>, %arg4: memref<1x128xf32, #tpu.memory_space<vmem>>, %arg5: memref<9x128x128xf32, #tpu.memory_space<vmem>>, %arg6: memref<1x128xf32, #tpu.memory_space<vmem>>, %arg7: memref<1x16x16x128xf32, #tpu.memory_space<vmem>>, %arg8: memref<1x1x128xf32, #tpu.memory_space<vmem>>, %arg9: memref<1x1x128xf32, #tpu.memory_space<vmem>>, %arg10: memref<18x32x128xf32, #tpu.memory_space<vmem>>) attributes {dimension_semantics = [#tpu.dimension_semantics<parallel>], iteration_bounds = array<i64: 2>, scalar_prefetch = 0 : i64, scratch_operands = 1 : i64, tpu.core_type = #tpu.core_type<tc>, window_params = [{transform_indices = @transform_0, window_bounds = array<i64: 1, 18, 18, 128>}, {transform_indices = @transform_1, window_bounds = array<i64: 1, 18, 18, 128>}, {pipeline_mode = #tpu.pipeline_mode<synchronous>, transform_indices = @transform_2, window_bounds = array<i64: 9, 128, 128>}, {pipeline_mode = #tpu.pipeline_mode<synchronous>, transform_indices = @transform_3, window_bounds = array<i64: 1, 128>}, {pipeline_mode = #tpu.pipeline_mode<synchronous>, transform_indices = @transform_4, window_bounds = array<i64: 9, 128, 128>}, {pipeline_mode = #tpu.pipeline_mode<synchronous>, transform_indices = @transform_5, window_bounds = array<i64: 1, 128>}, {transform_indices = @transform_6, window_bounds = array<i64: 1, 16, 16, 128>}, {transform_indices = @transform_7, window_bounds = array<i64: 1, 1, 128>}, {transform_indices = @transform_8, window_bounds = array<i64: 1, 1, 128>}]} {
    %cst = arith.constant 0.000000e+00 : f32
    %0 = vector.broadcast %cst : f32 to vector<256x128xf32>
    %c0 = arith.constant 0 : index
    %c0_0 = arith.constant 0 : index
    %c0_1 = arith.constant 0 : index
    %c0_2 = arith.constant 0 : index
    %1 = vector.load %arg1[%c0, %c0_0, %c0_1, %c0_2] : memref<1x18x18x128xf32, #tpu.memory_space<vmem>>, vector<1x16x16x128xf32>
    %2 = vector.shape_cast %1 : vector<1x16x16x128xf32> to vector<16x16x128xf32>
    %c0_3 = arith.constant 0 : index
    %c0_4 = arith.constant 0 : index
    %c0_5 = arith.constant 0 : index
    %c0_6 = arith.constant 0 : index
    %3 = vector.load %arg2[%c0_3, %c0_4, %c0_5, %c0_6] : memref<1x18x18x128xf32, #tpu.memory_space<vmem>>, vector<1x16x16x128xf32>
    %4 = vector.shape_cast %3 : vector<1x16x16x128xf32> to vector<16x16x128xf32>
    %5 = arith.mulf %2, %4 : vector<16x16x128xf32>
    %6 = vector.shape_cast %5 : vector<16x16x128xf32> to vector<256x128xf32>
    %c0_7 = arith.constant 0 : index
    %c0_8 = arith.constant 0 : index
    %c0_9 = arith.constant 0 : index
    %7 = vector.load %arg3[%c0_7, %c0_8, %c0_9] : memref<9x128x128xf32, #tpu.memory_space<vmem>>, vector<1x128x128xf32>
    %8 = vector.shape_cast %7 : vector<1x128x128xf32> to vector<128x128xf32>
    %cst_10 = arith.constant dense<0.000000e+00> : vector<256x128xf32>
    %9 = tpu.matmul %6, %8, %cst_10 {dimension_numbers = #tpu.dot_dimension_numbers<[1], [0], [0], [1], [0, 0, 1, 1], [], []>} : vector<256x128xf32>, vector<128x128xf32>, vector<256x128xf32> -> vector<256x128xf32>
    %10 = arith.addf %0, %9 : vector<256x128xf32>
    %c0_11 = arith.constant 0 : index
    %c0_12 = arith.constant 0 : index
    %c1 = arith.constant 1 : index
    %c0_13 = arith.constant 0 : index
    %11 = vector.load %arg1[%c0_11, %c0_12, %c1, %c0_13] : memref<1x18x18x128xf32, #tpu.memory_space<vmem>>, vector<1x16x16x128xf32>
    %12 = vector.shape_cast %11 : vector<1x16x16x128xf32> to vector<16x16x128xf32>
    %c0_14 = arith.constant 0 : index
    %c0_15 = arith.constant 0 : index
    %c1_16 = arith.constant 1 : index
    %c0_17 = arith.constant 0 : index
    %13 = vector.load %arg2[%c0_14, %c0_15, %c1_16, %c0_17] : memref<1x18x18x128xf32, #tpu.memory_space<vmem>>, vector<1x16x16x128xf32>
    %14 = vector.shape_cast %13 : vector<1x16x16x128xf32> to vector<16x16x128xf32>
    %15 = arith.mulf %12, %14 : vector<16x16x128xf32>
    %16 = vector.shape_cast %15 : vector<16x16x128xf32> to vector<256x128xf32>
    %c1_18 = arith.constant 1 : index
    %c0_19 = arith.constant 0 : index
    %c0_20 = arith.constant 0 : index
    %17 = vector.load %arg3[%c1_18, %c0_19, %c0_20] : memref<9x128x128xf32, #tpu.memory_space<vmem>>, vector<1x128x128xf32>
    %18 = vector.shape_cast %17 : vector<1x128x128xf32> to vector<128x128xf32>
    %cst_21 = arith.constant dense<0.000000e+00> : vector<256x128xf32>
    %19 = tpu.matmul %16, %18, %cst_21 {dimension_numbers = #tpu.dot_dimension_numbers<[1], [0], [0], [1], [0, 0, 1, 1], [], []>} : vector<256x128xf32>, vector<128x128xf32>, vector<256x128xf32> -> vector<256x128xf32>
    %20 = arith.addf %10, %19 : vector<256x128xf32>
    %c0_22 = arith.constant 0 : index
    %c0_23 = arith.constant 0 : index
    %c2 = arith.constant 2 : index
    %c0_24 = arith.constant 0 : index
    %21 = vector.load %arg1[%c0_22, %c0_23, %c2, %c0_24] : memref<1x18x18x128xf32, #tpu.memory_space<vmem>>, vector<1x16x16x128xf32>
    %22 = vector.shape_cast %21 : vector<1x16x16x128xf32> to vector<16x16x128xf32>
    %c0_25 = arith.constant 0 : index
    %c0_26 = arith.constant 0 : index
    %c2_27 = arith.constant 2 : index
    %c0_28 = arith.constant 0 : index
    %23 = vector.load %arg2[%c0_25, %c0_26, %c2_27, %c0_28] : memref<1x18x18x128xf32, #tpu.memory_space<vmem>>, vector<1x16x16x128xf32>
    %24 = vector.shape_cast %23 : vector<1x16x16x128xf32> to vector<16x16x128xf32>
    %25 = arith.mulf %22, %24 : vector<16x16x128xf32>
    %26 = vector.shape_cast %25 : vector<16x16x128xf32> to vector<256x128xf32>
    %c2_29 = arith.constant 2 : index
    %c0_30 = arith.constant 0 : index
    %c0_31 = arith.constant 0 : index
    %27 = vector.load %arg3[%c2_29, %c0_30, %c0_31] : memref<9x128x128xf32, #tpu.memory_space<vmem>>, vector<1x128x128xf32>
    %28 = vector.shape_cast %27 : vector<1x128x128xf32> to vector<128x128xf32>
    %cst_32 = arith.constant dense<0.000000e+00> : vector<256x128xf32>
    %29 = tpu.matmul %26, %28, %cst_32 {dimension_numbers = #tpu.dot_dimension_numbers<[1], [0], [0], [1], [0, 0, 1, 1], [], []>} : vector<256x128xf32>, vector<128x128xf32>, vector<256x128xf32> -> vector<256x128xf32>
    %30 = arith.addf %20, %29 : vector<256x128xf32>
    %c0_33 = arith.constant 0 : index
    %c1_34 = arith.constant 1 : index
    %c0_35 = arith.constant 0 : index
    %c0_36 = arith.constant 0 : index
    %31 = vector.load %arg1[%c0_33, %c1_34, %c0_35, %c0_36] : memref<1x18x18x128xf32, #tpu.memory_space<vmem>>, vector<1x16x16x128xf32>
    %32 = vector.shape_cast %31 : vector<1x16x16x128xf32> to vector<16x16x128xf32>
    %c0_37 = arith.constant 0 : index
    %c1_38 = arith.constant 1 : index
    %c0_39 = arith.constant 0 : index
    %c0_40 = arith.constant 0 : index
    %33 = vector.load %arg2[%c0_37, %c1_38, %c0_39, %c0_40] : memref<1x18x18x128xf32, #tpu.memory_space<vmem>>, vector<1x16x16x128xf32>
    %34 = vector.shape_cast %33 : vector<1x16x16x128xf32> to vector<16x16x128xf32>
    %35 = arith.mulf %32, %34 : vector<16x16x128xf32>
    %36 = vector.shape_cast %35 : vector<16x16x128xf32> to vector<256x128xf32>
    %c3 = arith.constant 3 : index
    %c0_41 = arith.constant 0 : index
    %c0_42 = arith.constant 0 : index
    %37 = vector.load %arg3[%c3, %c0_41, %c0_42] : memref<9x128x128xf32, #tpu.memory_space<vmem>>, vector<1x128x128xf32>
    %38 = vector.shape_cast %37 : vector<1x128x128xf32> to vector<128x128xf32>
    %cst_43 = arith.constant dense<0.000000e+00> : vector<256x128xf32>
    %39 = tpu.matmul %36, %38, %cst_43 {dimension_numbers = #tpu.dot_dimension_numbers<[1], [0], [0], [1], [0, 0, 1, 1], [], []>} : vector<256x128xf32>, vector<128x128xf32>, vector<256x128xf32> -> vector<256x128xf32>
    %40 = arith.addf %30, %39 : vector<256x128xf32>
    %c0_44 = arith.constant 0 : index
    %c1_45 = arith.constant 1 : index
    %c1_46 = arith.constant 1 : index
    %c0_47 = arith.constant 0 : index
    %41 = vector.load %arg1[%c0_44, %c1_45, %c1_46, %c0_47] : memref<1x18x18x128xf32, #tpu.memory_space<vmem>>, vector<1x16x16x128xf32>
    %42 = vector.shape_cast %41 : vector<1x16x16x128xf32> to vector<16x16x128xf32>
    %c0_48 = arith.constant 0 : index
    %c1_49 = arith.constant 1 : index
    %c1_50 = arith.constant 1 : index
    %c0_51 = arith.constant 0 : index
    %43 = vector.load %arg2[%c0_48, %c1_49, %c1_50, %c0_51] : memref<1x18x18x128xf32, #tpu.memory_space<vmem>>, vector<1x16x16x128xf32>
    %44 = vector.shape_cast %43 : vector<1x16x16x128xf32> to vector<16x16x128xf32>
    %45 = arith.mulf %42, %44 : vector<16x16x128xf32>
    %46 = vector.shape_cast %45 : vector<16x16x128xf32> to vector<256x128xf32>
    %c4 = arith.constant 4 : index
    %c0_52 = arith.constant 0 : index
    %c0_53 = arith.constant 0 : index
    %47 = vector.load %arg3[%c4, %c0_52, %c0_53] : memref<9x128x128xf32, #tpu.memory_space<vmem>>, vector<1x128x128xf32>
    %48 = vector.shape_cast %47 : vector<1x128x128xf32> to vector<128x128xf32>
    %cst_54 = arith.constant dense<0.000000e+00> : vector<256x128xf32>
    %49 = tpu.matmul %46, %48, %cst_54 {dimension_numbers = #tpu.dot_dimension_numbers<[1], [0], [0], [1], [0, 0, 1, 1], [], []>} : vector<256x128xf32>, vector<128x128xf32>, vector<256x128xf32> -> vector<256x128xf32>
    %50 = arith.addf %40, %49 : vector<256x128xf32>
    %c0_55 = arith.constant 0 : index
    %c1_56 = arith.constant 1 : index
    %c2_57 = arith.constant 2 : index
    %c0_58 = arith.constant 0 : index
    %51 = vector.load %arg1[%c0_55, %c1_56, %c2_57, %c0_58] : memref<1x18x18x128xf32, #tpu.memory_space<vmem>>, vector<1x16x16x128xf32>
    %52 = vector.shape_cast %51 : vector<1x16x16x128xf32> to vector<16x16x128xf32>
    %c0_59 = arith.constant 0 : index
    %c1_60 = arith.constant 1 : index
    %c2_61 = arith.constant 2 : index
    %c0_62 = arith.constant 0 : index
    %53 = vector.load %arg2[%c0_59, %c1_60, %c2_61, %c0_62] : memref<1x18x18x128xf32, #tpu.memory_space<vmem>>, vector<1x16x16x128xf32>
    %54 = vector.shape_cast %53 : vector<1x16x16x128xf32> to vector<16x16x128xf32>
    %55 = arith.mulf %52, %54 : vector<16x16x128xf32>
    %56 = vector.shape_cast %55 : vector<16x16x128xf32> to vector<256x128xf32>
    %c5 = arith.constant 5 : index
    %c0_63 = arith.constant 0 : index
    %c0_64 = arith.constant 0 : index
    %57 = vector.load %arg3[%c5, %c0_63, %c0_64] : memref<9x128x128xf32, #tpu.memory_space<vmem>>, vector<1x128x128xf32>
    %58 = vector.shape_cast %57 : vector<1x128x128xf32> to vector<128x128xf32>
    %cst_65 = arith.constant dense<0.000000e+00> : vector<256x128xf32>
    %59 = tpu.matmul %56, %58, %cst_65 {dimension_numbers = #tpu.dot_dimension_numbers<[1], [0], [0], [1], [0, 0, 1, 1], [], []>} : vector<256x128xf32>, vector<128x128xf32>, vector<256x128xf32> -> vector<256x128xf32>
    %60 = arith.addf %50, %59 : vector<256x128xf32>
    %c0_66 = arith.constant 0 : index
    %c2_67 = arith.constant 2 : index
    %c0_68 = arith.constant 0 : index
    %c0_69 = arith.constant 0 : index
    %61 = vector.load %arg1[%c0_66, %c2_67, %c0_68, %c0_69] : memref<1x18x18x128xf32, #tpu.memory_space<vmem>>, vector<1x16x16x128xf32>
    %62 = vector.shape_cast %61 : vector<1x16x16x128xf32> to vector<16x16x128xf32>
    %c0_70 = arith.constant 0 : index
    %c2_71 = arith.constant 2 : index
    %c0_72 = arith.constant 0 : index
    %c0_73 = arith.constant 0 : index
    %63 = vector.load %arg2[%c0_70, %c2_71, %c0_72, %c0_73] : memref<1x18x18x128xf32, #tpu.memory_space<vmem>>, vector<1x16x16x128xf32>
    %64 = vector.shape_cast %63 : vector<1x16x16x128xf32> to vector<16x16x128xf32>
    %65 = arith.mulf %62, %64 : vector<16x16x128xf32>
    %66 = vector.shape_cast %65 : vector<16x16x128xf32> to vector<256x128xf32>
    %c6 = arith.constant 6 : index
    %c0_74 = arith.constant 0 : index
    %c0_75 = arith.constant 0 : index
    %67 = vector.load %arg3[%c6, %c0_74, %c0_75] : memref<9x128x128xf32, #tpu.memory_space<vmem>>, vector<1x128x128xf32>
    %68 = vector.shape_cast %67 : vector<1x128x128xf32> to vector<128x128xf32>
    %cst_76 = arith.constant dense<0.000000e+00> : vector<256x128xf32>
    %69 = tpu.matmul %66, %68, %cst_76 {dimension_numbers = #tpu.dot_dimension_numbers<[1], [0], [0], [1], [0, 0, 1, 1], [], []>} : vector<256x128xf32>, vector<128x128xf32>, vector<256x128xf32> -> vector<256x128xf32>
    %70 = arith.addf %60, %69 : vector<256x128xf32>
    %c0_77 = arith.constant 0 : index
    %c2_78 = arith.constant 2 : index
    %c1_79 = arith.constant 1 : index
    %c0_80 = arith.constant 0 : index
    %71 = vector.load %arg1[%c0_77, %c2_78, %c1_79, %c0_80] : memref<1x18x18x128xf32, #tpu.memory_space<vmem>>, vector<1x16x16x128xf32>
    %72 = vector.shape_cast %71 : vector<1x16x16x128xf32> to vector<16x16x128xf32>
    %c0_81 = arith.constant 0 : index
    %c2_82 = arith.constant 2 : index
    %c1_83 = arith.constant 1 : index
    %c0_84 = arith.constant 0 : index
    %73 = vector.load %arg2[%c0_81, %c2_82, %c1_83, %c0_84] : memref<1x18x18x128xf32, #tpu.memory_space<vmem>>, vector<1x16x16x128xf32>
    %74 = vector.shape_cast %73 : vector<1x16x16x128xf32> to vector<16x16x128xf32>
    %75 = arith.mulf %72, %74 : vector<16x16x128xf32>
    %76 = vector.shape_cast %75 : vector<16x16x128xf32> to vector<256x128xf32>
    %c7 = arith.constant 7 : index
    %c0_85 = arith.constant 0 : index
    %c0_86 = arith.constant 0 : index
    %77 = vector.load %arg3[%c7, %c0_85, %c0_86] : memref<9x128x128xf32, #tpu.memory_space<vmem>>, vector<1x128x128xf32>
    %78 = vector.shape_cast %77 : vector<1x128x128xf32> to vector<128x128xf32>
    %cst_87 = arith.constant dense<0.000000e+00> : vector<256x128xf32>
    %79 = tpu.matmul %76, %78, %cst_87 {dimension_numbers = #tpu.dot_dimension_numbers<[1], [0], [0], [1], [0, 0, 1, 1], [], []>} : vector<256x128xf32>, vector<128x128xf32>, vector<256x128xf32> -> vector<256x128xf32>
    %80 = arith.addf %70, %79 : vector<256x128xf32>
    %c0_88 = arith.constant 0 : index
    %c2_89 = arith.constant 2 : index
    %c2_90 = arith.constant 2 : index
    %c0_91 = arith.constant 0 : index
    %81 = vector.load %arg1[%c0_88, %c2_89, %c2_90, %c0_91] : memref<1x18x18x128xf32, #tpu.memory_space<vmem>>, vector<1x16x16x128xf32>
    %82 = vector.shape_cast %81 : vector<1x16x16x128xf32> to vector<16x16x128xf32>
    %c0_92 = arith.constant 0 : index
    %c2_93 = arith.constant 2 : index
    %c2_94 = arith.constant 2 : index
    %c0_95 = arith.constant 0 : index
    %83 = vector.load %arg2[%c0_92, %c2_93, %c2_94, %c0_95] : memref<1x18x18x128xf32, #tpu.memory_space<vmem>>, vector<1x16x16x128xf32>
    %84 = vector.shape_cast %83 : vector<1x16x16x128xf32> to vector<16x16x128xf32>
    %85 = arith.mulf %82, %84 : vector<16x16x128xf32>
    %86 = vector.shape_cast %85 : vector<16x16x128xf32> to vector<256x128xf32>
    %c8 = arith.constant 8 : index
    %c0_96 = arith.constant 0 : index
    %c0_97 = arith.constant 0 : index
    %87 = vector.load %arg3[%c8, %c0_96, %c0_97] : memref<9x128x128xf32, #tpu.memory_space<vmem>>, vector<1x128x128xf32>
    %88 = vector.shape_cast %87 : vector<1x128x128xf32> to vector<128x128xf32>
    %cst_98 = arith.constant dense<0.000000e+00> : vector<256x128xf32>
    %89 = tpu.matmul %86, %88, %cst_98 {dimension_numbers = #tpu.dot_dimension_numbers<[1], [0], [0], [1], [0, 0, 1, 1], [], []>} : vector<256x128xf32>, vector<128x128xf32>, vector<256x128xf32> -> vector<256x128xf32>
    %90 = arith.addf %80, %89 : vector<256x128xf32>
    %c0_99 = arith.constant 0 : index
    %c0_100 = arith.constant 0 : index
    %91 = vector.load %arg4[%c0_99, %c0_100] : memref<1x128xf32, #tpu.memory_space<vmem>>, vector<1x128xf32>
    %92 = vector.broadcast %91 : vector<1x128xf32> to vector<256x128xf32>
    %93 = arith.addf %90, %92 : vector<256x128xf32>
    %cst_101 = arith.constant 0.000000e+00 : f32
    %94 = vector.broadcast %cst_101 : f32 to vector<18x32x128xf32>
    %c0_102 = arith.constant 0 : index
    %c0_103 = arith.constant 0 : index
    %c0_104 = arith.constant 0 : index
    %95 = vector.load %arg10[%c0_102, %c0_103, %c0_104] : memref<18x32x128xf32, #tpu.memory_space<vmem>>, vector<18x32x128xf32>
    tpu.vector_store %arg10[%c0_102, %c0_103, %c0_104], %94 {strides = array<i32>} : memref<18x32x128xf32, #tpu.memory_space<vmem>>, vector<18x32x128xf32>,
    %96 = vector.shape_cast %93 : vector<256x128xf32> to vector<16x16x128xf32>
    %c1_105 = arith.constant 1 : index
    %c8_106 = arith.constant 8 : index
    %c0_107 = arith.constant 0 : index
    %97 = vector.load %arg10[%c1_105, %c8_106, %c0_107] : memref<18x32x128xf32, #tpu.memory_space<vmem>>, vector<16x16x128xf32>
    tpu.vector_store %arg10[%c1_105, %c8_106, %c0_107], %96 {strides = array<i32>} : memref<18x32x128xf32, #tpu.memory_space<vmem>>, vector<16x16x128xf32>,
    %cst_108 = arith.constant 0.000000e+00 : f32
    %98 = vector.broadcast %cst_108 : f32 to vector<256x128xf32>
    %c0_109 = arith.constant 0 : index
    %c7_110 = arith.constant 7 : index
    %c0_111 = arith.constant 0 : index
    %99 = vector.load %arg10[%c0_109, %c7_110, %c0_111] : memref<18x32x128xf32, #tpu.memory_space<vmem>>, vector<16x16x128xf32>
    %100 = vector.shape_cast %99 : vector<16x16x128xf32> to vector<256x128xf32>
    %c0_112 = arith.constant 0 : index
    %c0_113 = arith.constant 0 : index
    %c0_114 = arith.constant 0 : index
    %101 = vector.load %arg5[%c0_112, %c0_113, %c0_114] : memref<9x128x128xf32, #tpu.memory_space<vmem>>, vector<1x128x128xf32>
    %102 = vector.shape_cast %101 : vector<1x128x128xf32> to vector<128x128xf32>
    %cst_115 = arith.constant dense<0.000000e+00> : vector<256x128xf32>
    %103 = tpu.matmul %100, %102, %cst_115 {dimension_numbers = #tpu.dot_dimension_numbers<[1], [0], [0], [1], [0, 0, 1, 1], [], []>} : vector<256x128xf32>, vector<128x128xf32>, vector<256x128xf32> -> vector<256x128xf32>
    %104 = arith.addf %98, %103 : vector<256x128xf32>
    %c0_116 = arith.constant 0 : index
    %c8_117 = arith.constant 8 : index
    %c0_118 = arith.constant 0 : index
    %105 = vector.load %arg10[%c0_116, %c8_117, %c0_118] : memref<18x32x128xf32, #tpu.memory_space<vmem>>, vector<16x16x128xf32>
    %106 = vector.shape_cast %105 : vector<16x16x128xf32> to vector<256x128xf32>
    %c1_119 = arith.constant 1 : index
    %c0_120 = arith.constant 0 : index
    %c0_121 = arith.constant 0 : index
    %107 = vector.load %arg5[%c1_119, %c0_120, %c0_121] : memref<9x128x128xf32, #tpu.memory_space<vmem>>, vector<1x128x128xf32>
    %108 = vector.shape_cast %107 : vector<1x128x128xf32> to vector<128x128xf32>
    %cst_122 = arith.constant dense<0.000000e+00> : vector<256x128xf32>
    %109 = tpu.matmul %106, %108, %cst_122 {dimension_numbers = #tpu.dot_dimension_numbers<[1], [0], [0], [1], [0, 0, 1, 1], [], []>} : vector<256x128xf32>, vector<128x128xf32>, vector<256x128xf32> -> vector<256x128xf32>
    %110 = arith.addf %104, %109 : vector<256x128xf32>
    %c0_123 = arith.constant 0 : index
    %c9 = arith.constant 9 : index
    %c0_124 = arith.constant 0 : index
    %111 = vector.load %arg10[%c0_123, %c9, %c0_124] : memref<18x32x128xf32, #tpu.memory_space<vmem>>, vector<16x16x128xf32>
    %112 = vector.shape_cast %111 : vector<16x16x128xf32> to vector<256x128xf32>
    %c2_125 = arith.constant 2 : index
    %c0_126 = arith.constant 0 : index
    %c0_127 = arith.constant 0 : index
    %113 = vector.load %arg5[%c2_125, %c0_126, %c0_127] : memref<9x128x128xf32, #tpu.memory_space<vmem>>, vector<1x128x128xf32>
    %114 = vector.shape_cast %113 : vector<1x128x128xf32> to vector<128x128xf32>
    %cst_128 = arith.constant dense<0.000000e+00> : vector<256x128xf32>
    %115 = tpu.matmul %112, %114, %cst_128 {dimension_numbers = #tpu.dot_dimension_numbers<[1], [0], [0], [1], [0, 0, 1, 1], [], []>} : vector<256x128xf32>, vector<128x128xf32>, vector<256x128xf32> -> vector<256x128xf32>
    %116 = arith.addf %110, %115 : vector<256x128xf32>
    %c1_129 = arith.constant 1 : index
    %c7_130 = arith.constant 7 : index
    %c0_131 = arith.constant 0 : index
    %117 = vector.load %arg10[%c1_129, %c7_130, %c0_131] : memref<18x32x128xf32, #tpu.memory_space<vmem>>, vector<16x16x128xf32>
    %118 = vector.shape_cast %117 : vector<16x16x128xf32> to vector<256x128xf32>
    %c3_132 = arith.constant 3 : index
    %c0_133 = arith.constant 0 : index
    %c0_134 = arith.constant 0 : index
    %119 = vector.load %arg5[%c3_132, %c0_133, %c0_134] : memref<9x128x128xf32, #tpu.memory_space<vmem>>, vector<1x128x128xf32>
    %120 = vector.shape_cast %119 : vector<1x128x128xf32> to vector<128x128xf32>
    %cst_135 = arith.constant dense<0.000000e+00> : vector<256x128xf32>
    %121 = tpu.matmul %118, %120, %cst_135 {dimension_numbers = #tpu.dot_dimension_numbers<[1], [0], [0], [1], [0, 0, 1, 1], [], []>} : vector<256x128xf32>, vector<128x128xf32>, vector<256x128xf32> -> vector<256x128xf32>
    %122 = arith.addf %116, %121 : vector<256x128xf32>
    %c1_136 = arith.constant 1 : index
    %c8_137 = arith.constant 8 : index
    %c0_138 = arith.constant 0 : index
    %123 = vector.load %arg10[%c1_136, %c8_137, %c0_138] : memref<18x32x128xf32, #tpu.memory_space<vmem>>, vector<16x16x128xf32>
    %124 = vector.shape_cast %123 : vector<16x16x128xf32> to vector<256x128xf32>
    %c4_139 = arith.constant 4 : index
    %c0_140 = arith.constant 0 : index
    %c0_141 = arith.constant 0 : index
    %125 = vector.load %arg5[%c4_139, %c0_140, %c0_141] : memref<9x128x128xf32, #tpu.memory_space<vmem>>, vector<1x128x128xf32>
    %126 = vector.shape_cast %125 : vector<1x128x128xf32> to vector<128x128xf32>
    %cst_142 = arith.constant dense<0.000000e+00> : vector<256x128xf32>
    %127 = tpu.matmul %124, %126, %cst_142 {dimension_numbers = #tpu.dot_dimension_numbers<[1], [0], [0], [1], [0, 0, 1, 1], [], []>} : vector<256x128xf32>, vector<128x128xf32>, vector<256x128xf32> -> vector<256x128xf32>
    %128 = arith.addf %122, %127 : vector<256x128xf32>
    %c1_143 = arith.constant 1 : index
    %c9_144 = arith.constant 9 : index
    %c0_145 = arith.constant 0 : index
    %129 = vector.load %arg10[%c1_143, %c9_144, %c0_145] : memref<18x32x128xf32, #tpu.memory_space<vmem>>, vector<16x16x128xf32>
    %130 = vector.shape_cast %129 : vector<16x16x128xf32> to vector<256x128xf32>
    %c5_146 = arith.constant 5 : index
    %c0_147 = arith.constant 0 : index
    %c0_148 = arith.constant 0 : index
    %131 = vector.load %arg5[%c5_146, %c0_147, %c0_148] : memref<9x128x128xf32, #tpu.memory_space<vmem>>, vector<1x128x128xf32>
    %132 = vector.shape_cast %131 : vector<1x128x128xf32> to vector<128x128xf32>
    %cst_149 = arith.constant dense<0.000000e+00> : vector<256x128xf32>
    %133 = tpu.matmul %130, %132, %cst_149 {dimension_numbers = #tpu.dot_dimension_numbers<[1], [0], [0], [1], [0, 0, 1, 1], [], []>} : vector<256x128xf32>, vector<128x128xf32>, vector<256x128xf32> -> vector<256x128xf32>
    %134 = arith.addf %128, %133 : vector<256x128xf32>
    %c2_150 = arith.constant 2 : index
    %c7_151 = arith.constant 7 : index
    %c0_152 = arith.constant 0 : index
    %135 = vector.load %arg10[%c2_150, %c7_151, %c0_152] : memref<18x32x128xf32, #tpu.memory_space<vmem>>, vector<16x16x128xf32>
    %136 = vector.shape_cast %135 : vector<16x16x128xf32> to vector<256x128xf32>
    %c6_153 = arith.constant 6 : index
    %c0_154 = arith.constant 0 : index
    %c0_155 = arith.constant 0 : index
    %137 = vector.load %arg5[%c6_153, %c0_154, %c0_155] : memref<9x128x128xf32, #tpu.memory_space<vmem>>, vector<1x128x128xf32>
    %138 = vector.shape_cast %137 : vector<1x128x128xf32> to vector<128x128xf32>
    %cst_156 = arith.constant dense<0.000000e+00> : vector<256x128xf32>
    %139 = tpu.matmul %136, %138, %cst_156 {dimension_numbers = #tpu.dot_dimension_numbers<[1], [0], [0], [1], [0, 0, 1, 1], [], []>} : vector<256x128xf32>, vector<128x128xf32>, vector<256x128xf32> -> vector<256x128xf32>
    %140 = arith.addf %134, %139 : vector<256x128xf32>
    %c2_157 = arith.constant 2 : index
    %c8_158 = arith.constant 8 : index
    %c0_159 = arith.constant 0 : index
    %141 = vector.load %arg10[%c2_157, %c8_158, %c0_159] : memref<18x32x128xf32, #tpu.memory_space<vmem>>, vector<16x16x128xf32>
    %142 = vector.shape_cast %141 : vector<16x16x128xf32> to vector<256x128xf32>
    %c7_160 = arith.constant 7 : index
    %c0_161 = arith.constant 0 : index
    %c0_162 = arith.constant 0 : index
    %143 = vector.load %arg5[%c7_160, %c0_161, %c0_162] : memref<9x128x128xf32, #tpu.memory_space<vmem>>, vector<1x128x128xf32>
    %144 = vector.shape_cast %143 : vector<1x128x128xf32> to vector<128x128xf32>
    %cst_163 = arith.constant dense<0.000000e+00> : vector<256x128xf32>
    %145 = tpu.matmul %142, %144, %cst_163 {dimension_numbers = #tpu.dot_dimension_numbers<[1], [0], [0], [1], [0, 0, 1, 1], [], []>} : vector<256x128xf32>, vector<128x128xf32>, vector<256x128xf32> -> vector<256x128xf32>
    %146 = arith.addf %140, %145 : vector<256x128xf32>
    %c2_164 = arith.constant 2 : index
    %c9_165 = arith.constant 9 : index
    %c0_166 = arith.constant 0 : index
    %147 = vector.load %arg10[%c2_164, %c9_165, %c0_166] : memref<18x32x128xf32, #tpu.memory_space<vmem>>, vector<16x16x128xf32>
    %148 = vector.shape_cast %147 : vector<16x16x128xf32> to vector<256x128xf32>
    %c8_167 = arith.constant 8 : index
    %c0_168 = arith.constant 0 : index
    %c0_169 = arith.constant 0 : index
    %149 = vector.load %arg5[%c8_167, %c0_168, %c0_169] : memref<9x128x128xf32, #tpu.memory_space<vmem>>, vector<1x128x128xf32>
    %150 = vector.shape_cast %149 : vector<1x128x128xf32> to vector<128x128xf32>
    %cst_170 = arith.constant dense<0.000000e+00> : vector<256x128xf32>
    %151 = tpu.matmul %148, %150, %cst_170 {dimension_numbers = #tpu.dot_dimension_numbers<[1], [0], [0], [1], [0, 0, 1, 1], [], []>} : vector<256x128xf32>, vector<128x128xf32>, vector<256x128xf32> -> vector<256x128xf32>
    %152 = arith.addf %146, %151 : vector<256x128xf32>
    %c0_171 = arith.constant 0 : index
    %c0_172 = arith.constant 0 : index
    %153 = vector.load %arg6[%c0_171, %c0_172] : memref<1x128xf32, #tpu.memory_space<vmem>>, vector<1x128xf32>
    %154 = vector.broadcast %153 : vector<1x128xf32> to vector<256x128xf32>
    %155 = arith.addf %152, %154 : vector<256x128xf32>
    %cst_173 = arith.constant 0.000000e+00 : f32
    %156 = vector.broadcast %cst_173 : f32 to vector<256x128xf32>
    %157 = arith.maximumf %155, %156 : vector<256x128xf32>
    %158 = vector.shape_cast %157 : vector<256x128xf32> to vector<16x16x128xf32>
    %c0_174 = arith.constant 0 : index
    %c0_175 = arith.constant 0 : index
    %c0_176 = arith.constant 0 : index
    %c0_177 = arith.constant 0 : index
    %159 = vector.load %arg7[%c0_174, %c0_175, %c0_176, %c0_177] : memref<1x16x16x128xf32, #tpu.memory_space<vmem>>, vector<1x16x16x128xf32>
    %160 = vector.shape_cast %159 : vector<1x16x16x128xf32> to vector<16x16x128xf32>
    %161 = vector.shape_cast %158 : vector<16x16x128xf32> to vector<1x16x16x128xf32>
    tpu.vector_store %arg7[%c0_174, %c0_175, %c0_176, %c0_177], %161 {strides = array<i32>} : memref<1x16x16x128xf32, #tpu.memory_space<vmem>>, vector<1x16x16x128xf32>,
    %cst_178 = arith.constant dense<0.000000e+00> : vector<128xf32>
    %162 = vector.multi_reduction <add>, %157, %cst_178 [0] : vector<256x128xf32> to vector<128xf32>
    %163 = vector.shape_cast %162 : vector<128xf32> to vector<1x128xf32>
    %c0_179 = arith.constant 0 : index
    %c0_180 = arith.constant 0 : index
    %c0_181 = arith.constant 0 : index
    %164 = vector.load %arg8[%c0_179, %c0_180, %c0_181] : memref<1x1x128xf32, #tpu.memory_space<vmem>>, vector<1x1x128xf32>
    %165 = vector.shape_cast %164 : vector<1x1x128xf32> to vector<1x128xf32>
    %166 = vector.shape_cast %163 : vector<1x128xf32> to vector<1x1x128xf32>
    tpu.vector_store %arg8[%c0_179, %c0_180, %c0_181], %166 {strides = array<i32>} : memref<1x1x128xf32, #tpu.memory_space<vmem>>, vector<1x1x128xf32>,
    %167 = arith.mulf %157, %157 : vector<256x128xf32>
    %cst_182 = arith.constant dense<0.000000e+00> : vector<128xf32>
    %168 = vector.multi_reduction <add>, %167, %cst_182 [0] : vector<256x128xf32> to vector<128xf32>
    %169 = vector.shape_cast %168 : vector<128xf32> to vector<1x128xf32>
    %c0_183 = arith.constant 0 : index
    %c0_184 = arith.constant 0 : index
    %c0_185 = arith.constant 0 : index
    %170 = vector.load %arg9[%c0_183, %c0_184, %c0_185] : memref<1x1x128xf32, #tpu.memory_space<vmem>>, vector<1x1x128xf32>
    %171 = vector.shape_cast %170 : vector<1x1x128xf32> to vector<1x128xf32>
    %172 = vector.shape_cast %169 : vector<1x128xf32> to vector<1x1x128xf32>
    tpu.vector_store %arg9[%c0_183, %c0_184, %c0_185], %172 {strides = array<i32>} : memref<1x1x128xf32, #tpu.memory_space<vmem>>, vector<1x1x128xf32>,
    return
  }
  func.func @transform_0(%arg0: i32) -> (i32, i32, i32, i32) {
    %c0_i32 = arith.constant 0 : i32
    %c0_i32_0 = arith.constant 0 : i32
    %c0_i32_1 = arith.constant 0 : i32
    %c0_i32_2 = arith.constant 0 : i32
    return %arg0, %c0_i32, %c0_i32_0, %c0_i32_1 : i32, i32, i32, i32
  }
  func.func @transform_1(%arg0: i32) -> (i32, i32, i32, i32) {
    %c0_i32 = arith.constant 0 : i32
    %c0_i32_0 = arith.constant 0 : i32
    %c0_i32_1 = arith.constant 0 : i32
    %c0_i32_2 = arith.constant 0 : i32
    return %arg0, %c0_i32, %c0_i32_0, %c0_i32_1 : i32, i32, i32, i32
  }
  func.func @transform_2(%arg0: i32) -> (i32, i32, i32) {
    %c0_i32 = arith.constant 0 : i32
    %c0_i32_0 = arith.constant 0 : i32
    %c0_i32_1 = arith.constant 0 : i32
    %c0_i32_2 = arith.constant 0 : i32
    return %c0_i32, %c0_i32_0, %c0_i32_1 : i32, i32, i32
  }
  func.func @transform_3(%arg0: i32) -> (i32, i32) {
    %c0_i32 = arith.constant 0 : i32
    %c0_i32_0 = arith.constant 0 : i32
    %c0_i32_1 = arith.constant 0 : i32
    return %c0_i32, %c0_i32_0 : i32, i32
  }
  func.func @transform_4(%arg0: i32) -> (i32, i32, i32) {
    %c0_i32 = arith.constant 0 : i32
    %c0_i32_0 = arith.constant 0 : i32
    %c0_i32_1 = arith.constant 0 : i32
    %c0_i32_2 = arith.constant 0 : i32
    return %c0_i32, %c0_i32_0, %c0_i32_1 : i32, i32, i32
  }
  func.func @transform_5(%arg0: i32) -> (i32, i32) {
    %c0_i32 = arith.constant 0 : i32
    %c0_i32_0 = arith.constant 0 : i32
    %c0_i32_1 = arith.constant 0 : i32
    return %c0_i32, %c0_i32_0 : i32, i32
  }
  func.func @transform_6(%arg0: i32) -> (i32, i32, i32, i32) {
    %c0_i32 = arith.constant 0 : i32
    %c0_i32_0 = arith.constant 0 : i32
    %c0_i32_1 = arith.constant 0 : i32
    %c0_i32_2 = arith.constant 0 : i32
    return %arg0, %c0_i32, %c0_i32_0, %c0_i32_1 : i32, i32, i32, i32
  }
  func.func @transform_7(%arg0: i32) -> (i32, i32, i32) {
    %c0_i32 = arith.constant 0 : i32
    %c0_i32_0 = arith.constant 0 : i32
    %c0_i32_1 = arith.constant 0 : i32
    return %arg0, %c0_i32, %c0_i32_0 : i32, i32, i32
  }
  func.func @transform_8(%arg0: i32) -> (i32, i32, i32) {
    %c0_i32 = arith.constant 0 : i32
    %c0_i32_0 = arith.constant 0 : i32
    %c0_i32_1 = arith.constant 0 : i32
    return %arg0, %c0_i32, %c0_i32_0 : i32, i32, i32
  }
}

</mosaic_0001>

<bundles_post_ra>
// kernel: conv_block_forward.3
= control target key start
LH: loop header
LB: loop body
LE: loop exit
PB: predicated region body
PF: predicated region fallthrough
CT: control target
= control target key end

     0   :  { %s1387_s12 = smov 0   ;;  %s3086_s0 = inlined_call_operand.vmem [shape: f32[2,8,2,8,2,128], index: 0, kind: input, shape index: {}]   ;;  %s3087_s1 = inlined_call_operand.vmem [shape: f32[1,128], index: 1, kind: input, shape index: {}]   ;;  %s3088_s2 = inlined_call_operand.vmem [shape: f32[1,128], index: 2, kind: input, shape index: {}]   ;;  %s3089_s3 = inlined_call_operand.vmem [shape: f32[2,8,8,128], index: 3, kind: output, shape index: {}]  }
   0x1 LB: > { %s1336_s13 = sadd.s32 4294967295, %s1365_s12   ;;  %p1340_p0 = scmp.ge.s32.totalorder %s1365_s12, 1  ;;  %s1365_s12 = sphi %s1387_s12, %s13_s12  }
   0x2   : > { %p137_p1 = scmp.lt.s32.totalorder %s1365_s12, 3 }
   0x4   : > { %p138_p2 = pnand %p1340_p0, %p137_p1 }
   0x6   : > { %141 = sbr.rel (%p138_p2) target bundleno = 296 (0x128), region = 32 }
   0xd   : > { %p161_p3 = scmp.lt.s32.totalorder %s1336_s13, 1  ;;  %vm299_vm0 = vcmask 1041408   ;;  %vm1147_vm1 = vcmask 1041409   ;;  %vm1150_vm2 = vcmask 1042434   ;;  %vm1153_vm3 = vcmask 1043459  }
   0xe   : > { %vm1156_vm4 = vcmask 1044484   ;;  %vm1159_vm5 = vcmask 1045509   ;;  %vm1162_vm6 = vcmask 1046534   ;;  %vm1165_vm7 = vcmask 1047559  }
   0xf   : > { %s3572_s13 = smov (!%p161_p3, %s1336_s13), 1 }
  0x10   : > { %s1349_s14 = sshll.u32 %s3572_s13, 8  ;;  %s1350_s22 = sshll.u32 %s3572_s13, 6 }
  0x11   : > { %s1401_s17 = scalar_lea.vmem %s3086_s0, %s1349_s14  ;;  %s2969_s25 = scalar_lea.vmem %s3089_s3, %s1350_s22 }
  0x12   : > { %v171_v0 = vld [vmem:[%s1401_s17] sm:$0x3]  ;;  %v172_v1 = vld [vmem:[%s1401_s17 + $0x2] sm:$0x3]  ;;  %v173_v2 = vld [vmem:[%s1401_s17 + $0x4] sm:$0x3] }
  0x13   : > { %v174_v3 = vld [vmem:[%s1401_s17 + $0x6] sm:$0x3]  ;;  %v179_v4 = vld [vmem:[%s1401_s17 + $0x10] sm:$0x3]  ;;  %v175_v5 = vld [vmem:[%s1401_s17 + $0x8] sm:$0x3] }
  0x14   : > { %v180_v6 = vld [vmem:[%s1401_s17 + $0x12] sm:$0x3]  ;;  %v181_v7 = vld [vmem:[%s1401_s17 + $0x14] sm:$0x3]  ;;  %v176_v8 = vld [vmem:[%s1401_s17 + $0xa] sm:$0x3] }
  0x15   : > { %v177_v9 = vld [vmem:[%s1401_s17 + $0xc] sm:$0x3]  ;;  %v182_v10 = vld [vmem:[%s1401_s17 + $0x16] sm:$0x3]  ;;  %v183_v11 = vld [vmem:[%s1401_s17 + $0x18] sm:$0x3] }
  0x16   : > { %v184_v12 = vld [vmem:[%s1401_s17 + $0x1a] sm:$0x3]  ;;  %v178_v13 = vld [vmem:[%s1401_s17 + $0xe] sm:$0x3]  ;;  %v185_v14 = vld [vmem:[%s1401_s17 + $0x1c] sm:$0x3] }
  0x17   : > { %v186_v15 = vld [vmem:[%s1401_s17 + $0x1e] sm:$0x3]  ;;  %v1420_v16 = vsel %vm299_vm0, %v171_v0, -inf  ;;  %v1423_v17 = vsel %vm299_vm0, %v179_v4, -inf  ;;  %v187_v18 = vld [vmem:[%s1401_s17 + $0x20] sm:$0x3] }
  0x18   : > { %v195_v19 = vld [vmem:[%s1401_s17 + $0x30] sm:$0x3]  ;;  %v1430_v21 = vsel %vm299_vm0, %v172_v1, -inf  ;;  %v1433_v22 = vsel %vm299_vm0, %v180_v6, -inf  ;;  %v1436_v23 = vsel %vm299_vm0, %v173_v2, -inf  ;;  %v1444_v28 = vsel %vm299_vm0, %v181_v7, -inf }
  0x19   : > { %v188_v24 = vld [vmem:[%s1401_s17 + $0x22] sm:$0x3]  ;;  %v189_v25 = vld [vmem:[%s1401_s17 + $0x24] sm:$0x3]  ;;  %v196_v26 = vld [vmem:[%s1401_s17 + $0x32] sm:$0x3] }
  0x1a   : > { %v1447_v29 = vsel %vm299_vm0, %v174_v3, -inf  ;;  %v1450_v30 = vsel %vm299_vm0, %v182_v10, -inf  ;;  %v190_v31 = vld [vmem:[%s1401_s17 + $0x26] sm:$0x3]  ;;  %v197_v32 = vld [vmem:[%s1401_s17 + $0x34] sm:$0x3] }
  0x1b   : > { %v198_v33 = vld [vmem:[%s1401_s17 + $0x36] sm:$0x3]  ;;  %v1460_v36 = vsel %vm299_vm0, %v175_v5, -inf  ;;  %v1463_v37 = vsel %vm299_vm0, %v183_v11, -inf  ;;  %v191_v38 = vld [vmem:[%s1401_s17 + $0x28] sm:$0x3] }
  0x1c   : > { %v199_v39 = vld [vmem:[%s1401_s17 + $0x38] sm:$0x3]  ;;  %v1470_v41 = vsel %vm299_vm0, %v176_v8, -inf  ;;  %v1473_v42 = vsel %vm299_vm0, %v184_v12, -inf  ;;  %v1476_v43 = vsel %vm299_vm0, %v177_v9, -inf  ;;  %v1484_v48 = vsel %vm299_vm0, %v185_v14, -inf }
  0x1d   : > { %v192_v44 = vld [vmem:[%s1401_s17 + $0x2a] sm:$0x3]  ;;  %v193_v45 = vld [vmem:[%s1401_s17 + $0x2c] sm:$0x3]  ;;  %v200_v46 = vld [vmem:[%s1401_s17 + $0x3a] sm:$0x3] }
  0x1e   : > { %v1487_v49 = vsel %vm299_vm0, %v178_v13, -inf  ;;  %v1490_v50 = vsel %vm299_vm0, %v186_v15, -inf  ;;  %v194_v51 = vld [vmem:[%s1401_s17 + $0x2e] sm:$0x3]  ;;  %v201_v52 = vld [vmem:[%s1401_s17 + $0x3c] sm:$0x3] }
  0x1f   : > { %v202_v53 = vld [vmem:[%s1401_s17 + $0x3e] sm:$0x3]  ;;  %v1500_v56 = vsel %vm299_vm0, %v187_v18, -inf  ;;  %v1503_v57 = vsel %vm299_vm0, %v195_v19, -inf  ;;  %v203_v58 = vld [vmem:[%s1401_s17 + $0x40] sm:$0x3] }
  0x20   : > { %v211_v59 = vld [vmem:[%s1401_s17 + $0x50] sm:$0x3]  ;;  %v1510_v61 = vsel %vm299_vm0, %v188_v24, -inf  ;;  %v1513_v62 = vsel %vm299_vm0, %v196_v26, -inf  ;;  %v1516_v63 = vsel %vm299_vm0, %v189_v25, -inf  ;;  %v1524_v4 = vsel %vm299_vm0, %v197_v32, -inf }
  0x21   : > { %v204_v0 = vld [vmem:[%s1401_s17 + $0x42] sm:$0x3]  ;;  %v205_v1 = vld [vmem:[%s1401_s17 + $0x44] sm:$0x3]  ;;  %v212_v2 = vld [vmem:[%s1401_s17 + $0x52] sm:$0x3] }
  0x22   : > { %v1527_v5 = vsel %vm299_vm0, %v190_v31, -inf  ;;  %v1530_v6 = vsel %vm299_vm0, %v198_v33, -inf  ;;  %v206_v7 = vld [vmem:[%s1401_s17 + $0x46] sm:$0x3]  ;;  %v213_v8 = vld [vmem:[%s1401_s17 + $0x54] sm:$0x3] }
  0x23   : > { %v214_v9 = vld [vmem:[%s1401_s17 + $0x56] sm:$0x3]  ;;  %v1540_v12 = vsel %vm299_vm0, %v191_v38, -inf  ;;  %v1543_v13 = vsel %vm299_vm0, %v199_v39, -inf  ;;  %v207_v14 = vld [vmem:[%s1401_s17 + $0x48] sm:$0x3] }
  0x24   : > { %v215_v15 = vld [vmem:[%s1401_s17 + $0x58] sm:$0x3]  ;;  %v1550_v19 = vsel %vm299_vm0, %v192_v44, -inf  ;;  %v1553_v24 = vsel %vm299_vm0, %v200_v46, -inf  ;;  %v1556_v25 = vsel %vm299_vm0, %v193_v45, -inf  ;;  %v1564_v38 = vsel %vm299_vm0, %v201_v52, -inf }
  0x25   : > { %v208_v26 = vld [vmem:[%s1401_s17 + $0x4a] sm:$0x3]  ;;  %v209_v31 = vld [vmem:[%s1401_s17 + $0x4c] sm:$0x3]  ;;  %v216_v32 = vld [vmem:[%s1401_s17 + $0x5a] sm:$0x3] }
  0x26   : > { %v1567_v39 = vsel %vm299_vm0, %v194_v51, -inf  ;;  %v1570_v44 = vsel %vm299_vm0, %v202_v53, -inf  ;;  %v210_v45 = vld [vmem:[%s1401_s17 + $0x4e] sm:$0x3]  ;;  %v217_v46 = vld [vmem:[%s1401_s17 + $0x5c] sm:$0x3] }
  0x27   : > { %v218_v18 = vld [vmem:[%s1401_s17 + $0x5e] sm:$0x3]  ;;  %v1580_v52 = vsel %vm299_vm0, %v203_v58, -inf  ;;  %v1583_v51 = vsel %vm299_vm0, %v211_v59, -inf  ;;  %v219_v53 = vld [vmem:[%s1401_s17 + $0x60] sm:$0x3] }
  0x28   : > { %v227_v10 = vld [vmem:[%s1401_s17 + $0x70] sm:$0x3]  ;;  %v1590_v60 = vsel %vm299_vm0, %v204_v0, -inf  ;;  %v1593_v11 = vsel %vm299_vm0, %v212_v2, -inf  ;;  %v1596_v58 = vsel %vm299_vm0, %v205_v1, -inf  ;;  %v1604_v47 = vsel %vm299_vm0, %v213_v8, -inf }
  0x29   : > { %3200 = vst [vmem:[#allocation2_spill] sm:$0xff] %v1596_v58  ;;  %v220_v33 = vld [vmem:[%s1401_s17 + $0x62] sm:$0x3]  ;;  %v221_v59 = vld [vmem:[%s1401_s17 + $0x64] sm:$0x3]  ;;  %3201 = vst [vmem:[#allocation3_spill] sm:$0xff] %v1604_v47 }
  0x2a   : > { %v228_v55 = vld [vmem:[%s1401_s17 + $0x72] sm:$0x3]  ;;  %v1607_v0 = vsel %vm299_vm0, %v206_v7, -inf  ;;  %v1610_v2 = vsel %vm299_vm0, %v214_v9, -inf  ;;  %v222_v1 = vld [vmem:[%s1401_s17 + $0x66] sm:$0x3] }
  0x2b   : > { %3202 = vst [vmem:[#allocation4_spill] sm:$0xff] %v1607_v0  ;;  %3203 = vst [vmem:[#allocation5_spill] sm:$0xff] %v1610_v2  ;;  %v229_v3 = vld [vmem:[%s1401_s17 + $0x74] sm:$0x3]  ;;  %v230_v40 = vld [vmem:[%s1401_s17 + $0x76] sm:$0x3] }
  0x2c   : > { %v1620_v8 = vsel %vm299_vm0, %v207_v14, -inf  ;;  %v1623_v7 = vsel %vm299_vm0, %v215_v15, -inf  ;;  %v223_v9 = vld [vmem:[%s1401_s17 + $0x68] sm:$0x3]  ;;  %v231_v34 = vld [vmem:[%s1401_s17 + $0x78] sm:$0x3] }
  0x2d   : > { %3204 = vst [vmem:[#allocation6_spill] sm:$0xff] %v1620_v8  ;;  %3205 = vst [vmem:[#allocation7_spill] sm:$0xff] %v1623_v7  ;;  %v1630_v20 = vsel %vm299_vm0, %v208_v26, -inf  ;;  %v1633_v35 = vsel %vm299_vm0, %v216_v32, -inf  ;;  %v1636_v14 = vsel %vm299_vm0, %v209_v31, -inf  ;;  %v1644_v47 = vsel %vm299_vm0, %v217_v46, -inf }
  0x2e   : > { %3206 = vst [vmem:[#allocation8_spill] sm:$0xff] %v1630_v20  ;;  %3207 = vst [vmem:[#allocation9_spill] sm:$0xff] %v1633_v35  ;;  %v224_v54 = vld [vmem:[%s1401_s17 + $0x6a] sm:$0x3]  ;;  %v225_v15 = vld [vmem:[%s1401_s17 + $0x6c] sm:$0x3] }
  0x2f   : > { %3208 = vst [vmem:[#allocation10_spill] sm:$0xff] %v1636_v14  ;;  %v232_v2 = vld [vmem:[%s1401_s17 + $0x7a] sm:$0x3]  ;;  %3209 = vst [vmem:[#allocation11_spill] sm:$0xff] %v1644_v47  ;;  %v1647_v26 = vsel %vm299_vm0, %v210_v45, -inf  ;;  %v1650_v32 = vsel %vm299_vm0, %v218_v18, -inf }
  0x30   : > { %3210 = vst [vmem:[#allocation12_spill] sm:$0xff] %v1647_v26  ;;  %3211 = vst [vmem:[#allocation13_spill] sm:$0xff] %v1650_v32  ;;  %v226_v31 = vld [vmem:[%s1401_s17 + $0x6e] sm:$0x3]  ;;  %v233_v27 = vld [vmem:[%s1401_s17 + $0x7c] sm:$0x3] }
  0x31   : > { %v234_v7 = vld [vmem:[%s1401_s17 + $0x7e] sm:$0x3]  ;;  %v1660_v46 = vsel %vm299_vm0, %v219_v53, -inf  ;;  %v1663_v45 = vsel %vm299_vm0, %v227_v10, -inf  ;;  %v235_v18 = vld [vmem:[%s1401_s17 + $0x80] sm:$0x3] }
  0x32   : > { %3212 = vst [vmem:[#allocation14_spill] sm:$0xff] %v1660_v46  ;;  %3213 = vst [vmem:[#allocation15_spill] sm:$0xff] %v1663_v45  ;;  %v243_v35 = vld [vmem:[%s1401_s17 + $0x90] sm:$0x3]  ;;  %v1670_v58 = vsel %vm299_vm0, %v220_v33, -inf  ;;  %v1673_v8 = vsel %vm299_vm0, %v228_v55, -inf }
  0x33   : > { %3214 = vst [vmem:[#allocation16_spill] sm:$0xff] %v1670_v58  ;;  %3215 = vst [vmem:[#allocation17_spill] sm:$0xff] %v1673_v8  ;;  %v1676_v53 = vsel %vm299_vm0, %v221_v59, -inf  ;;  %v236_v0 = vld [vmem:[%s1401_s17 + $0x82] sm:$0x3]  ;;  %v1684_v47 = vsel %vm299_vm0, %v229_v3, -inf }
  0x34   : > { %3216 = vst [vmem:[#allocation18_spill] sm:$0xff] %v1676_v53  ;;  %v237_v10 = vld [vmem:[%s1401_s17 + $0x84] sm:$0x3]  ;;  %v244_v32 = vld [vmem:[%s1401_s17 + $0x92] sm:$0x3]  ;;  %3217 = vst [vmem:[#allocation19_spill] sm:$0xff] %v1684_v47 }
  0x35   : > { %v1687_v33 = vsel %vm299_vm0, %v222_v1, -inf  ;;  %v1690_v55 = vsel %vm299_vm0, %v230_v40, -inf  ;;  %v238_v59 = vld [vmem:[%s1401_s17 + $0x86] sm:$0x3]  ;;  %v245_v20 = vld [vmem:[%s1401_s17 + $0x94] sm:$0x3] }
  0x36   : > { %3218 = vst [vmem:[#allocation20_spill] sm:$0xff] %v1687_v33  ;;  %3219 = vst [vmem:[#allocation21_spill] sm:$0xff] %v1690_v55  ;;  %v246_v45 = vld [vmem:[%s1401_s17 + $0x96] sm:$0x3]  ;;  %v1700_v3 = vsel %vm299_vm0, %v223_v9, -inf  ;;  %v1703_v1 = vsel %vm299_vm0, %v231_v34, -inf }
  0x37   : > { %3220 = vst [vmem:[#allocation22_spill] sm:$0xff] %v1700_v3  ;;  %3221 = vst [vmem:[#allocation23_spill] sm:$0xff] %v1703_v1  ;;  %v239_v40 = vld [vmem:[%s1401_s17 + $0x88] sm:$0x3]  ;;  %v247_v8 = vld [vmem:[%s1401_s17 + $0x98] sm:$0x3] }
  0x38   : > { %v1710_v14 = vsel %vm299_vm0, %v224_v54, -inf  ;;  %v1713_v46 = vsel %vm299_vm0, %v232_v2, -inf  ;;  %v1716_v9 = vsel %vm299_vm0, %v225_v15, -inf  ;;  %v240_v26 = vld [vmem:[%s1401_s17 + $0x8a] sm:$0x3]  ;;  %v1724_v47 = vsel %vm299_vm0, %v233_v27, -inf }
  0x39   : > { %3222 = vst [vmem:[#allocation24_spill] sm:$0xff] %v1710_v14  ;;  %3223 = vst [vmem:[#allocation25_spill] sm:$0xff] %v1713_v46  ;;  %v241_v34 = vld [vmem:[%s1401_s17 + $0x8c] sm:$0x3]  ;;  %v248_v55 = vld [vmem:[%s1401_s17 + $0x9a] sm:$0x3] }
  0x3a   : > { %3224 = vst [vmem:[#allocation26_spill] sm:$0xff] %v1716_v9  ;;  %3225 = vst [vmem:[#allocation27_spill] sm:$0xff] %v1724_v47  ;;  %v1727_v54 = vsel %vm299_vm0, %v226_v31, -inf  ;;  %v1730_v2 = vsel %vm299_vm0, %v234_v7, -inf  ;;  %v242_v15 = vld [vmem:[%s1401_s17 + $0x8e] sm:$0x3] }
  0x3b   : > { %3226 = vst [vmem:[#allocation28_spill] sm:$0xff] %v1727_v54  ;;  %3227 = vst [vmem:[#allocation29_spill] sm:$0xff] %v1730_v2  ;;  %v249_v58 = vld [vmem:[%s1401_s17 + $0x9c] sm:$0x3]  ;;  %v250_v1 = vld [vmem:[%s1401_s17 + $0x9e] sm:$0x3] }
  0x3c   : > { %v1740_v27 = vsel %vm299_vm0, %v235_v18, -inf  ;;  %v1743_v31 = vsel %vm299_vm0, %v243_v35, -inf  ;;  %v251_v7 = vld [vmem:[%s1401_s17 + $0xa0] sm:$0x3]  ;;  %v259_v46 = vld [vmem:[%s1401_s17 + $0xb0] sm:$0x3] }
  0x3d   : > { %3228 = vst [vmem:[#allocation30_spill] sm:$0xff] %v1740_v27  ;;  %3229 = vst [vmem:[#allocation31_spill] sm:$0xff] %v1743_v31  ;;  %v1750_v53 = vsel %vm299_vm0, %v236_v0, -inf  ;;  %v1753_v3 = vsel %vm299_vm0, %v244_v32, -inf  ;;  %v1756_v18 = vsel %vm299_vm0, %v237_v10, -inf  ;;  %v1764_v47 = vsel %vm299_vm0, %v245_v20, -inf }
  0x3e   : > { %3230 = vst [vmem:[#allocation32_spill] sm:$0xff] %v1750_v53  ;;  %3231 = vst [vmem:[#allocation33_spill] sm:$0xff] %v1753_v3  ;;  %v252_v33 = vld [vmem:[%s1401_s17 + $0xa2] sm:$0x3]  ;;  %v253_v35 = vld [vmem:[%s1401_s17 + $0xa4] sm:$0x3] }
  0x3f   : > { %3232 = vst [vmem:[#allocation34_spill] sm:$0xff] %v1756_v18  ;;  %v260_v2 = vld [vmem:[%s1401_s17 + $0xb2] sm:$0x3]  ;;  %3233 = vst [vmem:[#allocation35_spill] sm:$0xff] %v1764_v47  ;;  %v1767_v0 = vsel %vm299_vm0, %v238_v59, -inf  ;;  %v1770_v32 = vsel %vm299_vm0, %v246_v45, -inf }
  0x40   : > { %3234 = vst [vmem:[#allocation36_spill] sm:$0xff] %v1767_v0  ;;  %3235 = vst [vmem:[#allocation37_spill] sm:$0xff] %v1770_v32  ;;  %v254_v10 = vld [vmem:[%s1401_s17 + $0xa6] sm:$0x3]  ;;  %v261_v14 = vld [vmem:[%s1401_s17 + $0xb4] sm:$0x3] }
  0x41   : > { %v262_v31 = vld [vmem:[%s1401_s17 + $0xb6] sm:$0x3]  ;;  %v1780_v20 = vsel %vm299_vm0, %v239_v40, -inf  ;;  %v1783_v59 = vsel %vm299_vm0, %v247_v8, -inf  ;;  %v255_v45 = vld [vmem:[%s1401_s17 + $0xa8] sm:$0x3] }
  0x42   : > { %3236 = vst [vmem:[#allocation38_spill] sm:$0xff] %v1780_v20  ;;  %3237 = vst [vmem:[#allocation39_spill] sm:$0xff] %v1783_v59  ;;  %v263_v3 = vld [vmem:[%s1401_s17 + $0xb8] sm:$0x3]  ;;  %v1790_v9 = vsel %vm299_vm0, %v240_v26, -inf  ;;  %v1793_v27 = vsel %vm299_vm0, %v248_v55, -inf }
  0x43   : > { %3238 = vst [vmem:[#allocation40_spill] sm:$0xff] %v1790_v9  ;;  %3239 = vst [vmem:[#allocation41_spill] sm:$0xff] %v1793_v27  ;;  %v1796_v40 = vsel %vm299_vm0, %v241_v34, -inf  ;;  %v256_v54 = vld [vmem:[%s1401_s17 + $0xaa] sm:$0x3]  ;;  %v1804_v47 = vsel %vm299_vm0, %v249_v58, -inf }
  0x44   : > { %3240 = vst [vmem:[#allocation42_spill] sm:$0xff] %v1796_v40  ;;  %v257_v8 = vld [vmem:[%s1401_s17 + $0xac] sm:$0x3]  ;;  %v264_v32 = vld [vmem:[%s1401_s17 + $0xba] sm:$0x3]  ;;  %3241 = vst [vmem:[#allocation43_spill] sm:$0xff] %v1804_v47 }
  0x45   : > { %v1807_v26 = vsel %vm299_vm0, %v242_v15, -inf  ;;  %v1810_v55 = vsel %vm299_vm0, %v250_v1, -inf  ;;  %v258_v34 = vld [vmem:[%s1401_s17 + $0xae] sm:$0x3]  ;;  %v265_v53 = vld [vmem:[%s1401_s17 + $0xbc] sm:$0x3] }
  0x46   : > { %3242 = vst [vmem:[#allocation44_spill] sm:$0xff] %v1807_v26  ;;  %3243 = vst [vmem:[#allocation45_spill] sm:$0xff] %v1810_v55  ;;  %v266_v59 = vld [vmem:[%s1401_s17 + $0xbe] sm:$0x3]  ;;  %v1820_v58 = vsel %vm299_vm0, %v251_v7, -inf  ;;  %v1823_v15 = vsel %vm299_vm0, %v259_v46, -inf }
  0x47   : > { %3244 = vst [vmem:[#allocation46_spill] sm:$0xff] %v1820_v58  ;;  %3245 = vst [vmem:[#allocation47_spill] sm:$0xff] %v1823_v15  ;;  %v267_v1 = vld [vmem:[%s1401_s17 + $0xc0] sm:$0x3]  ;;  %v275_v27 = vld [vmem:[%s1401_s17 + $0xd0] sm:$0x3] }
  0x48   : > { %v1830_v18 = vsel %vm299_vm0, %v252_v33, -inf  ;;  %v1833_v20 = vsel %vm299_vm0, %v260_v2, -inf  ;;  %v1836_v7 = vsel %vm299_vm0, %v253_v35, -inf  ;;  %v268_v0 = vld [vmem:[%s1401_s17 + $0xc2] sm:$0x3]  ;;  %v1844_v47 = vsel %vm299_vm0, %v261_v14, -inf }
  0x49   : > { %3246 = vst [vmem:[#allocation48_spill] sm:$0xff] %v1830_v18  ;;  %3247 = vst [vmem:[#allocation49_spill] sm:$0xff] %v1833_v20  ;;  %v269_v46 = vld [vmem:[%s1401_s17 + $0xc4] sm:$0x3]  ;;  %v276_v55 = vld [vmem:[%s1401_s17 + $0xd2] sm:$0x3] }
  0x4a   : > { %3248 = vst [vmem:[#allocation50_spill] sm:$0xff] %v1844_v47  ;;  %v1847_v33 = vsel %vm299_vm0, %v254_v10, -inf  ;;  %v1850_v2 = vsel %vm299_vm0, %v262_v31, -inf  ;;  %v270_v35 = vld [vmem:[%s1401_s17 + $0xc6] sm:$0x3]  ;;  %v1860_v14 = vsel %vm299_vm0, %v255_v45, -inf }
  0x4b   : > { %3249 = vst [vmem:[#allocation51_spill] sm:$0xff] %v1847_v33  ;;  %3250 = vst [vmem:[#allocation52_spill] sm:$0xff] %v1850_v2  ;;  %v277_v9 = vld [vmem:[%s1401_s17 + $0xd4] sm:$0x3]  ;;  %v278_v15 = vld [vmem:[%s1401_s17 + $0xd6] sm:$0x3] }
  0x4c   : > { %3251 = vst [vmem:[#allocation53_spill] sm:$0xff] %v1860_v14  ;;  %v1863_v10 = vsel %vm299_vm0, %v263_v3, -inf  ;;  %v271_v31 = vld [vmem:[%s1401_s17 + $0xc8] sm:$0x3]  ;;  %v279_v20 = vld [vmem:[%s1401_s17 + $0xd8] sm:$0x3] }
  0x4d   : > { %3252 = vst [vmem:[#allocation54_spill] sm:$0xff] %v1863_v10  ;;  %v1870_v40 = vsel %vm299_vm0, %v256_v54, -inf  ;;  %v1873_v58 = vsel %vm299_vm0, %v264_v32, -inf  ;;  %v1876_v45 = vsel %vm299_vm0, %v257_v8, -inf  ;;  %v272_v26 = vld [vmem:[%s1401_s17 + $0xca] sm:$0x3] }
  0x4e   : > { %3253 = vst [vmem:[#allocation55_spill] sm:$0xff] %v1870_v40  ;;  %3254 = vst [vmem:[#allocation56_spill] sm:$0xff] %v1873_v58  ;;  %v273_v2 = vld [vmem:[%s1401_s17 + $0xcc] sm:$0x3]  ;;  %v280_v3 = vld [vmem:[%s1401_s17 + $0xda] sm:$0x3] }
  0x4f   : > { %v1884_v47 = vsel %vm299_vm0, %v265_v53, -inf  ;;  %v1887_v54 = vsel %vm299_vm0, %v258_v34, -inf  ;;  %v1890_v32 = vsel %vm299_vm0, %v266_v59, -inf  ;;  %v274_v18 = vld [vmem:[%s1401_s17 + $0xce] sm:$0x3]  ;;  %v1900_v53 = vsel %vm299_vm0, %v267_v1, -inf }
  0x50   : > { %3255 = vst [vmem:[#allocation57_spill] sm:$0xff] %v1884_v47  ;;  %3256 = vst [vmem:[#allocation58_spill] sm:$0xff] %v1887_v54  ;;  %v281_v8 = vld [vmem:[%s1401_s17 + $0xdc] sm:$0x3]  ;;  %v282_v10 = vld [vmem:[%s1401_s17 + $0xde] sm:$0x3] }
  0x51   : > { %3257 = vst [vmem:[#allocation59_spill] sm:$0xff] %v1890_v32  ;;  %3258 = vst [vmem:[#allocation60_spill] sm:$0xff] %v1900_v53  ;;  %v1903_v34 = vsel %vm299_vm0, %v275_v27, -inf  ;;  %v283_v59 = vld [vmem:[%s1401_s17 + $0xe0] sm:$0x3]  ;;  %v1909_v40 = vsel %vm299_vm0, %v268_v0, -inf }
  0x52   : > { %3259 = vst [vmem:[#allocation61_spill] sm:$0xff] %v1903_v34  ;;  %3260 = vst [vmem:[#allocation62_spill] sm:$0xff] %v1909_v40  ;;  %v1912_v14 = vsel %vm299_vm0, %v276_v55, -inf  ;;  %v1915_v33 = vsel %vm299_vm0, %v269_v46, -inf  ;;  %v284_v1 = vld [vmem:[%s1401_s17 + $0xe2] sm:$0x3] }
  0x53   : > { %3261 = vst [vmem:[#allocation63_spill] sm:$0xff] %v1912_v14  ;;  %3262 = vst [vmem:[#allocation64_spill] sm:$0xff] %v1915_v33  ;;  %v285_v32 = vld [vmem:[%s1401_s17 + $0xe4] sm:$0x3]  ;;  %v1922_v54 = vsel %vm299_vm0, %v277_v9, -inf  ;;  %v1925_v0 = vsel %vm299_vm0, %v270_v35, -inf }
  0x54   : > { %3263 = vst [vmem:[#allocation65_spill] sm:$0xff] %v1922_v54  ;;  %3264 = vst [vmem:[#allocation66_spill] sm:$0xff] %v1925_v0  ;;  %v1928_v55 = vsel %vm299_vm0, %v278_v15, -inf  ;;  %v286_v58 = vld [vmem:[%s1401_s17 + $0xe6] sm:$0x3]  ;;  %v1938_v9 = vsel %vm299_vm0, %v271_v31, -inf }
  0x55   : > { %3265 = vst [vmem:[#allocation67_spill] sm:$0xff] %v1928_v55  ;;  %v291_v46 = vld [vmem:[%s1401_s17 + $0xf0] sm:$0x3]  ;;  %v292_v34 = vld [vmem:[%s1401_s17 + $0xf2] sm:$0x3]  ;;  %3266 = vst [vmem:[#allocation68_spill] sm:$0xff] %v1938_v9 }
  0x56   : > { %v1941_v35 = vsel %vm299_vm0, %v279_v20, -inf  ;;  %v287_v15 = vld [vmem:[%s1401_s17 + $0xe8] sm:$0x3]  ;;  %v293_v14 = vld [vmem:[%s1401_s17 + $0xf4] sm:$0x3]  ;;  %v1948_v47 = vsel %vm299_vm0, %v272_v26, -inf }
  0x57   : > { %3267 = vst [vmem:[#allocation69_spill] sm:$0xff] %v1941_v35  ;;  %3268 = vst [vmem:[#allocation70_spill] sm:$0xff] %v1948_v47  ;;  %v1951_v53 = vsel %vm299_vm0, %v280_v3, -inf  ;;  %v1954_v31 = vsel %vm299_vm0, %v273_v2, -inf  ;;  %v288_v27 = vld [vmem:[%s1401_s17 + $0xea] sm:$0x3] }
  0x58   : > { %3269 = vst [vmem:[#allocation71_spill] sm:$0xff] %v1951_v53  ;;  %v289_v55 = vld [vmem:[%s1401_s17 + $0xec] sm:$0x3]  ;;  %v294_v20 = vld [vmem:[%s1401_s17 + $0xf6] sm:$0x3]  ;;  %v1962_v54 = vsel %vm299_vm0, %v281_v8, -inf }
  0x59   : > { %v1965_v26 = vsel %vm299_vm0, %v274_v18, -inf  ;;  %v1968_v3 = vsel %vm299_vm0, %v282_v10, -inf  ;;  %v290_v40 = vld [vmem:[%s1401_s17 + $0xee] sm:$0x3]  ;;  %v295_v35 = vld [vmem:[%s1401_s17 + $0xf8] sm:$0x3] }
  0x5a   : > { %3270 = vst [vmem:[#allocation72_spill] sm:$0xff] %v1968_v3  ;;  %v296_v2 = vld [vmem:[%s1401_s17 + $0xfa] sm:$0x3]  ;;  %v1978_v0 = vsel %vm299_vm0, %v283_v59, -inf  ;;  %v1981_v8 = vsel %vm299_vm0, %v291_v46, -inf  ;;  %v1987_v53 = vsel %vm299_vm0, %v284_v1, -inf }
  0x5b   : > { %v297_v18 = vld [vmem:[%s1401_s17 + $0xfc] sm:$0x3]  ;;  %v1990_v47 = vsel %vm299_vm0, %v292_v34, -inf  ;;  %v1993_v9 = vsel %vm299_vm0, %v285_v32, -inf  ;;  %v298_v33 = vld [vmem:[%s1401_s17 + $0xfe] sm:$0x3] }
  0x5c   : > { %v1999_v46 = vsel %vm299_vm0, %v293_v14, -inf  ;;  %v2002_v3 = vsel %vm299_vm0, %v286_v58, -inf  ;;  %v2005_v10 = vsel %vm299_vm0, %v294_v20, -inf  ;;  %v2012_v1 = vsel %vm299_vm0, %v287_v15, -inf }
  0x5d   : > { %3271 = vst [vmem:[#allocation73_spill] sm:$0xff] %v2005_v10  ;;  %3272 = vst [vmem:[#allocation74_spill] sm:$0xff] %v2012_v1  ;;  %v2015_v59 = vsel %vm299_vm0, %v295_v35, -inf  ;;  %v2020_v58 = vsel %vm299_vm0, %v288_v27, -inf  ;;  %v2023_v20 = vsel %vm299_vm0, %v296_v2, -inf  ;;  %v2026_v34 = vsel %vm299_vm0, %v289_v55, -inf }
  0x5e   : > { %3273 = vst [vmem:[#allocation75_spill] sm:$0xff] %v2015_v59  ;;  %3274 = vst [vmem:[#allocation76_spill] sm:$0xff] %v2020_v58  ;;  %v2031_v15 = vsel %vm299_vm0, %v297_v18, -inf  ;;  %v2034_v35 = vsel %vm299_vm0, %v290_v40, -inf  ;;  %v2037_v14 = vsel %vm299_vm0, %v298_v33, -inf  ;;  %v3280_v55 = vmax.f32 %v1420_v16, %v1423_v17 }
  0x5f   : > { %3275 = vst [vmem:[#allocation77_spill] sm:$0xff] %v2023_v20  ;;  %3276 = vst [vmem:[#allocation78_spill] sm:$0xff] %v2026_v34  ;;  %v3281_v18 = vmax.f32 %v1430_v21, %v1433_v22  ;;  %v3282_v33 = vmax.f32 %v1436_v23, %v1444_v28  ;;  %v3283_v2 = vmax.f32 %v1447_v29, %v1450_v30 }
  0x60   : > { %3277 = vst [vmem:[#allocation79_spill] sm:$0xff] %v2031_v15  ;;  %3278 = vst [vmem:[#allocation80_spill] sm:$0xff] %v2034_v35  ;;  %v492_v32 = vsel %vm299_vm0, %v3280_v55, -inf  ;;  %v3284_v55 = vmax.f32 %v1460_v36, %v1463_v37  ;;  %v3285_v22 = vmax.f32 %v1470_v41, %v1473_v42  ;;  %v3286_v30 = vmax.f32 %v1476_v43, %v1484_v48 }
  0x61   : > { %3279 = vst [vmem:[#allocation81_spill] sm:$0xff] %v2037_v14  ;;  %v499_v40 = vsel %vm299_vm0, %v3281_v18, -inf  ;;  %v493_v20 = vrot.slane %v492_v32, 4  ;;  %v506_v27 = vsel %vm299_vm0, %v3282_v33, -inf  ;;  %v513_v14 = vsel %vm299_vm0, %v3283_v2, -inf }
  0x62   : > { %v500_v58 = vrot.slane %v499_v40, 4  ;;  %v507_v16 = vrot.slane %v506_v27, 4  ;;  %v514_v17 = vrot.slane %v513_v14, 4  ;;  %v520_v21 = vsel %vm299_vm0, %v3284_v55, -inf }
  0x63   : > { %v527_v18 = vsel %vm299_vm0, %v3285_v22, -inf  ;;  %v494_v23 = vmax.f32 %v492_v32, %v493_v20  ;;  %v521_v33 = vrot.slane %v520_v21, 4  ;;  %v534_v2 = vsel %vm299_vm0, %v3286_v30, -inf }
  0x64   : > { %v501_v28 = vmax.f32 %v499_v40, %v500_v58  ;;  %v528_v35 = vrot.slane %v527_v18, 4  ;;  %v508_v15 = vmax.f32 %v506_v27, %v507_v16  ;;  %v515_v29 = vmax.f32 %v513_v14, %v514_v17 }
  0x65   : > { %v3287_v36 = vmax.f32 %v1487_v49, %v1490_v50  ;;  %v495_v55 = vrot.slane %v494_v23, 2  ;;  %v522_v42 = vmax.f32 %v520_v21, %v521_v33  ;;  %v535_v20 = vrot.slane %v534_v2, 4 }
  0x66   : > { %v502_v41 = vrot.slane %v501_v28, 2  ;;  %v529_v22 = vmax.f32 %v527_v18, %v528_v35  ;;  %v509_v32 = vrot.slane %v508_v15, 2  ;;  %v516_v58 = vrot.slane %v515_v29, 2 }
  0x67   : > { %v541_v37 = vsel %vm299_vm0, %v3287_v36, -inf  ;;  %v496_v27 = vmax.f32 %v494_v23, %v495_v55  ;;  %v523_v16 = vrot.slane %v522_v42, 2  ;;  %v536_v30 = vmax.f32 %v534_v2, %v535_v20 }
  0x68   : > { %v542_v40 = vrot.slane %v541_v37, 4  ;;  %v503_v14 = vmax.f32 %v501_v28, %v502_v41  ;;  %v530_v17 = vrot.slane %v529_v22, 2  ;;  %v510_v43 = vmax.f32 %v508_v15, %v509_v32 }
  0x69   : > { %v517_v48 = vmax.f32 %v515_v29, %v516_v58  ;;  %v497_v59 = vrot.slane %v496_v27, 1  ;;  %v524_v50 = vmax.f32 %v522_v42, %v523_v16  ;;  %v537_v21 = vrot.slane %v536_v30, 2 }
  0x6a   : > { %v543_v34 = vmax.f32 %v541_v37, %v542_v40  ;;  %v504_v49 = vrot.slane %v503_v14, 1  ;;  %v531_v36 = vmax.f32 %v529_v22, %v530_v17  ;;  %v511_v1 = vrot.slane %v510_v43, 1 }
  0x6b   : > { %v518_v10 = vrot.slane %v517_v48, 1  ;;  %v2075_v18 = vmax.f32 %v496_v27, %v497_v59  ;;  %v525_v23 = vrot.slane %v524_v50, 1  ;;  %v538_v29 = vmax.f32 %v536_v30, %v537_v21 }
  0x6c   : > { %v544_v35 = vrot.slane %v543_v34, 2  ;;  %v2077_v33 = vmax.f32 %v503_v14, %v504_v49  ;;  %v532_v28 = vrot.slane %v531_v36, 1  ;;  %v2079_v55 = vmax.f32 %v510_v43, %v511_v1 }
  0x6d   : > { %v2081_v15 = vmax.f32 %v517_v48, %v518_v10  ;;  %v2083_v37 = vmax.f32 %v524_v50, %v525_v23  ;;  %v3288_v42 = vmax.f32 %v1500_v56, %v1503_v57  ;;  %v3289_v22 = vmax.f32 %v1510_v61, %v1513_v62 }
  0x6e   : > { %v545_v2 = vmax.f32 %v543_v34, %v544_v35  ;;  %v2085_v41 = vmax.f32 %v531_v36, %v532_v28  ;;  %v539_v1 = vrot.slane %v538_v29, 1  ;;  %v3290_v34 = vmax.f32 %v1516_v63, %v1524_v4 }
  0x6f   : > { %v548_v59 = vsel %vm299_vm0, %v3288_v42, -inf  ;;  %v555_v32 = vsel %vm299_vm0, %v3289_v22, -inf  ;;  %v3291_v27 = vmax.f32 %v1527_v5, %v1530_v6  ;;  %v3292_v57 = vmax.f32 %v1540_v12, %v1543_v13 }
  0x70   : > { %v546_v58 = vrot.slane %v545_v2, 1  ;;  %v549_v10 = vrot.slane %v548_v59, 4  ;;  %v556_v20 = vrot.slane %v555_v32, 4  ;;  %v562_v40 = vsel %vm299_vm0, %v3290_v34, -inf }
  0x71   : > { %v569_v56 = vsel %vm299_vm0, %v3291_v27, -inf  ;;  %v576_v61 = vsel %vm299_vm0, %v3292_v57, -inf  ;;  %v3293_v62 = vmax.f32 %v1550_v19, %v1553_v24  ;;  %v2111_v16 = vmax.f32 %v538_v29, %v539_v1 }
  0x72   : > { %v2113_v63 = vmax.f32 %v545_v2, %v546_v58  ;;  %v550_v4 = vmax.f32 %v548_v59, %v549_v10  ;;  %v557_v17 = vmax.f32 %v555_v32, %v556_v20  ;;  %v563_v43 = vrot.slane %v562_v40, 4 }
  0x73   : > { %v583_v14 = vsel %vm299_vm0, %v3293_v62, -inf  ;;  %v570_v5 = vrot.slane %v569_v56, 4  ;;  %v577_v6 = vrot.slane %v576_v61, 4  ;;  %v3294_v12 = vmax.f32 %v1556_v25, %v1564_v38 }
  0x74   : > { %v584_v48 = vrot.slane %v583_v14, 4  ;;  %v551_v30 = vrot.slane %v550_v4, 2  ;;  %v558_v49 = vrot.slane %v557_v17, 2  ;;  %v3295_v19 = vmax.f32 %v1567_v39, %v1570_v44 }
  0x75   : > { %v590_v13 = vsel %vm299_vm0, %v3294_v12, -inf  ;;  %v564_v50 = vmax.f32 %v562_v40, %v563_v43  ;;  %v571_v36 = vmax.f32 %v569_v56, %v570_v5  ;;  %v578_v21 = vmax.f32 %v576_v61, %v577_v6 }
  0x76   : > { %v597_v24 = vsel %vm299_vm0, %v3295_v19, -inf  ;;  %v585_v35 = vmax.f32 %v583_v14, %v584_v48  ;;  %v552_v23 = vmax.f32 %v550_v4, %v551_v30  ;;  %v559_v28 = vmax.f32 %v557_v17, %v558_v49 }
  0x77   : > { %v591_v29 = vrot.slane %v590_v13, 4  ;;  %v598_v2 = vrot.slane %v597_v24, 4  ;;  %v565_v42 = vrot.slane %v564_v50, 2  ;;  %v572_v59 = vrot.slane %v571_v36, 2 }
  0x78   : > { %v579_v22 = vrot.slane %v578_v21, 2  ;;  %v586_v32 = vrot.slane %v585_v35, 2  ;;  %v553_v25 = vrot.slane %v552_v23, 1  ;;  %v560_v38 = vrot.slane %v559_v28, 1 }
  0x79   : > { %v592_v1 = vmax.f32 %v590_v13, %v591_v29  ;;  %v599_v58 = vmax.f32 %v597_v24, %v598_v2  ;;  %v566_v10 = vmax.f32 %v564_v50, %v565_v42  ;;  %v573_v39 = vmax.f32 %v571_v36, %v572_v59  ;;  %v3304_v29 = vld [vmem:[#allocation6_spill] sm:$0xff]  ;;  %v3305_v2 = vld [vmem:[#allocation7_spill] sm:$0xff] }
  0x7a   : > { %v580_v44 = vmax.f32 %v578_v21, %v579_v22  ;;  %v587_v20 = vmax.f32 %v585_v35, %v586_v32  ;;  %v2123_v34 = vmax.f32 %v552_v23, %v553_v25  ;;  %v2125_v40 = vmax.f32 %v559_v28, %v560_v38  ;;  %v3307_v22 = vld [vmem:[#allocation8_spill] sm:$0xff]  ;;  %v3308_v32 = vld [vmem:[#allocation9_spill] sm:$0xff] }
  0x7b   : > { %v593_v27 = vrot.slane %v592_v1, 2  ;;  %v600_v56 = vrot.slane %v599_v58, 2  ;;  %v567_v57 = vrot.slane %v566_v10, 1  ;;  %v574_v61 = vrot.slane %v573_v39, 1 }
  0x7c   : > { %v581_v62 = vrot.slane %v580_v44, 1  ;;  %v588_v14 = vrot.slane %v587_v20, 1  ;;  %v3296_v43 = vmax.f32 %v1580_v52, %v1583_v51  ;;  %v3297_v6 = vmax.f32 %v1590_v60, %v1593_v11  ;;  %v3298_v52 = vld [vmem:[#allocation2_spill] sm:$0xff]  ;;  %v3299_v51 = vld [vmem:[#allocation3_spill] sm:$0xff]  ;;  %v3301_v60 = vld [vmem:[#allocation4_spill] sm:$0xff] }
  0x7d   : > { %v594_v4 = vmax.f32 %v592_v1, %v593_v27  ;;  %v601_v17 = vmax.f32 %v599_v58, %v600_v56  ;;  %v2135_v30 = vmax.f32 %v566_v10, %v567_v57  ;;  %v2137_v49 = vmax.f32 %v573_v39, %v574_v61  ;;  %v3302_v11 = vld [vmem:[#allocation5_spill] sm:$0xff] }
  0x7e   : > { %v604_v5 = vsel %vm299_vm0, %v3296_v43, -inf  ;;  %v611_v48 = vsel %vm299_vm0, %v3297_v6, -inf  ;;  %v2139_v12 = vmax.f32 %v580_v44, %v581_v62  ;;  %v2141_v13 = vmax.f32 %v587_v20, %v588_v14  ;;  %v3310_v62 = vld [vmem:[#allocation10_spill] sm:$0xff]  ;;  %v3311_v14 = vld [vmem:[#allocation11_spill] sm:$0xff] }
  0x7f   : > { %v595_v19 = vrot.slane %v594_v4, 1  ;;  %v602_v24 = vrot.slane %v601_v17, 1  ;;  %v605_v50 = vrot.slane %v604_v5, 4  ;;  %v612_v36 = vrot.slane %v611_v48, 4 }
  0x80   : > { %v3300_v21 = vmax.f32 %v3298_v52, %v3299_v51  ;;  %v3303_v23 = vmax.f32 %v3301_v60, %v3302_v11  ;;  %v3306_v42 = vmax.f32 %v3304_v29, %v3305_v2  ;;  %v3309_v25 = vmax.f32 %v3307_v22, %v3308_v32  ;;  %v3313_v52 = vld [vmem:[#allocation12_spill] sm:$0xff]  ;;  %v3314_v51 = vld [vmem:[#allocation13_spill] sm:$0xff] }
  0x81   : > { %v2159_v1 = vmax.f32 %v594_v4, %v595_v19  ;;  %v2161_v58 = vmax.f32 %v601_v17, %v602_v24  ;;  %v606_v10 = vmax.f32 %v604_v5, %v605_v50  ;;  %v613_v39 = vmax.f32 %v611_v48, %v612_v36 }
  0x82   : > { %v618_v35 = vsel %vm299_vm0, %v3300_v21, -inf  ;;  %v625_v28 = vsel %vm299_vm0, %v3303_v23, -inf  ;;  %v632_v59 = vsel %vm299_vm0, %v3306_v42, -inf  ;;  %v639_v38 = vsel %vm299_vm0, %v3309_v25, -inf }
  0x83   : > { %v619_v44 = vrot.slane %v618_v35, 4  ;;  %v626_v20 = vrot.slane %v625_v28, 4  ;;  %v633_v27 = vrot.slane %v632_v59, 4  ;;  %v640_v56 = vrot.slane %v639_v38, 4 }
  0x84   : > { %v607_v57 = vrot.slane %v606_v10, 2  ;;  %v614_v61 = vrot.slane %v613_v39, 2  ;;  %v3312_v43 = vmax.f32 %v3310_v62, %v3311_v14  ;;  %v3315_v21 = vmax.f32 %v3313_v52, %v3314_v51 }
  0x85   : > { %v620_v17 = vmax.f32 %v618_v35, %v619_v44  ;;  %v627_v19 = vmax.f32 %v625_v28, %v626_v20  ;;  %v634_v5 = vmax.f32 %v632_v59, %v633_v27  ;;  %v641_v48 = vmax.f32 %v639_v38, %v640_v56 }
  0x86   : > { %v646_v6 = vsel %vm299_vm0, %v3312_v43, -inf  ;;  %v653_v4 = vsel %vm299_vm0, %v3315_v21, -inf  ;;  %v608_v24 = vmax.f32 %v606_v10, %v607_v57  ;;  %v615_v50 = vmax.f32 %v613_v39, %v614_v61  ;;  %v3316_v57 = vld [vmem:[#allocation14_spill] sm:$0xff]  ;;  %v3317_v61 = vld [vmem:[#allocation15_spill] sm:$0xff]  ;;  %v3319_v21 = vld [vmem:[#allocation16_spill] sm:$0xff] }
  0x87   : > { %v647_v36 = vrot.slane %v646_v6, 4  ;;  %v654_v60 = vrot.slane %v653_v4, 4  ;;  %v621_v11 = vrot.slane %v620_v17, 2  ;;  %v628_v23 = vrot.slane %v627_v19, 2 }
  0x88   : > { %v635_v29 = vrot.slane %v634_v5, 2  ;;  %v642_v2 = vrot.slane %v641_v48, 2  ;;  %v609_v42 = vrot.slane %v608_v24, 1  ;;  %v616_v22 = vrot.slane %v615_v50, 1 }
  0x89   : > { %v648_v32 = vmax.f32 %v646_v6, %v647_v36  ;;  %v655_v25 = vmax.f32 %v653_v4, %v654_v60  ;;  %v622_v62 = vmax.f32 %v620_v17, %v621_v11  ;;  %v629_v14 = vmax.f32 %v627_v19, %v628_v23  ;;  %v3320_v4 = vld [vmem:[#allocation17_spill] sm:$0xff] }
  0x8a   : > { %v636_v43 = vmax.f32 %v634_v5, %v635_v29  ;;  %v643_v52 = vmax.f32 %v641_v48, %v642_v2  ;;  %v2171_v35 = vmax.f32 %v608_v24, %v609_v42  ;;  %v2173_v28 = vmax.f32 %v615_v50, %v616_v22  ;;  %v3326_v29 = vld [vmem:[#allocation18_spill] sm:$0xff]  ;;  %v3327_v2 = vld [vmem:[#allocation19_spill] sm:$0xff] }
  0x8b   : > { %v649_v59 = vrot.slane %v648_v32, 2  ;;  %v656_v38 = vrot.slane %v655_v25, 2  ;;  %v623_v10 = vrot.slane %v622_v62, 1  ;;  %v630_v39 = vrot.slane %v629_v14, 1 }
  0x8c   : > { %v637_v44 = vrot.slane %v636_v43, 1  ;;  %v644_v20 = vrot.slane %v643_v52, 1  ;;  %v3318_v6 = vmax.f32 %v3316_v57, %v3317_v61  ;;  %v3321_v17 = vmax.f32 %v3319_v21, %v3320_v4 }
  0x8d   : > { %v650_v27 = vmax.f32 %v648_v32, %v649_v59  ;;  %v657_v56 = vmax.f32 %v655_v25, %v656_v38  ;;  %v2183_v5 = vmax.f32 %v622_v62, %v623_v10  ;;  %v2185_v48 = vmax.f32 %v629_v14, %v630_v39  ;;  %v3329_v32 = vld [vmem:[#allocation20_spill] sm:$0xff]  ;;  %v3330_v25 = vld [vmem:[#allocation21_spill] sm:$0xff]  ;;  %v3332_v14 = vld [vmem:[#allocation22_spill] sm:$0xff] }
  0x8e   : > { %v660_v51 = vsel %vm299_vm0, %v3318_v6, -inf  ;;  %v667_v19 = vsel %vm299_vm0, %v3321_v17, -inf  ;;  %v2187_v24 = vmax.f32 %v636_v43, %v637_v44  ;;  %v2189_v50 = vmax.f32 %v643_v52, %v644_v20  ;;  %v3333_v38 = vld [vmem:[#allocation23_spill] sm:$0xff]  ;;  %v3335_v10 = vld [vmem:[#allocation24_spill] sm:$0xff]  ;;  %v3336_v39 = vld [vmem:[#allocation25_spill] sm:$0xff] }
  0x8f   : > { %3322 = vst [vmem:[#allocation2_spill] sm:$0xff] %v2183_v5  ;;  %3323 = vst [vmem:[#allocation3_spill] sm:$0xff] %v2185_v48  ;;  %v651_v36 = vrot.slane %v650_v27, 1  ;;  %v658_v60 = vrot.slane %v657_v56, 1  ;;  %v661_v11 = vrot.slane %v660_v51, 4  ;;  %v668_v23 = vrot.slane %v667_v19, 4 }
  0x90   : > { %3324 = vst [vmem:[#allocation4_spill] sm:$0xff] %v2187_v24  ;;  %3325 = vst [vmem:[#allocation5_spill] sm:$0xff] %v2189_v50  ;;  %v3328_v42 = vmax.f32 %v3326_v29, %v3327_v2  ;;  %v3331_v59 = vmax.f32 %v3329_v32, %v3330_v25  ;;  %v3334_v43 = vmax.f32 %v3332_v14, %v3333_v38  ;;  %v3340_v25 = vld [vmem:[#allocation26_spill] sm:$0xff] }
  0x91   : > { %v3337_v44 = vmax.f32 %v3335_v10, %v3336_v39  ;;  %v2207_v57 = vmax.f32 %v650_v27, %v651_v36  ;;  %v2209_v61 = vmax.f32 %v657_v56, %v658_v60  ;;  %v662_v6 = vmax.f32 %v660_v51, %v661_v11  ;;  %v3344_v10 = vld [vmem:[#allocation29_spill] sm:$0xff] }
  0x92   : > { %v674_v22 = vsel %vm299_vm0, %v3328_v42, -inf  ;;  %v681_v62 = vsel %vm299_vm0, %v3331_v59, -inf  ;;  %v688_v52 = vsel %vm299_vm0, %v3334_v43, -inf  ;;  %v669_v21 = vmax.f32 %v667_v19, %v668_v23  ;;  %v3341_v59 = vld [vmem:[#allocation27_spill] sm:$0xff]  ;;  %v3343_v43 = vld [vmem:[#allocation28_spill] sm:$0xff] }
  0x93   : > { %v695_v20 = vsel %vm299_vm0, %v3337_v44, -inf  ;;  %3338 = vst [vmem:[#allocation6_spill] sm:$0xff] %v2207_v57  ;;  %3339 = vst [vmem:[#allocation7_spill] sm:$0xff] %v2209_v61  ;;  %v675_v4 = vrot.slane %v674_v22, 4  ;;  %v682_v17 = vrot.slane %v681_v62, 4  ;;  %v689_v29 = vrot.slane %v688_v52, 4 }
  0x94   : > { %v696_v2 = vrot.slane %v695_v20, 4  ;;  %v663_v42 = vrot.slane %v662_v6, 2  ;;  %v670_v32 = vrot.slane %v669_v21, 2  ;;  %v3342_v14 = vmax.f32 %v3340_v25, %v3341_v59 }
  0x95   : > { %v3345_v39 = vmax.f32 %v3343_v43, %v3344_v10  ;;  %v676_v56 = vmax.f32 %v674_v22, %v675_v4  ;;  %v683_v36 = vmax.f32 %v681_v62, %v682_v17  ;;  %v690_v51 = vmax.f32 %v688_v52, %v689_v29 }
  0x96   : > { %v702_v38 = vsel %vm299_vm0, %v3342_v14, -inf  ;;  %v697_v19 = vmax.f32 %v695_v20, %v696_v2  ;;  %v664_v60 = vmax.f32 %v662_v6, %v663_v42  ;;  %v671_v11 = vmax.f32 %v669_v21, %v670_v32  ;;  %v3348_v42 = vld [vmem:[#allocation30_spill] sm:$0xff]  ;;  %v3349_v32 = vld [vmem:[#allocation31_spill] sm:$0xff] }
  0x97   : > { %v709_v27 = vsel %vm299_vm0, %v3345_v39, -inf  ;;  %v703_v23 = vrot.slane %v702_v38, 4  ;;  %v677_v61 = vrot.slane %v676_v56, 2  ;;  %v684_v57 = vrot.slane %v683_v36, 2 }
  0x98   : > { %v710_v44 = vrot.slane %v709_v27, 4  ;;  %v691_v50 = vrot.slane %v690_v51, 2  ;;  %v698_v24 = vrot.slane %v697_v19, 2  ;;  %v665_v25 = vrot.slane %v664_v60, 1 }
  0x99   : > { %v672_v59 = vrot.slane %v671_v11, 1  ;;  %v704_v14 = vmax.f32 %v702_v38, %v703_v23  ;;  %v678_v5 = vmax.f32 %v676_v56, %v677_v61  ;;  %v685_v43 = vmax.f32 %v683_v36, %v684_v57  ;;  %v3351_v57 = vld [vmem:[#allocation32_spill] sm:$0xff] }
  0x9a   : > { %v711_v48 = vmax.f32 %v709_v27, %v710_v44  ;;  %v692_v10 = vmax.f32 %v690_v51, %v691_v50  ;;  %v699_v39 = vmax.f32 %v697_v19, %v698_v24  ;;  %v2219_v22 = vmax.f32 %v664_v60, %v665_v25  ;;  %v3352_v50 = vld [vmem:[#allocation33_spill] sm:$0xff]  ;;  %v3358_v44 = vld [vmem:[#allocation34_spill] sm:$0xff]  ;;  %v3359_v25 = vld [vmem:[#allocation35_spill] sm:$0xff] }
  0x9b   : > { %v2221_v62 = vmax.f32 %v671_v11, %v672_v59  ;;  %v705_v52 = vrot.slane %v704_v14, 2  ;;  %v679_v6 = vrot.slane %v678_v5, 1  ;;  %v686_v21 = vrot.slane %v685_v43, 1 }
  0x9c   : > { %3346 = vst [vmem:[#allocation8_spill] sm:$0xff] %v2219_v22  ;;  %v712_v20 = vrot.slane %v711_v48, 2  ;;  %v693_v4 = vrot.slane %v692_v10, 1  ;;  %v700_v17 = vrot.slane %v699_v39, 1  ;;  %v3350_v38 = vmax.f32 %v3348_v42, %v3349_v32 }
  0x9d   : > { %3347 = vst [vmem:[#allocation9_spill] sm:$0xff] %v2221_v62  ;;  %v706_v29 = vmax.f32 %v704_v14, %v705_v52  ;;  %v3353_v24 = vmax.f32 %v3351_v57, %v3352_v50  ;;  %v2231_v56 = vmax.f32 %v678_v5, %v679_v6  ;;  %v2233_v36 = vmax.f32 %v685_v43, %v686_v21  ;;  %v3361_v52 = vld [vmem:[#allocation36_spill] sm:$0xff]  ;;  %v3364_v43 = vld [vmem:[#allocation38_spill] sm:$0xff]  ;;  %v3365_v6 = vld [vmem:[#allocation39_spill] sm:$0xff] }
  0x9e   : > { %v713_v2 = vmax.f32 %v711_v48, %v712_v20  ;;  %v716_v61 = vsel %vm299_vm0, %v3350_v38, -inf  ;;  %v2235_v51 = vmax.f32 %v692_v10, %v693_v4  ;;  %v2237_v19 = vmax.f32 %v699_v39, %v700_v17  ;;  %v3362_v20 = vld [vmem:[#allocation37_spill] sm:$0xff]  ;;  %v3367_v21 = vld [vmem:[#allocation40_spill] sm:$0xff] }
  0x9f   : > { %v723_v27 = vsel %vm299_vm0, %v3353_v24, -inf  ;;  %3354 = vst [vmem:[#allocation10_spill] sm:$0xff] %v2231_v56  ;;  %3355 = vst [vmem:[#allocation11_spill] sm:$0xff] %v2233_v36  ;;  %v707_v60 = vrot.slane %v706_v29, 1  ;;  %v717_v11 = vrot.slane %v716_v61, 4  ;;  %v3360_v59 = vmax.f32 %v3358_v44, %v3359_v25  ;;  %v3368_v4 = vld [vmem:[#allocation41_spill] sm:$0xff] }
  0xa0   : > { %3356 = vst [vmem:[#allocation12_spill] sm:$0xff] %v2235_v51  ;;  %3357 = vst [vmem:[#allocation13_spill] sm:$0xff] %v2237_v19  ;;  %v714_v48 = vrot.slane %v713_v2, 1  ;;  %v724_v23 = vrot.slane %v723_v27, 4  ;;  %v3363_v42 = vmax.f32 %v3361_v52, %v3362_v20  ;;  %v3366_v10 = vmax.f32 %v3364_v43, %v3365_v6  ;;  %v3372_v43 = vld [vmem:[#allocation42_spill] sm:$0xff]  ;;  %v3373_v6 = vld [vmem:[#allocation43_spill] sm:$0xff] }
  0xa1   : > { %v730_v14 = vsel %vm299_vm0, %v3360_v59, -inf  ;;  %v3369_v17 = vmax.f32 %v3367_v21, %v3368_v4  ;;  %v2255_v38 = vmax.f32 %v706_v29, %v707_v60  ;;  %v718_v50 = vmax.f32 %v716_v61, %v717_v11  ;;  %v3375_v21 = vld [vmem:[#allocation44_spill] sm:$0xff]  ;;  %v3376_v4 = vld [vmem:[#allocation45_spill] sm:$0xff] }
  0xa2   : > { %v737_v5 = vsel %vm299_vm0, %v3363_v42, -inf  ;;  %v744_v39 = vsel %vm299_vm0, %v3366_v10, -inf  ;;  %v2257_v57 = vmax.f32 %v713_v2, %v714_v48  ;;  %v725_v24 = vmax.f32 %v723_v27, %v724_v23 }
  0xa3   : > { %v751_v32 = vsel %vm299_vm0, %v3369_v17, -inf  ;;  %3370 = vst [vmem:[#allocation14_spill] sm:$0xff] %v2255_v38  ;;  %v731_v44 = vrot.slane %v730_v14, 4  ;;  %v738_v25 = vrot.slane %v737_v5, 4  ;;  %v745_v59 = vrot.slane %v744_v39, 4 }
  0xa4   : > { %3371 = vst [vmem:[#allocation15_spill] sm:$0xff] %v2257_v57  ;;  %v752_v52 = vrot.slane %v751_v32, 4  ;;  %v719_v20 = vrot.slane %v718_v50, 2  ;;  %v726_v42 = vrot.slane %v725_v24, 2  ;;  %v3374_v10 = vmax.f32 %v3372_v43, %v3373_v6 }
  0xa5   : > { %v3377_v17 = vmax.f32 %v3375_v21, %v3376_v4  ;;  %v732_v2 = vmax.f32 %v730_v14, %v731_v44  ;;  %v739_v60 = vmax.f32 %v737_v5, %v738_v25  ;;  %v746_v61 = vmax.f32 %v744_v39, %v745_v59 }
  0xa6   : > { %v758_v19 = vsel %vm299_vm0, %v3374_v10, -inf  ;;  %v753_v27 = vmax.f32 %v751_v32, %v752_v52  ;;  %v720_v48 = vmax.f32 %v718_v50, %v719_v20  ;;  %v727_v11 = vmax.f32 %v725_v24, %v726_v42  ;;  %v3379_v20 = vld [vmem:[#allocation46_spill] sm:$0xff]  ;;  %v3380_v42 = vld [vmem:[#allocation47_spill] sm:$0xff] }
  0xa7   : > { %v765_v29 = vsel %vm299_vm0, %v3377_v17, -inf  ;;  %v759_v23 = vrot.slane %v758_v19, 4  ;;  %v733_v38 = vrot.slane %v732_v2, 2  ;;  %v740_v51 = vrot.slane %v739_v60, 2 }
  0xa8   : > { %v766_v57 = vrot.slane %v765_v29, 4  ;;  %v747_v36 = vrot.slane %v746_v61, 2  ;;  %v754_v56 = vrot.slane %v753_v27, 2  ;;  %v721_v43 = vrot.slane %v720_v48, 1 }
  0xa9   : > { %v728_v6 = vrot.slane %v727_v11, 1  ;;  %v760_v10 = vmax.f32 %v758_v19, %v759_v23  ;;  %v734_v22 = vmax.f32 %v732_v2, %v733_v38  ;;  %v741_v21 = vmax.f32 %v739_v60, %v740_v51  ;;  %v3382_v51 = vld [vmem:[#allocation48_spill] sm:$0xff]  ;;  %v3389_v23 = vld [vmem:[#allocation50_spill] sm:$0xff] }
  0xaa   : > { %v767_v62 = vmax.f32 %v765_v29, %v766_v57  ;;  %v748_v4 = vmax.f32 %v746_v61, %v747_v36  ;;  %v755_v17 = vmax.f32 %v753_v27, %v754_v56  ;;  %v2267_v14 = vmax.f32 %v720_v48, %v721_v43  ;;  %v3383_v36 = vld [vmem:[#allocation49_spill] sm:$0xff] }
  0xab   : > { %v2269_v5 = vmax.f32 %v727_v11, %v728_v6  ;;  %v761_v39 = vrot.slane %v760_v10, 2  ;;  %v735_v50 = vrot.slane %v734_v22, 1  ;;  %v742_v24 = vrot.slane %v741_v21, 1 }
  0xac   : > { %3378 = vst [vmem:[#allocation16_spill] sm:$0xff] %v2267_v14  ;;  %v768_v32 = vrot.slane %v767_v62, 2  ;;  %v749_v44 = vrot.slane %v748_v4, 1  ;;  %v756_v25 = vrot.slane %v755_v17, 1  ;;  %v3381_v19 = vmax.f32 %v3379_v20, %v3380_v42 }
  0xad   : > { %v762_v59 = vmax.f32 %v760_v10, %v761_v39  ;;  %v3384_v56 = vmax.f32 %v3382_v51, %v3383_v36  ;;  %v2279_v29 = vmax.f32 %v734_v22, %v735_v50  ;;  %v2281_v2 = vmax.f32 %v741_v21, %v742_v24  ;;  %v3391_v10 = vld [vmem:[#allocation51_spill] sm:$0xff]  ;;  %v3392_v39 = vld [vmem:[#allocation52_spill] sm:$0xff]  ;;  %v3394_v21 = vld [vmem:[#allocation53_spill] sm:$0xff] }
  0xae   : > { %v769_v52 = vmax.f32 %v767_v62, %v768_v32  ;;  %v772_v38 = vsel %vm299_vm0, %v3381_v19, -inf  ;;  %v2283_v60 = vmax.f32 %v748_v4, %v749_v44  ;;  %v2285_v61 = vmax.f32 %v755_v17, %v756_v25  ;;  %v3395_v50 = vld [vmem:[#allocation54_spill] sm:$0xff]  ;;  %v3397_v24 = vld [vmem:[#allocation55_spill] sm:$0xff]  ;;  %v3398_v44 = vld [vmem:[#allocation56_spill] sm:$0xff] }
  0xaf   : > { %v779_v57 = vsel %vm299_vm0, %v3384_v56, -inf  ;;  %3385 = vst [vmem:[#allocation17_spill] sm:$0xff] %v2279_v29  ;;  %3386 = vst [vmem:[#allocation18_spill] sm:$0xff] %v2281_v2  ;;  %v763_v27 = vrot.slane %v762_v59, 1  ;;  %v773_v48 = vrot.slane %v772_v38, 4  ;;  %v3390_v43 = vmax.f32 %v1836_v7, %v3389_v23 }
  0xb0   : > { %3387 = vst [vmem:[#allocation19_spill] sm:$0xff] %v2283_v60  ;;  %3388 = vst [vmem:[#allocation20_spill] sm:$0xff] %v2285_v61  ;;  %v770_v62 = vrot.slane %v769_v52, 1  ;;  %v780_v11 = vrot.slane %v779_v57, 4  ;;  %v3393_v32 = vmax.f32 %v3391_v10, %v3392_v39  ;;  %v3396_v4 = vmax.f32 %v3394_v21, %v3395_v50 }
  0xb1   : > { %v786_v6 = vsel %vm299_vm0, %v3390_v43, -inf  ;;  %v3399_v25 = vmax.f32 %v3397_v24, %v3398_v44  ;;  %v2303_v42 = vmax.f32 %v762_v59, %v763_v27  ;;  %v774_v19 = vmax.f32 %v772_v38, %v773_v48  ;;  %v3405_v24 = vld [vmem:[#allocation59_spill] sm:$0xff] }
  0xb2   : > { %v793_v22 = vsel %vm299_vm0, %v3393_v32, -inf  ;;  %v800_v17 = vsel %vm299_vm0, %v3396_v4, -inf  ;;  %v2305_v7 = vmax.f32 %v769_v52, %v770_v62  ;;  %v781_v51 = vmax.f32 %v779_v57, %v780_v11  ;;  %v3402_v32 = vld [vmem:[#allocation57_spill] sm:$0xff]  ;;  %v3404_v4 = vld [vmem:[#allocation58_spill] sm:$0xff] }
  0xb3   : > { %v807_v20 = vsel %vm299_vm0, %v3399_v25, -inf  ;;  %3400 = vst [vmem:[#allocation21_spill] sm:$0xff] %v2303_v42  ;;  %v787_v36 = vrot.slane %v786_v6, 4  ;;  %v794_v56 = vrot.slane %v793_v22, 4  ;;  %v801_v23 = vrot.slane %v800_v17, 4 }
  0xb4   : > { %3401 = vst [vmem:[#allocation22_spill] sm:$0xff] %v2305_v7  ;;  %v808_v43 = vrot.slane %v807_v20, 4  ;;  %v775_v10 = vrot.slane %v774_v19, 2  ;;  %v782_v39 = vrot.slane %v781_v51, 2  ;;  %v3403_v21 = vmax.f32 %v1876_v45, %v3402_v32 }
  0xb5   : > { %v3406_v44 = vmax.f32 %v3404_v4, %v3405_v24  ;;  %v788_v52 = vmax.f32 %v786_v6, %v787_v36  ;;  %v795_v27 = vmax.f32 %v793_v22, %v794_v56  ;;  %v802_v38 = vmax.f32 %v800_v17, %v801_v23 }
  0xb6   : > { %v814_v50 = vsel %vm299_vm0, %v3403_v21, -inf  ;;  %v809_v57 = vmax.f32 %v807_v20, %v808_v43  ;;  %v776_v62 = vmax.f32 %v774_v19, %v775_v10  ;;  %v783_v48 = vmax.f32 %v781_v51, %v782_v39  ;;  %v3408_v10 = vld [vmem:[#allocation60_spill] sm:$0xff]  ;;  %v3409_v39 = vld [vmem:[#allocation61_spill] sm:$0xff] }
  0xb7   : > { %v821_v59 = vsel %vm299_vm0, %v3406_v44, -inf  ;;  %v815_v11 = vrot.slane %v814_v50, 4  ;;  %v789_v7 = vrot.slane %v788_v52, 2  ;;  %v796_v42 = vrot.slane %v795_v27, 2 }
  0xb8   : > { %v822_v25 = vrot.slane %v821_v59, 4  ;;  %v803_v61 = vrot.slane %v802_v38, 2  ;;  %v810_v60 = vrot.slane %v809_v57, 2  ;;  %v777_v45 = vrot.slane %v776_v62, 1 }
  0xb9   : > { %v784_v32 = vrot.slane %v783_v48, 1  ;;  %v816_v21 = vmax.f32 %v814_v50, %v815_v11  ;;  %v790_v29 = vmax.f32 %v788_v52, %v789_v7  ;;  %v797_v4 = vmax.f32 %v795_v27, %v796_v42  ;;  %v3411_v42 = vld [vmem:[#allocation62_spill] sm:$0xff] }
  0xba   : > { %v823_v2 = vmax.f32 %v821_v59, %v822_v25  ;;  %v804_v24 = vmax.f32 %v802_v38, %v803_v61  ;;  %v811_v44 = vmax.f32 %v809_v57, %v810_v60  ;;  %v2315_v6 = vmax.f32 %v776_v62, %v777_v45  ;;  %v3412_v61 = vld [vmem:[#allocation63_spill] sm:$0xff]  ;;  %v3417_v25 = vld [vmem:[#allocation64_spill] sm:$0xff]  ;;  %v3418_v45 = vld [vmem:[#allocation65_spill] sm:$0xff] }
  0xbb   : > { %v2317_v22 = vmax.f32 %v783_v48, %v784_v32  ;;  %v817_v17 = vrot.slane %v816_v21, 2  ;;  %v791_v19 = vrot.slane %v790_v29, 1  ;;  %v798_v51 = vrot.slane %v797_v4, 1 }
  0xbc   : > { %3407 = vst [vmem:[#allocation23_spill] sm:$0xff] %v2315_v6  ;;  %v824_v20 = vrot.slane %v823_v2, 2  ;;  %v805_v36 = vrot.slane %v804_v24, 1  ;;  %v812_v56 = vrot.slane %v811_v44, 1  ;;  %v3410_v50 = vmax.f32 %v3408_v10, %v3409_v39  ;;  %v2543_v6 = vld [vmem:[%s3088_s2] ss:$0 sm:$0xff] }
  0xbd   : > { %v818_v23 = vmax.f32 %v816_v21, %v817_v17  ;;  %v3413_v60 = vmax.f32 %v3411_v42, %v3412_v61  ;;  %v2327_v52 = vmax.f32 %v790_v29, %v791_v19  ;;  %v2329_v27 = vmax.f32 %v797_v4, %v798_v51  ;;  %v3420_v17 = vld [vmem:[#allocation66_spill] sm:$0xff]  ;;  %v3423_v4 = vld [vmem:[#allocation68_spill] sm:$0xff]  ;;  %v3424_v19 = vld [vmem:[#allocation69_spill] sm:$0xff] }
  0xbe   : > { %v825_v43 = vmax.f32 %v823_v2, %v824_v20  ;;  %v828_v7 = vsel %vm299_vm0, %v3410_v50, -inf  ;;  %v2331_v38 = vmax.f32 %v804_v24, %v805_v36  ;;  %v2333_v57 = vmax.f32 %v811_v44, %v812_v56  ;;  %v3421_v20 = vld [vmem:[#allocation67_spill] sm:$0xff]  ;;  %v3426_v51 = vld [vmem:[#allocation70_spill] sm:$0xff] }
  0xbf   : > { %v835_v59 = vsel %vm299_vm0, %v3413_v60, -inf  ;;  %3414 = vst [vmem:[#allocation24_spill] sm:$0xff] %v2329_v27  ;;  %v819_v62 = vrot.slane %v818_v23, 1  ;;  %v829_v48 = vrot.slane %v828_v7, 4  ;;  %v3419_v32 = vmax.f32 %v3417_v25, %v3418_v45  ;;  %v3427_v36 = vld [vmem:[#allocation71_spill] sm:$0xff] }
  0xc0   : > { %3415 = vst [vmem:[#allocation25_spill] sm:$0xff] %v2331_v38  ;;  %3416 = vst [vmem:[#allocation26_spill] sm:$0xff] %v2333_v57  ;;  %v826_v2 = vrot.slane %v825_v43, 1  ;;  %v836_v11 = vrot.slane %v835_v59, 4  ;;  %v3422_v10 = vmax.f32 %v3420_v17, %v3421_v20  ;;  %v3425_v24 = vmax.f32 %v3423_v4, %v3424_v19 }
  0xc1   : > { %v842_v21 = vsel %vm299_vm0, %v3419_v32, -inf  ;;  %v3428_v56 = vmax.f32 %v3426_v51, %v3427_v36  ;;  %v2351_v50 = vmax.f32 %v818_v23, %v819_v62  ;;  %v830_v61 = vmax.f32 %v828_v7, %v829_v48 }
  0xc2   : > { %v849_v29 = vsel %vm299_vm0, %v3422_v10, -inf  ;;  %v856_v44 = vsel %vm299_vm0, %v3425_v24, -inf  ;;  %v2353_v42 = vmax.f32 %v825_v43, %v826_v2  ;;  %v837_v60 = vmax.f32 %v835_v59, %v836_v11  ;;  %v3432_v24 = vld [vmem:[#allocation72_spill] sm:$0xff] }
  0xc3   : > { %v863_v39 = vsel %vm299_vm0, %v3428_v56, -inf  ;;  %3429 = vst [vmem:[#allocation27_spill] sm:$0xff] %v2351_v50  ;;  %v843_v25 = vrot.slane %v842_v21, 4  ;;  %v850_v45 = vrot.slane %v849_v29, 4  ;;  %v857_v32 = vrot.slane %v856_v44, 4 }
  0xc4   : > { %3430 = vst [vmem:[#allocation28_spill] sm:$0xff] %v2353_v42  ;;  %v864_v17 = vrot.slane %v863_v39, 4  ;;  %v831_v20 = vrot.slane %v830_v61, 2  ;;  %v838_v10 = vrot.slane %v837_v60, 2  ;;  %v3431_v4 = vmax.f32 %v1954_v31, %v1962_v54 }
  0xc5   : > { %v3433_v51 = vmax.f32 %v1965_v26, %v3432_v24  ;;  %v844_v43 = vmax.f32 %v842_v21, %v843_v25  ;;  %v851_v62 = vmax.f32 %v849_v29, %v850_v45  ;;  %v858_v7 = vmax.f32 %v856_v44, %v857_v32 }
  0xc6   : > { %v870_v19 = vsel %vm299_vm0, %v3431_v4, -inf  ;;  %v865_v59 = vmax.f32 %v863_v39, %v864_v17  ;;  %v832_v2 = vmax.f32 %v830_v61, %v831_v20  ;;  %v839_v48 = vmax.f32 %v837_v60, %v838_v10 }
  0xc7   : > { %v877_v23 = vsel %vm299_vm0, %v3433_v51, -inf  ;;  %v871_v11 = vrot.slane %v870_v19, 4  ;;  %v845_v56 = vrot.slane %v844_v43, 2  ;;  %v852_v42 = vrot.slane %v851_v62, 2 }
  0xc8   : > { %v878_v36 = vrot.slane %v877_v23, 4  ;;  %v859_v50 = vrot.slane %v858_v7, 2  ;;  %v866_v57 = vrot.slane %v865_v59, 2  ;;  %v833_v54 = vrot.slane %v832_v2, 1 }
  0xc9   : > { %v840_v31 = vrot.slane %v839_v48, 1  ;;  %v872_v4 = vmax.f32 %v870_v19, %v871_v11  ;;  %v846_v27 = vmax.f32 %v844_v43, %v845_v56  ;;  %v853_v26 = vmax.f32 %v851_v62, %v852_v42  ;;  %v3444_v56 = vld [vmem:[#allocation76_spill] sm:$0xff] }
  0xca   : > { %v879_v38 = vmax.f32 %v877_v23, %v878_v36  ;;  %v860_v24 = vmax.f32 %v858_v7, %v859_v50  ;;  %v867_v51 = vmax.f32 %v865_v59, %v866_v57  ;;  %v2363_v21 = vmax.f32 %v832_v2, %v833_v54  ;;  %v3441_v2 = vld [vmem:[#allocation74_spill] sm:$0xff]  ;;  %v3445_v54 = vld [vmem:[#allocation77_spill] sm:$0xff]  ;;  %v3477_v14 = vld [vmem:[#allocation27_spill] sm:$0xff] }
  0xcb   : > { %v2365_v29 = vmax.f32 %v839_v48, %v840_v31  ;;  %v873_v44 = vrot.slane %v872_v4, 2  ;;  %v847_v61 = vrot.slane %v846_v27, 1  ;;  %v854_v60 = vrot.slane %v853_v26, 1  ;;  %v3442_v48 = vld [vmem:[#allocation75_spill] sm:$0xff] }
  0xcc   : > { %v880_v39 = vrot.slane %v879_v38, 2  ;;  %v861_v25 = vrot.slane %v860_v24, 1  ;;  %v868_v45 = vrot.slane %v867_v51, 1  ;;  %v3434_v20 = vmax.f32 %v1978_v0, %v1981_v8 }
  0xcd   : > { %v874_v32 = vmax.f32 %v872_v4, %v873_v44  ;;  %v3435_v57 = vmax.f32 %v1987_v53, %v1990_v47  ;;  %v2375_v42 = vmax.f32 %v846_v27, %v847_v61  ;;  %v2377_v19 = vmax.f32 %v853_v26, %v854_v60  ;;  %v3439_v47 = vld [vmem:[#allocation73_spill] sm:$0xff] }
  0xce   : > { %v881_v17 = vmax.f32 %v879_v38, %v880_v39  ;;  %v884_v10 = vsel %vm299_vm0, %v3434_v20, -inf  ;;  %v2379_v23 = vmax.f32 %v860_v24, %v861_v25  ;;  %v2381_v43 = vmax.f32 %v867_v51, %v868_v45  ;;  %v3448_v25 = vld [vmem:[#allocation78_spill] sm:$0xff]  ;;  %v3449_v45 = vld [vmem:[#allocation79_spill] sm:$0xff] }
  0xcf   : > { %v891_v50 = vsel %vm299_vm0, %v3435_v57, -inf  ;;  %v875_v62 = vrot.slane %v874_v32, 1  ;;  %v885_v7 = vrot.slane %v884_v10, 4  ;;  %v3438_v0 = vmax.f32 %v1993_v9, %v1999_v46 }
  0xd0   : > { %3436 = vst [vmem:[#allocation29_spill] sm:$0xff] %v2379_v23  ;;  %3437 = vst [vmem:[#allocation30_spill] sm:$0xff] %v2381_v43  ;;  %v882_v38 = vrot.slane %v881_v17, 1  ;;  %v892_v59 = vrot.slane %v891_v50, 4  ;;  %v3440_v53 = vmax.f32 %v2002_v3, %v3439_v47  ;;  %v3443_v11 = vmax.f32 %v3441_v2, %v3442_v48  ;;  %v3452_v47 = vld [vmem:[#allocation81_spill] sm:$0xff] }
  0xd1   : > { %v898_v8 = vsel %vm299_vm0, %v3438_v0, -inf  ;;  %v3446_v31 = vmax.f32 %v3444_v56, %v3445_v54  ;;  %v2399_v26 = vmax.f32 %v874_v32, %v875_v62  ;;  %v886_v46 = vmax.f32 %v884_v10, %v885_v7  ;;  %v3451_v0 = vld [vmem:[#allocation80_spill] sm:$0xff] }
  0xd2   : > { %v905_v27 = vsel %vm299_vm0, %v3440_v53, -inf  ;;  %v912_v36 = vsel %vm299_vm0, %v3443_v11, -inf  ;;  %v2401_v9 = vmax.f32 %v881_v17, %v882_v38  ;;  %v893_v24 = vmax.f32 %v891_v50, %v892_v59 }
  0xd3   : > { %v919_v4 = vsel %vm299_vm0, %v3446_v31, -inf  ;;  %v899_v51 = vrot.slane %v898_v8, 4  ;;  %v906_v3 = vrot.slane %v905_v27, 4  ;;  %v913_v44 = vrot.slane %v912_v36, 4 }
  0xd4   : > { %3447 = vst [vmem:[#allocation31_spill] sm:$0xff] %v2401_v9  ;;  %v920_v39 = vrot.slane %v919_v4, 4  ;;  %v887_v61 = vrot.slane %v886_v46, 2  ;;  %v894_v60 = vrot.slane %v893_v24, 2  ;;  %v3450_v20 = vmax.f32 %v3448_v25, %v3449_v45 }
  0xd5   : > { %v3453_v53 = vmax.f32 %v3451_v0, %v3452_v47  ;;  %v900_v17 = vmax.f32 %v898_v8, %v899_v51  ;;  %v907_v62 = vmax.f32 %v905_v27, %v906_v3  ;;  %v914_v10 = vmax.f32 %v912_v36, %v913_v44  ;;  %v2414_v8 = vld [vmem:[%s3087_s1] ss:$0 sm:$0xff] }
  0xd6   : > { %v926_v57 = vsel %vm299_vm0, %v3450_v20, -inf  ;;  %v921_v50 = vmax.f32 %v919_v4, %v920_v39  ;;  %v888_v38 = vmax.f32 %v886_v46, %v887_v61  ;;  %v895_v7 = vmax.f32 %v893_v24, %v894_v60  ;;  %v3475_v60 = vld [vmem:[#allocation25_spill] sm:$0xff] }
  0xd7   : > { %v933_v32 = vsel %vm299_vm0, %v3453_v53, -inf  ;;  %v927_v59 = vrot.slane %v926_v57, 4  ;;  %v901_v48 = vrot.slane %v900_v17, 2  ;;  %v908_v11 = vrot.slane %v907_v62, 2 }
  0xd8   : > { %v934_v2 = vrot.slane %v933_v32, 4  ;;  %v915_v56 = vrot.slane %v914_v10, 2  ;;  %v922_v54 = vrot.slane %v921_v50, 2  ;;  %v889_v31 = vrot.slane %v888_v38, 1 }
  0xd9   : > { %v896_v25 = vrot.slane %v895_v7, 1  ;;  %v928_v45 = vmax.f32 %v926_v57, %v927_v59  ;;  %v902_v9 = vmax.f32 %v900_v17, %v901_v48  ;;  %v909_v0 = vmax.f32 %v907_v62, %v908_v11  ;;  %v3469_v11 = vld [vmem:[#allocation18_spill] sm:$0xff]  ;;  %v3474_v57 = vld [vmem:[#allocation24_spill] sm:$0xff] }
  0xda   : > { %v935_v20 = vmax.f32 %v933_v32, %v934_v2  ;;  %v916_v47 = vmax.f32 %v914_v10, %v915_v56  ;;  %v923_v53 = vmax.f32 %v921_v50, %v922_v54  ;;  %v2416_v27 = vmax.f32 %v888_v38, %v889_v31  ;;  %v3468_v31 = vld [vmem:[#allocation17_spill] sm:$0xff] }
  0xdb   : > { %v2418_v36 = vmax.f32 %v895_v7, %v896_v25  ;;  %v929_v4 = vrot.slane %v928_v45, 2  ;;  %v903_v24 = vrot.slane %v902_v9, 1  ;;  %v910_v51 = vrot.slane %v909_v0, 1  ;;  %v3478_v25 = vld [vmem:[#allocation28_spill] sm:$0xff]  ;;  %v3479_v59 = vld [vmem:[#allocation31_spill] sm:$0xff] }
  0xdc   : > { %v936_v46 = vrot.slane %v935_v20, 2  ;;  %v917_v3 = vrot.slane %v916_v47, 1  ;;  %v924_v44 = vrot.slane %v923_v53, 1  ;;  %v3480_v2 = vsub.f32 %v2075_v18, %v2414_v8 }
  0xdd   : > { %v930_v39 = vmax.f32 %v928_v45, %v929_v4  ;;  %v2424_v32 = vmax.f32 %v902_v9, %v903_v24  ;;  %v2426_v17 = vmax.f32 %v909_v0, %v910_v51  ;;  %v3454_v51 = vld [vmem:[#allocation2_spill] sm:$0xff]  ;;  %v3460_v24 = vld [vmem:[#allocation8_spill] sm:$0xff]  ;;  %v3481_v43 = vsub.f32 %v2077_v33, %v2414_v8 }
  0xde   : > { %v937_v61 = vmax.f32 %v935_v20, %v936_v46  ;;  %v2428_v62 = vmax.f32 %v916_v47, %v917_v3  ;;  %v2430_v10 = vmax.f32 %v923_v53, %v924_v44  ;;  %v3455_v44 = vld [vmem:[#allocation3_spill] sm:$0xff]  ;;  %v3458_v4 = vld [vmem:[#allocation6_spill] sm:$0xff]  ;;  %v3461_v3 = vld [vmem:[#allocation9_spill] sm:$0xff]  ;;  %v2569_v45 = vmul.f32 %v2543_v6, %v3480_v2 }
  0xdf   : > { %v931_v50 = vrot.slane %v930_v39, 1  ;;  %v3459_v46 = vld [vmem:[#allocation7_spill] sm:$0xff]  ;;  %v3464_v53 = vld [vmem:[#allocation12_spill] sm:$0xff]  ;;  %v3465_v47 = vld [vmem:[#allocation13_spill] sm:$0xff]  ;;  %v2575_v23 = vmul.f32 %v2543_v6, %v3481_v43  ;;  %v3482_v7 = vsub.f32 %v2079_v55, %v2414_v8  ;;  %v3483_v9 = vsub.f32 %v2081_v15, %v2414_v8 }
  0xe0   : > { %v938_v38 = vrot.slane %v937_v61, 1  ;;  %v3466_v0 = vld [vmem:[#allocation14_spill] sm:$0xff]  ;;  %v3484_v2 = vsub.f32 %v2083_v37, %v2414_v8  ;;  %v3485_v43 = vsub.f32 %v2085_v41, %v2414_v8 }
  0xe1   : > { %v2444_v56 = vmax.f32 %v930_v39, %v931_v50  ;;  %v3462_v39 = vld [vmem:[#allocation10_spill] sm:$0xff]  ;;  %v3463_v50 = vld [vmem:[#allocation11_spill] sm:$0xff]  ;;  %v2581_v48 = vmul.f32 %v2543_v6, %v3482_v7  ;;  %v2587_v18 = vmul.f32 %v2543_v6, %v3483_v9  ;;  %v3486_v7 = vsub.f32 %v2111_v16, %v2414_v8 }
  0xe2   : > { %v2446_v54 = vmax.f32 %v937_v61, %v938_v38  ;;  %v3456_v61 = vld [vmem:[#allocation4_spill] sm:$0xff]  ;;  %v3457_v38 = vld [vmem:[#allocation5_spill] sm:$0xff]  ;;  %v3476_v20 = vld [vmem:[#allocation26_spill] sm:$0xff]  ;;  %v2593_v33 = vmul.f32 %v2543_v6, %v3484_v2  ;;  %v2599_v55 = vmul.f32 %v2543_v6, %v3485_v43  ;;  %v3487_v9 = vsub.f32 %v2113_v63, %v2414_v8 }
  0xe3   : > { %v2605_v15 = vmul.f32 %v2543_v6, %v3486_v7  ;;  %v3488_v2 = vsub.f32 %v2123_v34, %v2414_v8  ;;  %v3489_v43 = vsub.f32 %v2125_v40, %v2414_v8  ;;  %v3490_v7 = vsub.f32 %v2135_v30, %v2414_v8 }
  0xe4   : > { %v2611_v37 = vmul.f32 %v2543_v6, %v3487_v9  ;;  %v3491_v9 = vsub.f32 %v2137_v49, %v2414_v8 }
  0xe5   : > { %v2617_v41 = vmul.f32 %v2543_v6, %v3488_v2  ;;  %v2623_v16 = vmul.f32 %v2543_v6, %v3489_v43  ;;  %v2629_v63 = vmul.f32 %v2543_v6, %v3490_v7  ;;  %v3492_v2 = vsub.f32 %v2139_v12, %v2414_v8 }
  0xe6   : > { %v2635_v34 = vmul.f32 %v2543_v6, %v3491_v9  ;;  %v3493_v43 = vsub.f32 %v2141_v13, %v2414_v8  ;;  %v3494_v7 = vsub.f32 %v2159_v1, %v2414_v8  ;;  %v3495_v9 = vsub.f32 %v2161_v58, %v2414_v8 }
  0xe7   : > { %v2641_v40 = vmul.f32 %v2543_v6, %v3492_v2  ;;  %v3496_v2 = vsub.f32 %v2171_v35, %v2414_v8 }
  0xe8   : > { %v2647_v30 = vmul.f32 %v2543_v6, %v3493_v43  ;;  %v2653_v49 = vmul.f32 %v2543_v6, %v3494_v7  ;;  %v2659_v12 = vmul.f32 %v2543_v6, %v3495_v9  ;;  %v3497_v43 = vsub.f32 %v2173_v28, %v2414_v8 }
  0xe9   : > { %v2665_v13 = vmul.f32 %v2543_v6, %v3496_v2  ;;  %v3498_v7 = vsub.f32 %v3454_v51, %v2414_v8  ;;  %v3499_v9 = vsub.f32 %v3455_v44, %v2414_v8  ;;  %v3500_v2 = vsub.f32 %v3456_v61, %v2414_v8 }
  0xea   : > { %v2671_v1 = vmul.f32 %v2543_v6, %v3497_v43  ;;  %v3501_v43 = vsub.f32 %v3457_v38, %v2414_v8 }
  0xeb   : > { %v2677_v58 = vmul.f32 %v2543_v6, %v3498_v7  ;;  %v2683_v35 = vmul.f32 %v2543_v6, %v3499_v9  ;;  %v2689_v28 = vmul.f32 %v2543_v6, %v3500_v2  ;;  %v3502_v7 = vsub.f32 %v3458_v4, %v2414_v8 }
  0xec   : > { %v2695_v51 = vmul.f32 %v2543_v6, %v3501_v43  ;;  %v3503_v9 = vsub.f32 %v3459_v46, %v2414_v8  ;;  %v3504_v2 = vsub.f32 %v3460_v24, %v2414_v8  ;;  %v3506_v43 = vsub.f32 %v3461_v3, %v2414_v8 }
  0xed   : > { %v2701_v44 = vmul.f32 %v2543_v6, %v3502_v7  ;;  %v3507_v7 = vsub.f32 %v3462_v39, %v2414_v8 }
  0xee   : > { %v2707_v61 = vmul.f32 %v2543_v6, %v3503_v9  ;;  %v2713_v38 = vmul.f32 %v2543_v6, %v3504_v2  ;;  %v2719_v4 = vmul.f32 %v2543_v6, %v3506_v43  ;;  %v3508_v9 = vsub.f32 %v3463_v50, %v2414_v8 }
  0xef   : > { %v2725_v46 = vmul.f32 %v2543_v6, %v3507_v7  ;;  %v3509_v2 = vsub.f32 %v3464_v53, %v2414_v8  ;;  %v3511_v43 = vsub.f32 %v3465_v47, %v2414_v8  ;;  %v3512_v7 = vsub.f32 %v3466_v0, %v2414_v8 }
  0xf0   : > { %3505 = vst [vmem:[#allocation32_spill] sm:$0xff] %v2713_v38  ;;  %v2731_v24 = vmul.f32 %v2543_v6, %v3508_v9  ;;  %v3513_v9 = vld [vmem:[#allocation15_spill] sm:$0xff] }
  0xf1   : > { %v2737_v3 = vmul.f32 %v2543_v6, %v3509_v2  ;;  %v2743_v39 = vmul.f32 %v2543_v6, %v3511_v43  ;;  %v2749_v50 = vmul.f32 %v2543_v6, %v3512_v7  ;;  %v3514_v38 = vsub.f32 %v3513_v9, %v2414_v8  ;;  %v3515_v2 = vld [vmem:[#allocation16_spill] sm:$0xff] }
  0xf2   : > { %v3518_v43 = vsub.f32 %v2269_v5, %v2414_v8  ;;  %v3520_v7 = vsub.f32 %v3468_v31, %v2414_v8 }
  0xf3   : > { %3510 = vst [vmem:[#allocation33_spill] sm:$0xff] %v2737_v3  ;;  %v2755_v53 = vmul.f32 %v2543_v6, %v3514_v38  ;;  %v3516_v3 = vsub.f32 %v3515_v2, %v2414_v8  ;;  %v3522_v38 = vsub.f32 %v3469_v11, %v2414_v8 }
  0xf4   : > { %v2767_v0 = vmul.f32 %v2543_v6, %v3518_v43  ;;  %v2773_v9 = vmul.f32 %v2543_v6, %v3520_v7  ;;  %v3527_v43 = vld [vmem:[#allocation20_spill] sm:$0xff]  ;;  %v3529_v7 = vld [vmem:[#allocation21_spill] sm:$0xff] }
  0xf5   : > { %v2761_v47 = vmul.f32 %v2543_v6, %v3516_v3  ;;  %v2779_v2 = vmul.f32 %v2543_v6, %v3522_v38  ;;  %v3524_v3 = vld [vmem:[#allocation19_spill] sm:$0xff]  ;;  %v3531_v38 = vld [vmem:[#allocation22_spill] sm:$0xff] }
  0xf6   : > { %3519 = vst [vmem:[#allocation35_spill] sm:$0xff] %v2767_v0  ;;  %3521 = vst [vmem:[#allocation36_spill] sm:$0xff] %v2773_v9  ;;  %v3528_v0 = vsub.f32 %v3527_v43, %v2414_v8  ;;  %v3530_v9 = vsub.f32 %v3529_v7, %v2414_v8 }
  0xf7   : > { %3517 = vst [vmem:[#allocation34_spill] sm:$0xff] %v2761_v47  ;;  %3523 = vst [vmem:[#allocation37_spill] sm:$0xff] %v2779_v2  ;;  %v3525_v47 = vsub.f32 %v3524_v3, %v2414_v8  ;;  %v3532_v2 = vsub.f32 %v3531_v38, %v2414_v8 }
  0xf8   : > { %v2791_v31 = vmul.f32 %v2543_v6, %v3528_v0  ;;  %v2797_v11 = vmul.f32 %v2543_v6, %v3530_v9  ;;  %v3535_v0 = vsub.f32 %v2317_v22, %v2414_v8  ;;  %v3536_v9 = vsub.f32 %v2327_v52, %v2414_v8 }
  0xf9   : > { %v2785_v5 = vmul.f32 %v2543_v6, %v3525_v47  ;;  %v2803_v3 = vmul.f32 %v2543_v6, %v3532_v2  ;;  %v3533_v47 = vld [vmem:[#allocation23_spill] sm:$0xff]  ;;  %v3537_v2 = vsub.f32 %v3474_v57, %v2414_v8 }
  0xfa   : > { %v2815_v7 = vmul.f32 %v2543_v6, %v3535_v0  ;;  %v2821_v38 = vmul.f32 %v2543_v6, %v3536_v9  ;;  %v3539_v0 = vsub.f32 %v3476_v20, %v2414_v8  ;;  %v3540_v9 = vsub.f32 %v3477_v14, %v2414_v8 }
  0xfb   : > { %3526 = vst [vmem:[#allocation38_spill] sm:$0xff] %v2785_v5  ;;  %v3534_v5 = vsub.f32 %v3533_v47, %v2414_v8  ;;  %v2827_v47 = vmul.f32 %v2543_v6, %v3537_v2  ;;  %v3541_v2 = vsub.f32 %v3478_v25, %v2414_v8 }
  0xfc   : > { %v2839_v52 = vmul.f32 %v2543_v6, %v3539_v0  ;;  %v2845_v57 = vmul.f32 %v2543_v6, %v3540_v9  ;;  %v3544_v0 = vsub.f32 %v2365_v29, %v2414_v8  ;;  %v3546_v9 = vsub.f32 %v2375_v42, %v2414_v8 }
  0xfd   : > { %v2809_v43 = vmul.f32 %v2543_v6, %v3534_v5  ;;  %v3538_v5 = vsub.f32 %v3475_v60, %v2414_v8  ;;  %v2851_v60 = vmul.f32 %v2543_v6, %v3541_v2  ;;  %v3547_v2 = vsub.f32 %v2377_v19, %v2414_v8 }
  0xfe   : > { %v2863_v14 = vmul.f32 %v2543_v6, %v3544_v0  ;;  %v2869_v25 = vmul.f32 %v2543_v6, %v3546_v9  ;;  %v3550_v0 = vld [vmem:[#allocation30_spill] sm:$0xff]  ;;  %v3552_v9 = vsub.f32 %v2399_v26, %v2414_v8 }
  0xff   : > { %v2833_v22 = vmul.f32 %v2543_v6, %v3538_v5  ;;  %v3542_v5 = vsub.f32 %v2363_v21, %v2414_v8  ;;  %v2875_v21 = vmul.f32 %v2543_v6, %v3547_v2  ;;  %v3553_v2 = vsub.f32 %v3479_v59, %v2414_v8 }
 0x100   : > { %3545 = vst [vmem:[#allocation40_spill] sm:$0xff] %v2863_v14  ;;  %v3551_v14 = vsub.f32 %v3550_v0, %v2414_v8  ;;  %v2893_v19 = vmul.f32 %v2543_v6, %v3552_v9  ;;  %v3556_v9 = vsub.f32 %v2424_v32, %v2414_v8 }
 0x101   : > { %v2857_v20 = vmul.f32 %v2543_v6, %v3542_v5  ;;  %v3548_v5 = vld [vmem:[#allocation29_spill] sm:$0xff] }
 0x102   : > { %v2887_v42 = vmul.f32 %v2543_v6, %v3551_v14  ;;  %v3555_v14 = vsub.f32 %v2418_v36, %v2414_v8  ;;  %v2917_v59 = vmul.f32 %v2543_v6, %v3556_v9  ;;  %v3560_v9 = vsub.f32 %v2444_v56, %v2414_v8 }
 0x103   : > { %3543 = vst [vmem:[#allocation39_spill] sm:$0xff] %v2857_v20  ;;  %v3549_v20 = vsub.f32 %v3548_v5, %v2414_v8  ;;  %v2899_v5 = vmul.f32 %v2543_v6, %v3553_v2  ;;  %v3557_v2 = vsub.f32 %v2426_v17, %v2414_v8 }
 0x104   : > { %v2911_v26 = vmul.f32 %v2543_v6, %v3555_v14  ;;  %v3559_v14 = vsub.f32 %v2430_v10, %v2414_v8  ;;  %v2941_v17 = vmul.f32 %v2543_v6, %v3560_v9  ;;  %v1149_v10 = vrot.slane %v2581_v48, 6 }
 0x105   : > { %v2881_v29 = vmul.f32 %v2543_v6, %v3549_v20  ;;  %v3554_v20 = vsub.f32 %v2416_v27, %v2414_v8  ;;  %v2923_v27 = vmul.f32 %v2543_v6, %v3557_v2  ;;  %v3561_v2 = vsub.f32 %v2446_v54, %v2414_v8 }
 0x106   : > { %v2935_v32 = vmul.f32 %v2543_v6, %v3559_v14  ;;  %v1152_v14 = vrot.slane %v2587_v18, 5  ;;  %v1155_v9 = vrot.slane %v2593_v33, 4  ;;  %v1164_v54 = vrot.slane %v2611_v37, 1 }
 0x107   : > { %v2905_v0 = vmul.f32 %v2543_v6, %v3554_v20  ;;  %v3558_v20 = vsub.f32 %v2428_v62, %v2414_v8  ;;  %v2947_v62 = vmul.f32 %v2543_v6, %v3561_v2  ;;  %v1158_v8 = vrot.slane %v2599_v55, 3 }
 0x108   : > { %v1167_v18 = vrot.slane %v2623_v16, 7  ;;  %v1169_v33 = vrot.slane %v2629_v63, 6  ;;  %v1171_v55 = vrot.slane %v2635_v34, 5  ;;  %v1173_v2 = vrot.slane %v2641_v40, 4 }
 0x109   : > { %v2929_v36 = vmul.f32 %v2543_v6, %v3558_v20  ;;  %v1146_v20 = vrot.slane %v2575_v23, 7  ;;  %v1161_v23 = vrot.slane %v2605_v15, 2  ;;  %v1175_v16 = vrot.slane %v2647_v30, 3 }
 0x10a   : > { %v1168_v37 = vsel %vm1147_vm1, %v1167_v18, %v2617_v41  ;;  %v1179_v40 = vrot.slane %v2659_v12, 1  ;;  %v1185_v41 = vrot.slane %v2683_v35, 5  ;;  %v1199_v18 = vrot.slane %v2731_v24, 5  ;;  %v3564_v24 = vld [vmem:[#allocation35_spill] sm:$0xff] }
 0x10b   : > { %v1148_v56 = vsel %vm1147_vm1, %v1146_v20, %v2569_v45  ;;  %v1177_v20 = vrot.slane %v2653_v49, 2  ;;  %v1170_v34 = vsel %vm1150_vm2, %v1169_v33, %v1168_v37  ;;  %v1207_v37 = vrot.slane %v2755_v53, 1 }
 0x10c   : > { %v1151_v6 = vsel %vm1150_vm2, %v1149_v10, %v1148_v56  ;;  %v1181_v10 = vrot.slane %v2671_v1, 7  ;;  %v1172_v56 = vsel %vm1153_vm3, %v1171_v55, %v1170_v34  ;;  %v3563_v55 = vld [vmem:[#allocation32_spill] sm:$0xff] }
 0x10d   : > { %v1154_v48 = vsel %vm1153_vm3, %v1152_v14, %v1151_v6  ;;  %v1174_v30 = vsel %vm1156_vm4, %v1173_v2, %v1172_v56  ;;  %v1189_v6 = vrot.slane %v2695_v51, 3  ;;  %v1203_v2 = vrot.slane %v2743_v39, 3  ;;  %v3565_v34 = vld [vmem:[#allocation36_spill] sm:$0xff] }
 0x10e   : > { %v1157_v45 = vsel %vm1156_vm4, %v1155_v9, %v1154_v48  ;;  %v1183_v9 = vrot.slane %v2677_v58, 6  ;;  %v1182_v49 = vsel %vm1147_vm1, %v1181_v10, %v2665_v13  ;;  %v1176_v12 = vsel %vm1159_vm5, %v1175_v16, %v1174_v30  ;;  %v3566_v10 = vld [vmem:[#allocation37_spill] sm:$0xff] }
 0x10f   : > { %v1160_v15 = vsel %vm1159_vm5, %v1158_v8, %v1157_v45  ;;  %v1187_v8 = vrot.slane %v2689_v28, 4  ;;  %v1193_v58 = vrot.slane %v2707_v61, 1  ;;  %v1178_v35 = vsel %vm1162_vm6, %v1177_v20, %v1176_v12  ;;  %v3562_v45 = vld [vmem:[#allocation33_spill] sm:$0xff] }
 0x110   : > { %v1163_v63 = vsel %vm1162_vm6, %v1161_v23, %v1160_v15  ;;  %v1184_v1 = vsel %vm1150_vm2, %v1183_v9, %v1182_v49  ;;  %v1191_v23 = vrot.slane %v2701_v44, 2  ;;  %v1195_v13 = vrot.slane %v2719_v4, 7  ;;  %v3568_v9 = vld [vmem:[#allocation38_spill] sm:$0xff] }
 0x111   : > { %v1166_v14 = vsel %vm1165_vm7, %v1164_v54, %v1163_v63  ;;  %v1186_v48 = vsel %vm1153_vm3, %v1185_v41, %v1184_v1  ;;  %v1197_v28 = vrot.slane %v2725_v46, 6  ;;  %v1180_v51 = vsel %vm1165_vm7, %v1179_v40, %v1178_v35 }
 0x112   : > { %1273 = vst [vmem:[%s2969_s25] sm:$0xff] %v1166_v14  ;;  %v1188_v54 = vsel %vm1156_vm4, %v1187_v8, %v1186_v48  ;;  %v1201_v33 = vrot.slane %v3562_v45, 4  ;;  %v1196_v61 = vsel %vm1147_vm1, %v1195_v13, %v3563_v55  ;;  %v1205_v4 = vrot.slane %v2749_v50, 2  ;;  %1274 = vst [vmem:[%s2969_s25 + $0x8] sm:$0xff] %v1180_v51  ;;  %v3567_v50 = vld [vmem:[#allocation34_spill] sm:$0xff] }
 0x113   : > { %v1190_v44 = vsel %vm1159_vm5, %v1189_v6, %v1188_v54  ;;  %v1198_v15 = vsel %vm1150_vm2, %v1197_v28, %v1196_v61  ;;  %v1209_v16 = vrot.slane %v3564_v24, 7  ;;  %v1211_v40 = vrot.slane %v3565_v34, 6 }
 0x114   : > { %v1192_v46 = vsel %vm1162_vm6, %v1191_v23, %v1190_v44  ;;  %v1200_v63 = vsel %vm1153_vm3, %v1199_v18, %v1198_v15  ;;  %v1213_v14 = vrot.slane %v3566_v10, 5  ;;  %v1215_v41 = vrot.slane %v3568_v9, 4 }
 0x115   : > { %v1194_v20 = vsel %vm1165_vm7, %v1193_v58, %v1192_v46  ;;  %v1202_v39 = vsel %vm1156_vm4, %v1201_v33, %v1200_v63  ;;  %v1210_v56 = vsel %vm1147_vm1, %v1209_v16, %v3567_v50  ;;  %v1217_v30 = vrot.slane %v2791_v31, 3 }
 0x116   : > { %1275 = vst [vmem:[%s2969_s25 + $0x10] sm:$0xff] %v1194_v20  ;;  %v1204_v53 = vsel %vm1159_vm5, %v1203_v2, %v1202_v39  ;;  %v1212_v49 = vsel %vm1150_vm2, %v1211_v40, %v1210_v56  ;;  %v1219_v8 = vrot.slane %v2797_v11, 2  ;;  %v1221_v6 = vrot.slane %v2803_v3, 1 }
 0x117   : > { %v1206_v12 = vsel %vm1162_vm6, %v1205_v4, %v1204_v53  ;;  %v1214_v1 = vsel %vm1153_vm3, %v1213_v14, %v1212_v49  ;;  %v1223_v23 = vrot.slane %v2815_v7, 7  ;;  %v1225_v58 = vrot.slane %v2821_v38, 6 }
 0x118   : > { %v1208_v31 = vsel %vm1165_vm7, %v1207_v37, %v1206_v12  ;;  %v1216_v35 = vsel %vm1156_vm4, %v1215_v41, %v1214_v1  ;;  %v1227_v48 = vrot.slane %v2827_v47, 5  ;;  %v1229_v13 = vrot.slane %v2833_v22, 4  ;;  %v3569_v47 = vld [vmem:[#allocation40_spill] sm:$0xff] }
 0x119   : > { %v1218_v11 = vsel %vm1159_vm5, %v1217_v30, %v1216_v35  ;;  %v1224_v3 = vsel %vm1147_vm1, %v1223_v23, %v2809_v43  ;;  %v1231_v28 = vrot.slane %v2839_v52, 3  ;;  %v1233_v7 = vrot.slane %v2845_v57, 2  ;;  %1276 = vst [vmem:[%s2969_s25 + $0x18] sm:$0xff] %v1208_v31  ;;  %v3570_v57 = vld [vmem:[#allocation39_spill] sm:$0xff] }
 0x11a   : > { %v1220_v38 = vsel %vm1162_vm6, %v1219_v8, %v1218_v11  ;;  %v1226_v51 = vsel %vm1150_vm2, %v1225_v58, %v1224_v3  ;;  %v1235_v54 = vrot.slane %v2851_v60, 1  ;;  %v1237_v18 = vrot.slane %v3569_v47, 7 }
 0x11b   : > { %v1222_v22 = vsel %vm1165_vm7, %v1221_v6, %v1220_v38  ;;  %v1228_v45 = vsel %vm1153_vm3, %v1227_v48, %v1226_v51  ;;  %v1239_v43 = vrot.slane %v2869_v25, 6  ;;  %v1241_v33 = vrot.slane %v2875_v21, 5 }
 0x11c   : > { %v1230_v52 = vsel %vm1156_vm4, %v1229_v13, %v1228_v45  ;;  %v1238_v44 = vsel %vm1147_vm1, %v1237_v18, %v3570_v57  ;;  %v1243_v55 = vrot.slane %v2881_v29, 4  ;;  %v1245_v61 = vrot.slane %v2887_v42, 3  ;;  %1277 = vst [vmem:[%s2969_s25 + $0x20] sm:$0xff] %v1222_v22 }
 0x11d   : > { %v1232_v60 = vsel %vm1159_vm5, %v1231_v28, %v1230_v52  ;;  %v1240_v2 = vsel %vm1150_vm2, %v1239_v43, %v1238_v44  ;;  %v1247_v4 = vrot.slane %v2893_v19, 2  ;;  %v1249_v25 = vrot.slane %v2899_v5, 1 }
 0x11e   : > { %v1234_v21 = vsel %vm1162_vm6, %v1233_v7, %v1232_v60  ;;  %v1242_v46 = vsel %vm1153_vm3, %v1241_v33, %v1240_v2  ;;  %v1251_v15 = vrot.slane %v2911_v26, 7  ;;  %v1253_v29 = vrot.slane %v2917_v59, 6 }
 0x11f   : > { %v1236_v42 = vsel %vm1165_vm7, %v1235_v54, %v1234_v21  ;;  %v1244_v37 = vsel %vm1156_vm4, %v1243_v55, %v1242_v46  ;;  %v1255_v24 = vrot.slane %v2923_v27, 5  ;;  %v1257_v16 = vrot.slane %v2929_v36, 4 }
 0x120   : > { %v1246_v19 = vsel %vm1159_vm5, %v1245_v61, %v1244_v37  ;;  %v1252_v5 = vsel %vm1147_vm1, %v1251_v15, %v2905_v0  ;;  %v1259_v20 = vrot.slane %v2935_v32, 3  ;;  %1278 = vst [vmem:[%s2969_s25 + $0x28] sm:$0xff] %v1236_v42  ;;  %v1261_v63 = vrot.slane %v2941_v17, 2 }
 0x121   : > { %v1248_v26 = vsel %vm1162_vm6, %v1247_v4, %v1246_v19  ;;  %v1254_v59 = vsel %vm1150_vm2, %v1253_v29, %v1252_v5  ;;  %v1263_v36 = vrot.slane %v2947_v62, 1 }
 0x122   : > { %v1250_v34 = vsel %vm1165_vm7, %v1249_v25, %v1248_v26  ;;  %v1256_v27 = vsel %vm1153_vm3, %v1255_v24, %v1254_v59 }
 0x123   : > { %v1258_v40 = vsel %vm1156_vm4, %v1257_v16, %v1256_v27  ;;  %1279 = vst [vmem:[%s2969_s25 + $0x30] sm:$0xff] %v1250_v34 }
 0x124   : > { %v1260_v0 = vsel %vm1159_vm5, %v1259_v20, %v1258_v40 }
 0x125   : > { %v1262_v32 = vsel %vm1162_vm6, %v1261_v63, %v1260_v0 }
 0x126   : > { %v1264_v10 = vsel %vm1165_vm7, %v1263_v36, %v1262_v32 }
 0x127   : > { %1280 = vst [vmem:[%s2969_s25 + $0x38] sm:$0xff] %v1264_v10 }
 0x128 PF: > { %s13_s12 = sadd.s32 1, %s1365_s12  }
 0x129   : > { %p10_p4 = scmp.ge.s32.totalorder %s13_s12, 4  }
 0x12b   :  { %12 = sbr.rel (!%p10_p4) target bundleno = 1 (0x1), region = 62 }

// kernel: conv_block_forward.2
= control target key start
LH: loop header
LB: loop body
LE: loop exit
PB: predicated region body
PF: predicated region fallthrough
CT: control target
= control target key end

     0   :  { %s10885_s27 = smov 0   ;;  %s13110_s0 = inlined_call_operand.vmem [shape: f32[2,18,18,128], index: 0, kind: input, shape index: {}]   ;;  %s13111_s1 = inlined_call_operand.vmem [shape: f32[2,18,18,128], index: 1, kind: input, shape index: {}]   ;;  %s13112_s2 = inlined_call_operand.vmem [shape: f32[9,128,128], index: 2, kind: input, shape index: {}]   ;;  %s13113_s3 = inlined_call_operand.vmem [shape: f32[1,128], index: 3, kind: input, shape index: {}]   ;;  %s13114_s4 = inlined_call_operand.vmem [shape: f32[9,128,128], index: 4, kind: input, shape index: {}]   ;;  %s13115_s5 = inlined_call_operand.vmem [shape: f32[1,128], index: 5, kind: input, shape index: {}]   ;;  %s13116_s6 = inlined_call_operand.vmem [shape: f32[2,16,16,128], index: 6, kind: output, shape index: {0}]   ;;  %s13117_s7 = inlined_call_operand.vmem [shape: f32[2,1,128], index: 7, kind: output, shape index: {1}]   ;;  %s13118_s8 = inlined_call_operand.vmem [shape: f32[2,1,128], index: 8, kind: output, shape index: {2}]  }
   0x1 LB: > { %s6774_s28 = sadd.s32 4294967295, %s10837_s27   ;;  %p6778_p0 = scmp.ge.s32.totalorder %s10837_s27, 1  ;;  %s10837_s27 = sphi %s10885_s27, %s19_s27  }
   0x2   : > { %p277_p1 = scmp.lt.s32.totalorder %s10837_s27, 3 }
   0x4   : > { %p278_p2 = pnand %p6778_p0, %p277_p1 }
   0x6   : > { %281 = sbr.rel (%p278_p2) target bundleno = 1580 (0x62c), region = 44 }
   0xd   : > { %v6783_v0 = vld [vmem:[%s13112_s2 + $0x80] sm:$0xff]  ;;  %v6784_v1 = vld [vmem:[%s13112_s2 + $0x88] sm:$0xff]  ;;  %v6785_v2 = vld [vmem:[%s13112_s2 + $0x90] sm:$0xff]  ;;  %p322_p3 = scmp.lt.s32.totalorder %s6774_s28, 1 }
   0xe   : > { %v9732_v3 = vpack.c.bf16 %v6784_v1, %v6783_v0  ;;  %v6786_v4 = vld [vmem:[%s13112_s2 + $0x98] sm:$0xff]  ;;  %v6787_v6 = vld [vmem:[%s13112_s2 + $0xa0] sm:$0xff]  ;;  %v6788_v7 = vld [vmem:[%s13112_s2 + $0xa8] sm:$0xff] }
   0xf   : > { %v9736_v5 = vpack.c.bf16 %v6786_v4, %v6785_v2  ;;  %s13246_s28 = smov (!%p322_p3, %s6774_s28), 1  ;;  %v9740_v8 = vpack.c.bf16 %v6788_v7, %v6787_v6  ;;  %v6789_v9 = vld [vmem:[%s13112_s2 + $0xb0] sm:$0xff]  ;;  %v6790_v10 = vld [vmem:[%s13112_s2 + $0xb8] sm:$0xff]  ;;  %v6791_v15 = vld [vmem:[%s13112_s2 + $0xc0] sm:$0xff] }
  0x10   : > { %9733 = vmatprep.subr.bf16.mxu0 %v9732_v3  ;;  %s10820_s19 = smul.u32 432, %s13246_s28  ;;  %v9744_v14 = vpack.c.bf16 %v6790_v10, %v6789_v9  ;;  %v6792_v16 = vld [vmem:[%s13112_s2 + $0xc8] sm:$0xff]  ;;  %v6793_v18 = vld [vmem:[%s13112_s2 + $0xd0] sm:$0xff]  ;;  %v6794_v19 = vld [vmem:[%s13112_s2 + $0xd8] sm:$0xff]  ;;  %s7427_s24 = sshll.u32 %s13246_s28, 8 }
  0x11   : > { %9735 = vmatpush3.bf16.msra.mxu0 %v9732_v3  ;;  %v9748_v17 = vpack.c.bf16 %v6792_v16, %v6791_v15  ;;  %v9752_v20 = vpack.c.bf16 %v6794_v19, %v6793_v18  ;;  %v6795_v21 = vld [vmem:[%s13112_s2 + $0xe0] sm:$0xff]  ;;  %v6796_v22 = vld [vmem:[%s13112_s2 + $0xe8] sm:$0xff]  ;;  %v6797_v24 = vld [vmem:[%s13112_s2 + $0xf0] sm:$0xff]  ;;  %s13034_s30 = scalar_lea.vmem %s13116_s6, %s7427_s24  ;;  %s339_s12 = scalar_lea.vmem %s13117_s7, %s13246_s28 }
  0x12   : > { %9737 = vmatprep.subr.bf16.mxu0 %v9736_v5  ;;  %s10923_s26 = scalar_lea.vmem %s13110_s0, %s10820_s19  ;;  %s10928_s9 = scalar_lea.vmem %s13111_s1, %s10820_s19  ;;  %v9756_v23 = vpack.c.bf16 %v6796_v22, %v6795_v21  ;;  %v6798_v25 = vld [vmem:[%s13112_s2 + $0xf8] sm:$0xff]  ;;  %v439_v27 = vld [vmem:[%s13112_s2] sm:$0xff]  ;;  %v440_v28 = vld [vmem:[%s13112_s2 + $0x8] sm:$0xff] }
  0x13   : > { %v455_v11 = vld [vmem:[%s10923_s26 + $0x1] sm:$0xff]  ;;  %v9760_v26 = vpack.c.bf16 %v6798_v25, %v6797_v24  ;;  %v456_v29 = vld [vmem:[%s10923_s26 + $0x9] sm:$0xff]  ;;  %v9764_v31 = vpack.c.bf16 %v440_v28, %v439_v27  ;;  %v457_v32 = vld [vmem:[%s10923_s26 + $0x19] sm:$0xff]  ;;  %s342_s15 = scalar_lea.vmem %s13118_s8, %s13246_s28 }
  0x14   : > { %v487_v12 = vld [vmem:[%s10928_s9 + $0x1] sm:$0xff]  ;;  %v488_v30 = vld [vmem:[%s10928_s9 + $0x9] sm:$0xff]  ;;  %v489_v33 = vld [vmem:[%s10928_s9 + $0x19] sm:$0xff] }
  0x15   : > { %9739 = vmatpush3.bf16.msra.mxu0 %v9736_v5  ;;  %v519_v13 = vmul.f32 %v487_v12, %v455_v11  ;;  %v441_v34 = vld [vmem:[%s13112_s2 + $0x10] sm:$0xff]  ;;  %v442_v35 = vld [vmem:[%s13112_s2 + $0x18] sm:$0xff]  ;;  %v520_v36 = vmul.f32 %v488_v30, %v456_v29  ;;  %v521_v37 = vmul.f32 %v489_v33, %v457_v32  ;;  %v458_v38 = vld [vmem:[%s10923_s26 + $0x21] sm:$0xff] }
  0x16   : > { %9741 = vmatprep.subr.bf16.mxu0 %v9740_v8  ;;  %v490_v39 = vld [vmem:[%s10928_s9 + $0x21] sm:$0xff]  ;;  %v459_v40 = vld [vmem:[%s10923_s26 + $0x31] sm:$0xff]  ;;  %v9768_v42 = vpack.c.bf16 %v442_v35, %v441_v34  ;;  %v460_v47 = vld [vmem:[%s10923_s26 + $0x39] sm:$0xff] }
  0x17   : > { %8324 = vmatprep.mubr.f32.mxu0 %v519_v13  ;;  %v491_v41 = vld [vmem:[%s10928_s9 + $0x31] sm:$0xff]  ;;  %v443_v43 = vld [vmem:[%s13112_s2 + $0x20] sm:$0xff]  ;;  %v444_v44 = vld [vmem:[%s13112_s2 + $0x28] sm:$0xff]  ;;  %v522_v45 = vmul.f32 %v490_v39, %v458_v38 }
  0x18   : > { %v523_v46 = vmul.f32 %v491_v41, %v459_v40  ;;  %v492_v48 = vld [vmem:[%s10928_s9 + $0x39] sm:$0xff]  ;;  %v461_v49 = vld [vmem:[%s10923_s26 + $0x49] sm:$0xff]  ;;  %v9772_v51 = vpack.c.bf16 %v444_v44, %v443_v43  ;;  %v462_v56 = vld [vmem:[%s10923_s26 + $0x51] sm:$0xff] }
  0x19   : > { %9743 = vmatpush3.bf16.msra.mxu0 %v9740_v8  ;;  %v493_v50 = vld [vmem:[%s10928_s9 + $0x49] sm:$0xff]  ;;  %v446_v53 = vld [vmem:[%s13112_s2 + $0x38] sm:$0xff]  ;;  %v524_v54 = vmul.f32 %v492_v48, %v460_v47  ;;  %v463_v58 = vld [vmem:[%s10923_s26 + $0x61] sm:$0xff] }
  0x1a   : > { %9745 = vmatprep.subr.bf16.mxu0 %v9744_v14  ;;  %v445_v52 = vld [vmem:[%s13112_s2 + $0x30] sm:$0xff]  ;;  %v525_v55 = vmul.f32 %v493_v50, %v461_v49  ;;  %v495_v59 = vld [vmem:[%s10928_s9 + $0x61] sm:$0xff]  ;;  %v465_v3 = vld [vmem:[%s10923_s26 + $0x79] sm:$0xff] }
  0x1b   : > { %v494_v57 = vld [vmem:[%s10928_s9 + $0x51] sm:$0xff]  ;;  %v9776_v60 = vpack.c.bf16 %v446_v53, %v445_v52  ;;  %v447_v61 = vld [vmem:[%s13112_s2 + $0x40] sm:$0xff]  ;;  %v448_v62 = vld [vmem:[%s13112_s2 + $0x48] sm:$0xff]  ;;  %v527_v0 = vmul.f32 %v495_v59, %v463_v58 }
  0x1c   : > { %v526_v63 = vmul.f32 %v494_v57, %v462_v56  ;;  %v464_v1 = vld [vmem:[%s10923_s26 + $0x69] sm:$0xff]  ;;  %v497_v4 = vld [vmem:[%s10928_s9 + $0x79] sm:$0xff]  ;;  %v9780_v5 = vpack.c.bf16 %v448_v62, %v447_v61  ;;  %v466_v10 = vld [vmem:[%s10923_s26 + $0x81] sm:$0xff] }
  0x1d   : > { %9747 = vmatpush3.bf16.msra.mxu0 %v9744_v14  ;;  %v496_v2 = vld [vmem:[%s10928_s9 + $0x69] sm:$0xff]  ;;  %v450_v7 = vld [vmem:[%s13112_s2 + $0x58] sm:$0xff]  ;;  %v529_v9 = vmul.f32 %v497_v4, %v465_v3  ;;  %v498_v11 = vld [vmem:[%s10928_s9 + $0x81] sm:$0xff] }
  0x1e   : > { %9749 = vmatprep.subr.bf16.mxu0 %v9748_v17  ;;  %v449_v6 = vld [vmem:[%s13112_s2 + $0x50] sm:$0xff]  ;;  %v528_v8 = vmul.f32 %v496_v2, %v464_v1  ;;  %v451_v15 = vld [vmem:[%s13112_s2 + $0x60] sm:$0xff]  ;;  %v452_v16 = vld [vmem:[%s13112_s2 + $0x68] sm:$0xff] }
  0x1f   : > { %v467_v12 = vld [vmem:[%s10923_s26 + $0x91] sm:$0xff]  ;;  %v9784_v14 = vpack.c.bf16 %v450_v7, %v449_v6  ;;  %v468_v19 = vld [vmem:[%s10923_s26 + $0x99] sm:$0xff]  ;;  %v469_v21 = vld [vmem:[%s10923_s26 + $0xa9] sm:$0xff] }
  0x20   : > { %v499_v13 = vld [vmem:[%s10928_s9 + $0x91] sm:$0xff]  ;;  %v501_v22 = vld [vmem:[%s10928_s9 + $0xa9] sm:$0xff]  ;;  %v471_v30 = vld [vmem:[%s10923_s26 + $0xc1] sm:$0xff] }
  0x21   : > { %9751 = vmatpush3.bf16.msra.mxu0 %v9748_v17  ;;  %v530_v17 = vmul.f32 %v498_v11, %v466_v10  ;;  %v531_v18 = vmul.f32 %v499_v13, %v467_v12  ;;  %v453_v24 = vld [vmem:[%s13112_s2 + $0x70] sm:$0xff]  ;;  %v454_v25 = vld [vmem:[%s13112_s2 + $0x78] sm:$0xff]  ;;  %v533_v27 = vmul.f32 %v501_v22, %v469_v21  ;;  %v6799_v33 = vld [vmem:[%s13112_s2 + $0x100] sm:$0xff] }
  0x22   : > { %9753 = vmatprep.subr.bf16.mxu0 %v9752_v20  ;;  %v470_v28 = vld [vmem:[%s10923_s26 + $0xb1] sm:$0xff]  ;;  %v9792_v32 = vpack.c.bf16 %v454_v25, %v453_v24  ;;  %v6800_v34 = vld [vmem:[%s13112_s2 + $0x108] sm:$0xff]  ;;  %v473_v39 = vld [vmem:[%s10923_s26 + $0xd9] sm:$0xff] }
  0x23   : > { %v502_v29 = vld [vmem:[%s10928_s9 + $0xb1] sm:$0xff]  ;;  %v504_v38 = vld [vmem:[%s10928_s9 + $0xc9] sm:$0xff]  ;;  %v505_v40 = vld [vmem:[%s10928_s9 + $0xd9] sm:$0xff]  ;;  %v11046_v41 = vpack.c.bf16 %v6800_v34, %v6799_v33 }
  0x24   : > { %v534_v35 = vmul.f32 %v502_v29, %v470_v28  ;;  %v537_v43 = vmul.f32 %v505_v40, %v473_v39  ;;  %v474_v44 = vld [vmem:[%s10923_s26 + $0xe1] sm:$0xff]  ;;  %v507_v47 = vld [vmem:[%s10928_s9 + $0xf1] sm:$0xff]  ;;  %v476_v50 = vld [vmem:[%s10923_s26 + $0xf9] sm:$0xff] }
  0x25   : > { %9755 = vmatpush3.bf16.msra.mxu0 %v9752_v20  ;;  %v500_v20 = vld [vmem:[%s10928_s9 + $0x99] sm:$0xff]  ;;  %v477_v52 = vld [vmem:[%s10923_s26 + $0x109] sm:$0xff]  ;;  %v478_v56 = vld [vmem:[%s10923_s26 + $0x111] sm:$0xff] }
  0x26   : > { %9757 = vmatprep.subr.bf16.mxu0 %v9756_v23  ;;  %v509_v53 = vld [vmem:[%s10928_s9 + $0x109] sm:$0xff]  ;;  %v510_v57 = vld [vmem:[%s10928_s9 + $0x111] sm:$0xff]  ;;  %v479_v58 = vld [vmem:[%s10923_s26 + $0x121] sm:$0xff] }
  0x27   : > { %v511_v59 = vld [vmem:[%s10928_s9 + $0x121] sm:$0xff]  ;;  %v480_v62 = vld [vmem:[%s10923_s26 + $0x129] sm:$0xff]  ;;  %v513_v1 = vld [vmem:[%s10928_s9 + $0x139] sm:$0xff] }
  0x28   : > { %v543_v61 = vmul.f32 %v511_v59, %v479_v58  ;;  %v482_v4 = vld [vmem:[%s10923_s26 + $0x141] sm:$0xff]  ;;  %v483_v6 = vld [vmem:[%s10923_s26 + $0x151] sm:$0xff]  ;;  %v484_v10 = vld [vmem:[%s10923_s26 + $0x159] sm:$0xff] }
  0x29   : > { %9759 = vmatpush3.bf16.msra.mxu0 %v9756_v23  ;;  %v9788_v23 = vpack.c.bf16 %v452_v16, %v451_v15  ;;  %v515_v7 = vld [vmem:[%s10928_s9 + $0x151] sm:$0xff]  ;;  %v516_v11 = vld [vmem:[%s10928_s9 + $0x159] sm:$0xff]  ;;  %v485_v12 = vld [vmem:[%s10923_s26 + $0x169] sm:$0xff] }
  0x2a   : > { %9761 = vmatprep.subr.bf16.mxu0 %v9760_v26  ;;  %v517_v13 = vld [vmem:[%s10928_s9 + $0x169] sm:$0xff]  ;;  %v486_v16 = vld [vmem:[%s10923_s26 + $0x171] sm:$0xff] }
  0x2b   : > { %v549_v15 = vmul.f32 %v517_v13, %v485_v12  ;;  %v344_v22 = vld [vmem:[%s10923_s26 + $0x8] sm:$0xff]  ;;  %v345_v24 = vld [vmem:[%s10923_s26 + $0x18] sm:$0xff]  ;;  %v379_v33 = vld [vmem:[%s10928_s9 + $0x30] sm:$0xff] }
  0x2c   : > { %v377_v25 = vld [vmem:[%s10928_s9 + $0x18] sm:$0xff]  ;;  %v384_v58 = vld [vmem:[%s10928_s9 + $0x68] sm:$0xff] }
  0x2d   : > { %9763 = vmatpush3.bf16.msra.mxu0 %v9760_v26  ;;  %v532_v26 = vmul.f32 %v500_v20, %v468_v19  ;;  %v375_v19 = vld [vmem:[%s10928_s9] sm:$0xff]  ;;  %v11087_v29 = vmul.f32 %v377_v25, %v345_v24  ;;  %v348_v39 = vld [vmem:[%s10923_s26 + $0x38] sm:$0xff]  ;;  %v357_v13 = vld [vmem:[%s10923_s26 + $0xa8] sm:$0xff] }
  0x2e   : > { %9765 = vmatprep.subr.bf16.mxu0 %v9764_v31  ;;  %v380_v40 = vld [vmem:[%s10928_s9 + $0x38] sm:$0xff]  ;;  %v6879_v25 = vld [vmem:[%s13112_s2 + $0x180] sm:$0xff] }
  0x2f   : > { %v353_v59 = vld [vmem:[%s10923_s26 + $0x78] sm:$0xff] }
  0x30   : > { %8325 = vmatmul.mubr.f32.vlgmr.msra.gmra.mrb[0].mxu0 %v520_v36  ;;  %v388_v12 = vld [vmem:[%s10928_s9 + $0x98] sm:$0xff] }
  0x31   : > { %9767 = vmatpush3.bf16.msra.mxu0 %v9764_v31  ;;  %8327 = vmatprep.mubr.f32.mxu0 %v521_v37  ;;  %v503_v31 = vld [vmem:[%s10928_s9 + $0xc1] sm:$0xff]  ;;  %v472_v37 = vld [vmem:[%s10923_s26 + $0xc9] sm:$0xff] }
  0x32   : > { %9769 = vmatprep.subr.bf16.mxu0 %v9768_v42  ;;  %v535_v36 = vmul.f32 %v503_v31, %v471_v30  ;;  %v346_v30 = vld [vmem:[%s10923_s26 + $0x20] sm:$0xff] }
  0x33   : > { %v378_v31 = vld [vmem:[%s10928_s9 + $0x20] sm:$0xff] }
  0x34   : > { %8328 = vmatmul.mubr.f32.gmra.mrb[2].mxu0 %v522_v45  ;;  %v506_v45 = vld [vmem:[%s10928_s9 + $0xe1] sm:$0xff] }
  0x35   : > { %8330 = vmatprep.mubr.f32.mxu0 %v523_v46  ;;  %9771 = vmatpush3.bf16.msra.mxu0 %v9768_v42  ;;  %v536_v42 = vmul.f32 %v504_v38, %v472_v37  ;;  %v475_v46 = vld [vmem:[%s10923_s26 + $0xf1] sm:$0xff]  ;;  %v538_v48 = vmul.f32 %v506_v45, %v474_v44  ;;  %v11099_v37 = vmul.f32 %v378_v31, %v346_v30  ;;  %v360_v30 = vld [vmem:[%s10923_s26 + $0xc8] sm:$0xff] }
  0x36   : > { %9773 = vmatprep.subr.bf16.mxu0 %v9772_v51  ;;  %v539_v49 = vmul.f32 %v507_v47, %v475_v46  ;;  %v6805_v45 = vld [vmem:[%s13112_s2 + $0x130] sm:$0xff]  ;;  %v11116_v46 = vmul.f32 %v380_v40, %v348_v39  ;;  %v392_v31 = vld [vmem:[%s10928_s9 + $0xc8] sm:$0xff]  ;;  %v362_v39 = vld [vmem:[%s10923_s26 + $0xe0] sm:$0xff] }
  0x37   : > { %v394_v40 = vld [vmem:[%s10928_s9 + $0xe0] sm:$0xff] }
  0x38   : > { %8331 = vmatmul.mubr.f32.gmra.mrb[4].mxu0 %v524_v54 }
  0x39   : > { %8333 = vmatprep.mubr.f32.mxu0 %v525_v55  ;;  %9775 = vmatpush3.bf16.msra.mxu0 %v9772_v51  ;;  %v508_v51 = vld [vmem:[%s10928_s9 + $0xf9] sm:$0xff]  ;;  %v541_v55 = vmul.f32 %v509_v53, %v477_v52 }
  0x3a   : > { %9777 = vmatprep.subr.bf16.mxu0 %v9776_v60  ;;  %v540_v54 = vmul.f32 %v508_v51, %v476_v50  ;;  %v351_v50 = vld [vmem:[%s10923_s26 + $0x60] sm:$0xff] }
  0x3b   : > { %v383_v51 = vld [vmem:[%s10928_s9 + $0x60] sm:$0xff] }
  0x3c   : > { %8334 = vmatmul.mubr.f32.gmra.mrb[6].mxu0 %v526_v63  ;;  %v512_v63 = vld [vmem:[%s10928_s9 + $0x129] sm:$0xff]  ;;  %v6807_v53 = vld [vmem:[%s13112_s2 + $0x140] sm:$0xff] }
  0x3d   : > { %8336 = vmatprep.mubr.f32.mxu0 %v527_v0  ;;  %9779 = vmatpush3.bf16.msra.mxu0 %v9776_v60  ;;  %v542_v60 = vmul.f32 %v510_v57, %v478_v56  ;;  %v481_v0 = vld [vmem:[%s10923_s26 + $0x139] sm:$0xff]  ;;  %v544_v2 = vmul.f32 %v512_v63, %v480_v62  ;;  %v11135_v56 = vmul.f32 %v383_v51, %v351_v50  ;;  %v352_v57 = vld [vmem:[%s10923_s26 + $0x68] sm:$0xff]  ;;  %v6809_v62 = vld [vmem:[%s13112_s2 + $0x150] sm:$0xff] }
  0x3e   : > { %9781 = vmatprep.subr.bf16.mxu0 %v9780_v5  ;;  %v545_v3 = vmul.f32 %v513_v1, %v481_v0  ;;  %v6810_v63 = vld [vmem:[%s13112_s2 + $0x158] sm:$0xff]  ;;  %v11148_v0 = vmul.f32 %v384_v58, %v352_v57  ;;  %v397_v50 = vld [vmem:[%s10928_s9 + $0x108] sm:$0xff]  ;;  %v367_v57 = vld [vmem:[%s10923_s26 + $0x120] sm:$0xff] }
  0x3f   : > { %v399_v58 = vld [vmem:[%s10928_s9 + $0x120] sm:$0xff] }
  0x40   : > { %8337 = vmatmul.mubr.f32.gmra.mrb[8].mxu0 %v528_v8 }
  0x41   : > { %8339 = vmatprep.mubr.f32.mxu0 %v529_v9  ;;  %9783 = vmatpush3.bf16.msra.mxu0 %v9780_v5  ;;  %v514_v5 = vld [vmem:[%s10928_s9 + $0x141] sm:$0xff]  ;;  %v547_v9 = vmul.f32 %v515_v7, %v483_v6  ;;  %v9816_v6 = vpack.c.bf16 %v6810_v63, %v6809_v62  ;;  %v369_v63 = vld [vmem:[%s10923_s26 + $0x138] sm:$0xff] }
  0x42   : > { %9785 = vmatprep.subr.bf16.mxu0 %v9784_v14  ;;  %v546_v8 = vmul.f32 %v514_v5, %v482_v4  ;;  %v355_v4 = vld [vmem:[%s10923_s26 + $0x90] sm:$0xff]  ;;  %v6811_v7 = vld [vmem:[%s13112_s2 + $0x160] sm:$0xff]  ;;  %v400_v62 = vld [vmem:[%s10928_s9 + $0x128] sm:$0xff] }
  0x43   : > { %v387_v5 = vld [vmem:[%s10928_s9 + $0x90] sm:$0xff] }
  0x44   : > { %8340 = vmatmul.mubr.f32.gmra.mrb[10].mxu0 %v530_v17  ;;  %v518_v17 = vld [vmem:[%s10928_s9 + $0x171] sm:$0xff] }
  0x45   : > { %8342 = vmatprep.mubr.f32.mxu0 %v531_v18  ;;  %9787 = vmatpush3.bf16.msra.mxu0 %v9784_v14  ;;  %v548_v14 = vmul.f32 %v516_v11, %v484_v10  ;;  %v343_v18 = vld [vmem:[%s10923_s26] sm:$0xff]  ;;  %v550_v20 = vmul.f32 %v518_v17, %v486_v16  ;;  %v11167_v10 = vmul.f32 %v387_v5, %v355_v4  ;;  %v356_v11 = vld [vmem:[%s10923_s26 + $0x98] sm:$0xff]  ;;  %v6813_v16 = vld [vmem:[%s13112_s2 + $0x170] sm:$0xff] }
  0x46   : > { %9789 = vmatprep.subr.bf16.mxu0 %v9788_v23  ;;  %v407_v21 = vmul.f32 %v375_v19, %v343_v18  ;;  %v6814_v17 = vld [vmem:[%s13112_s2 + $0x178] sm:$0xff]  ;;  %v11180_v18 = vmul.f32 %v388_v12, %v356_v11  ;;  %v370_v5 = vld [vmem:[%s10923_s26 + $0x140] sm:$0xff] }
  0x47   : > { %v9824_v24 = vpack.c.bf16 %v6814_v17, %v6813_v16  ;;  %v405_v16 = vld [vmem:[%s10928_s9 + $0x168] sm:$0xff] }
  0x48   : > { %8343 = vmatmul.mubr.f32.gmra.mrb[12].mxu0 %v532_v26  ;;  %v6801_v26 = vld [vmem:[%s13112_s2 + $0x110] sm:$0xff] }
  0x49   : > { %8345 = vmatprep.mubr.f32.mxu0 %v533_v27  ;;  %9791 = vmatpush3.bf16.msra.mxu0 %v9788_v23  ;;  %v376_v23 = vld [vmem:[%s10928_s9 + $0x8] sm:$0xff]  ;;  %v6802_v27 = vld [vmem:[%s13112_s2 + $0x118] sm:$0xff] }
  0x4a   : > { %9793 = vmatprep.subr.bf16.mxu0 %v9792_v32  ;;  %v408_v28 = vmul.f32 %v376_v23, %v344_v22  ;;  %v9800_v34 = vpack.c.bf16 %v6802_v27, %v6801_v26  ;;  %v359_v22 = vld [vmem:[%s10923_s26 + $0xc0] sm:$0xff]  ;;  %v6880_v26 = vld [vmem:[%s13112_s2 + $0x188] sm:$0xff] }
  0x4b   : > { %v391_v23 = vld [vmem:[%s10928_s9 + $0xc0] sm:$0xff] }
  0x4c   : > { %8346 = vmatmul.mubr.f32.gmra.mrb[14].mxu0 %v534_v35  ;;  %v6803_v35 = vld [vmem:[%s13112_s2 + $0x120] sm:$0xff] }
  0x4d   : > { %8348 = vmatprep.mubr.f32.mxu0 %v535_v36  ;;  %9795 = vmatpush3.bf16.msra.mxu0 %v9792_v32  ;;  %v347_v32 = vld [vmem:[%s10923_s26 + $0x30] sm:$0xff]  ;;  %v6804_v36 = vld [vmem:[%s13112_s2 + $0x128] sm:$0xff] }
  0x4e   : > { %9797 = vmatprep.subr.bf16.mxu0 %v11046_v41  ;;  %v11103_v38 = vmul.f32 %v379_v33, %v347_v32  ;;  %v9804_v44 = vpack.c.bf16 %v6804_v36, %v6803_v35  ;;  %v361_v32 = vld [vmem:[%s10923_s26 + $0xd8] sm:$0xff]  ;;  %v11208_v35 = vmul.f32 %v392_v31, %v360_v30  ;;  %v1019_v30 = vld [vmem:[%s10923_s26 + $0xa] sm:$0xff] }
  0x4f   : > { %v393_v33 = vld [vmem:[%s10928_s9 + $0xd8] sm:$0xff]  ;;  %v1051_v31 = vld [vmem:[%s10928_s9 + $0xa] sm:$0xff] }
  0x50   : > { %8349 = vmatmul.mubr.f32.gmra.mrb[16].mxu0 %v536_v42  ;;  %v349_v42 = vld [vmem:[%s10923_s26 + $0x48] sm:$0xff]  ;;  %v11211_v36 = vmul.f32 %v393_v33, %v361_v32  ;;  %v1020_v32 = vld [vmem:[%s10923_s26 + $0x1a] sm:$0xff] }
  0x51   : > { %8351 = vmatprep.mubr.f32.mxu0 %v537_v43  ;;  %v381_v43 = vld [vmem:[%s10928_s9 + $0x48] sm:$0xff]  ;;  %v1052_v33 = vld [vmem:[%s10928_s9 + $0x1a] sm:$0xff] }
  0x52   : > { %v11119_v47 = vmul.f32 %v381_v43, %v349_v42  ;;  %v363_v42 = vld [vmem:[%s10923_s26 + $0xf0] sm:$0xff] }
  0x53   : > { %v395_v43 = vld [vmem:[%s10928_s9 + $0xf0] sm:$0xff] }
  0x54   : > { %8352 = vmatmul.mubr.f32.gmra.mrb[18].mxu0 %v538_v48  ;;  %v350_v48 = vld [vmem:[%s10923_s26 + $0x50] sm:$0xff] }
  0x55   : > { %8354 = vmatprep.mubr.f32.mxu0 %v539_v49  ;;  %v382_v49 = vld [vmem:[%s10928_s9 + $0x50] sm:$0xff] }
  0x58   : > { %8355 = vmatmul.mubr.f32.gmra.mrb[20].mxu0 %v540_v54  ;;  %v6808_v54 = vld [vmem:[%s13112_s2 + $0x148] sm:$0xff] }
  0x59   : > { %8357 = vmatprep.mubr.f32.mxu0 %v541_v55  ;;  %v11132_v55 = vmul.f32 %v382_v49, %v350_v48  ;;  %v396_v48 = vld [vmem:[%s10928_s9 + $0xf8] sm:$0xff]  ;;  %v365_v49 = vld [vmem:[%s10923_s26 + $0x108] sm:$0xff] }
  0x5c   : > { %8358 = vmatmul.mubr.f32.gmra.mrb[22].mxu0 %v542_v60  ;;  %v385_v60 = vld [vmem:[%s10928_s9 + $0x78] sm:$0xff] }
  0x5d   : > { %8360 = vmatprep.mubr.f32.mxu0 %v543_v61  ;;  %v9812_v61 = vpack.c.bf16 %v6808_v54, %v6807_v53  ;;  %v11151_v1 = vmul.f32 %v385_v60, %v353_v59  ;;  %v366_v53 = vld [vmem:[%s10923_s26 + $0x110] sm:$0xff]  ;;  %v11242_v60 = vmul.f32 %v399_v58, %v367_v57  ;;  %v6884_v57 = vld [vmem:[%s13112_s2 + $0x1a8] sm:$0xff] }
  0x5e   : > { %v398_v54 = vld [vmem:[%s10928_s9 + $0x110] sm:$0xff] }
  0x5f   : > { %v11239_v59 = vmul.f32 %v398_v54, %v366_v53  ;;  %v6883_v54 = vld [vmem:[%s13112_s2 + $0x1a0] sm:$0xff] }
  0x60   : > { %8361 = vmatmul.mubr.f32.gmra.mrb[24].mxu0 %v544_v2  ;;  %v354_v2 = vld [vmem:[%s10923_s26 + $0x80] sm:$0xff] }
  0x61   : > { %8363 = vmatprep.mubr.f32.mxu0 %v545_v3  ;;  %v386_v3 = vld [vmem:[%s10928_s9 + $0x80] sm:$0xff] }
  0x64   : > { %8364 = vmatmul.mubr.f32.gmra.mrb[26].mxu0 %v546_v8  ;;  %v6812_v8 = vld [vmem:[%s13112_s2 + $0x168] sm:$0xff] }
  0x65   : > { %8366 = vmatprep.mubr.f32.mxu0 %v547_v9  ;;  %v11164_v9 = vmul.f32 %v386_v3, %v354_v2  ;;  %v401_v2 = vld [vmem:[%s10928_s9 + $0x138] sm:$0xff] }
  0x66   : > { %v11252_v4 = vmul.f32 %v401_v2, %v369_v63  ;;  %v1055_v63 = vld [vmem:[%s10928_s9 + $0x3a] sm:$0xff]  ;;  %v1024_v2 = vld [vmem:[%s10923_s26 + $0x4a] sm:$0xff] }
  0x68   : > { %8367 = vmatmul.mubr.f32.gmra.mrb[28].mxu0 %v548_v14  ;;  %v389_v14 = vld [vmem:[%s10928_s9 + $0xa8] sm:$0xff] }
  0x69   : > { %8369 = vmatprep.mubr.f32.mxu0 %v549_v15  ;;  %v9820_v15 = vpack.c.bf16 %v6812_v8, %v6811_v7  ;;  %v11183_v19 = vmul.f32 %v389_v14, %v357_v13  ;;  %v371_v7 = vld [vmem:[%s10923_s26 + $0x150] sm:$0xff]  ;;  %v372_v13 = vld [vmem:[%s10923_s26 + $0x158] sm:$0xff] }
  0x6a   : > { %v403_v8 = vld [vmem:[%s10928_s9 + $0x150] sm:$0xff]  ;;  %v404_v14 = vld [vmem:[%s10928_s9 + $0x158] sm:$0xff] }
  0x6b   : > { %v11262_v12 = vmul.f32 %v403_v8, %v371_v7  ;;  %v11269_v17 = vmul.f32 %v404_v14, %v372_v13  ;;  %v6885_v7 = vld [vmem:[%s13112_s2 + $0x1b0] sm:$0xff] }
  0x6c   : > { %8370 = vmatmul.mubr.f32.gmra.mrb[30].mxu0 %v550_v20  ;;  %v358_v20 = vld [vmem:[%s10923_s26 + $0xb0] sm:$0xff] }
  0x6d   : > { %8404 = vmatprep.mubr.f32.mxu0 %v407_v21  ;;  %v390_v21 = vld [vmem:[%s10928_s9 + $0xb0] sm:$0xff] }
  0x6e   : > { %v11196_v27 = vmul.f32 %v390_v21, %v358_v20  ;;  %v374_v21 = vld [vmem:[%s10923_s26 + $0x170] sm:$0xff] }
  0x6f   : > { %v1025_v14 = vld [vmem:[%s10923_s26 + $0x52] sm:$0xff] }
  0x70   : > { %8405 = vmatmul.mubr.f32.vlgmr.msra.gmra.mrb[0].mxu0 %v408_v28  ;;  %v11199_v28 = vmul.f32 %v391_v23, %v359_v22  ;;  %v406_v22 = vld [vmem:[%s10928_s9 + $0x170] sm:$0xff]  ;;  %v1018_v23 = vld [vmem:[%s10923_s26 + $0x2] sm:$0xff] }
  0x71   : > { %9799 = vmatpush3.bf16.msra.mxu0 %v11046_v41  ;;  %8407 = vmatprep.mubr.f32.mxu0 %v11087_v29  ;;  %v6806_v41 = vld [vmem:[%s13112_s2 + $0x138] sm:$0xff] }
  0x72   : > { %9801 = vmatprep.subr.bf16.mxu0 %v9800_v34  ;;  %v9808_v52 = vpack.c.bf16 %v6806_v41, %v6805_v45  ;;  %v11222_v45 = vmul.f32 %v395_v43, %v363_v42  ;;  %v364_v41 = vld [vmem:[%s10923_s26 + $0xf8] sm:$0xff]  ;;  %v1083_v42 = vmul.f32 %v1051_v31, %v1019_v30  ;;  %v11293_v43 = vmul.f32 %v1052_v33, %v1020_v32  ;;  %v1027_v31 = vld [vmem:[%s10923_s26 + $0x6a] sm:$0xff] }
  0x73   : > { %v11229_v51 = vmul.f32 %v396_v48, %v364_v41  ;;  %v1021_v41 = vld [vmem:[%s10923_s26 + $0x22] sm:$0xff]  ;;  %v1059_v32 = vld [vmem:[%s10928_s9 + $0x6a] sm:$0xff]  ;;  %v1028_v33 = vld [vmem:[%s10923_s26 + $0x7a] sm:$0xff] }
  0x74   : > { %8408 = vmatmul.mubr.f32.gmra.mrb[2].mxu0 %v11099_v37  ;;  %v1053_v48 = vld [vmem:[%s10928_s9 + $0x22] sm:$0xff] }
  0x75   : > { %8410 = vmatprep.mubr.f32.mxu0 %v11103_v38  ;;  %9803 = vmatpush3.bf16.msra.mxu0 %v9800_v34  ;;  %v11205_v34 = vpack.c.bf16 %v6880_v26, %v6879_v25  ;;  %v11279_v25 = vmul.f32 %v406_v22, %v374_v21  ;;  %v11305_v58 = vmul.f32 %v1053_v48, %v1021_v41  ;;  %v1058_v21 = vld [vmem:[%s10928_s9 + $0x62] sm:$0xff]  ;;  %v6890_v41 = vld [vmem:[%s13112_s2 + $0x1d8] sm:$0xff] }
  0x76   : > { %9805 = vmatprep.subr.bf16.mxu0 %v9804_v44  ;;  %v11354_v48 = vmul.f32 %v1059_v32, %v1027_v31  ;;  %v1033_v31 = vld [vmem:[%s10923_s26 + $0xb2] sm:$0xff] }
  0x77   : > { %v1065_v32 = vld [vmem:[%s10928_s9 + $0xb2] sm:$0xff] }
  0x78   : > { %8411 = vmatmul.mubr.f32.gmra.mrb[4].mxu0 %v11116_v46 }
  0x79   : > { %8413 = vmatprep.mubr.f32.mxu0 %v11119_v47  ;;  %9807 = vmatpush3.bf16.msra.mxu0 %v9804_v44  ;;  %v11219_v44 = vmul.f32 %v394_v40, %v362_v39  ;;  %v6881_v39 = vld [vmem:[%s13112_s2 + $0x190] sm:$0xff]  ;;  %v6882_v40 = vld [vmem:[%s13112_s2 + $0x198] sm:$0xff] }
  0x7a   : > { %9809 = vmatprep.subr.bf16.mxu0 %v9808_v52  ;;  %v9832_v53 = vpack.c.bf16 %v6882_v40, %v6881_v39  ;;  %v1060_v39 = vld [vmem:[%s10928_s9 + $0x7a] sm:$0xff] }
  0x7c   : > { %8414 = vmatmul.mubr.f32.gmra.mrb[6].mxu0 %v11132_v55 }
  0x7d   : > { %8416 = vmatprep.mubr.f32.mxu0 %v11135_v56  ;;  %9811 = vmatpush3.bf16.msra.mxu0 %v9808_v52  ;;  %v11232_v52 = vmul.f32 %v397_v50, %v365_v49  ;;  %v1022_v49 = vld [vmem:[%s10923_s26 + $0x32] sm:$0xff] }
  0x7e   : > { %9813 = vmatprep.subr.bf16.mxu0 %v9812_v61  ;;  %v1054_v50 = vld [vmem:[%s10928_s9 + $0x32] sm:$0xff] }
  0x80   : > { %8417 = vmatmul.mubr.f32.gmra.mrb[8].mxu0 %v11148_v0 }
  0x81   : > { %8419 = vmatprep.mubr.f32.mxu0 %v11151_v1  ;;  %9815 = vmatpush3.bf16.msra.mxu0 %v9812_v61  ;;  %v368_v61 = vld [vmem:[%s10923_s26 + $0x128] sm:$0xff] }
  0x82   : > { %9817 = vmatprep.subr.bf16.mxu0 %v9816_v6  ;;  %v11249_v3 = vmul.f32 %v400_v62, %v368_v61  ;;  %v11309_v61 = vmul.f32 %v1054_v50, %v1022_v49  ;;  %v1023_v62 = vld [vmem:[%s10923_s26 + $0x3a] sm:$0xff]  ;;  %v11357_v49 = vmul.f32 %v1060_v39, %v1028_v33  ;;  %v1029_v50 = vld [vmem:[%s10923_s26 + $0x82] sm:$0xff] }
  0x83   : > { %v11322_v8 = vmul.f32 %v1055_v63, %v1023_v62  ;;  %v6891_v63 = vld [vmem:[%s13112_s2 + $0x1e0] sm:$0xff] }
  0x84   : > { %8420 = vmatmul.mubr.f32.gmra.mrb[10].mxu0 %v11164_v9  ;;  %v1034_v33 = vld [vmem:[%s10923_s26 + $0xc2] sm:$0xff] }
  0x85   : > { %8422 = vmatprep.mubr.f32.mxu0 %v11167_v10  ;;  %9819 = vmatpush3.bf16.msra.mxu0 %v9816_v6  ;;  %v402_v6 = vld [vmem:[%s10928_s9 + $0x140] sm:$0xff] }
  0x86   : > { %9821 = vmatprep.subr.bf16.mxu0 %v9820_v15  ;;  %v11259_v11 = vmul.f32 %v402_v6, %v370_v5  ;;  %v1056_v5 = vld [vmem:[%s10928_s9 + $0x4a] sm:$0xff]  ;;  %v9836_v6 = vpack.c.bf16 %v6884_v57, %v6883_v54  ;;  %v1030_v54 = vld [vmem:[%s10923_s26 + $0x92] sm:$0xff]  ;;  %v1066_v39 = vld [vmem:[%s10928_s9 + $0xc2] sm:$0xff] }
  0x87   : > { %v11325_v13 = vmul.f32 %v1056_v5, %v1024_v2  ;;  %v1062_v57 = vld [vmem:[%s10928_s9 + $0x92] sm:$0xff]  ;;  %v6892_v2 = vld [vmem:[%s13112_s2 + $0x1e8] sm:$0xff] }
  0x88   : > { %8423 = vmatmul.mubr.f32.gmra.mrb[12].mxu0 %v11180_v18 }
  0x89   : > { %8425 = vmatprep.mubr.f32.mxu0 %v11183_v19  ;;  %9823 = vmatpush3.bf16.msra.mxu0 %v9820_v15  ;;  %v373_v15 = vld [vmem:[%s10923_s26 + $0x168] sm:$0xff] }
  0x8a   : > { %9825 = vmatprep.subr.bf16.mxu0 %v9824_v24  ;;  %v11272_v20 = vmul.f32 %v405_v16, %v373_v15  ;;  %v1057_v15 = vld [vmem:[%s10928_s9 + $0x52] sm:$0xff]  ;;  %v1026_v16 = vld [vmem:[%s10923_s26 + $0x62] sm:$0xff] }
  0x8b   : > { %v11341_v30 = vmul.f32 %v1058_v21, %v1026_v16  ;;  %v9852_v16 = vpack.c.bf16 %v6892_v2, %v6891_v63  ;;  %v6893_v21 = vld [vmem:[%s13112_s2 + $0x1f0] sm:$0xff]  ;;  %v1068_v63 = vld [vmem:[%s10928_s9 + $0xda] sm:$0xff] }
  0x8c   : > { %8426 = vmatmul.mubr.f32.gmra.mrb[14].mxu0 %v11196_v27 }
  0x8d   : > { %8428 = vmatprep.mubr.f32.mxu0 %v11199_v28  ;;  %9827 = vmatpush3.bf16.msra.mxu0 %v9824_v24  ;;  %v1050_v24 = vld [vmem:[%s10928_s9 + $0x2] sm:$0xff] }
  0x8e   : > { %9829 = vmatprep.subr.bf16.mxu0 %v11205_v34  ;;  %v1082_v26 = vmul.f32 %v1050_v24, %v1018_v23  ;;  %v6887_v23 = vld [vmem:[%s13112_s2 + $0x1c0] sm:$0xff]  ;;  %v6888_v24 = vld [vmem:[%s13112_s2 + $0x1c8] sm:$0xff] }
  0x8f   : > { %v9844_v40 = vpack.c.bf16 %v6888_v24, %v6887_v23 }
  0x90   : > { %8429 = vmatmul.mubr.f32.gmra.mrb[16].mxu0 %v11208_v35 }
  0x91   : > { %8431 = vmatprep.mubr.f32.mxu0 %v11211_v36 }
  0x94   : > { %8432 = vmatmul.mubr.f32.gmra.mrb[18].mxu0 %v11219_v44 }
  0x95   : > { %8434 = vmatprep.mubr.f32.mxu0 %v11222_v45 }
  0x98   : > { %8435 = vmatmul.mubr.f32.gmra.mrb[20].mxu0 %v11229_v51 }
  0x99   : > { %8437 = vmatprep.mubr.f32.mxu0 %v11232_v52 }
  0x9c   : > { %8438 = vmatmul.mubr.f32.gmra.mrb[22].mxu0 %v11239_v59 }
  0x9d   : > { %8440 = vmatprep.mubr.f32.mxu0 %v11242_v60 }
  0xa0   : > { %8441 = vmatmul.mubr.f32.gmra.mrb[24].mxu0 %v11249_v3 }
  0xa1   : > { %8443 = vmatprep.mubr.f32.mxu0 %v11252_v4 }
  0xa4   : > { %8444 = vmatmul.mubr.f32.gmra.mrb[26].mxu0 %v11259_v11 }
  0xa5   : > { %8446 = vmatprep.mubr.f32.mxu0 %v11262_v12 }
  0xa8   : > { %8447 = vmatmul.mubr.f32.gmra.mrb[28].mxu0 %v11269_v17 }
  0xa9   : > { %8449 = vmatprep.mubr.f32.mxu0 %v11272_v20 }
  0xac   : > { %8450 = vmatmul.mubr.f32.gmra.mrb[30].mxu0 %v11279_v25 }
  0xad   : > { %8484 = vmatprep.mubr.f32.mxu0 %v1082_v26  ;;  %v11338_v26 = vmul.f32 %v1057_v15, %v1025_v14  ;;  %v1032_v14 = vld [vmem:[%s10923_s26 + $0xaa] sm:$0xff] }
  0xae   : > { %v1064_v15 = vld [vmem:[%s10928_s9 + $0xaa] sm:$0xff] }
  0xaf   : > { %v11389_v24 = vmul.f32 %v1064_v15, %v1032_v14  ;;  %v1037_v14 = vld [vmem:[%s10923_s26 + $0xe2] sm:$0xff] }
  0xb0   : > { %8485 = vmatmul.mubr.f32.vlgmr.msra.gmra.mrb[0].mxu0 %v1083_v42  ;;  %v6889_v42 = vld [vmem:[%s13112_s2 + $0x1d0] sm:$0xff]  ;;  %v1069_v15 = vld [vmem:[%s10928_s9 + $0xe2] sm:$0xff] }
  0xb1   : > { %9831 = vmatpush3.bf16.msra.mxu0 %v11205_v34  ;;  %8487 = vmatprep.mubr.f32.mxu0 %v11293_v43  ;;  %v6886_v34 = vld [vmem:[%s13112_s2 + $0x1b8] sm:$0xff]  ;;  %v9848_v62 = vpack.c.bf16 %v6890_v41, %v6889_v42  ;;  %v6959_v42 = vld [vmem:[%s13112_s2 + $0x200] sm:$0xff]  ;;  %v6960_v41 = vld [vmem:[%s13112_s2 + $0x208] sm:$0xff] }
  0xb2   : > { %9833 = vmatprep.subr.bf16.mxu0 %v9832_v53  ;;  %v9840_v22 = vpack.c.bf16 %v6886_v34, %v6885_v7  ;;  %v1031_v7 = vld [vmem:[%s10923_s26 + $0x9a] sm:$0xff]  ;;  %v11411_v2 = vpack.c.bf16 %v6960_v41, %v6959_v42 }
  0xb3   : > { %v1063_v34 = vld [vmem:[%s10928_s9 + $0x9a] sm:$0xff] }
  0xb4   : > { %8488 = vmatmul.mubr.f32.gmra.mrb[2].mxu0 %v11305_v58  ;;  %v11386_v23 = vmul.f32 %v1063_v34, %v1031_v7 }
  0xb5   : > { %8490 = vmatprep.mubr.f32.mxu0 %v11309_v61  ;;  %9835 = vmatpush3.bf16.msra.mxu0 %v9832_v53  ;;  %v1061_v53 = vld [vmem:[%s10928_s9 + $0x82] sm:$0xff] }
  0xb6   : > { %9837 = vmatprep.subr.bf16.mxu0 %v9836_v6  ;;  %v11370_v5 = vmul.f32 %v1061_v53, %v1029_v50  ;;  %v11402_v50 = vmul.f32 %v1065_v32, %v1033_v31  ;;  %v11405_v53 = vmul.f32 %v1066_v39, %v1034_v33  ;;  %v1039_v32 = vld [vmem:[%s10923_s26 + $0xfa] sm:$0xff]  ;;  %v1040_v39 = vld [vmem:[%s10923_s26 + $0x10a] sm:$0xff] }
  0xb7   : > { %v1071_v33 = vld [vmem:[%s10928_s9 + $0xfa] sm:$0xff] }
  0xb8   : > { %8491 = vmatmul.mubr.f32.gmra.mrb[4].mxu0 %v11322_v8  ;;  %v11435_v42 = vmul.f32 %v1071_v33, %v1039_v32  ;;  %v1044_v32 = vld [vmem:[%s10923_s26 + $0x13a] sm:$0xff] }
  0xb9   : > { %8493 = vmatprep.mubr.f32.mxu0 %v11325_v13  ;;  %9839 = vmatpush3.bf16.msra.mxu0 %v9836_v6  ;;  %v11373_v6 = vmul.f32 %v1062_v57, %v1030_v54  ;;  %v1035_v54 = vld [vmem:[%s10923_s26 + $0xca] sm:$0xff]  ;;  %v1076_v33 = vld [vmem:[%s10928_s9 + $0x13a] sm:$0xff] }
  0xba   : > { %9841 = vmatprep.subr.bf16.mxu0 %v9840_v22  ;;  %v1067_v57 = vld [vmem:[%s10928_s9 + $0xca] sm:$0xff]  ;;  %13162 = vst [vmem:[#allocation4_spill] sm:$0xff] %v11435_v42 }
  0xbb   : > { %v11414_v7 = vmul.f32 %v1067_v57, %v1035_v54  ;;  %v1041_v54 = vld [vmem:[%s10923_s26 + $0x112] sm:$0xff] }
  0xbc   : > { %8494 = vmatmul.mubr.f32.gmra.mrb[6].mxu0 %v11338_v26  ;;  %v1073_v57 = vld [vmem:[%s10928_s9 + $0x112] sm:$0xff] }
  0xbd   : > { %8496 = vmatprep.mubr.f32.mxu0 %v11341_v30  ;;  %9843 = vmatpush3.bf16.msra.mxu0 %v9840_v22  ;;  %v6894_v22 = vld [vmem:[%s13112_s2 + $0x1f8] sm:$0xff] }
  0xbe   : > { %9845 = vmatprep.subr.bf16.mxu0 %v9844_v40 }
  0xc0   : > { %8497 = vmatmul.mubr.f32.gmra.mrb[8].mxu0 %v11354_v48 }
  0xc1   : > { %8499 = vmatprep.mubr.f32.mxu0 %v11357_v49  ;;  %9847 = vmatpush3.bf16.msra.mxu0 %v9844_v40  ;;  %v9856_v40 = vpack.c.bf16 %v6894_v22, %v6893_v21  ;;  %v1070_v21 = vld [vmem:[%s10928_s9 + $0xf2] sm:$0xff]  ;;  %v11425_v22 = vmul.f32 %v1069_v15, %v1037_v14  ;;  %v11445_v14 = vmul.f32 %v1073_v57, %v1041_v54  ;;  %v1045_v54 = vld [vmem:[%s10923_s26 + $0x142] sm:$0xff] }
  0xc2   : > { %9849 = vmatprep.subr.bf16.mxu0 %v9848_v62  ;;  %v1077_v57 = vld [vmem:[%s10928_s9 + $0x142] sm:$0xff] }
  0xc3   : > { %13164 = vst [vmem:[#allocation6_spill] sm:$0xff] %v11445_v14 }
  0xc4   : > { %8500 = vmatmul.mubr.f32.gmra.mrb[10].mxu0 %v11370_v5 }
  0xc5   : > { %8502 = vmatprep.mubr.f32.mxu0 %v11373_v6  ;;  %9851 = vmatpush3.bf16.msra.mxu0 %v9848_v62  ;;  %v1036_v62 = vld [vmem:[%s10923_s26 + $0xda] sm:$0xff] }
  0xc6   : > { %9853 = vmatprep.subr.bf16.mxu0 %v9852_v16  ;;  %v11417_v34 = vmul.f32 %v1068_v63, %v1036_v62  ;;  %v1042_v62 = vld [vmem:[%s10923_s26 + $0x122] sm:$0xff] }
  0xc7   : > { %v1074_v63 = vld [vmem:[%s10928_s9 + $0x122] sm:$0xff] }
  0xc8   : > { %8503 = vmatmul.mubr.f32.gmra.mrb[12].mxu0 %v11386_v23  ;;  %v11448_v15 = vmul.f32 %v1074_v63, %v1042_v62  ;;  %v1046_v62 = vld [vmem:[%s10923_s26 + $0x152] sm:$0xff] }
  0xc9   : > { %8505 = vmatprep.mubr.f32.mxu0 %v11389_v24  ;;  %9855 = vmatpush3.bf16.msra.mxu0 %v9852_v16  ;;  %v1038_v16 = vld [vmem:[%s10923_s26 + $0xf2] sm:$0xff] }
  0xca   : > { %9857 = vmatprep.subr.bf16.mxu0 %v9856_v40  ;;  %v11428_v31 = vmul.f32 %v1070_v21, %v1038_v16  ;;  %13165 = vst [vmem:[#allocation7_spill] sm:$0xff] %v11448_v15  ;;  %v1043_v16 = vld [vmem:[%s10923_s26 + $0x12a] sm:$0xff]  ;;  %v1078_v63 = vld [vmem:[%s10928_s9 + $0x152] sm:$0xff] }
  0xcb   : > { %v1075_v21 = vld [vmem:[%s10928_s9 + $0x12a] sm:$0xff] }
  0xcc   : > { %8506 = vmatmul.mubr.f32.gmra.mrb[14].mxu0 %v11402_v50  ;;  %13161 = vst [vmem:[#allocation3_spill] sm:$0xff] %v11428_v31 }
  0xcd   : > { %8508 = vmatprep.mubr.f32.mxu0 %v11405_v53  ;;  %9859 = vmatpush3.bf16.msra.mxu0 %v9856_v40  ;;  %v1072_v40 = vld [vmem:[%s10928_s9 + $0x10a] sm:$0xff] }
  0xce   : > { %9861 = vmatprep.subr.bf16.mxu0 %v11411_v2  ;;  %v11438_v41 = vmul.f32 %v1072_v40, %v1040_v39  ;;  %v11455_v39 = vmul.f32 %v1075_v21, %v1043_v16  ;;  %v11458_v40 = vmul.f32 %v1076_v33, %v1044_v32  ;;  %v1047_v16 = vld [vmem:[%s10923_s26 + $0x15a] sm:$0xff] }
  0xcf   : > { %v1079_v21 = vld [vmem:[%s10928_s9 + $0x15a] sm:$0xff] }
  0xd0   : > { %8509 = vmatmul.mubr.f32.gmra.mrb[16].mxu0 %v11414_v7  ;;  %13163 = vst [vmem:[#allocation5_spill] sm:$0xff] %v11438_v41  ;;  %13166 = vst [vmem:[#allocation8_spill] sm:$0xff] %v11455_v39  ;;  %v11475_v32 = vmul.f32 %v1079_v21, %v1047_v16  ;;  %v6970_v16 = vld [vmem:[%s13112_s2 + $0x258] sm:$0xff]  ;;  %v6972_v21 = vld [vmem:[%s13112_s2 + $0x268] sm:$0xff] }
  0xd1   : > { %8511 = vmatprep.mubr.f32.mxu0 %v11417_v34 }
  0xd4   : > { %8512 = vmatmul.mubr.f32.gmra.mrb[18].mxu0 %v11425_v22 }
  0xd5   : > { %8514 = vmatprep.mubr.f32.mxu0 %v11428_v31  ;;  %v1049_v31 = vld [vmem:[%s10923_s26 + $0x172] sm:$0xff] }
  0xd8   : > { %8515 = vmatmul.mubr.f32.gmra.mrb[20].mxu0 %v11435_v42  ;;  %v11468_v42 = vmul.f32 %v1078_v63, %v1046_v62  ;;  %v6962_v62 = vld [vmem:[%s13112_s2 + $0x218] sm:$0xff] }
  0xd9   : > { %8517 = vmatprep.mubr.f32.mxu0 %v11438_v41  ;;  %v11465_v41 = vmul.f32 %v1077_v57, %v1045_v54  ;;  %v6961_v57 = vld [vmem:[%s13112_s2 + $0x210] sm:$0xff]  ;;  %v6966_v63 = vld [vmem:[%s13112_s2 + $0x238] sm:$0xff] }
  0xdc   : > { %8518 = vmatmul.mubr.f32.gmra.mrb[22].mxu0 %v11445_v14  ;;  %v1048_v14 = vld [vmem:[%s10923_s26 + $0x16a] sm:$0xff] }
  0xdd   : > { %8520 = vmatprep.mubr.f32.mxu0 %v11448_v15  ;;  %v1080_v15 = vld [vmem:[%s10928_s9 + $0x16a] sm:$0xff] }
  0xde   : > { %v11478_v33 = vmul.f32 %v1080_v15, %v1048_v14  ;;  %v9864_v14 = vpack.c.bf16 %v6962_v62, %v6961_v57  ;;  %v6964_v15 = vld [vmem:[%s13112_s2 + $0x228] sm:$0xff]  ;;  %v6974_v57 = vld [vmem:[%s13112_s2 + $0x278] sm:$0xff] }
  0xdf   : > { %v7040_v62 = vld [vmem:[%s13112_s2 + $0x288] sm:$0xff] }
  0xe0   : > { %8521 = vmatmul.mubr.f32.gmra.mrb[24].mxu0 %v11455_v39  ;;  %v1081_v39 = vld [vmem:[%s10928_s9 + $0x172] sm:$0xff] }
  0xe1   : > { %8523 = vmatprep.mubr.f32.mxu0 %v11458_v40  ;;  %v11483_v54 = vmul.f32 %v1081_v39, %v1049_v31  ;;  %v6963_v31 = vld [vmem:[%s13112_s2 + $0x220] sm:$0xff] }
  0xe2   : > { %v9868_v39 = vpack.c.bf16 %v6964_v15, %v6963_v31  ;;  %v6899_v31 = vld [vmem:[%s10923_s26 + $0x49] sm:$0xff] }
  0xe3   : > { %v6931_v15 = vld [vmem:[%s10928_s9 + $0x49] sm:$0xff] }
  0xe4   : > { %8524 = vmatmul.mubr.f32.gmra.mrb[26].mxu0 %v11465_v41 }
  0xe5   : > { %8526 = vmatprep.mubr.f32.mxu0 %v11468_v42 }
  0xe8   : > { %8527 = vmatmul.mubr.f32.gmra.mrb[28].mxu0 %v11475_v32 }
  0xe9   : > { %8529 = vmatprep.mubr.f32.mxu0 %v11478_v33 }
  0xec   : > { %8530 = vmatmul.mubr.f32.gmra.mrb[30].mxu0 %v11483_v54 }
  0xed   : > { %8564 = vmatprep.mubr.f32.mxu0 %v11087_v29  ;;  %v6965_v29 = vld [vmem:[%s13112_s2 + $0x230] sm:$0xff] }
  0xf0   : > { %8565 = vmatmul.mubr.f32.vlgmr.msra.gmra.mrb[0].mxu0 %v11099_v37  ;;  %v9872_v37 = vpack.c.bf16 %v6966_v63, %v6965_v29  ;;  %v7043_v29 = vld [vmem:[%s13112_s2 + $0x2a0] sm:$0xff]  ;;  %v7044_v63 = vld [vmem:[%s13112_s2 + $0x2a8] sm:$0xff] }
  0xf1   : > { %9863 = vmatpush3.bf16.msra.mxu0 %v11411_v2  ;;  %8567 = vmatprep.mubr.f32.mxu0 %v11103_v38  ;;  %v6967_v38 = vld [vmem:[%s13112_s2 + $0x240] sm:$0xff]  ;;  %v6968_v2 = vld [vmem:[%s13112_s2 + $0x248] sm:$0xff] }
  0xf2   : > { %9865 = vmatprep.subr.bf16.mxu0 %v9864_v14 }
  0xf4   : > { %8568 = vmatmul.mubr.f32.gmra.mrb[2].mxu0 %v11116_v46  ;;  %v9876_v46 = vpack.c.bf16 %v6968_v2, %v6967_v38  ;;  %v11603_v38 = vmul.f32 %v6931_v15, %v6899_v31  ;;  %v6900_v2 = vld [vmem:[%s10923_s26 + $0x51] sm:$0xff]  ;;  %v6939_v31 = vld [vmem:[%s10928_s9 + $0xa9] sm:$0xff] }
  0xf5   : > { %8570 = vmatprep.mubr.f32.mxu0 %v11119_v47  ;;  %9867 = vmatpush3.bf16.msra.mxu0 %v9864_v14  ;;  %v6969_v47 = vld [vmem:[%s13112_s2 + $0x250] sm:$0xff]  ;;  %v6930_v14 = vld [vmem:[%s10928_s9 + $0x39] sm:$0xff] }
  0xf6   : > { %9869 = vmatprep.subr.bf16.mxu0 %v9868_v39 }
  0xf8   : > { %8571 = vmatmul.mubr.f32.gmra.mrb[4].mxu0 %v11132_v55  ;;  %v9880_v55 = vpack.c.bf16 %v6970_v16, %v6969_v47  ;;  %v6901_v47 = vld [vmem:[%s10923_s26 + $0x61] sm:$0xff] }
  0xf9   : > { %8573 = vmatprep.mubr.f32.mxu0 %v11135_v56  ;;  %9871 = vmatpush3.bf16.msra.mxu0 %v9868_v39  ;;  %v6971_v56 = vld [vmem:[%s13112_s2 + $0x260] sm:$0xff] }
  0xfa   : > { %9873 = vmatprep.subr.bf16.mxu0 %v9872_v37  ;;  %v6933_v16 = vld [vmem:[%s10928_s9 + $0x61] sm:$0xff] }
  0xfc   : > { %8574 = vmatmul.mubr.f32.gmra.mrb[6].mxu0 %v11148_v0  ;;  %v9884_v0 = vpack.c.bf16 %v6972_v21, %v6971_v56  ;;  %v7045_v56 = vld [vmem:[%s13112_s2 + $0x2b0] sm:$0xff]  ;;  %v7046_v21 = vld [vmem:[%s13112_s2 + $0x2b8] sm:$0xff] }
  0xfd   : > { %8576 = vmatprep.mubr.f32.mxu0 %v11151_v1  ;;  %9875 = vmatpush3.bf16.msra.mxu0 %v9872_v37  ;;  %v6973_v1 = vld [vmem:[%s13112_s2 + $0x270] sm:$0xff] }
  0xfe   : > { %9877 = vmatprep.subr.bf16.mxu0 %v9876_v46 }
 0x100   : > { %8577 = vmatmul.mubr.f32.gmra.mrb[8].mxu0 %v11164_v9  ;;  %v9888_v9 = vpack.c.bf16 %v6974_v57, %v6973_v1  ;;  %v11619_v1 = vmul.f32 %v6933_v16, %v6901_v47  ;;  %v6902_v57 = vld [vmem:[%s10923_s26 + $0x69] sm:$0xff]  ;;  %v6940_v47 = vld [vmem:[%s10928_s9 + $0xb1] sm:$0xff]  ;;  %v6909_v16 = vld [vmem:[%s10923_s26 + $0xc1] sm:$0xff] }
 0x101   : > { %8579 = vmatprep.mubr.f32.mxu0 %v11167_v10  ;;  %9879 = vmatpush3.bf16.msra.mxu0 %v9876_v46  ;;  %v7039_v10 = vld [vmem:[%s13112_s2 + $0x280] sm:$0xff]  ;;  %v6932_v46 = vld [vmem:[%s10928_s9 + $0x51] sm:$0xff] }
 0x102   : > { %9881 = vmatprep.subr.bf16.mxu0 %v9880_v55 }
 0x104   : > { %8580 = vmatmul.mubr.f32.gmra.mrb[10].mxu0 %v11180_v18  ;;  %v9892_v18 = vpack.c.bf16 %v7040_v62, %v7039_v10  ;;  %v6903_v10 = vld [vmem:[%s10923_s26 + $0x79] sm:$0xff] }
 0x105   : > { %8582 = vmatprep.mubr.f32.mxu0 %v11183_v19  ;;  %9883 = vmatpush3.bf16.msra.mxu0 %v9880_v55  ;;  %v6845_v19 = vld [vmem:[%s10923_s26 + $0x180] sm:$0xff]  ;;  %v9900_v55 = vpack.c.bf16 %v7044_v63, %v7043_v29  ;;  %v7052_v29 = vld [vmem:[%s13112_s2 + $0x2e8] sm:$0xff] }
 0x106   : > { %9885 = vmatprep.subr.bf16.mxu0 %v9884_v0  ;;  %v6935_v62 = vld [vmem:[%s10928_s9 + $0x79] sm:$0xff] }
 0x108   : > { %8583 = vmatmul.mubr.f32.gmra.mrb[12].mxu0 %v11196_v27  ;;  %v6877_v27 = vld [vmem:[%s10928_s9 + $0x180] sm:$0xff] }
 0x109   : > { %8585 = vmatprep.mubr.f32.mxu0 %v11199_v28  ;;  %9887 = vmatpush3.bf16.msra.mxu0 %v9884_v0  ;;  %v11567_v28 = vmul.f32 %v6877_v27, %v6845_v19  ;;  %v11616_v0 = vmul.f32 %v6932_v46, %v6900_v2  ;;  %v7047_v19 = vld [vmem:[%s13112_s2 + $0x2c0] sm:$0xff]  ;;  %v7048_v27 = vld [vmem:[%s13112_s2 + $0x2c8] sm:$0xff]  ;;  %v6908_v46 = vld [vmem:[%s10923_s26 + $0xb1] sm:$0xff] }
 0x10a   : > { %9889 = vmatprep.subr.bf16.mxu0 %v9888_v9 }
 0x10c   : > { %8586 = vmatmul.mubr.f32.gmra.mrb[14].mxu0 %v11208_v35  ;;  %v6846_v35 = vld [vmem:[%s10923_s26 + $0x188] sm:$0xff] }
 0x10d   : > { %8588 = vmatprep.mubr.f32.mxu0 %v11211_v36  ;;  %9891 = vmatpush3.bf16.msra.mxu0 %v9888_v9  ;;  %v6878_v36 = vld [vmem:[%s10928_s9 + $0x188] sm:$0xff] }
 0x10e   : > { %9893 = vmatprep.subr.bf16.mxu0 %v9892_v18  ;;  %v6934_v9 = vld [vmem:[%s10928_s9 + $0x69] sm:$0xff] }
 0x110   : > { %8589 = vmatmul.mubr.f32.gmra.mrb[16].mxu0 %v11219_v44  ;;  %v6895_v44 = vld [vmem:[%s10923_s26 + $0x19] sm:$0xff] }
 0x111   : > { %8591 = vmatprep.mubr.f32.mxu0 %v11222_v45  ;;  %v6927_v45 = vld [vmem:[%s10928_s9 + $0x19] sm:$0xff] }
 0x114   : > { %8592 = vmatmul.mubr.f32.gmra.mrb[18].mxu0 %v11229_v51  ;;  %v11574_v51 = vmul.f32 %v6878_v36, %v6846_v35  ;;  %v11632_v35 = vmul.f32 %v6934_v9, %v6902_v57  ;;  %v11635_v36 = vmul.f32 %v6935_v62, %v6903_v10  ;;  %v7054_v57 = vld [vmem:[%s13112_s2 + $0x2f8] sm:$0xff]  ;;  %v11680_v9 = vmul.f32 %v6940_v47, %v6908_v46  ;;  %v6910_v62 = vld [vmem:[%s10923_s26 + $0xc9] sm:$0xff] }
 0x115   : > { %8594 = vmatprep.mubr.f32.mxu0 %v11232_v52  ;;  %v1824_v52 = vmul.f32 %v6927_v45, %v6895_v44  ;;  %v6904_v44 = vld [vmem:[%s10923_s26 + $0x81] sm:$0xff]  ;;  %v6915_v46 = vld [vmem:[%s10923_s26 + $0x109] sm:$0xff] }
 0x116   : > { %v6936_v45 = vld [vmem:[%s10928_s9 + $0x81] sm:$0xff]  ;;  %v6947_v47 = vld [vmem:[%s10928_s9 + $0x109] sm:$0xff] }
 0x118   : > { %8595 = vmatmul.mubr.f32.gmra.mrb[20].mxu0 %v11239_v59  ;;  %v6896_v59 = vld [vmem:[%s10923_s26 + $0x21] sm:$0xff] }
 0x119   : > { %8597 = vmatprep.mubr.f32.mxu0 %v11242_v60  ;;  %v6928_v60 = vld [vmem:[%s10928_s9 + $0x21] sm:$0xff] }
 0x11c   : > { %8598 = vmatmul.mubr.f32.gmra.mrb[22].mxu0 %v11249_v3  ;;  %v6897_v3 = vld [vmem:[%s10923_s26 + $0x31] sm:$0xff] }
 0x11d   : > { %8600 = vmatprep.mubr.f32.mxu0 %v11252_v4  ;;  %v6929_v4 = vld [vmem:[%s10928_s9 + $0x31] sm:$0xff] }
 0x120   : > { %8601 = vmatmul.mubr.f32.gmra.mrb[24].mxu0 %v11259_v11  ;;  %v7041_v11 = vld [vmem:[%s13112_s2 + $0x290] sm:$0xff] }
 0x121   : > { %8603 = vmatprep.mubr.f32.mxu0 %v11262_v12  ;;  %v7042_v12 = vld [vmem:[%s13112_s2 + $0x298] sm:$0xff] }
 0x122   : > { %v9896_v39 = vpack.c.bf16 %v7042_v12, %v7041_v11  ;;  %v11648_v11 = vmul.f32 %v6936_v45, %v6904_v44  ;;  %v7119_v45 = vld [vmem:[%s13112_s2 + $0x300] sm:$0xff] }
 0x124   : > { %8604 = vmatmul.mubr.f32.gmra.mrb[26].mxu0 %v11269_v17  ;;  %v1825_v17 = vmul.f32 %v6928_v60, %v6896_v59  ;;  %v6937_v59 = vld [vmem:[%s10928_s9 + $0x91] sm:$0xff]  ;;  %v9908_v60 = vpack.c.bf16 %v7048_v27, %v7047_v19  ;;  %v6911_v19 = vld [vmem:[%s10923_s26 + $0xd9] sm:$0xff] }
 0x125   : > { %8606 = vmatprep.mubr.f32.mxu0 %v11272_v20  ;;  %v11588_v20 = vmul.f32 %v6929_v4, %v6897_v3  ;;  %v7049_v3 = vld [vmem:[%s13112_s2 + $0x2d0] sm:$0xff]  ;;  %v7050_v4 = vld [vmem:[%s13112_s2 + $0x2d8] sm:$0xff] }
 0x126   : > { %v9912_v15 = vpack.c.bf16 %v7050_v4, %v7049_v3  ;;  %v6943_v27 = vld [vmem:[%s10928_s9 + $0xd9] sm:$0xff]  ;;  %v6912_v3 = vld [vmem:[%s10923_s26 + $0xe1] sm:$0xff] }
 0x127   : > { %v6944_v4 = vld [vmem:[%s10928_s9 + $0xe1] sm:$0xff] }
 0x128   : > { %8607 = vmatmul.mubr.f32.gmra.mrb[28].mxu0 %v11279_v25  ;;  %v6898_v25 = vld [vmem:[%s10923_s26 + $0x39] sm:$0xff] }
 0x129   : > { %8609 = vmatprep.mubr.f32.mxu0 %v11567_v28  ;;  %v11600_v37 = vmul.f32 %v6930_v14, %v6898_v25  ;;  %v6938_v25 = vld [vmem:[%s10928_s9 + $0x99] sm:$0xff]  ;;  %v6907_v14 = vld [vmem:[%s10923_s26 + $0xa9] sm:$0xff] }
 0x12a   : > { %v11667_v2 = vmul.f32 %v6939_v31, %v6907_v14  ;;  %v11708_v31 = vmul.f32 %v6944_v4, %v6912_v3 }
 0x12c   : > { %8610 = vmatmul.mubr.f32.gmra.mrb[30].mxu0 %v11574_v51 }
 0x12d   : > { %8644 = vmatprep.mubr.f32.mxu0 %v1824_v52  ;;  %v6905_v52 = vld [vmem:[%s10923_s26 + $0x91] sm:$0xff] }
 0x12e   : > { %v11651_v12 = vmul.f32 %v6937_v59, %v6905_v52  ;;  %v7120_v52 = vld [vmem:[%s13112_s2 + $0x308] sm:$0xff] }
 0x12f   : > { %v11705_v14 = vpack.c.bf16 %v7120_v52, %v7119_v45  ;;  %v6919_v45 = vld [vmem:[%s10923_s26 + $0x139] sm:$0xff] }
 0x130   : > { %8645 = vmatmul.mubr.f32.vlgmr.msra.gmra.mrb[0].mxu0 %v1825_v17  ;;  %v6906_v17 = vld [vmem:[%s10923_s26 + $0x99] sm:$0xff] }
 0x131   : > { %9895 = vmatpush3.bf16.msra.mxu0 %v9892_v18  ;;  %8647 = vmatprep.mubr.f32.mxu0 %v11588_v20  ;;  %v9904_v18 = vpack.c.bf16 %v7046_v21, %v7045_v56  ;;  %v11664_v63 = vmul.f32 %v6938_v25, %v6906_v17  ;;  %v7053_v21 = vld [vmem:[%s13112_s2 + $0x2f0] sm:$0xff]  ;;  %v6951_v52 = vld [vmem:[%s10928_s9 + $0x139] sm:$0xff] }
 0x132   : > { %9897 = vmatprep.subr.bf16.mxu0 %v9896_v39  ;;  %v9920_v44 = vpack.c.bf16 %v7054_v57, %v7053_v21  ;;  %v6913_v17 = vld [vmem:[%s10923_s26 + $0xf1] sm:$0xff]  ;;  %v6917_v57 = vld [vmem:[%s10923_s26 + $0x121] sm:$0xff]  ;;  %v11742_v4 = vmul.f32 %v6951_v52, %v6919_v45 }
 0x133   : > { %v6945_v25 = vld [vmem:[%s10928_s9 + $0xf1] sm:$0xff] }
 0x134   : > { %8648 = vmatmul.mubr.f32.gmra.mrb[2].mxu0 %v11600_v37  ;;  %v6948_v21 = vld [vmem:[%s10928_s9 + $0x111] sm:$0xff]  ;;  %13167 = vst [vmem:[#allocation9_spill] sm:$0xff] %v11742_v4 }
 0x135   : > { %8650 = vmatprep.mubr.f32.mxu0 %v11603_v38  ;;  %9899 = vmatpush3.bf16.msra.mxu0 %v9896_v39  ;;  %v7051_v39 = vld [vmem:[%s13112_s2 + $0x2e0] sm:$0xff]  ;;  %v6924_v45 = vld [vmem:[%s10923_s26 + $0x171] sm:$0xff] }
 0x136   : > { %9901 = vmatprep.subr.bf16.mxu0 %v9900_v55  ;;  %v9916_v56 = vpack.c.bf16 %v7052_v29, %v7051_v39  ;;  %v6914_v39 = vld [vmem:[%s10923_s26 + $0xf9] sm:$0xff]  ;;  %v6956_v52 = vld [vmem:[%s10928_s9 + $0x171] sm:$0xff] }
 0x137   : > { %v6946_v29 = vld [vmem:[%s10928_s9 + $0xf9] sm:$0xff] }
 0x138   : > { %8651 = vmatmul.mubr.f32.gmra.mrb[4].mxu0 %v11616_v0 }
 0x139   : > { %8653 = vmatprep.mubr.f32.mxu0 %v11619_v1  ;;  %9903 = vmatpush3.bf16.msra.mxu0 %v9900_v55  ;;  %v6941_v55 = vld [vmem:[%s10928_s9 + $0xc1] sm:$0xff] }
 0x13a   : > { %9905 = vmatprep.subr.bf16.mxu0 %v9904_v18  ;;  %v11683_v10 = vmul.f32 %v6941_v55, %v6909_v16  ;;  %v11719_v16 = vmul.f32 %v6946_v29, %v6914_v39  ;;  %v11722_v55 = vmul.f32 %v6947_v47, %v6915_v46  ;;  %v6921_v39 = vld [vmem:[%s10923_s26 + $0x151] sm:$0xff] }
 0x13b   : > { %v6953_v29 = vld [vmem:[%s10928_s9 + $0x151] sm:$0xff] }
 0x13c   : > { %8654 = vmatmul.mubr.f32.gmra.mrb[6].mxu0 %v11632_v35  ;;  %v11752_v47 = vmul.f32 %v6953_v29, %v6921_v39  ;;  %v11769_v39 = vmul.f32 %v6956_v52, %v6924_v45  ;;  %v7126_v52 = vld [vmem:[%s13112_s2 + $0x338] sm:$0xff] }
 0x13d   : > { %8656 = vmatprep.mubr.f32.mxu0 %v11635_v36  ;;  %9907 = vmatpush3.bf16.msra.mxu0 %v9904_v18  ;;  %v6942_v18 = vld [vmem:[%s10928_s9 + $0xc9] sm:$0xff] }
 0x13e   : > { %9909 = vmatprep.subr.bf16.mxu0 %v9908_v60  ;;  %v11696_v59 = vmul.f32 %v6942_v18, %v6910_v62  ;;  %v6949_v62 = vld [vmem:[%s10928_s9 + $0x121] sm:$0xff] }
 0x140   : > { %8657 = vmatmul.mubr.f32.gmra.mrb[8].mxu0 %v11648_v11 }
 0x141   : > { %8659 = vmatprep.mubr.f32.mxu0 %v11651_v12  ;;  %9911 = vmatpush3.bf16.msra.mxu0 %v9908_v60  ;;  %v11699_v60 = vmul.f32 %v6943_v27, %v6911_v19  ;;  %v11732_v19 = vmul.f32 %v6949_v62, %v6917_v57  ;;  %v6918_v27 = vld [vmem:[%s10923_s26 + $0x129] sm:$0xff] }
 0x142   : > { %9913 = vmatprep.subr.bf16.mxu0 %v9912_v15  ;;  %v6923_v57 = vld [vmem:[%s10923_s26 + $0x169] sm:$0xff] }
 0x143   : > { %v6955_v62 = vld [vmem:[%s10928_s9 + $0x169] sm:$0xff] }
 0x144   : > { %8660 = vmatmul.mubr.f32.gmra.mrb[10].mxu0 %v11664_v63 }
 0x145   : > { %8662 = vmatprep.mubr.f32.mxu0 %v11667_v2  ;;  %9915 = vmatpush3.bf16.msra.mxu0 %v9912_v15  ;;  %v11711_v15 = vmul.f32 %v6945_v25, %v6913_v17  ;;  %v6920_v17 = vld [vmem:[%s10923_s26 + $0x141] sm:$0xff] }
 0x146   : > { %9917 = vmatprep.subr.bf16.mxu0 %v9916_v56  ;;  %v6952_v25 = vld [vmem:[%s10928_s9 + $0x141] sm:$0xff] }
 0x147   : > { %v11749_v46 = vmul.f32 %v6952_v25, %v6920_v17  ;;  %v6925_v17 = vld [vmem:[%s10923_s26 + $0x181] sm:$0xff] }
 0x148   : > { %8663 = vmatmul.mubr.f32.gmra.mrb[12].mxu0 %v11680_v9  ;;  %v6957_v25 = vld [vmem:[%s10928_s9 + $0x181] sm:$0xff] }
 0x149   : > { %8665 = vmatprep.mubr.f32.mxu0 %v11683_v10  ;;  %9919 = vmatpush3.bf16.msra.mxu0 %v9916_v56  ;;  %v6916_v56 = vld [vmem:[%s10923_s26 + $0x111] sm:$0xff]  ;;  %13168 = vst [vmem:[#allocation10_spill] sm:$0xff] %v11749_v46  ;;  %v11772_v29 = vmul.f32 %v6957_v25, %v6925_v17  ;;  %v7132_v25 = vld [vmem:[%s13112_s2 + $0x368] sm:$0xff] }
 0x14a   : > { %9921 = vmatprep.subr.bf16.mxu0 %v9920_v44  ;;  %v11729_v18 = vmul.f32 %v6948_v21, %v6916_v56  ;;  %v6922_v56 = vld [vmem:[%s10923_s26 + $0x159] sm:$0xff] }
 0x14b   : > { %v6954_v21 = vld [vmem:[%s10928_s9 + $0x159] sm:$0xff] }
 0x14c   : > { %8666 = vmatmul.mubr.f32.gmra.mrb[14].mxu0 %v11696_v59  ;;  %v7130_v17 = vld [vmem:[%s13112_s2 + $0x358] sm:$0xff] }
 0x14d   : > { %8668 = vmatprep.mubr.f32.mxu0 %v11699_v60  ;;  %9923 = vmatpush3.bf16.msra.mxu0 %v9920_v44  ;;  %v6950_v44 = vld [vmem:[%s10928_s9 + $0x129] sm:$0xff] }
 0x14e   : > { %9925 = vmatprep.subr.bf16.mxu0 %v11705_v14  ;;  %v11739_v3 = vmul.f32 %v6950_v44, %v6918_v27  ;;  %v11759_v27 = vmul.f32 %v6954_v21, %v6922_v56  ;;  %v11762_v44 = vmul.f32 %v6955_v62, %v6923_v57  ;;  %v7121_v21 = vld [vmem:[%s13112_s2 + $0x310] sm:$0xff]  ;;  %v7122_v57 = vld [vmem:[%s13112_s2 + $0x318] sm:$0xff] }
 0x14f   : > { %v9928_v62 = vpack.c.bf16 %v7122_v57, %v7121_v21  ;;  %v7134_v21 = vld [vmem:[%s13112_s2 + $0x378] sm:$0xff]  ;;  %v7200_v57 = vld [vmem:[%s13112_s2 + $0x388] sm:$0xff] }
 0x150   : > { %8669 = vmatmul.mubr.f32.gmra.mrb[16].mxu0 %v11708_v31 }
 0x151   : > { %8671 = vmatprep.mubr.f32.mxu0 %v11711_v15 }
 0x154   : > { %8672 = vmatmul.mubr.f32.gmra.mrb[18].mxu0 %v11719_v16 }
 0x155   : > { %8674 = vmatprep.mubr.f32.mxu0 %v11722_v55 }
 0x158   : > { %8675 = vmatmul.mubr.f32.gmra.mrb[20].mxu0 %v11729_v18 }
 0x159   : > { %8677 = vmatprep.mubr.f32.mxu0 %v11732_v19 }
 0x15c   : > { %8678 = vmatmul.mubr.f32.gmra.mrb[22].mxu0 %v11739_v3 }
 0x15d   : > { %8680 = vmatprep.mubr.f32.mxu0 %v11742_v4  ;;  %v6926_v4 = vld [vmem:[%s10923_s26 + $0x189] sm:$0xff] }
 0x160   : > { %8681 = vmatmul.mubr.f32.gmra.mrb[24].mxu0 %v11749_v46  ;;  %v6958_v46 = vld [vmem:[%s10928_s9 + $0x189] sm:$0xff] }
 0x161   : > { %8683 = vmatprep.mubr.f32.mxu0 %v11752_v47  ;;  %v11777_v56 = vmul.f32 %v6958_v46, %v6926_v4  ;;  %v7123_v4 = vld [vmem:[%s13112_s2 + $0x320] sm:$0xff]  ;;  %v7124_v46 = vld [vmem:[%s13112_s2 + $0x328] sm:$0xff] }
 0x162   : > { %v9932_v45 = vpack.c.bf16 %v7124_v46, %v7123_v4  ;;  %v13173_v4 = vld [vmem:[#allocation7_spill] sm:$0xff] }
 0x164   : > { %8684 = vmatmul.mubr.f32.gmra.mrb[26].mxu0 %v11759_v27 }
 0x165   : > { %8686 = vmatprep.mubr.f32.mxu0 %v11762_v44 }
 0x168   : > { %8687 = vmatmul.mubr.f32.gmra.mrb[28].mxu0 %v11769_v39 }
 0x169   : > { %8689 = vmatprep.mubr.f32.mxu0 %v11772_v29 }
 0x16c   : > { %8690 = vmatmul.mubr.f32.gmra.mrb[30].mxu0 %v11777_v56 }
 0x16d   : > { %8724 = vmatprep.mubr.f32.mxu0 %v11293_v43  ;;  %v7125_v43 = vld [vmem:[%s13112_s2 + $0x330] sm:$0xff] }
 0x170   : > { %8725 = vmatmul.mubr.f32.vlgmr.msra.gmra.mrb[0].mxu0 %v11305_v58  ;;  %v9936_v58 = vpack.c.bf16 %v7126_v52, %v7125_v43  ;;  %v7038_v43 = vld [vmem:[%s10928_s9 + $0x18a] sm:$0xff] }
 0x171   : > { %9927 = vmatpush3.bf16.msra.mxu0 %v11705_v14  ;;  %8727 = vmatprep.mubr.f32.mxu0 %v11309_v61  ;;  %v7127_v61 = vld [vmem:[%s13112_s2 + $0x340] sm:$0xff]  ;;  %v7128_v14 = vld [vmem:[%s13112_s2 + $0x348] sm:$0xff]  ;;  %v7055_v52 = vld [vmem:[%s10923_s26 + $0x30] sm:$0xff] }
 0x172   : > { %9929 = vmatprep.subr.bf16.mxu0 %v9928_v62 }
 0x174   : > { %8728 = vmatmul.mubr.f32.gmra.mrb[2].mxu0 %v11322_v8  ;;  %v9940_v8 = vpack.c.bf16 %v7128_v14, %v7127_v61  ;;  %v7089_v61 = vld [vmem:[%s10928_s9 + $0x48] sm:$0xff]  ;;  %v7201_v14 = vld [vmem:[%s13112_s2 + $0x390] sm:$0xff] }
 0x175   : > { %8730 = vmatprep.mubr.f32.mxu0 %v11325_v13  ;;  %9931 = vmatpush3.bf16.msra.mxu0 %v9928_v62  ;;  %v7129_v13 = vld [vmem:[%s13112_s2 + $0x350] sm:$0xff]  ;;  %v13172_v62 = vld [vmem:[#allocation6_spill] sm:$0xff] }
 0x176   : > { %9933 = vmatprep.subr.bf16.mxu0 %v9932_v45 }
 0x178   : > { %8731 = vmatmul.mubr.f32.gmra.mrb[4].mxu0 %v11338_v26  ;;  %v9944_v26 = vpack.c.bf16 %v7130_v17, %v7129_v13  ;;  %v7058_v17 = vld [vmem:[%s10923_s26 + $0x50] sm:$0xff] }
 0x179   : > { %8733 = vmatprep.mubr.f32.mxu0 %v11341_v30  ;;  %9935 = vmatpush3.bf16.msra.mxu0 %v9932_v45  ;;  %v7131_v30 = vld [vmem:[%s13112_s2 + $0x360] sm:$0xff]  ;;  %v7006_v45 = vld [vmem:[%s10923_s26 + $0x18a] sm:$0xff] }
 0x17a   : > { %9937 = vmatprep.subr.bf16.mxu0 %v9936_v58 }
 0x17c   : > { %8734 = vmatmul.mubr.f32.gmra.mrb[6].mxu0 %v11354_v48  ;;  %v9948_v48 = vpack.c.bf16 %v7132_v25, %v7131_v30  ;;  %v7059_v30 = vld [vmem:[%s10923_s26 + $0x60] sm:$0xff] }
 0x17d   : > { %8736 = vmatprep.mubr.f32.mxu0 %v11357_v49  ;;  %9939 = vmatpush3.bf16.msra.mxu0 %v9936_v58  ;;  %v7133_v49 = vld [vmem:[%s13112_s2 + $0x370] sm:$0xff]  ;;  %v7088_v58 = vld [vmem:[%s10928_s9 + $0x38] sm:$0xff]  ;;  %v7091_v25 = vld [vmem:[%s10928_s9 + $0x60] sm:$0xff] }
 0x17e   : > { %9941 = vmatprep.subr.bf16.mxu0 %v9940_v8 }
 0x180   : > { %8737 = vmatmul.mubr.f32.gmra.mrb[8].mxu0 %v11370_v5  ;;  %v9952_v5 = vpack.c.bf16 %v7134_v21, %v7133_v49  ;;  %v7203_v49 = vld [vmem:[%s13112_s2 + $0x3a0] sm:$0xff]  ;;  %v7204_v21 = vld [vmem:[%s13112_s2 + $0x3a8] sm:$0xff] }
 0x181   : > { %8739 = vmatprep.mubr.f32.mxu0 %v11373_v6  ;;  %9943 = vmatpush3.bf16.msra.mxu0 %v9940_v8  ;;  %v7199_v6 = vld [vmem:[%s13112_s2 + $0x380] sm:$0xff]  ;;  %v7202_v8 = vld [vmem:[%s13112_s2 + $0x398] sm:$0xff] }
 0x182   : > { %9945 = vmatprep.subr.bf16.mxu0 %v9944_v26 }
 0x184   : > { %8740 = vmatmul.mubr.f32.gmra.mrb[10].mxu0 %v11386_v23  ;;  %v9956_v23 = vpack.c.bf16 %v7200_v57, %v7199_v6  ;;  %v2570_v6 = vmul.f32 %v7091_v25, %v7059_v30  ;;  %v7060_v57 = vld [vmem:[%s10923_s26 + $0x68] sm:$0xff] }
 0x185   : > { %8742 = vmatprep.mubr.f32.mxu0 %v11389_v24  ;;  %9947 = vmatpush3.bf16.msra.mxu0 %v9944_v26  ;;  %v13169_v24 = vld [vmem:[#allocation3_spill] sm:$0xff]  ;;  %v7090_v26 = vld [vmem:[%s10928_s9 + $0x50] sm:$0xff] }
 0x186   : > { %9949 = vmatprep.subr.bf16.mxu0 %v9948_v48 }
 0x188   : > { %8743 = vmatmul.mubr.f32.gmra.mrb[12].mxu0 %v11402_v50  ;;  %v13170_v50 = vld [vmem:[#allocation4_spill] sm:$0xff] }
 0x189   : > { %8745 = vmatprep.mubr.f32.mxu0 %v11405_v53  ;;  %9951 = vmatpush3.bf16.msra.mxu0 %v9948_v48  ;;  %v13171_v53 = vld [vmem:[#allocation5_spill] sm:$0xff]  ;;  %v9960_v48 = vpack.c.bf16 %v7202_v8, %v7201_v14  ;;  %v7096_v14 = vld [vmem:[%s10928_s9 + $0x98] sm:$0xff]  ;;  %v7065_v8 = vld [vmem:[%s10923_s26 + $0xa8] sm:$0xff] }
 0x18a   : > { %9953 = vmatprep.subr.bf16.mxu0 %v9952_v5 }
 0x18c   : > { %8746 = vmatmul.mubr.f32.gmra.mrb[14].mxu0 %v11414_v7  ;;  %v13174_v7 = vld [vmem:[#allocation8_spill] sm:$0xff] }
 0x18d   : > { %8748 = vmatprep.mubr.f32.mxu0 %v11417_v34  ;;  %9955 = vmatpush3.bf16.msra.mxu0 %v9952_v5  ;;  %v7005_v34 = vld [vmem:[%s10923_s26 + $0x182] sm:$0xff]  ;;  %v2569_v5 = vmul.f32 %v7090_v26, %v7058_v17  ;;  %v7209_v17 = vld [vmem:[%s13112_s2 + $0x3d0] sm:$0xff]  ;;  %v7210_v26 = vld [vmem:[%s13112_s2 + $0x3d8] sm:$0xff] }
 0x18e   : > { %9957 = vmatprep.subr.bf16.mxu0 %v9956_v23 }
 0x190   : > { %8749 = vmatmul.mubr.f32.gmra.mrb[16].mxu0 %v11425_v22  ;;  %v7037_v22 = vld [vmem:[%s10928_s9 + $0x182] sm:$0xff] }
 0x191   : > { %8751 = vmatprep.mubr.f32.mxu0 %v13169_v24  ;;  %v11861_v46 = vmul.f32 %v7037_v22, %v7005_v34  ;;  %v7092_v24 = vld [vmem:[%s10928_s9 + $0x68] sm:$0xff]  ;;  %v7062_v22 = vld [vmem:[%s10923_s26 + $0x80] sm:$0xff] }
 0x194   : > { %8752 = vmatmul.mubr.f32.gmra.mrb[18].mxu0 %v13170_v50  ;;  %v7061_v50 = vld [vmem:[%s10923_s26 + $0x78] sm:$0xff] }
 0x195   : > { %8754 = vmatprep.mubr.f32.mxu0 %v13171_v53  ;;  %v7093_v53 = vld [vmem:[%s10928_s9 + $0x78] sm:$0xff] }
 0x196   : > { %v2572_v34 = vmul.f32 %v7093_v53, %v7061_v50 }
 0x198   : > { %8755 = vmatmul.mubr.f32.gmra.mrb[20].mxu0 %v13172_v62  ;;  %v9964_v62 = vpack.c.bf16 %v7204_v21, %v7203_v49  ;;  %v7098_v49 = vld [vmem:[%s10928_s9 + $0xb0] sm:$0xff]  ;;  %v7067_v21 = vld [vmem:[%s10923_s26 + $0xc0] sm:$0xff] }
 0x199   : > { %8757 = vmatprep.mubr.f32.mxu0 %v13173_v4  ;;  %v7205_v4 = vld [vmem:[%s13112_s2 + $0x3b0] sm:$0xff] }
 0x19c   : > { %8758 = vmatmul.mubr.f32.gmra.mrb[22].mxu0 %v13174_v7  ;;  %v2571_v7 = vmul.f32 %v7092_v24, %v7060_v57  ;;  %v7211_v57 = vld [vmem:[%s13112_s2 + $0x3e0] sm:$0xff]  ;;  %v7212_v24 = vld [vmem:[%s13112_s2 + $0x3e8] sm:$0xff] }
 0x19d   : > { %8760 = vmatprep.mubr.f32.mxu0 %v11458_v40  ;;  %v7087_v40 = vld [vmem:[%s10928_s9 + $0x30] sm:$0xff] }
 0x1a0   : > { %8761 = vmatmul.mubr.f32.gmra.mrb[24].mxu0 %v11465_v41  ;;  %v2566_v41 = vmul.f32 %v7087_v40, %v7055_v52  ;;  %v7095_v52 = vld [vmem:[%s10928_s9 + $0x90] sm:$0xff] }
 0x1a1   : > { %8763 = vmatprep.mubr.f32.mxu0 %v11468_v42  ;;  %v11868_v42 = vmul.f32 %v7038_v43, %v7006_v45  ;;  %v7094_v45 = vld [vmem:[%s10928_s9 + $0x80] sm:$0xff]  ;;  %v7063_v43 = vld [vmem:[%s10923_s26 + $0x90] sm:$0xff] }
 0x1a4   : > { %8764 = vmatmul.mubr.f32.gmra.mrb[26].mxu0 %v11475_v32  ;;  %v7056_v32 = vld [vmem:[%s10923_s26 + $0x38] sm:$0xff] }
 0x1a5   : > { %8766 = vmatprep.mubr.f32.mxu0 %v11478_v33  ;;  %v7057_v33 = vld [vmem:[%s10923_s26 + $0x48] sm:$0xff] }
 0x1a6   : > { %v2568_v13 = vmul.f32 %v7089_v61, %v7057_v33  ;;  %v2574_v33 = vmul.f32 %v7095_v52, %v7063_v43  ;;  %v7064_v61 = vld [vmem:[%s10923_s26 + $0x98] sm:$0xff] }
 0x1a7   : > { %v2575_v30 = vmul.f32 %v7096_v14, %v7064_v61  ;;  %v7279_v61 = vld [vmem:[%s13112_s2 + $0x400] sm:$0xff]  ;;  %v7280_v14 = vld [vmem:[%s13112_s2 + $0x408] sm:$0xff] }
 0x1a8   : > { %8767 = vmatmul.mubr.f32.gmra.mrb[28].mxu0 %v11483_v54  ;;  %v2567_v54 = vmul.f32 %v7088_v58, %v7056_v32  ;;  %v7208_v32 = vld [vmem:[%s13112_s2 + $0x3c8] sm:$0xff]  ;;  %v2573_v58 = vmul.f32 %v7094_v45, %v7062_v22  ;;  %v7213_v22 = vld [vmem:[%s13112_s2 + $0x3f0] sm:$0xff]  ;;  %v7214_v45 = vld [vmem:[%s13112_s2 + $0x3f8] sm:$0xff] }
 0x1a9   : > { %8769 = vmatprep.mubr.f32.mxu0 %v11861_v46 }
 0x1ac   : > { %8770 = vmatmul.mubr.f32.gmra.mrb[30].mxu0 %v11868_v42 }
 0x1ad   : > { %8804 = vmatprep.mubr.f32.mxu0 %v2566_v41  ;;  %v7207_v41 = vld [vmem:[%s13112_s2 + $0x3c0] sm:$0xff] }
 0x1b0   : > { %8805 = vmatmul.mubr.f32.vlgmr.msra.gmra.mrb[0].mxu0 %v2567_v54  ;;  %v7097_v54 = vld [vmem:[%s10928_s9 + $0xa8] sm:$0xff] }
 0x1b1   : > { %9959 = vmatpush3.bf16.msra.mxu0 %v9956_v23  ;;  %8807 = vmatprep.mubr.f32.mxu0 %v2568_v13  ;;  %v7206_v23 = vld [vmem:[%s13112_s2 + $0x3b8] sm:$0xff]  ;;  %v9972_v13 = vpack.c.bf16 %v7208_v32, %v7207_v41  ;;  %v2576_v25 = vmul.f32 %v7097_v54, %v7065_v8  ;;  %v7102_v41 = vld [vmem:[%s10928_s9 + $0xe0] sm:$0xff]  ;;  %v7071_v32 = vld [vmem:[%s10923_s26 + $0xf0] sm:$0xff] }
 0x1b2   : > { %9961 = vmatprep.subr.bf16.mxu0 %v9960_v48  ;;  %v9968_v40 = vpack.c.bf16 %v7206_v23, %v7205_v4  ;;  %v7100_v4 = vld [vmem:[%s10928_s9 + $0xc8] sm:$0xff]  ;;  %v7069_v23 = vld [vmem:[%s10923_s26 + $0xd8] sm:$0xff] }
 0x1b4   : > { %8808 = vmatmul.mubr.f32.gmra.mrb[2].mxu0 %v2569_v5  ;;  %v7099_v5 = vld [vmem:[%s10928_s9 + $0xc0] sm:$0xff] }
 0x1b5   : > { %8810 = vmatprep.mubr.f32.mxu0 %v2570_v6  ;;  %9963 = vmatpush3.bf16.msra.mxu0 %v9960_v48  ;;  %v7066_v48 = vld [vmem:[%s10923_s26 + $0xb0] sm:$0xff]  ;;  %v9976_v6 = vpack.c.bf16 %v7210_v26, %v7209_v17  ;;  %v2578_v53 = vmul.f32 %v7099_v5, %v7067_v21  ;;  %v7104_v17 = vld [vmem:[%s10928_s9 + $0xf8] sm:$0xff]  ;;  %v7073_v26 = vld [vmem:[%s10923_s26 + $0x108] sm:$0xff] }
 0x1b6   : > { %9965 = vmatprep.subr.bf16.mxu0 %v9964_v62  ;;  %v2577_v50 = vmul.f32 %v7098_v49, %v7066_v48  ;;  %v7074_v21 = vld [vmem:[%s10923_s26 + $0x110] sm:$0xff] }
 0x1b7   : > { %v7106_v5 = vld [vmem:[%s10928_s9 + $0x110] sm:$0xff] }
 0x1b8   : > { %8811 = vmatmul.mubr.f32.gmra.mrb[4].mxu0 %v2571_v7  ;;  %v7101_v7 = vld [vmem:[%s10928_s9 + $0xd8] sm:$0xff] }
 0x1b9   : > { %8813 = vmatprep.mubr.f32.mxu0 %v2572_v34  ;;  %9967 = vmatpush3.bf16.msra.mxu0 %v9964_v62  ;;  %v7068_v62 = vld [vmem:[%s10923_s26 + $0xc8] sm:$0xff]  ;;  %v9980_v34 = vpack.c.bf16 %v7212_v24, %v7211_v57  ;;  %v2580_v52 = vmul.f32 %v7101_v7, %v7069_v23  ;;  %v7107_v57 = vld [vmem:[%s10928_s9 + $0x120] sm:$0xff]  ;;  %v2585_v24 = vmul.f32 %v7106_v5, %v7074_v21  ;;  %v7109_v23 = vld [vmem:[%s10928_s9 + $0x138] sm:$0xff] }
 0x1ba   : > { %9969 = vmatprep.subr.bf16.mxu0 %v9968_v40  ;;  %v2579_v43 = vmul.f32 %v7100_v4, %v7068_v62  ;;  %v7108_v62 = vld [vmem:[%s10928_s9 + $0x128] sm:$0xff]  ;;  %v7077_v4 = vld [vmem:[%s10923_s26 + $0x138] sm:$0xff]  ;;  %v7118_v21 = vld [vmem:[%s10928_s9 + $0x1a0] sm:$0xff] }
 0x1bc   : > { %8814 = vmatmul.mubr.f32.gmra.mrb[6].mxu0 %v2573_v58  ;;  %v7103_v58 = vld [vmem:[%s10928_s9 + $0xf0] sm:$0xff] }
 0x1bd   : > { %8816 = vmatprep.mubr.f32.mxu0 %v2574_v33  ;;  %9971 = vmatpush3.bf16.msra.mxu0 %v9968_v40  ;;  %v7070_v40 = vld [vmem:[%s10923_s26 + $0xe0] sm:$0xff]  ;;  %v9984_v33 = vpack.c.bf16 %v7214_v45, %v7213_v22  ;;  %v2582_v54 = vmul.f32 %v7103_v58, %v7071_v32  ;;  %v7080_v32 = vld [vmem:[%s10923_s26 + $0x158] sm:$0xff] }
 0x1be   : > { %9973 = vmatprep.subr.bf16.mxu0 %v9972_v13  ;;  %v2581_v8 = vmul.f32 %v7102_v41, %v7070_v40  ;;  %v7078_v22 = vld [vmem:[%s10923_s26 + $0x140] sm:$0xff]  ;;  %v7112_v58 = vld [vmem:[%s10928_s9 + $0x158] sm:$0xff] }
 0x1bf   : > { %v7110_v45 = vld [vmem:[%s10928_s9 + $0x140] sm:$0xff] }
 0x1c0   : > { %8817 = vmatmul.mubr.f32.gmra.mrb[8].mxu0 %v2575_v30  ;;  %v7105_v30 = vld [vmem:[%s10928_s9 + $0x108] sm:$0xff]  ;;  %v2589_v40 = vmul.f32 %v7110_v45, %v7078_v22  ;;  %v7285_v45 = vld [vmem:[%s13112_s2 + $0x430] sm:$0xff] }
 0x1c1   : > { %8819 = vmatprep.mubr.f32.mxu0 %v2576_v25  ;;  %9975 = vmatpush3.bf16.msra.mxu0 %v9972_v13  ;;  %v7072_v13 = vld [vmem:[%s10923_s26 + $0xf8] sm:$0xff]  ;;  %v11956_v25 = vpack.c.bf16 %v7280_v14, %v7279_v61  ;;  %v2584_v49 = vmul.f32 %v7105_v30, %v7073_v26  ;;  %v7113_v61 = vld [vmem:[%s10928_s9 + $0x168] sm:$0xff]  ;;  %v2591_v14 = vmul.f32 %v7112_v58, %v7080_v32 }
 0x1c2   : > { %9977 = vmatprep.subr.bf16.mxu0 %v9976_v6  ;;  %v2583_v48 = vmul.f32 %v7104_v17, %v7072_v13  ;;  %v7114_v13 = vld [vmem:[%s10928_s9 + $0x170] sm:$0xff]  ;;  %v7085_v26 = vld [vmem:[%s10923_s26 + $0x198] sm:$0xff]  ;;  %v7288_v32 = vld [vmem:[%s13112_s2 + $0x448] sm:$0xff] }
 0x1c3   : > { %v7117_v30 = vld [vmem:[%s10928_s9 + $0x198] sm:$0xff] }
 0x1c4   : > { %8820 = vmatmul.mubr.f32.gmra.mrb[10].mxu0 %v2577_v50 }
 0x1c5   : > { %8822 = vmatprep.mubr.f32.mxu0 %v2578_v53  ;;  %9979 = vmatpush3.bf16.msra.mxu0 %v9976_v6  ;;  %v7075_v6 = vld [vmem:[%s10923_s26 + $0x120] sm:$0xff]  ;;  %v7076_v53 = vld [vmem:[%s10923_s26 + $0x128] sm:$0xff] }
 0x1c6   : > { %9981 = vmatprep.subr.bf16.mxu0 %v9980_v34  ;;  %v2586_v50 = vmul.f32 %v7107_v57, %v7075_v6  ;;  %v2587_v7 = vmul.f32 %v7108_v62, %v7076_v53  ;;  %v7281_v6 = vld [vmem:[%s13112_s2 + $0x410] sm:$0xff]  ;;  %v7282_v57 = vld [vmem:[%s13112_s2 + $0x418] sm:$0xff] }
 0x1c7   : > { %v7299_v53 = vld [vmem:[%s13114_s4 + $0x98] sm:$0xff]  ;;  %v9992_v62 = vpack.c.bf16 %v7282_v57, %v7281_v6  ;;  %v7220_v6 = vld [vmem:[%s10923_s26 + $0x6a] sm:$0xff] }
 0x1c8   : > { %8823 = vmatmul.mubr.f32.gmra.mrb[12].mxu0 %v2579_v43  ;;  %v7079_v43 = vld [vmem:[%s10923_s26 + $0x150] sm:$0xff] }
 0x1c9   : > { %8825 = vmatprep.mubr.f32.mxu0 %v2580_v52  ;;  %9983 = vmatpush3.bf16.msra.mxu0 %v9980_v34  ;;  %v2588_v34 = vmul.f32 %v7109_v23, %v7077_v4  ;;  %v7111_v52 = vld [vmem:[%s10928_s9 + $0x150] sm:$0xff]  ;;  %v7283_v4 = vld [vmem:[%s13112_s2 + $0x420] sm:$0xff] }
 0x1ca   : > { %9985 = vmatprep.subr.bf16.mxu0 %v9984_v33  ;;  %v2590_v41 = vmul.f32 %v7111_v52, %v7079_v43  ;;  %v7286_v52 = vld [vmem:[%s13112_s2 + $0x438] sm:$0xff]  ;;  %v7252_v57 = vld [vmem:[%s10928_s9 + $0x6a] sm:$0xff] }
 0x1cc   : > { %8826 = vmatmul.mubr.f32.gmra.mrb[14].mxu0 %v2581_v8 }
 0x1cd   : > { %8828 = vmatprep.mubr.f32.mxu0 %v2582_v54  ;;  %9987 = vmatpush3.bf16.msra.mxu0 %v9984_v33  ;;  %v7081_v33 = vld [vmem:[%s10923_s26 + $0x168] sm:$0xff]  ;;  %v7082_v54 = vld [vmem:[%s10923_s26 + $0x170] sm:$0xff] }
 0x1ce   : > { %9989 = vmatprep.subr.bf16.mxu0 %v11956_v25  ;;  %v2592_v8 = vmul.f32 %v7113_v61, %v7081_v33  ;;  %v2593_v17 = vmul.f32 %v7114_v13, %v7082_v54  ;;  %v7289_v33 = vld [vmem:[%s13112_s2 + $0x450] sm:$0xff]  ;;  %v7291_v13 = vld [vmem:[%s13112_s2 + $0x460] sm:$0xff] }
 0x1d0   : > { %8829 = vmatmul.mubr.f32.gmra.mrb[16].mxu0 %v2583_v48  ;;  %v2596_v48 = vmul.f32 %v7117_v30, %v7085_v26  ;;  %v7294_v26 = vld [vmem:[%s13112_s2 + $0x478] sm:$0xff] }
 0x1d1   : > { %8831 = vmatprep.mubr.f32.mxu0 %v2584_v49  ;;  %v7086_v49 = vld [vmem:[%s10923_s26 + $0x1a0] sm:$0xff]  ;;  %v7218_v30 = vld [vmem:[%s10923_s26 + $0x52] sm:$0xff] }
 0x1d2   : > { %v2597_v5 = vmul.f32 %v7118_v21, %v7086_v49  ;;  %v7251_v49 = vld [vmem:[%s10928_s9 + $0x62] sm:$0xff] }
 0x1d4   : > { %8832 = vmatmul.mubr.f32.gmra.mrb[18].mxu0 %v2585_v24  ;;  %v7297_v24 = vld [vmem:[%s13114_s4 + $0x88] sm:$0xff] }
 0x1d5   : > { %8834 = vmatprep.mubr.f32.mxu0 %v2586_v50 }
 0x1d8   : > { %8835 = vmatmul.mubr.f32.gmra.mrb[20].mxu0 %v2587_v7  ;;  %v7284_v7 = vld [vmem:[%s13112_s2 + $0x428] sm:$0xff] }
 0x1d9   : > { %8837 = vmatprep.mubr.f32.mxu0 %v2588_v34  ;;  %v7301_v34 = vld [vmem:[%s13114_s4 + $0xa8] sm:$0xff]  ;;  %v9996_v22 = vpack.c.bf16 %v7284_v7, %v7283_v4  ;;  %v7223_v4 = vld [vmem:[%s10923_s26 + $0x92] sm:$0xff] }
 0x1dc   : > { %8838 = vmatmul.mubr.f32.gmra.mrb[22].mxu0 %v2589_v40  ;;  %v7287_v40 = vld [vmem:[%s13112_s2 + $0x440] sm:$0xff] }
 0x1dd   : > { %8840 = vmatprep.mubr.f32.mxu0 %v2590_v41  ;;  %v10004_v58 = vpack.c.bf16 %v7288_v32, %v7287_v40  ;;  %v7227_v40 = vld [vmem:[%s10923_s26 + $0xc2] sm:$0xff] }
 0x1e0   : > { %8841 = vmatmul.mubr.f32.gmra.mrb[24].mxu0 %v2591_v14  ;;  %v7290_v14 = vld [vmem:[%s13112_s2 + $0x458] sm:$0xff] }
 0x1e1   : > { %8843 = vmatprep.mubr.f32.mxu0 %v2592_v8  ;;  %v10008_v8 = vpack.c.bf16 %v7290_v14, %v7289_v33  ;;  %v7229_v33 = vld [vmem:[%s10923_s26 + $0xda] sm:$0xff] }
 0x1e4   : > { %8844 = vmatmul.mubr.f32.gmra.mrb[26].mxu0 %v2593_v17  ;;  %v7292_v17 = vld [vmem:[%s13112_s2 + $0x468] sm:$0xff] }
 0x1e5   : > { %8846 = vmatprep.mubr.f32.mxu0 %v11567_v28  ;;  %v7296_v28 = vld [vmem:[%s13114_s4 + $0x80] sm:$0xff] }
 0x1e6   : > { %v10020_v50 = vpack.c.bf16 %v7297_v24, %v7296_v28  ;;  %v7221_v28 = vld [vmem:[%s10923_s26 + $0x7a] sm:$0xff] }
 0x1e7   : > { %v7253_v24 = vld [vmem:[%s10928_s9 + $0x7a] sm:$0xff] }
 0x1e8   : > { %8847 = vmatmul.mubr.f32.gmra.mrb[28].mxu0 %v11574_v51  ;;  %v7298_v51 = vld [vmem:[%s13114_s4 + $0x90] sm:$0xff]  ;;  %10021 = vmatprep.subr.bf16.mxu1 %v10020_v50 }
 0x1e9   : > { %8849 = vmatprep.mubr.f32.mxu0 %v2596_v48  ;;  %v10024_v23 = vpack.c.bf16 %v7299_v53, %v7298_v51  ;;  %10023 = vmatpush3.bf16.msra.mxu1 %v10020_v50  ;;  %v7250_v48 = vld [vmem:[%s10928_s9 + $0x52] sm:$0xff]  ;;  %v3311_v51 = vmul.f32 %v7252_v57, %v7220_v6  ;;  %v3312_v50 = vmul.f32 %v7253_v24, %v7221_v28  ;;  %v7222_v53 = vld [vmem:[%s10923_s26 + $0x82] sm:$0xff]  ;;  %v7241_v6 = vld [vmem:[%s10923_s26 + $0x16a] sm:$0xff] }
 0x1ea   : > { %v3309_v21 = vmul.f32 %v7250_v48, %v7218_v30  ;;  %v7239_v30 = vld [vmem:[%s10923_s26 + $0x152] sm:$0xff]  ;;  %v7273_v57 = vld [vmem:[%s10928_s9 + $0x16a] sm:$0xff] }
 0x1eb   : > { %10025 = vmatprep.subr.bf16.mxu1 %v10024_v23  ;;  %v7271_v48 = vld [vmem:[%s10928_s9 + $0x152] sm:$0xff]  ;;  %v3332_v24 = vmul.f32 %v7273_v57, %v7241_v6 }
 0x1ec   : > { %8850 = vmatmul.mubr.f32.gmra.mrb[30].mxu0 %v2597_v5 }
 0x1ed   : > { %8884 = vmatprep.mubr.f32.mxu0 %v11588_v20  ;;  %v7300_v20 = vld [vmem:[%s13114_s4 + $0xa0] sm:$0xff]  ;;  %10027 = vmatpush3.bf16.msra.mxu1 %v10024_v23  ;;  %v7255_v23 = vld [vmem:[%s10928_s9 + $0x92] sm:$0xff] }
 0x1ee   : > { %v10028_v43 = vpack.c.bf16 %v7301_v34, %v7300_v20  ;;  %v3314_v20 = vmul.f32 %v7255_v23, %v7223_v4  ;;  %v7224_v34 = vld [vmem:[%s10923_s26 + $0x9a] sm:$0xff] }
 0x1ef   : > { %v7277_v4 = vld [vmem:[%s10928_s9 + $0x19a] sm:$0xff] }
 0x1f0   : > { %8885 = vmatmul.mubr.f32.vlgmr.msra.gmra.mrb[0].mxu0 %v11600_v37  ;;  %v7302_v37 = vld [vmem:[%s13114_s4 + $0xb0] sm:$0xff]  ;;  %10029 = vmatprep.subr.bf16.mxu1 %v10028_v43 }
 0x1f1   : > { %9991 = vmatpush3.bf16.msra.mxu0 %v11956_v25  ;;  %8887 = vmatprep.mubr.f32.mxu0 %v11603_v38  ;;  %v7303_v38 = vld [vmem:[%s13114_s4 + $0xb8] sm:$0xff]  ;;  %v10000_v25 = vpack.c.bf16 %v7286_v52, %v7285_v45  ;;  %v7225_v45 = vld [vmem:[%s10923_s26 + $0xaa] sm:$0xff] }
 0x1f2   : > { %9993 = vmatprep.subr.bf16.mxu0 %v9992_v62  ;;  %v10032_v41 = vpack.c.bf16 %v7303_v38, %v7302_v37  ;;  %10031 = vmatpush3.bf16.msra.mxu1 %v10028_v43  ;;  %v7257_v43 = vld [vmem:[%s10928_s9 + $0xaa] sm:$0xff]  ;;  %v7226_v38 = vld [vmem:[%s10923_s26 + $0xb2] sm:$0xff] }
 0x1f3   : > { %v3316_v37 = vmul.f32 %v7257_v43, %v7225_v45  ;;  %v7309_v45 = vld [vmem:[%s13114_s4 + $0xe8] sm:$0xff] }
 0x1f4   : > { %8888 = vmatmul.mubr.f32.gmra.mrb[2].mxu0 %v11616_v0  ;;  %v7304_v0 = vld [vmem:[%s13114_s4 + $0xc0] sm:$0xff]  ;;  %10033 = vmatprep.subr.bf16.mxu1 %v10032_v41 }
 0x1f5   : > { %8890 = vmatprep.mubr.f32.mxu0 %v11619_v1  ;;  %9995 = vmatpush3.bf16.msra.mxu0 %v9992_v62  ;;  %v7305_v1 = vld [vmem:[%s13114_s4 + $0xc8] sm:$0xff] }
 0x1f6   : > { %9997 = vmatprep.subr.bf16.mxu0 %v9996_v22  ;;  %v10036_v61 = vpack.c.bf16 %v7305_v1, %v7304_v0  ;;  %10035 = vmatpush3.bf16.msra.mxu1 %v10032_v41  ;;  %v7254_v62 = vld [vmem:[%s10928_s9 + $0x82] sm:$0xff]  ;;  %v7228_v1 = vld [vmem:[%s10923_s26 + $0xca] sm:$0xff] }
 0x1f7   : > { %v3313_v7 = vmul.f32 %v7254_v62, %v7222_v53  ;;  %v7259_v41 = vld [vmem:[%s10928_s9 + $0xc2] sm:$0xff]  ;;  %v7245_v62 = vld [vmem:[%s10923_s26 + $0x19a] sm:$0xff] }
 0x1f8   : > { %8891 = vmatmul.mubr.f32.gmra.mrb[4].mxu0 %v11632_v35  ;;  %v7306_v35 = vld [vmem:[%s13114_s4 + $0xd0] sm:$0xff]  ;;  %10037 = vmatprep.subr.bf16.mxu1 %v10036_v61  ;;  %v3318_v0 = vmul.f32 %v7259_v41, %v7227_v40  ;;  %v3336_v23 = vmul.f32 %v7277_v4, %v7245_v62 }
 0x1f9   : > { %8893 = vmatprep.mubr.f32.mxu0 %v11635_v36  ;;  %9999 = vmatpush3.bf16.msra.mxu0 %v9996_v22  ;;  %v7307_v36 = vld [vmem:[%s13114_s4 + $0xd8] sm:$0xff]  ;;  %v3790_v41 = vld [vmem:[%s13114_s4 + $0x10] sm:$0xff] }
 0x1fa   : > { %10001 = vmatprep.subr.bf16.mxu0 %v10000_v25  ;;  %v10040_v54 = vpack.c.bf16 %v7307_v36, %v7306_v35  ;;  %10039 = vmatpush3.bf16.msra.mxu1 %v10036_v61  ;;  %v7256_v22 = vld [vmem:[%s10928_s9 + $0x9a] sm:$0xff]  ;;  %v7230_v36 = vld [vmem:[%s10923_s26 + $0xe2] sm:$0xff] }
 0x1fb   : > { %v3315_v52 = vmul.f32 %v7256_v22, %v7224_v34  ;;  %v7261_v61 = vld [vmem:[%s10928_s9 + $0xda] sm:$0xff] }
 0x1fc   : > { %8894 = vmatmul.mubr.f32.gmra.mrb[6].mxu0 %v11648_v11  ;;  %v10012_v11 = vpack.c.bf16 %v7292_v17, %v7291_v13  ;;  %10041 = vmatprep.subr.bf16.mxu1 %v10040_v54  ;;  %v3320_v35 = vmul.f32 %v7261_v61, %v7229_v33  ;;  %v7263_v13 = vld [vmem:[%s10928_s9 + $0xf2] sm:$0xff]  ;;  %v7308_v22 = vld [vmem:[%s13114_s4 + $0xe0] sm:$0xff] }
 0x1fd   : > { %8896 = vmatprep.mubr.f32.mxu0 %v11651_v12  ;;  %10003 = vmatpush3.bf16.msra.mxu0 %v10000_v25  ;;  %v7293_v12 = vld [vmem:[%s13112_s2 + $0x470] sm:$0xff]  ;;  %v10044_v43 = vpack.c.bf16 %v7309_v45, %v7308_v22 }
 0x1fe   : > { %10005 = vmatprep.subr.bf16.mxu0 %v10004_v58  ;;  %10043 = vmatpush3.bf16.msra.mxu1 %v10040_v54  ;;  %v7258_v25 = vld [vmem:[%s10928_s9 + $0xb2] sm:$0xff] }
 0x1ff   : > { %v3317_v32 = vmul.f32 %v7258_v25, %v7226_v38  ;;  %v7231_v54 = vld [vmem:[%s10923_s26 + $0xf2] sm:$0xff]  ;;  %10045 = vmatprep.subr.bf16.mxu1 %v10044_v43  ;;  %v3788_v38 = vld [vmem:[%s13114_s4] sm:$0xff]  ;;  %v3789_v25 = vld [vmem:[%s13114_s4 + $0x8] sm:$0xff] }
 0x200   : > { %8897 = vmatmul.mubr.f32.gmra.mrb[8].mxu0 %v11664_v63  ;;  %v10016_v63 = vpack.c.bf16 %v7294_v26, %v7293_v12  ;;  %v7232_v12 = vld [vmem:[%s10923_s26 + $0xfa] sm:$0xff]  ;;  %v10052_v40 = vpack.c.bf16 %v3789_v25, %v3788_v38  ;;  %v3794_v61 = vld [vmem:[%s13114_s4 + $0x30] sm:$0xff] }
 0x201   : > { %8899 = vmatprep.mubr.f32.mxu0 %v11667_v2  ;;  %10007 = vmatpush3.bf16.msra.mxu0 %v10004_v58  ;;  %v13175_v2 = vld [vmem:[#allocation9_spill] sm:$0xff]  ;;  %v7264_v26 = vld [vmem:[%s10928_s9 + $0xfa] sm:$0xff] }
 0x202   : > { %10009 = vmatprep.subr.bf16.mxu0 %v10008_v8  ;;  %v7260_v58 = vld [vmem:[%s10928_s9 + $0xca] sm:$0xff]  ;;  %10047 = vmatpush3.bf16.msra.mxu1 %v10044_v43 }
 0x203   : > { %v3319_v14 = vmul.f32 %v7260_v58, %v7228_v1  ;;  %v3792_v1 = vld [vmem:[%s13114_s4 + $0x20] sm:$0xff]  ;;  %v3793_v58 = vld [vmem:[%s13114_s4 + $0x28] sm:$0xff] }
 0x204   : > { %8900 = vmatmul.mubr.f32.gmra.mrb[10].mxu0 %v11680_v9  ;;  %v13176_v9 = vld [vmem:[#allocation10_spill] sm:$0xff]  ;;  %v10060_v33 = vpack.c.bf16 %v3793_v58, %v3792_v1 }
 0x205   : > { %8902 = vmatprep.mubr.f32.mxu0 %v11683_v10  ;;  %10011 = vmatpush3.bf16.msra.mxu0 %v10008_v8  ;;  %v7165_v10 = vld [vmem:[%s10923_s26 + $0x199] sm:$0xff]  ;;  %v7262_v8 = vld [vmem:[%s10928_s9 + $0xe2] sm:$0xff] }
 0x206   : > { %10013 = vmatprep.subr.bf16.mxu0 %v10012_v11  ;;  %v3321_v17 = vmul.f32 %v7262_v8, %v7230_v36  ;;  %v3796_v36 = vld [vmem:[%s13114_s4 + $0x40] sm:$0xff]  ;;  %v3797_v8 = vld [vmem:[%s13114_s4 + $0x48] sm:$0xff] }
 0x208   : > { %8903 = vmatmul.mubr.f32.gmra.mrb[12].mxu0 %v11696_v59  ;;  %v7197_v59 = vld [vmem:[%s10928_s9 + $0x199] sm:$0xff] }
 0x209   : > { %8905 = vmatprep.mubr.f32.mxu0 %v11699_v60  ;;  %10015 = vmatpush3.bf16.msra.mxu0 %v10012_v11  ;;  %v2966_v60 = vmul.f32 %v7197_v59, %v7165_v10  ;;  %v3322_v11 = vmul.f32 %v7263_v13, %v7231_v54  ;;  %v7234_v59 = vld [vmem:[%s10923_s26 + $0x112] sm:$0xff]  ;;  %v10068_v54 = vpack.c.bf16 %v3797_v8, %v3796_v36 }
 0x20a   : > { %10017 = vmatprep.subr.bf16.mxu0 %v10016_v63  ;;  %v3798_v13 = vld [vmem:[%s13114_s4 + $0x50] sm:$0xff] }
 0x20c   : > { %8906 = vmatmul.mubr.f32.gmra.mrb[14].mxu0 %v11708_v31  ;;  %v7166_v31 = vld [vmem:[%s10923_s26 + $0x1a1] sm:$0xff] }
 0x20d   : > { %8908 = vmatprep.mubr.f32.mxu0 %v11711_v15  ;;  %10019 = vmatpush3.bf16.msra.mxu0 %v10016_v63  ;;  %v7198_v15 = vld [vmem:[%s10928_s9 + $0x1a1] sm:$0xff]  ;;  %v7233_v63 = vld [vmem:[%s10923_s26 + $0x10a] sm:$0xff] }
 0x210   : > { %8909 = vmatmul.mubr.f32.gmra.mrb[16].mxu0 %v11719_v16  ;;  %v7215_v16 = vld [vmem:[%s10923_s26 + $0x32] sm:$0xff] }
 0x211   : > { %8911 = vmatprep.mubr.f32.mxu0 %v11722_v55  ;;  %v7247_v55 = vld [vmem:[%s10928_s9 + $0x32] sm:$0xff] }
 0x214   : > { %8912 = vmatmul.mubr.f32.gmra.mrb[18].mxu0 %v11729_v18  ;;  %v2967_v18 = vmul.f32 %v7198_v15, %v7166_v31  ;;  %v7235_v31 = vld [vmem:[%s10923_s26 + $0x122] sm:$0xff] }
 0x215   : > { %8914 = vmatprep.mubr.f32.mxu0 %v11732_v19  ;;  %v3306_v19 = vmul.f32 %v7247_v55, %v7215_v16  ;;  %v7267_v15 = vld [vmem:[%s10928_s9 + $0x122] sm:$0xff] }
 0x216   : > { %v3326_v55 = vmul.f32 %v7267_v15, %v7235_v31  ;;  %v12230_v15 = vld [vmem:[%s13113_s3] ss:$0 sm:$0xff] }
 0x218   : > { %8915 = vmatmul.mubr.f32.gmra.mrb[20].mxu0 %v11739_v3  ;;  %v7216_v3 = vld [vmem:[%s10923_s26 + $0x3a] sm:$0xff] }
 0x219   : > { %8917 = vmatprep.mubr.f32.mxu0 %v13175_v2  ;;  %v7265_v2 = vld [vmem:[%s10928_s9 + $0x10a] sm:$0xff] }
 0x21a   : > { %v3324_v10 = vmul.f32 %v7265_v2, %v7233_v63  ;;  %v3802_v2 = vld [vmem:[%s13114_s4 + $0x70] sm:$0xff] }
 0x21c   : > { %8918 = vmatmul.mubr.f32.gmra.mrb[22].mxu0 %v13176_v9  ;;  %v3323_v9 = vmul.f32 %v7264_v26, %v7232_v12  ;;  %v3800_v12 = vld [vmem:[%s13114_s4 + $0x60] sm:$0xff]  ;;  %v3801_v26 = vld [vmem:[%s13114_s4 + $0x68] sm:$0xff] }
 0x21d   : > { %8920 = vmatprep.mubr.f32.mxu0 %v11752_v47  ;;  %v7248_v47 = vld [vmem:[%s10928_s9 + $0x3a] sm:$0xff]  ;;  %v10076_v63 = vpack.c.bf16 %v3801_v26, %v3800_v12 }
 0x220   : > { %8921 = vmatmul.mubr.f32.gmra.mrb[24].mxu0 %v11759_v27  ;;  %v7217_v27 = vld [vmem:[%s10923_s26 + $0x4a] sm:$0xff] }
 0x221   : > { %8923 = vmatprep.mubr.f32.mxu0 %v11762_v44  ;;  %v7249_v44 = vld [vmem:[%s10928_s9 + $0x4a] sm:$0xff] }
 0x224   : > { %8924 = vmatmul.mubr.f32.gmra.mrb[26].mxu0 %v11769_v39  ;;  %v3307_v39 = vmul.f32 %v7248_v47, %v7216_v3  ;;  %v7237_v3 = vld [vmem:[%s10923_s26 + $0x13a] sm:$0xff] }
 0x225   : > { %8926 = vmatprep.mubr.f32.mxu0 %v11772_v29  ;;  %v3308_v29 = vmul.f32 %v7249_v44, %v7217_v27  ;;  %v7269_v47 = vld [vmem:[%s10928_s9 + $0x13a] sm:$0xff] }
 0x226   : > { %v3328_v44 = vmul.f32 %v7269_v47, %v7237_v3 }
 0x228   : > { %8927 = vmatmul.mubr.f32.gmra.mrb[28].mxu0 %v11777_v56  ;;  %v7219_v56 = vld [vmem:[%s10923_s26 + $0x62] sm:$0xff] }
 0x229   : > { %8929 = vmatprep.mubr.f32.mxu0 %v2966_v60  ;;  %v3310_v5 = vmul.f32 %v7251_v49, %v7219_v56  ;;  %v7266_v60 = vld [vmem:[%s10928_s9 + $0x112] sm:$0xff]  ;;  %v3330_v49 = vmul.f32 %v7271_v48, %v7239_v30 }
 0x22a   : > { %v3325_v16 = vmul.f32 %v7266_v60, %v7234_v59  ;;  %v7312_v59 = vld [vmem:[%s13114_s4 + $0x100] sm:$0xff]  ;;  %v7313_v60 = vld [vmem:[%s13114_s4 + $0x108] sm:$0xff] }
 0x22b   : > { %v12224_v31 = vpack.c.bf16 %v7313_v60, %v7312_v59 }
 0x22c   : > { %8930 = vmatmul.mubr.f32.gmra.mrb[30].mxu0 %v2967_v18  ;;  %v7236_v18 = vld [vmem:[%s10923_s26 + $0x12a] sm:$0xff] }
 0x22d   : > { %8964 = vmatprep.mubr.f32.mxu0 %v3306_v19  ;;  %v7268_v19 = vld [vmem:[%s10928_s9 + $0x12a] sm:$0xff] }
 0x22e   : > { %v3327_v27 = vmul.f32 %v7268_v19, %v7236_v18 }
 0x230   : > { %8965 = vmatmul.mubr.f32.vlgmr.msra.gmra.mrb[0].mxu0 %v3307_v39  ;;  %v7238_v39 = vld [vmem:[%s10923_s26 + $0x142] sm:$0xff] }
 0x231   : > { %8967 = vmatprep.mubr.f32.mxu0 %v3308_v29  ;;  %v7270_v29 = vld [vmem:[%s10928_s9 + $0x142] sm:$0xff] }
 0x232   : > { %v3329_v56 = vmul.f32 %v7270_v29, %v7238_v39 }
 0x234   : > { %8968 = vmatmul.mubr.f32.gmra.mrb[2].mxu0 %v3309_v21  ;;  %v7240_v21 = vld [vmem:[%s10923_s26 + $0x15a] sm:$0xff] }
 0x235   : > { %8970 = vmatprep.mubr.f32.mxu0 %v3310_v5  ;;  %v7272_v5 = vld [vmem:[%s10928_s9 + $0x15a] sm:$0xff] }
 0x236   : > { %v3331_v28 = vmul.f32 %v7272_v5, %v7240_v21 }
 0x238   : > { %8971 = vmatmul.mubr.f32.gmra.mrb[4].mxu0 %v3311_v51  ;;  %v7242_v51 = vld [vmem:[%s10923_s26 + $0x172] sm:$0xff] }
 0x239   : > { %8973 = vmatprep.mubr.f32.mxu0 %v3312_v50  ;;  %v7274_v50 = vld [vmem:[%s10928_s9 + $0x172] sm:$0xff] }
 0x23a   : > { %v3333_v53 = vmul.f32 %v7274_v50, %v7242_v51 }
 0x23c   : > { %8974 = vmatmul.mubr.f32.gmra.mrb[6].mxu0 %v3313_v7  ;;  %v7246_v7 = vld [vmem:[%s10923_s26 + $0x1a2] sm:$0xff] }
 0x23d   : > { %8976 = vmatprep.mubr.f32.mxu0 %v3314_v20  ;;  %v7278_v20 = vld [vmem:[%s10928_s9 + $0x1a2] sm:$0xff] }
 0x23e   : > { %v3337_v34 = vmul.f32 %v7278_v20, %v7246_v7 }
 0x240   : > { %8977 = vmatmul.mubr.f32.gmra.mrb[8].mxu0 %v3315_v52 }
 0x241   : > { %8979 = vmatprep.mubr.f32.mxu0 %v3316_v37  ;;  %v10839_v37 = vmov 0.0  }
 0x242   : > { %3651 = vst [vmem:[#allocation2] sm:$0xff] %v10839_v37  ;;  %3652 = vst [vmem:[#allocation2 + $0x8] sm:$0xff] %v10839_v37  ;;  %9044 = vmatprep.mubr.f32.mxu1 %v10839_v37 }
 0x243   : > { %3653 = vst [vmem:[#allocation2 + $0x10] sm:$0xff] %v10839_v37  ;;  %3654 = vst [vmem:[#allocation2 + $0x18] sm:$0xff] %v10839_v37 }
 0x244   : > { %8980 = vmatmul.mubr.f32.gmra.mrb[10].mxu0 %v3317_v32  ;;  %3655 = vst [vmem:[#allocation2 + $0x20] sm:$0xff] %v10839_v37  ;;  %3658 = vst [vmem:[#allocation2 + $0x38] sm:$0xff] %v10839_v37  ;;  %v3791_v32 = vld [vmem:[%s13114_s4 + $0x18] sm:$0xff] }
 0x245   : > { %8982 = vmatprep.mubr.f32.mxu0 %v3318_v0  ;;  %3659 = vst [vmem:[#allocation2 + $0x40] sm:$0xff] %v10839_v37  ;;  %3662 = vst [vmem:[#allocation2 + $0x58] sm:$0xff] %v10839_v37  ;;  %v10056_v0 = vpack.c.bf16 %v3791_v32, %v3790_v41 }
 0x246   : > { %3663 = vst [vmem:[#allocation2 + $0x60] sm:$0xff] %v10839_v37  ;;  %3666 = vst [vmem:[#allocation2 + $0x78] sm:$0xff] %v10839_v37 }
 0x247   : > { %3667 = vst [vmem:[#allocation2 + $0x80] sm:$0xff] %v10839_v37  ;;  %3670 = vst [vmem:[#allocation2 + $0x98] sm:$0xff] %v10839_v37 }
 0x248   : > { %8983 = vmatmul.mubr.f32.gmra.mrb[12].mxu0 %v3319_v14  ;;  %3671 = vst [vmem:[#allocation2 + $0xa0] sm:$0xff] %v10839_v37  ;;  %3674 = vst [vmem:[#allocation2 + $0xb8] sm:$0xff] %v10839_v37  ;;  %v3795_v14 = vld [vmem:[%s13114_s4 + $0x38] sm:$0xff] }
 0x249   : > { %8985 = vmatprep.mubr.f32.mxu0 %v3320_v35  ;;  %3675 = vst [vmem:[#allocation2 + $0xc0] sm:$0xff] %v10839_v37  ;;  %3678 = vst [vmem:[#allocation2 + $0xd8] sm:$0xff] %v10839_v37  ;;  %v10064_v35 = vpack.c.bf16 %v3795_v14, %v3794_v61  ;;  %v3756_v59 = vld [vmem:[#allocation2 + $0x7] sm:$0xff] }
 0x24a   : > { %3679 = vst [vmem:[#allocation2 + $0xe0] sm:$0xff] %v10839_v37  ;;  %3682 = vst [vmem:[#allocation2 + $0xf8] sm:$0xff] %v10839_v37 }
 0x24b   : > { %3683 = vst [vmem:[#allocation2 + $0x100] sm:$0xff] %v10839_v37  ;;  %3686 = vst [vmem:[#allocation2 + $0x118] sm:$0xff] %v10839_v37 }
 0x24c   : > { %8986 = vmatmul.mubr.f32.gmra.mrb[14].mxu0 %v3321_v17  ;;  %3687 = vst [vmem:[#allocation2 + $0x120] sm:$0xff] %v10839_v37  ;;  %3690 = vst [vmem:[#allocation2 + $0x138] sm:$0xff] %v10839_v37  ;;  %v3799_v17 = vld [vmem:[%s13114_s4 + $0x58] sm:$0xff] }
 0x24d   : > { %8988 = vmatprep.mubr.f32.mxu0 %v3322_v11  ;;  %3691 = vst [vmem:[#allocation2 + $0x140] sm:$0xff] %v10839_v37  ;;  %3694 = vst [vmem:[#allocation2 + $0x158] sm:$0xff] %v10839_v37  ;;  %v10072_v11 = vpack.c.bf16 %v3799_v17, %v3798_v13 }
 0x24e   : > { %3695 = vst [vmem:[#allocation2 + $0x160] sm:$0xff] %v10839_v37  ;;  %3698 = vst [vmem:[#allocation2 + $0x178] sm:$0xff] %v10839_v37 }
 0x24f   : > { %3699 = vst [vmem:[#allocation2 + $0x180] sm:$0xff] %v10839_v37  ;;  %3702 = vst [vmem:[#allocation2 + $0x198] sm:$0xff] %v10839_v37 }
 0x250   : > { %8989 = vmatmul.mubr.f32.gmra.mrb[16].mxu0 %v3323_v9  ;;  %3703 = vst [vmem:[#allocation2 + $0x1a0] sm:$0xff] %v10839_v37  ;;  %3706 = vst [vmem:[#allocation2 + $0x1b8] sm:$0xff] %v10839_v37  ;;  %v3803_v9 = vld [vmem:[%s13114_s4 + $0x78] sm:$0xff] }
 0x251   : > { %8991 = vmatprep.mubr.f32.mxu0 %v3324_v10  ;;  %3707 = vst [vmem:[#allocation2 + $0x1c0] sm:$0xff] %v10839_v37  ;;  %3710 = vst [vmem:[#allocation2 + $0x1d8] sm:$0xff] %v10839_v37  ;;  %v10080_v10 = vpack.c.bf16 %v3803_v9, %v3802_v2 }
 0x252   : > { %3711 = vst [vmem:[#allocation2 + $0x1e0] sm:$0xff] %v10839_v37  ;;  %3714 = vst [vmem:[#allocation2 + $0x1f8] sm:$0xff] %v10839_v37 }
 0x253   : > { %3715 = vst [vmem:[#allocation2 + $0x200] sm:$0xff] %v10839_v37  ;;  %3718 = vst [vmem:[#allocation2 + $0x218] sm:$0xff] %v10839_v37 }
 0x254   : > { %8992 = vmatmul.mubr.f32.gmra.mrb[18].mxu0 %v3325_v16  ;;  %3719 = vst [vmem:[#allocation2 + $0x220] sm:$0xff] %v10839_v37  ;;  %3720 = vst [vmem:[#allocation2 + $0x228] sm:$0xff] %v10839_v37 }
 0x255   : > { %8994 = vmatprep.mubr.f32.mxu0 %v3326_v55  ;;  %3721 = vst [vmem:[#allocation2 + $0x230] sm:$0xff] %v10839_v37  ;;  %3722 = vst [vmem:[#allocation2 + $0x238] sm:$0xff] %v10839_v37 }
 0x258   : > { %8995 = vmatmul.mubr.f32.gmra.mrb[20].mxu0 %v3327_v27 }
 0x259   : > { %8997 = vmatprep.mubr.f32.mxu0 %v3328_v44 }
 0x25c   : > { %8998 = vmatmul.mubr.f32.gmra.mrb[22].mxu0 %v3329_v56 }
 0x25d   : > { %9000 = vmatprep.mubr.f32.mxu0 %v3330_v49 }
 0x260   : > { %9001 = vmatmul.mubr.f32.gmra.mrb[24].mxu0 %v3331_v28 }
 0x261   : > { %9003 = vmatprep.mubr.f32.mxu0 %v3332_v24 }
 0x264   : > { %9004 = vmatmul.mubr.f32.gmra.mrb[26].mxu0 %v3333_v53 }
 0x265   : > { %9006 = vmatprep.mubr.f32.mxu0 %v11861_v46  ;;  %v7310_v46 = vld [vmem:[%s13114_s4 + $0xf0] sm:$0xff] }
 0x268   : > { %9007 = vmatmul.mubr.f32.gmra.mrb[28].mxu0 %v11868_v42  ;;  %v7311_v42 = vld [vmem:[%s13114_s4 + $0xf8] sm:$0xff] }
 0x269   : > { %9009 = vmatprep.mubr.f32.mxu0 %v3336_v23  ;;  %v10048_v52 = vpack.c.bf16 %v7311_v42, %v7310_v46 }
 0x26b   : > { %10049 = vmatprep.subr.bf16.mxu1 %v10048_v52 }
 0x26c   : > { %9010 = vmatmul.mubr.f32.gmra.mrb[30].mxu0 %v3337_v34  ;;  %10051 = vmatpush3.bf16.msra.mxu1 %v10048_v52 }
 0x26d   : > { %10053 = vmatprep.subr.bf16.mxu1 %v10052_v40 }
 0x26f   : > { %9045 = vmatmul.mubr.f32.vlgmr.msra.gmra.mrb[0].mxu1 %v10839_v37 }
 0x270   : > { %10055 = vmatpush3.bf16.msra.mxu1 %v10052_v40 }
 0x271   : > { %10057 = vmatprep.subr.bf16.mxu1 %v10056_v0 }
 0x274   : > { %10059 = vmatpush3.bf16.msra.mxu1 %v10056_v0 }
 0x275   : > { %10061 = vmatprep.subr.bf16.mxu1 %v10060_v33 }
 0x278   : > { %10063 = vmatpush3.bf16.msra.mxu1 %v10060_v33 }
 0x279   : > { %10065 = vmatprep.subr.bf16.mxu1 %v10064_v35 }
 0x27c   : > { %10067 = vmatpush3.bf16.msra.mxu1 %v10064_v35 }
 0x27d   : > { %10069 = vmatprep.subr.bf16.mxu1 %v10068_v54 }
 0x280   : > { %10071 = vmatpush3.bf16.msra.mxu1 %v10068_v54 }
 0x281   : > { %10073 = vmatprep.subr.bf16.mxu1 %v10072_v11 }
 0x284   : > { %10075 = vmatpush3.bf16.msra.mxu1 %v10072_v11 }
 0x285   : > { %10077 = vmatprep.subr.bf16.mxu1 %v10076_v63 }
 0x288   : > { %10079 = vmatpush3.bf16.msra.mxu1 %v10076_v63 }
 0x289   : > { %10081 = vmatprep.subr.bf16.mxu1 %v10080_v10 }
 0x28c   : > { %10083 = vmatpush3.bf16.msra.mxu1 %v10080_v10 }
 0x28d   : > { %10085 = vmatprep.subr.bf16.mxu1 %v12224_v31 }
 0x303   : > { %v8966_v16 = vpop.f32.mrb[0].mxu0 }
 0x304   : > { %v3620_v55 = vadd.f32 %v8966_v16, %v12230_v15  ;;  %v3421_v18 = vpop.f32.mrb[1].mxu0  ;;  %v7314_v16 = vld [vmem:[%s13114_s4 + $0x110] sm:$0xff] }
 0x305   : > { %v3619_v19 = vadd.f32 %v12230_v15, %v3421_v18 }
 0x306   : > { %3725 = vst [vmem:[#allocation2 + $0x30] sm:$0xff] %v3620_v55 }
 0x307   : > { %3724 = vst [vmem:[#allocation2 + $0x28] sm:$0xff] %v3619_v19  ;;  %v8969_v3 = vpop.f32.mrb[2].mxu0  ;;  %9047 = vmatprep.mubr.f32.mxu1 %v3619_v19 }
 0x308   : > { %v3622_v47 = vadd.f32 %v8969_v3, %v12230_v15  ;;  %v3431_v27 = vpop.f32.mrb[3].mxu0  ;;  %9048 = vmatmul.mubr.f32.gmra.mrb[2].mxu1 %v3620_v55  ;;  %v7315_v55 = vld [vmem:[%s13114_s4 + $0x118] sm:$0xff] }
 0x309   : > { %v3621_v44 = vadd.f32 %v12230_v15, %v3431_v27  ;;  %v10088_v27 = vpack.c.bf16 %v7315_v55, %v7314_v16 }
 0x30a   : > { %3727 = vst [vmem:[#allocation2 + $0x50] sm:$0xff] %v3622_v47 }
 0x30b   : > { %3726 = vst [vmem:[#allocation2 + $0x48] sm:$0xff] %v3621_v44  ;;  %v8972_v39 = vpop.f32.mrb[4].mxu0  ;;  %9050 = vmatprep.mubr.f32.mxu1 %v3621_v44  ;;  %v7316_v44 = vld [vmem:[%s13114_s4 + $0x120] sm:$0xff] }
 0x30c   : > { %v3624_v29 = vadd.f32 %v8972_v39, %v12230_v15  ;;  %v3441_v30 = vpop.f32.mrb[5].mxu0  ;;  %9051 = vmatmul.mubr.f32.gmra.mrb[4].mxu1 %v3622_v47  ;;  %v3757_v47 = vld [vmem:[#allocation2 + $0xf] sm:$0xff] }
 0x30d   : > { %v12238_v48 = vadd.f32 %v12230_v15, %v3441_v30  ;;  %v7317_v39 = vld [vmem:[%s13114_s4 + $0x128] sm:$0xff] }
 0x30e   : > { %3729 = vst [vmem:[#allocation2 + $0x70] sm:$0xff] %v3624_v29  ;;  %v12386_v30 = vld [vmem:[#allocation2 + $0x2f] sm:$0xff] }
 0x30f   : > { %3728 = vst [vmem:[#allocation2 + $0x68] sm:$0xff] %v12238_v48  ;;  %v8975_v56 = vpop.f32.mrb[6].mxu0  ;;  %9053 = vmatprep.mubr.f32.mxu1 %v12238_v48 }
 0x310   : > { %v12243_v49 = vadd.f32 %v8975_v56, %v12230_v15  ;;  %v3451_v21 = vpop.f32.mrb[7].mxu0  ;;  %9054 = vmatmul.mubr.f32.gmra.mrb[6].mxu1 %v3624_v29  ;;  %v12382_v29 = vld [vmem:[#allocation2 + $0x27] sm:$0xff]  ;;  %v7318_v56 = vld [vmem:[%s13114_s4 + $0x130] sm:$0xff] }
 0x311   : > { %v12246_v5 = vadd.f32 %v12230_v15, %v3451_v21  ;;  %v7319_v21 = vld [vmem:[%s13114_s4 + $0x138] sm:$0xff] }
 0x312   : > { %3731 = vst [vmem:[#allocation2 + $0x90] sm:$0xff] %v12243_v49 }
 0x313   : > { %3730 = vst [vmem:[#allocation2 + $0x88] sm:$0xff] %v12246_v5  ;;  %v8978_v6 = vpop.f32.mrb[8].mxu0  ;;  %9056 = vmatprep.mubr.f32.mxu1 %v12246_v5 }
 0x314   : > { %v12252_v57 = vadd.f32 %v8978_v6, %v12230_v15  ;;  %v3461_v28 = vpop.f32.mrb[9].mxu0  ;;  %9057 = vmatmul.mubr.f32.gmra.mrb[8].mxu1 %v12243_v49  ;;  %v12395_v6 = vld [vmem:[#allocation2 + $0x47] sm:$0xff] }
 0x315   : > { %v12256_v24 = vadd.f32 %v12230_v15, %v3461_v28  ;;  %v12398_v28 = vld [vmem:[#allocation2 + $0x4f] sm:$0xff] }
 0x316   : > { %3733 = vst [vmem:[#allocation2 + $0xb0] sm:$0xff] %v12252_v57 }
 0x317   : > { %3732 = vst [vmem:[#allocation2 + $0xa8] sm:$0xff] %v12256_v24  ;;  %v8981_v51 = vpop.f32.mrb[10].mxu0  ;;  %9059 = vmatprep.mubr.f32.mxu1 %v12256_v24 }
 0x318   : > { %v12262_v50 = vadd.f32 %v8981_v51, %v12230_v15  ;;  %v3471_v53 = vpop.f32.mrb[11].mxu0  ;;  %9060 = vmatmul.mubr.f32.gmra.mrb[10].mxu1 %v12252_v57  ;;  %v7320_v51 = vld [vmem:[%s13114_s4 + $0x140] sm:$0xff] }
 0x319   : > { %v12266_v62 = vadd.f32 %v12230_v15, %v3471_v53  ;;  %v7321_v53 = vld [vmem:[%s13114_s4 + $0x148] sm:$0xff] }
 0x31a   : > { %3735 = vst [vmem:[#allocation2 + $0xd0] sm:$0xff] %v12262_v50 }
 0x31b   : > { %3734 = vst [vmem:[#allocation2 + $0xc8] sm:$0xff] %v12266_v62  ;;  %v8984_v4 = vpop.f32.mrb[12].mxu0  ;;  %9062 = vmatprep.mubr.f32.mxu1 %v12266_v62 }
 0x31c   : > { %v12272_v23 = vadd.f32 %v8984_v4, %v12230_v15  ;;  %v3481_v7 = vpop.f32.mrb[13].mxu0  ;;  %9063 = vmatmul.mubr.f32.gmra.mrb[12].mxu1 %v12262_v50  ;;  %v12407_v4 = vld [vmem:[#allocation2 + $0x67] sm:$0xff] }
 0x31d   : > { %v12276_v20 = vadd.f32 %v12230_v15, %v3481_v7  ;;  %v10100_v7 = vpack.c.bf16 %v7321_v53, %v7320_v51 }
 0x31e   : > { %3737 = vst [vmem:[#allocation2 + $0xf0] sm:$0xff] %v12272_v23 }
 0x31f   : > { %3736 = vst [vmem:[#allocation2 + $0xe8] sm:$0xff] %v12276_v20  ;;  %v8987_v34 = vpop.f32.mrb[14].mxu0  ;;  %9065 = vmatprep.mubr.f32.mxu1 %v12276_v20 }
 0x320   : > { %v12282_v22 = vadd.f32 %v8987_v34, %v12230_v15  ;;  %v3491_v45 = vpop.f32.mrb[15].mxu0  ;;  %9066 = vmatmul.mubr.f32.gmra.mrb[14].mxu1 %v12272_v23  ;;  %v12410_v34 = vld [vmem:[#allocation2 + $0x6f] sm:$0xff] }
 0x321   : > { %v12286_v43 = vadd.f32 %v12230_v15, %v3491_v45  ;;  %v7322_v45 = vld [vmem:[%s13114_s4 + $0x150] sm:$0xff] }
 0x322   : > { %3739 = vst [vmem:[#allocation2 + $0x110] sm:$0xff] %v12282_v22 }
 0x323   : > { %3738 = vst [vmem:[#allocation2 + $0x108] sm:$0xff] %v12286_v43  ;;  %v8990_v46 = vpop.f32.mrb[16].mxu0  ;;  %9068 = vmatprep.mubr.f32.mxu1 %v12286_v43 }
 0x324   : > { %v12292_v42 = vadd.f32 %v8990_v46, %v12230_v15  ;;  %v3501_v52 = vpop.f32.mrb[17].mxu0  ;;  %9069 = vmatmul.mubr.f32.gmra.mrb[16].mxu1 %v12282_v22  ;;  %v7323_v46 = vld [vmem:[%s13114_s4 + $0x158] sm:$0xff] }
 0x325   : > { %v12296_v37 = vadd.f32 %v12230_v15, %v3501_v52  ;;  %v12419_v52 = vld [vmem:[#allocation2 + $0x87] sm:$0xff] }
 0x326   : > { %3741 = vst [vmem:[#allocation2 + $0x130] sm:$0xff] %v12292_v42  ;;  %v12455_v16 = vld [vmem:[#allocation2 + $0xe7] sm:$0xff] }
 0x327   : > { %3740 = vst [vmem:[#allocation2 + $0x128] sm:$0xff] %v12296_v37  ;;  %v8993_v38 = vpop.f32.mrb[18].mxu0  ;;  %9071 = vmatprep.mubr.f32.mxu1 %v12296_v37 }
 0x328   : > { %v12302_v25 = vadd.f32 %v8993_v38, %v12230_v15  ;;  %v3511_v40 = vpop.f32.mrb[19].mxu0  ;;  %9072 = vmatmul.mubr.f32.gmra.mrb[18].mxu1 %v12292_v42  ;;  %v10104_v38 = vpack.c.bf16 %v7323_v46, %v7322_v45 }
 0x329   : > { %v12306_v41 = vadd.f32 %v12230_v15, %v3511_v40  ;;  %v12422_v40 = vld [vmem:[#allocation2 + $0x8f] sm:$0xff] }
 0x32a   : > { %3743 = vst [vmem:[#allocation2 + $0x150] sm:$0xff] %v12302_v25 }
 0x32b   : > { %3742 = vst [vmem:[#allocation2 + $0x148] sm:$0xff] %v12306_v41  ;;  %v8996_v32 = vpop.f32.mrb[20].mxu0  ;;  %9074 = vmatprep.mubr.f32.mxu1 %v12306_v41 }
 0x32c   : > { %v12312_v0 = vadd.f32 %v8996_v32, %v12230_v15  ;;  %v3521_v1 = vpop.f32.mrb[21].mxu0  ;;  %9075 = vmatmul.mubr.f32.gmra.mrb[20].mxu1 %v12302_v25  ;;  %v7324_v32 = vld [vmem:[%s13114_s4 + $0x160] sm:$0xff] }
 0x32d   : > { %v12316_v58 = vadd.f32 %v12230_v15, %v3521_v1  ;;  %v7325_v1 = vld [vmem:[%s13114_s4 + $0x168] sm:$0xff] }
 0x32e   : > { %3745 = vst [vmem:[#allocation2 + $0x170] sm:$0xff] %v12312_v0 }
 0x32f   : > { %3744 = vst [vmem:[#allocation2 + $0x168] sm:$0xff] %v12316_v58  ;;  %v8999_v33 = vpop.f32.mrb[22].mxu0  ;;  %9077 = vmatprep.mubr.f32.mxu1 %v12316_v58 }
 0x330   : > { %v12322_v61 = vadd.f32 %v8999_v33, %v12230_v15  ;;  %v3531_v14 = vpop.f32.mrb[23].mxu0  ;;  %9078 = vmatmul.mubr.f32.gmra.mrb[22].mxu1 %v12312_v0  ;;  %v12431_v33 = vld [vmem:[#allocation2 + $0xa7] sm:$0xff] }
 0x331   : > { %v12326_v35 = vadd.f32 %v12230_v15, %v3531_v14  ;;  %v10108_v14 = vpack.c.bf16 %v7325_v1, %v7324_v32  ;;  %v4303_v1 = vld [vmem:[#allocation2 + $0x9] sm:$0xff] }
 0x332   : > { %3747 = vst [vmem:[#allocation2 + $0x190] sm:$0xff] %v12322_v61 }
 0x333   : > { %3746 = vst [vmem:[#allocation2 + $0x188] sm:$0xff] %v12326_v35  ;;  %v9002_v36 = vpop.f32.mrb[24].mxu0  ;;  %9080 = vmatprep.mubr.f32.mxu1 %v12326_v35 }
 0x334   : > { %v12332_v8 = vadd.f32 %v9002_v36, %v12230_v15  ;;  %v3541_v54 = vpop.f32.mrb[25].mxu0  ;;  %9081 = vmatmul.mubr.f32.gmra.mrb[24].mxu1 %v12322_v61  ;;  %v12434_v36 = vld [vmem:[#allocation2 + $0xaf] sm:$0xff] }
 0x335   : > { %v12336_v13 = vadd.f32 %v12230_v15, %v3541_v54  ;;  %v7326_v54 = vld [vmem:[%s13114_s4 + $0x170] sm:$0xff] }
 0x336   : > { %3749 = vst [vmem:[#allocation2 + $0x1b0] sm:$0xff] %v12332_v8 }
 0x337   : > { %3748 = vst [vmem:[#allocation2 + $0x1a8] sm:$0xff] %v12336_v13  ;;  %v9005_v17 = vpop.f32.mrb[26].mxu0  ;;  %9083 = vmatprep.mubr.f32.mxu1 %v12336_v13 }
 0x338   : > { %v12342_v11 = vadd.f32 %v9005_v17, %v12230_v15  ;;  %v3551_v12 = vpop.f32.mrb[27].mxu0  ;;  %9084 = vmatmul.mubr.f32.gmra.mrb[26].mxu1 %v12332_v8  ;;  %v7327_v17 = vld [vmem:[%s13114_s4 + $0x178] sm:$0xff] }
 0x339   : > { %v12346_v26 = vadd.f32 %v12230_v15, %v3551_v12  ;;  %v12443_v12 = vld [vmem:[#allocation2 + $0xc7] sm:$0xff] }
 0x33a   : > { %3751 = vst [vmem:[#allocation2 + $0x1d0] sm:$0xff] %v12342_v11  ;;  %v12485_v51 = vld [vmem:[#allocation2 + $0x187] sm:$0xff]  ;;  %v12488_v53 = vld [vmem:[#allocation2 + $0x18f] sm:$0xff] }
 0x33b   : > { %3750 = vst [vmem:[#allocation2 + $0x1c8] sm:$0xff] %v12346_v26  ;;  %v9008_v63 = vpop.f32.mrb[28].mxu0  ;;  %9086 = vmatprep.mubr.f32.mxu1 %v12346_v26 }
 0x33c   : > { %v12352_v2 = vadd.f32 %v9008_v63, %v12230_v15  ;;  %v3561_v9 = vpop.f32.mrb[29].mxu0  ;;  %9087 = vmatmul.mubr.f32.gmra.mrb[28].mxu1 %v12342_v11  ;;  %v10112_v63 = vpack.c.bf16 %v7327_v17, %v7326_v54  ;;  %v7330_v54 = vld [vmem:[%s13114_s4 + $0x190] sm:$0xff]  ;;  %v7331_v17 = vld [vmem:[%s13114_s4 + $0x198] sm:$0xff] }
 0x33d   : > { %v12356_v10 = vadd.f32 %v12230_v15, %v3561_v9  ;;  %v12446_v9 = vld [vmem:[#allocation2 + $0xcf] sm:$0xff] }
 0x33e   : > { %13177 = vst [vmem:[#allocation3_spill] sm:$0xff] %v12352_v2  ;;  %3753 = vst [vmem:[#allocation2 + $0x1f0] sm:$0xff] %v12352_v2  ;;  %v12494_v45 = vld [vmem:[#allocation2 + $0x1af] sm:$0xff] }
 0x33f   : > { %13178 = vst [vmem:[#allocation4_spill] sm:$0xff] %v12356_v10  ;;  %3752 = vst [vmem:[#allocation2 + $0x1e8] sm:$0xff] %v12356_v10  ;;  %v9011_v60 = vpop.f32.mrb[30].mxu0  ;;  %9089 = vmatprep.mubr.f32.mxu1 %v12356_v10  ;;  %v12524_v10 = vld [vmem:[#allocation2 + $0x31] sm:$0xff] }
 0x340   : > { %v12368_v18 = vadd.f32 %v9011_v60, %v12230_v15  ;;  %v3571_v19 = vpop.f32.mrb[31].mxu0  ;;  %9090 = vmatmul.mubr.f32.gmra.mrb[30].mxu1 %v12352_v2  ;;  %v7329_v60 = vld [vmem:[%s13114_s4 + $0x188] sm:$0xff]  ;;  %13183 = vst [vmem:[#allocation9_spill] sm:$0xff] %v12524_v10 }
 0x341   : > { %v12372_v3 = vadd.f32 %v12230_v15, %v3571_v19  ;;  %9124 = vmatprep.mubr.f32.mxu1 %v3756_v59  ;;  %v10092_v15 = vpack.c.bf16 %v7317_v39, %v7316_v44  ;;  %v7328_v59 = vld [vmem:[%s13114_s4 + $0x180] sm:$0xff]  ;;  %v12458_v19 = vld [vmem:[#allocation2 + $0xef] sm:$0xff] }
 0x342   : > { %13179 = vst [vmem:[#allocation5_spill] sm:$0xff] %v12368_v18  ;;  %3755 = vst [vmem:[#allocation2 + $0x210] sm:$0xff] %v12368_v18  ;;  %v10116_v55 = vpack.c.bf16 %v7329_v60, %v7328_v59  ;;  %v12467_v44 = vld [vmem:[#allocation2 + $0x127] sm:$0xff]  ;;  %v12470_v39 = vld [vmem:[#allocation2 + $0x12f] sm:$0xff]  ;;  %v10120_v59 = vpack.c.bf16 %v7331_v17, %v7330_v54 }
 0x343   : > { %13180 = vst [vmem:[#allocation6_spill] sm:$0xff] %v12372_v3  ;;  %3754 = vst [vmem:[#allocation2 + $0x208] sm:$0xff] %v12372_v3  ;;  %v12497_v46 = vld [vmem:[#allocation2 + $0x1c7] sm:$0xff]  ;;  %v7335_v54 = vld [vmem:[%s13114_s4 + $0x1b8] sm:$0xff] }
 0x344   : > { %9125 = vmatmul.mubr.f32.vlgmr.msra.gmra.mrb[0].mxu1 %v3757_v47  ;;  %v12461_v47 = vld [vmem:[#allocation2 + $0x107] sm:$0xff] }
 0x345   : > { %9127 = vmatprep.mubr.f32.mxu1 %v12382_v29  ;;  %10087 = vmatpush3.bf16.msra.mxu1 %v12224_v31  ;;  %v10096_v31 = vpack.c.bf16 %v7319_v21, %v7318_v56  ;;  %v12476_v56 = vld [vmem:[#allocation2 + $0x14f] sm:$0xff]  ;;  %v12479_v21 = vld [vmem:[#allocation2 + $0x167] sm:$0xff] }
 0x346   : > { %10089 = vmatprep.subr.bf16.mxu1 %v10088_v27  ;;  %v12503_v32 = vld [vmem:[#allocation2 + $0x1e7] sm:$0xff] }
 0x347   : > { %13181 = vst [vmem:[#allocation7_spill] sm:$0xff] %v12503_v32  ;;  %v7332_v60 = vld [vmem:[%s13114_s4 + $0x1a0] sm:$0xff]  ;;  %v7333_v18 = vld [vmem:[%s13114_s4 + $0x1a8] sm:$0xff] }
 0x348   : > { %9128 = vmatmul.mubr.f32.gmra.mrb[2].mxu1 %v12386_v30  ;;  %v12521_v3 = vld [vmem:[#allocation2 + $0x29] sm:$0xff]  ;;  %v10124_v2 = vpack.c.bf16 %v7333_v18, %v7332_v60  ;;  %v12536_v18 = vld [vmem:[#allocation2 + $0x51] sm:$0xff] }
 0x349   : > { %9130 = vmatprep.mubr.f32.mxu1 %v12395_v6  ;;  %10091 = vmatpush3.bf16.msra.mxu1 %v10088_v27  ;;  %v12464_v27 = vld [vmem:[#allocation2 + $0x10f] sm:$0xff]  ;;  %13185 = vst [vmem:[#allocation11_spill] sm:$0xff] %v12536_v18 }
 0x34a   : > { %10093 = vmatprep.subr.bf16.mxu1 %v10092_v15  ;;  %v12533_v17 = vld [vmem:[#allocation2 + $0x49] sm:$0xff] }
 0x34b   : > { %13184 = vst [vmem:[#allocation10_spill] sm:$0xff] %v12533_v17  ;;  %v7337_v60 = vld [vmem:[%s13114_s4 + $0x1c8] sm:$0xff] }
 0x34c   : > { %9131 = vmatmul.mubr.f32.gmra.mrb[4].mxu1 %v12398_v28 }
 0x34d   : > { %9133 = vmatprep.mubr.f32.mxu1 %v12407_v4  ;;  %10095 = vmatpush3.bf16.msra.mxu1 %v10092_v15  ;;  %v12473_v15 = vld [vmem:[#allocation2 + $0x147] sm:$0xff] }
 0x34e   : > { %10097 = vmatprep.subr.bf16.mxu1 %v10096_v31 }
 0x350   : > { %9134 = vmatmul.mubr.f32.gmra.mrb[6].mxu1 %v12410_v34 }
 0x351   : > { %9136 = vmatprep.mubr.f32.mxu1 %v12419_v52  ;;  %10099 = vmatpush3.bf16.msra.mxu1 %v10096_v31  ;;  %v12482_v31 = vld [vmem:[#allocation2 + $0x16f] sm:$0xff] }
 0x352   : > { %10101 = vmatprep.subr.bf16.mxu1 %v10100_v7 }
 0x354   : > { %9137 = vmatmul.mubr.f32.gmra.mrb[8].mxu1 %v12422_v40 }
 0x355   : > { %9139 = vmatprep.mubr.f32.mxu1 %v12431_v33  ;;  %10103 = vmatpush3.bf16.msra.mxu1 %v10100_v7  ;;  %v12491_v7 = vld [vmem:[#allocation2 + $0x1a7] sm:$0xff] }
 0x356   : > { %10105 = vmatprep.subr.bf16.mxu1 %v10104_v38 }
 0x358   : > { %9140 = vmatmul.mubr.f32.gmra.mrb[10].mxu1 %v12434_v36 }
 0x359   : > { %9142 = vmatprep.mubr.f32.mxu1 %v12443_v12  ;;  %10107 = vmatpush3.bf16.msra.mxu1 %v10104_v38  ;;  %v12500_v38 = vld [vmem:[#allocation2 + $0x1cf] sm:$0xff] }
 0x35a   : > { %10109 = vmatprep.subr.bf16.mxu1 %v10108_v14 }
 0x35c   : > { %9143 = vmatmul.mubr.f32.gmra.mrb[12].mxu1 %v12446_v9 }
 0x35d   : > { %9145 = vmatprep.mubr.f32.mxu1 %v12455_v16  ;;  %10111 = vmatpush3.bf16.msra.mxu1 %v10108_v14  ;;  %v12506_v14 = vld [vmem:[#allocation2 + $0x1ef] sm:$0xff] }
 0x35e   : > { %10113 = vmatprep.subr.bf16.mxu1 %v10112_v63  ;;  %13182 = vst [vmem:[#allocation8_spill] sm:$0xff] %v12506_v14 }
 0x360   : > { %9146 = vmatmul.mubr.f32.gmra.mrb[14].mxu1 %v12458_v19 }
 0x361   : > { %9148 = vmatprep.mubr.f32.mxu1 %v12461_v47  ;;  %10115 = vmatpush3.bf16.msra.mxu1 %v10112_v63  ;;  %v4304_v63 = vld [vmem:[#allocation2 + $0x11] sm:$0xff] }
 0x362   : > { %10117 = vmatprep.subr.bf16.mxu1 %v10116_v55 }
 0x364   : > { %9149 = vmatmul.mubr.f32.gmra.mrb[16].mxu1 %v12464_v27 }
 0x365   : > { %9151 = vmatprep.mubr.f32.mxu1 %v12467_v44 }
 0x368   : > { %9152 = vmatmul.mubr.f32.gmra.mrb[18].mxu1 %v12470_v39 }
 0x369   : > { %9154 = vmatprep.mubr.f32.mxu1 %v12473_v15 }
 0x36c   : > { %9155 = vmatmul.mubr.f32.gmra.mrb[20].mxu1 %v12476_v56 }
 0x36d   : > { %9157 = vmatprep.mubr.f32.mxu1 %v12479_v21 }
 0x370   : > { %9158 = vmatmul.mubr.f32.gmra.mrb[22].mxu1 %v12482_v31 }
 0x371   : > { %9160 = vmatprep.mubr.f32.mxu1 %v12485_v51 }
 0x374   : > { %9161 = vmatmul.mubr.f32.gmra.mrb[24].mxu1 %v12488_v53 }
 0x375   : > { %9163 = vmatprep.mubr.f32.mxu1 %v12491_v7 }
 0x378   : > { %9164 = vmatmul.mubr.f32.gmra.mrb[26].mxu1 %v12494_v45 }
 0x379   : > { %9166 = vmatprep.mubr.f32.mxu1 %v12497_v46 }
 0x37c   : > { %9167 = vmatmul.mubr.f32.gmra.mrb[28].mxu1 %v12500_v38 }
 0x37d   : > { %9169 = vmatprep.mubr.f32.mxu1 %v12503_v32 }
 0x380   : > { %9170 = vmatmul.mubr.f32.gmra.mrb[30].mxu1 %v12506_v14 }
 0x381   : > { %9204 = vmatprep.mubr.f32.mxu1 %v4303_v1  ;;  %v7334_v1 = vld [vmem:[%s13114_s4 + $0x1b0] sm:$0xff] }
 0x384   : > { %9205 = vmatmul.mubr.f32.vlgmr.msra.gmra.mrb[0].mxu1 %v4304_v63  ;;  %v7336_v63 = vld [vmem:[%s13114_s4 + $0x1c0] sm:$0xff] }
 0x385   : > { %9207 = vmatprep.mubr.f32.mxu1 %v12521_v3  ;;  %10119 = vmatpush3.bf16.msra.mxu1 %v10116_v55  ;;  %v10128_v55 = vpack.c.bf16 %v7335_v54, %v7334_v1  ;;  %v12548_v1 = vld [vmem:[#allocation2 + $0x71] sm:$0xff] }
 0x386   : > { %10121 = vmatprep.subr.bf16.mxu1 %v10120_v59  ;;  %13187 = vst [vmem:[#allocation13_spill] sm:$0xff] %v12548_v1  ;;  %v7338_v54 = vld [vmem:[%s13114_s4 + $0x1d0] sm:$0xff] }
 0x388   : > { %9208 = vmatmul.mubr.f32.gmra.mrb[2].mxu1 %v12524_v10  ;;  %v12545_v10 = vld [vmem:[#allocation2 + $0x69] sm:$0xff] }
 0x389   : > { %9210 = vmatprep.mubr.f32.mxu1 %v12533_v17  ;;  %10123 = vmatpush3.bf16.msra.mxu1 %v10120_v59  ;;  %13186 = vst [vmem:[#allocation12_spill] sm:$0xff] %v12545_v10  ;;  %v10132_v59 = vpack.c.bf16 %v7337_v60, %v7336_v63  ;;  %v7339_v17 = vld [vmem:[%s13114_s4 + $0x1d8] sm:$0xff]  ;;  %v7340_v60 = vld [vmem:[%s13114_s4 + $0x1e0] sm:$0xff] }
 0x38a   : > { %10125 = vmatprep.subr.bf16.mxu1 %v10124_v2  ;;  %v12560_v63 = vld [vmem:[#allocation2 + $0x91] sm:$0xff] }
 0x38b   : > { %13189 = vst [vmem:[#allocation15_spill] sm:$0xff] %v12560_v63 }
 0x38c   : > { %9211 = vmatmul.mubr.f32.gmra.mrb[4].mxu1 %v12536_v18  ;;  %v12557_v18 = vld [vmem:[#allocation2 + $0x89] sm:$0xff] }
 0x38d   : > { %9213 = vmatprep.mubr.f32.mxu1 %v12545_v10  ;;  %10127 = vmatpush3.bf16.msra.mxu1 %v10124_v2  ;;  %13188 = vst [vmem:[#allocation14_spill] sm:$0xff] %v12557_v18  ;;  %v10136_v2 = vpack.c.bf16 %v7339_v17, %v7338_v54  ;;  %v7341_v10 = vld [vmem:[%s13114_s4 + $0x1e8] sm:$0xff]  ;;  %v12572_v17 = vld [vmem:[#allocation2 + $0xb1] sm:$0xff] }
 0x38e   : > { %10129 = vmatprep.subr.bf16.mxu1 %v10128_v55  ;;  %13191 = vst [vmem:[#allocation17_spill] sm:$0xff] %v12572_v17  ;;  %v7342_v54 = vld [vmem:[%s13114_s4 + $0x1f0] sm:$0xff] }
 0x390   : > { %9214 = vmatmul.mubr.f32.gmra.mrb[6].mxu1 %v12548_v1  ;;  %v12569_v1 = vld [vmem:[#allocation2 + $0xa9] sm:$0xff] }
 0x391   : > { %9216 = vmatprep.mubr.f32.mxu1 %v12557_v18  ;;  %10131 = vmatpush3.bf16.msra.mxu1 %v10128_v55  ;;  %13190 = vst [vmem:[#allocation16_spill] sm:$0xff] %v12569_v1  ;;  %v10140_v55 = vpack.c.bf16 %v7341_v10, %v7340_v60  ;;  %v7343_v18 = vld [vmem:[%s13114_s4 + $0x1f8] sm:$0xff]  ;;  %v7344_v60 = vld [vmem:[%s13114_s4 + $0x200] sm:$0xff] }
 0x392   : > { %10133 = vmatprep.subr.bf16.mxu1 %v10132_v59  ;;  %v12584_v10 = vld [vmem:[#allocation2 + $0xd1] sm:$0xff] }
 0x393   : > { %13193 = vst [vmem:[#allocation19_spill] sm:$0xff] %v12584_v10 }
 0x394   : > { %9217 = vmatmul.mubr.f32.gmra.mrb[8].mxu1 %v12560_v63  ;;  %v12581_v63 = vld [vmem:[#allocation2 + $0xc9] sm:$0xff] }
 0x395   : > { %9219 = vmatprep.mubr.f32.mxu1 %v12569_v1  ;;  %10135 = vmatpush3.bf16.msra.mxu1 %v10132_v59  ;;  %13192 = vst [vmem:[#allocation18_spill] sm:$0xff] %v12581_v63  ;;  %v10144_v59 = vpack.c.bf16 %v7343_v18, %v7342_v54  ;;  %v7345_v1 = vld [vmem:[%s13114_s4 + $0x208] sm:$0xff]  ;;  %v12596_v18 = vld [vmem:[#allocation2 + $0xf1] sm:$0xff] }
 0x396   : > { %10137 = vmatprep.subr.bf16.mxu1 %v10136_v2  ;;  %v12599_v54 = vld [vmem:[#allocation2 + $0x109] sm:$0xff] }
 0x397   : > { %13194 = vst [vmem:[#allocation20_spill] sm:$0xff] %v12599_v54 }
 0x398   : > { %9220 = vmatmul.mubr.f32.gmra.mrb[10].mxu1 %v12572_v17  ;;  %v12593_v17 = vld [vmem:[#allocation2 + $0xe9] sm:$0xff] }
 0x399   : > { %9222 = vmatprep.mubr.f32.mxu1 %v12581_v63  ;;  %10139 = vmatpush3.bf16.msra.mxu1 %v10136_v2  ;;  %v10148_v2 = vpack.c.bf16 %v7345_v1, %v7344_v60  ;;  %v12602_v63 = vld [vmem:[#allocation2 + $0x111] sm:$0xff]  ;;  %v12611_v1 = vld [vmem:[#allocation2 + $0x149] sm:$0xff] }
 0x39a   : > { %10141 = vmatprep.subr.bf16.mxu1 %v10140_v55  ;;  %13195 = vst [vmem:[#allocation21_spill] sm:$0xff] %v12602_v63  ;;  %13198 = vst [vmem:[#allocation24_spill] sm:$0xff] %v12611_v1  ;;  %v12614_v60 = vld [vmem:[#allocation2 + $0x151] sm:$0xff] }
 0x39b   : > { %13199 = vst [vmem:[#allocation25_spill] sm:$0xff] %v12614_v60 }
 0x39c   : > { %9223 = vmatmul.mubr.f32.gmra.mrb[12].mxu1 %v12584_v10  ;;  %v12605_v10 = vld [vmem:[#allocation2 + $0x129] sm:$0xff] }
 0x39d   : > { %9225 = vmatprep.mubr.f32.mxu1 %v12593_v17  ;;  %10143 = vmatpush3.bf16.msra.mxu1 %v10140_v55  ;;  %13196 = vst [vmem:[#allocation22_spill] sm:$0xff] %v12605_v10  ;;  %v12608_v55 = vld [vmem:[#allocation2 + $0x131] sm:$0xff] }
 0x39e   : > { %10145 = vmatprep.subr.bf16.mxu1 %v10144_v59  ;;  %13197 = vst [vmem:[#allocation23_spill] sm:$0xff] %v12608_v55 }
 0x3a0   : > { %9226 = vmatmul.mubr.f32.gmra.mrb[14].mxu1 %v12596_v18 }
 0x3a1   : > { %9228 = vmatprep.mubr.f32.mxu1 %v12599_v54  ;;  %10147 = vmatpush3.bf16.msra.mxu1 %v10144_v59  ;;  %v12617_v59 = vld [vmem:[#allocation2 + $0x169] sm:$0xff] }
 0x3a2   : > { %10149 = vmatprep.subr.bf16.mxu1 %v10148_v2  ;;  %13200 = vst [vmem:[#allocation26_spill] sm:$0xff] %v12617_v59 }
 0x3a4   : > { %9229 = vmatmul.mubr.f32.gmra.mrb[16].mxu1 %v12602_v63  ;;  %v12620_v63 = vld [vmem:[#allocation2 + $0x171] sm:$0xff] }
 0x3a5   : > { %9231 = vmatprep.mubr.f32.mxu1 %v12605_v10  ;;  %13201 = vst [vmem:[#allocation27_spill] sm:$0xff] %v12620_v63  ;;  %v12623_v10 = vld [vmem:[#allocation2 + $0x189] sm:$0xff] }
 0x3a6   : > { %13202 = vst [vmem:[#allocation28_spill] sm:$0xff] %v12623_v10 }
 0x3a8   : > { %9232 = vmatmul.mubr.f32.gmra.mrb[18].mxu1 %v12608_v55  ;;  %v12626_v55 = vld [vmem:[#allocation2 + $0x191] sm:$0xff] }
 0x3a9   : > { %9234 = vmatprep.mubr.f32.mxu1 %v12611_v1  ;;  %13203 = vst [vmem:[#allocation29_spill] sm:$0xff] %v12626_v55  ;;  %v12629_v1 = vld [vmem:[#allocation2 + $0x1a9] sm:$0xff] }
 0x3aa   : > { %13204 = vst [vmem:[#allocation30_spill] sm:$0xff] %v12629_v1 }
 0x3ac   : > { %9235 = vmatmul.mubr.f32.gmra.mrb[20].mxu1 %v12614_v60  ;;  %v12632_v60 = vld [vmem:[#allocation2 + $0x1b1] sm:$0xff] }
 0x3ad   : > { %9237 = vmatprep.mubr.f32.mxu1 %v12617_v59  ;;  %13205 = vst [vmem:[#allocation31_spill] sm:$0xff] %v12632_v60  ;;  %v12635_v59 = vld [vmem:[#allocation2 + $0x1c9] sm:$0xff] }
 0x3ae   : > { %13206 = vst [vmem:[#allocation32_spill] sm:$0xff] %v12635_v59 }
 0x3b0   : > { %9238 = vmatmul.mubr.f32.gmra.mrb[22].mxu1 %v12620_v63  ;;  %v12638_v63 = vld [vmem:[#allocation2 + $0x1d1] sm:$0xff] }
 0x3b1   : > { %9240 = vmatprep.mubr.f32.mxu1 %v12623_v10  ;;  %13207 = vst [vmem:[#allocation33_spill] sm:$0xff] %v12638_v63  ;;  %v12641_v10 = vld [vmem:[#allocation2 + $0x1e9] sm:$0xff] }
 0x3b2   : > { %13208 = vst [vmem:[#allocation34_spill] sm:$0xff] %v12641_v10 }
 0x3b4   : > { %9241 = vmatmul.mubr.f32.gmra.mrb[24].mxu1 %v12626_v55  ;;  %v12644_v55 = vld [vmem:[#allocation2 + $0x1f1] sm:$0xff] }
 0x3b5   : > { %9243 = vmatprep.mubr.f32.mxu1 %v12629_v1  ;;  %v7346_v1 = vld [vmem:[%s13114_s4 + $0x210] sm:$0xff] }
 0x3b8   : > { %9244 = vmatmul.mubr.f32.gmra.mrb[26].mxu1 %v12632_v60  ;;  %v7347_v60 = vld [vmem:[%s13114_s4 + $0x218] sm:$0xff] }
 0x3b9   : > { %9246 = vmatprep.mubr.f32.mxu1 %v12635_v59  ;;  %v10152_v59 = vpack.c.bf16 %v7347_v60, %v7346_v1  ;;  %v7351_v1 = vld [vmem:[%s13114_s4 + $0x238] sm:$0xff]  ;;  %v7354_v60 = vld [vmem:[%s13114_s4 + $0x250] sm:$0xff] }
 0x3bc   : > { %9247 = vmatmul.mubr.f32.gmra.mrb[28].mxu1 %v12638_v63  ;;  %v7348_v63 = vld [vmem:[%s13114_s4 + $0x220] sm:$0xff] }
 0x3bd   : > { %9249 = vmatprep.mubr.f32.mxu1 %v12641_v10  ;;  %v7349_v10 = vld [vmem:[%s13114_s4 + $0x228] sm:$0xff] }
 0x3be   : > { %v10156_v54 = vpack.c.bf16 %v7349_v10, %v7348_v63  ;;  %v7353_v63 = vld [vmem:[%s13114_s4 + $0x248] sm:$0xff] }
 0x3c0   : > { %9250 = vmatmul.mubr.f32.gmra.mrb[30].mxu1 %v12644_v55 }
 0x3c1   : > { %9284 = vmatprep.mubr.f32.mxu1 %v12382_v29  ;;  %v7350_v29 = vld [vmem:[%s13114_s4 + $0x230] sm:$0xff] }
 0x3c4   : > { %9285 = vmatmul.mubr.f32.vlgmr.msra.gmra.mrb[0].mxu1 %v12386_v30  ;;  %v10160_v30 = vpack.c.bf16 %v7351_v1, %v7350_v29  ;;  %v7357_v1 = vld [vmem:[%s13114_s4 + $0x268] sm:$0xff] }
 0x3c5   : > { %9287 = vmatprep.mubr.f32.mxu1 %v12395_v6  ;;  %10151 = vmatpush3.bf16.msra.mxu1 %v10148_v2  ;;  %v7352_v2 = vld [vmem:[%s13114_s4 + $0x240] sm:$0xff] }
 0x3c6   : > { %10153 = vmatprep.subr.bf16.mxu1 %v10152_v59  ;;  %v10164_v10 = vpack.c.bf16 %v7353_v63, %v7352_v2  ;;  %v7359_v63 = vld [vmem:[%s13114_s4 + $0x278] sm:$0xff] }
 0x3c8   : > { %9288 = vmatmul.mubr.f32.gmra.mrb[2].mxu1 %v12398_v28 }
 0x3c9   : > { %9290 = vmatprep.mubr.f32.mxu1 %v12407_v4  ;;  %10155 = vmatpush3.bf16.msra.mxu1 %v10152_v59  ;;  %v7355_v59 = vld [vmem:[%s13114_s4 + $0x258] sm:$0xff] }
 0x3ca   : > { %10157 = vmatprep.subr.bf16.mxu1 %v10156_v54  ;;  %v10168_v29 = vpack.c.bf16 %v7355_v59, %v7354_v60  ;;  %v7361_v59 = vld [vmem:[%s13114_s4 + $0x288] sm:$0xff] }
 0x3cc   : > { %9291 = vmatmul.mubr.f32.gmra.mrb[4].mxu1 %v12410_v34 }
 0x3cd   : > { %9293 = vmatprep.mubr.f32.mxu1 %v12419_v52  ;;  %10159 = vmatpush3.bf16.msra.mxu1 %v10156_v54  ;;  %v7356_v54 = vld [vmem:[%s13114_s4 + $0x260] sm:$0xff] }
 0x3ce   : > { %10161 = vmatprep.subr.bf16.mxu1 %v10160_v30  ;;  %v10172_v2 = vpack.c.bf16 %v7357_v1, %v7356_v54  ;;  %v12728_v1 = vld [vmem:[#allocation2 + $0x20f] sm:$0xff] }
 0x3cf   : > { %13210 = vst [vmem:[#allocation36_spill] sm:$0xff] %v12728_v1 }
 0x3d0   : > { %9294 = vmatmul.mubr.f32.gmra.mrb[6].mxu1 %v12422_v40 }
 0x3d1   : > { %9296 = vmatprep.mubr.f32.mxu1 %v12431_v33  ;;  %10163 = vmatpush3.bf16.msra.mxu1 %v10160_v30  ;;  %v7358_v30 = vld [vmem:[%s13114_s4 + $0x270] sm:$0xff] }
 0x3d2   : > { %10165 = vmatprep.subr.bf16.mxu1 %v10164_v10  ;;  %v10176_v60 = vpack.c.bf16 %v7359_v63, %v7358_v30  ;;  %v7363_v30 = vld [vmem:[%s13114_s4 + $0x298] sm:$0xff]  ;;  %v4915_v63 = vld [vmem:[#allocation2 + $0x28] sm:$0xff] }
 0x3d4   : > { %9297 = vmatmul.mubr.f32.gmra.mrb[8].mxu1 %v12434_v36 }
 0x3d5   : > { %9299 = vmatprep.mubr.f32.mxu1 %v12443_v12  ;;  %10167 = vmatpush3.bf16.msra.mxu1 %v10164_v10  ;;  %v7360_v10 = vld [vmem:[%s13114_s4 + $0x280] sm:$0xff] }
 0x3d6   : > { %10169 = vmatprep.subr.bf16.mxu1 %v10168_v29  ;;  %v10180_v54 = vpack.c.bf16 %v7361_v59, %v7360_v10  ;;  %v4916_v10 = vld [vmem:[#allocation2 + $0x30] sm:$0xff]  ;;  %v7364_v59 = vld [vmem:[%s13114_s4 + $0x2a0] sm:$0xff] }
 0x3d8   : > { %9300 = vmatmul.mubr.f32.gmra.mrb[10].mxu1 %v12446_v9 }
 0x3d9   : > { %9302 = vmatprep.mubr.f32.mxu1 %v12455_v16  ;;  %10171 = vmatpush3.bf16.msra.mxu1 %v10168_v29  ;;  %v12725_v29 = vld [vmem:[#allocation2 + $0x207] sm:$0xff] }
 0x3da   : > { %10173 = vmatprep.subr.bf16.mxu1 %v10172_v2  ;;  %13209 = vst [vmem:[#allocation35_spill] sm:$0xff] %v12725_v29 }
 0x3dc   : > { %9303 = vmatmul.mubr.f32.gmra.mrb[12].mxu1 %v12458_v19 }
 0x3dd   : > { %9305 = vmatprep.mubr.f32.mxu1 %v12461_v47  ;;  %10175 = vmatpush3.bf16.msra.mxu1 %v10172_v2  ;;  %v7362_v2 = vld [vmem:[%s13114_s4 + $0x290] sm:$0xff] }
 0x3de   : > { %10177 = vmatprep.subr.bf16.mxu1 %v10176_v60 }
 0x3e0   : > { %9306 = vmatmul.mubr.f32.gmra.mrb[14].mxu1 %v12464_v27 }
 0x3e1   : > { %9308 = vmatprep.mubr.f32.mxu1 %v12467_v44  ;;  %10179 = vmatpush3.bf16.msra.mxu1 %v10176_v60  ;;  %v10184_v60 = vpack.c.bf16 %v7363_v30, %v7362_v2  ;;  %v7366_v2 = vld [vmem:[%s13114_s4 + $0x2b0] sm:$0xff]  ;;  %v7367_v30 = vld [vmem:[%s13114_s4 + $0x2b8] sm:$0xff] }
 0x3e2   : > { %10181 = vmatprep.subr.bf16.mxu1 %v10180_v54 }
 0x3e4   : > { %9309 = vmatmul.mubr.f32.gmra.mrb[16].mxu1 %v12470_v39 }
 0x3e5   : > { %9311 = vmatprep.mubr.f32.mxu1 %v12473_v15 }
 0x3e8   : > { %9312 = vmatmul.mubr.f32.gmra.mrb[18].mxu1 %v12476_v56 }
 0x3e9   : > { %9314 = vmatprep.mubr.f32.mxu1 %v12479_v21 }
 0x3ec   : > { %9315 = vmatmul.mubr.f32.gmra.mrb[20].mxu1 %v12482_v31 }
 0x3ed   : > { %9317 = vmatprep.mubr.f32.mxu1 %v12485_v51 }
 0x3f0   : > { %9318 = vmatmul.mubr.f32.gmra.mrb[22].mxu1 %v12488_v53 }
 0x3f1   : > { %9320 = vmatprep.mubr.f32.mxu1 %v12491_v7 }
 0x3f4   : > { %9321 = vmatmul.mubr.f32.gmra.mrb[24].mxu1 %v12494_v45 }
 0x3f5   : > { %9323 = vmatprep.mubr.f32.mxu1 %v12497_v46 }
 0x3f8   : > { %9324 = vmatmul.mubr.f32.gmra.mrb[26].mxu1 %v12500_v38 }
 0x3f9   : > { %9326 = vmatprep.mubr.f32.mxu1 %v12503_v32  ;;  %v12746_v32 = vld [vmem:[#allocation2 + $0x50] sm:$0xff] }
 0x3fc   : > { %9327 = vmatmul.mubr.f32.gmra.mrb[28].mxu1 %v12506_v14  ;;  %v12743_v14 = vld [vmem:[#allocation2 + $0x48] sm:$0xff] }
 0x3fd   : > { %9329 = vmatprep.mubr.f32.mxu1 %v12725_v29  ;;  %v7365_v29 = vld [vmem:[%s13114_s4 + $0x2a8] sm:$0xff] }
 0x400   : > { %9330 = vmatmul.mubr.f32.gmra.mrb[30].mxu1 %v12728_v1  ;;  %v10188_v1 = vpack.c.bf16 %v7365_v29, %v7364_v59  ;;  %v7368_v29 = vld [vmem:[%s13114_s4 + $0x2c0] sm:$0xff]  ;;  %v7371_v59 = vld [vmem:[%s13114_s4 + $0x2d8] sm:$0xff] }
 0x401   : > { %9364 = vmatprep.mubr.f32.mxu1 %v4915_v63  ;;  %v10192_v63 = vpack.c.bf16 %v7367_v30, %v7366_v2  ;;  %v7375_v30 = vld [vmem:[%s13114_s4 + $0x2f8] sm:$0xff] }
 0x404   : > { %9365 = vmatmul.mubr.f32.vlgmr.msra.gmra.mrb[0].mxu1 %v4916_v10  ;;  %v7369_v10 = vld [vmem:[%s13114_s4 + $0x2c8] sm:$0xff] }
 0x405   : > { %9367 = vmatprep.mubr.f32.mxu1 %v12743_v14  ;;  %10183 = vmatpush3.bf16.msra.mxu1 %v10180_v54  ;;  %v12756_v54 = vld [vmem:[#allocation2 + $0x70] sm:$0xff] }
 0x406   : > { %10185 = vmatprep.subr.bf16.mxu1 %v10184_v60 }
 0x408   : > { %9368 = vmatmul.mubr.f32.gmra.mrb[2].mxu1 %v12746_v32 }
 0x409   : > { %9370 = vmatprep.mubr.f32.mxu1 %v12238_v48  ;;  %10187 = vmatpush3.bf16.msra.mxu1 %v10184_v60  ;;  %v10196_v48 = vpack.c.bf16 %v7369_v10, %v7368_v29  ;;  %v7370_v60 = vld [vmem:[%s13114_s4 + $0x2d0] sm:$0xff]  ;;  %v7384_v29 = vld [vmem:[%s13114_s4 + $0x340] sm:$0xff]  ;;  %v7385_v10 = vld [vmem:[%s13114_s4 + $0x348] sm:$0xff] }
 0x40a   : > { %10189 = vmatprep.subr.bf16.mxu1 %v10188_v1  ;;  %v10200_v2 = vpack.c.bf16 %v7371_v59, %v7370_v60  ;;  %v13220_v60 = vld [vmem:[#allocation14_spill] sm:$0xff]  ;;  %v10228_v59 = vpack.c.bf16 %v7385_v10, %v7384_v29  ;;  %v13238_v29 = vld [vmem:[#allocation32_spill] sm:$0xff]  ;;  %v13239_v10 = vld [vmem:[#allocation33_spill] sm:$0xff] }
 0x40c   : > { %9371 = vmatmul.mubr.f32.gmra.mrb[4].mxu1 %v12756_v54 }
 0x40d   : > { %9373 = vmatprep.mubr.f32.mxu1 %v12246_v5  ;;  %10191 = vmatpush3.bf16.msra.mxu1 %v10188_v1  ;;  %v7372_v5 = vld [vmem:[%s13114_s4 + $0x2e0] sm:$0xff]  ;;  %v7373_v1 = vld [vmem:[%s13114_s4 + $0x2e8] sm:$0xff] }
 0x40e   : > { %10193 = vmatprep.subr.bf16.mxu1 %v10192_v63 }
 0x410   : > { %9374 = vmatmul.mubr.f32.gmra.mrb[6].mxu1 %v12243_v49  ;;  %v10204_v49 = vpack.c.bf16 %v7373_v1, %v7372_v5  ;;  %v7387_v5 = vld [vmem:[%s13114_s4 + $0x358] sm:$0xff]  ;;  %v13221_v1 = vld [vmem:[#allocation15_spill] sm:$0xff] }
 0x411   : > { %9376 = vmatprep.mubr.f32.mxu1 %v12256_v24  ;;  %10195 = vmatpush3.bf16.msra.mxu1 %v10192_v63  ;;  %v7374_v24 = vld [vmem:[%s13114_s4 + $0x2f0] sm:$0xff]  ;;  %v7377_v63 = vld [vmem:[%s13114_s4 + $0x308] sm:$0xff] }
 0x412   : > { %10197 = vmatprep.subr.bf16.mxu1 %v10196_v48 }
 0x414   : > { %9377 = vmatmul.mubr.f32.gmra.mrb[8].mxu1 %v12252_v57  ;;  %v10208_v57 = vpack.c.bf16 %v7375_v30, %v7374_v24  ;;  %v7388_v30 = vld [vmem:[%s13114_s4 + $0x360] sm:$0xff] }
 0x415   : > { %9379 = vmatprep.mubr.f32.mxu1 %v12266_v62  ;;  %10199 = vmatpush3.bf16.msra.mxu1 %v10196_v48  ;;  %v7376_v62 = vld [vmem:[%s13114_s4 + $0x300] sm:$0xff]  ;;  %v13219_v48 = vld [vmem:[#allocation13_spill] sm:$0xff] }
 0x416   : > { %10201 = vmatprep.subr.bf16.mxu1 %v10200_v2 }
 0x418   : > { %9380 = vmatmul.mubr.f32.gmra.mrb[10].mxu1 %v12262_v50  ;;  %v10212_v50 = vpack.c.bf16 %v7377_v63, %v7376_v62  ;;  %v13223_v62 = vld [vmem:[#allocation17_spill] sm:$0xff]  ;;  %v13224_v63 = vld [vmem:[#allocation18_spill] sm:$0xff] }
 0x419   : > { %9382 = vmatprep.mubr.f32.mxu1 %v12276_v20  ;;  %10203 = vmatpush3.bf16.msra.mxu1 %v10200_v2  ;;  %v13212_v20 = vld [vmem:[#allocation3_spill] sm:$0xff]  ;;  %v7386_v2 = vld [vmem:[%s13114_s4 + $0x350] sm:$0xff] }
 0x41a   : > { %10205 = vmatprep.subr.bf16.mxu1 %v10204_v49  ;;  %v10232_v24 = vpack.c.bf16 %v7387_v5, %v7386_v2  ;;  %v7394_v2 = vld [vmem:[%s13114_s4 + $0x390] sm:$0xff]  ;;  %v7395_v5 = vld [vmem:[%s13114_s4 + $0x398] sm:$0xff] }
 0x41c   : > { %9383 = vmatmul.mubr.f32.gmra.mrb[12].mxu1 %v12272_v23  ;;  %v13211_v23 = vld [vmem:[#allocation4_spill] sm:$0xff] }
 0x41d   : > { %9385 = vmatprep.mubr.f32.mxu1 %v12286_v43  ;;  %10207 = vmatpush3.bf16.msra.mxu1 %v10204_v49  ;;  %v7378_v43 = vld [vmem:[%s13114_s4 + $0x310] sm:$0xff]  ;;  %v13222_v49 = vld [vmem:[#allocation16_spill] sm:$0xff] }
 0x41e   : > { %10209 = vmatprep.subr.bf16.mxu1 %v10208_v57 }
 0x420   : > { %9386 = vmatmul.mubr.f32.gmra.mrb[14].mxu1 %v12282_v22  ;;  %v13213_v22 = vld [vmem:[#allocation6_spill] sm:$0xff] }
 0x421   : > { %9388 = vmatprep.mubr.f32.mxu1 %v12296_v37  ;;  %10211 = vmatpush3.bf16.msra.mxu1 %v10208_v57  ;;  %v13214_v37 = vld [vmem:[#allocation5_spill] sm:$0xff]  ;;  %v7389_v57 = vld [vmem:[%s13114_s4 + $0x368] sm:$0xff] }
 0x422   : > { %10213 = vmatprep.subr.bf16.mxu1 %v10212_v50 }
 0x424   : > { %9389 = vmatmul.mubr.f32.gmra.mrb[16].mxu1 %v12292_v42  ;;  %v7379_v42 = vld [vmem:[%s13114_s4 + $0x318] sm:$0xff] }
 0x425   : > { %9391 = vmatprep.mubr.f32.mxu1 %v12306_v41  ;;  %v7380_v41 = vld [vmem:[%s13114_s4 + $0x320] sm:$0xff] }
 0x428   : > { %9392 = vmatmul.mubr.f32.gmra.mrb[18].mxu1 %v12302_v25  ;;  %v10216_v25 = vpack.c.bf16 %v7379_v42, %v7378_v43  ;;  %v7392_v42 = vld [vmem:[%s13114_s4 + $0x380] sm:$0xff] }
 0x429   : > { %9394 = vmatprep.mubr.f32.mxu1 %v12316_v58  ;;  %v13215_v58 = vld [vmem:[#allocation9_spill] sm:$0xff] }
 0x42c   : > { %9395 = vmatmul.mubr.f32.gmra.mrb[20].mxu1 %v12312_v0  ;;  %v7381_v0 = vld [vmem:[%s13114_s4 + $0x328] sm:$0xff] }
 0x42d   : > { %9397 = vmatprep.mubr.f32.mxu1 %v12326_v35  ;;  %v10220_v35 = vpack.c.bf16 %v7381_v0, %v7380_v41  ;;  %v13227_v0 = vld [vmem:[#allocation21_spill] sm:$0xff] }
 0x430   : > { %9398 = vmatmul.mubr.f32.gmra.mrb[22].mxu1 %v12322_v61  ;;  %v13216_v61 = vld [vmem:[#allocation10_spill] sm:$0xff] }
 0x431   : > { %9400 = vmatprep.mubr.f32.mxu1 %v12336_v13  ;;  %v7383_v13 = vld [vmem:[%s13114_s4 + $0x338] sm:$0xff] }
 0x434   : > { %9401 = vmatmul.mubr.f32.gmra.mrb[24].mxu1 %v12332_v8  ;;  %v7382_v8 = vld [vmem:[%s13114_s4 + $0x330] sm:$0xff] }
 0x435   : > { %9403 = vmatprep.mubr.f32.mxu1 %v12346_v26  ;;  %v13218_v26 = vld [vmem:[#allocation12_spill] sm:$0xff] }
 0x438   : > { %9404 = vmatmul.mubr.f32.gmra.mrb[26].mxu1 %v12342_v11  ;;  %v13217_v11 = vld [vmem:[#allocation11_spill] sm:$0xff] }
 0x439   : > { %9406 = vmatprep.mubr.f32.mxu1 %v13211_v23  ;;  %v7390_v23 = vld [vmem:[%s13114_s4 + $0x370] sm:$0xff] }
 0x43c   : > { %9407 = vmatmul.mubr.f32.gmra.mrb[28].mxu1 %v13212_v20  ;;  %v7391_v20 = vld [vmem:[%s13114_s4 + $0x378] sm:$0xff] }
 0x43d   : > { %9409 = vmatprep.mubr.f32.mxu1 %v13213_v22  ;;  %v13225_v22 = vld [vmem:[#allocation19_spill] sm:$0xff]  ;;  %v10240_v43 = vpack.c.bf16 %v7391_v20, %v7390_v23  ;;  %v7409_v23 = vld [vmem:[%s13114_s4 + $0x408] sm:$0xff] }
 0x43e   : > { %v5838_v20 = vld [vmem:[#allocation2 + $0x88] sm:$0xff] }
 0x440   : > { %9410 = vmatmul.mubr.f32.gmra.mrb[30].mxu1 %v13214_v37  ;;  %v7393_v37 = vld [vmem:[%s13114_s4 + $0x388] sm:$0xff] }
 0x441   : > { %9444 = vmatprep.mubr.f32.mxu1 %v12521_v3  ;;  %v10224_v3 = vpack.c.bf16 %v7383_v13, %v7382_v8  ;;  %v10244_v41 = vpack.c.bf16 %v7393_v37, %v7392_v42  ;;  %v13232_v8 = vld [vmem:[#allocation26_spill] sm:$0xff]  ;;  %v13234_v13 = vld [vmem:[#allocation28_spill] sm:$0xff] }
 0x442   : > { %v7417_v42 = vld [vmem:[%s13114_s4 + $0x448] sm:$0xff] }
 0x443   : > { %v5840_v37 = vld [vmem:[#allocation2 + $0xa8] sm:$0xff] }
 0x444   : > { %9445 = vmatmul.mubr.f32.vlgmr.msra.gmra.mrb[0].mxu1 %v13215_v58  ;;  %v13229_v58 = vld [vmem:[#allocation23_spill] sm:$0xff] }
 0x445   : > { %9447 = vmatprep.mubr.f32.mxu1 %v13216_v61  ;;  %10215 = vmatpush3.bf16.msra.mxu1 %v10212_v50  ;;  %v10236_v50 = vpack.c.bf16 %v7389_v57, %v7388_v30  ;;  %v13230_v61 = vld [vmem:[#allocation24_spill] sm:$0xff]  ;;  %v7399_v30 = vld [vmem:[%s13114_s4 + $0x3b8] sm:$0xff] }
 0x446   : > { %10217 = vmatprep.subr.bf16.mxu1 %v10216_v25  ;;  %v7401_v57 = vld [vmem:[%s13114_s4 + $0x3c8] sm:$0xff] }
 0x448   : > { %9448 = vmatmul.mubr.f32.gmra.mrb[2].mxu1 %v13217_v11  ;;  %v13235_v11 = vld [vmem:[#allocation29_spill] sm:$0xff] }
 0x449   : > { %9450 = vmatprep.mubr.f32.mxu1 %v13218_v26  ;;  %10219 = vmatpush3.bf16.msra.mxu1 %v10216_v25  ;;  %v13226_v25 = vld [vmem:[#allocation20_spill] sm:$0xff]  ;;  %v13236_v26 = vld [vmem:[#allocation30_spill] sm:$0xff] }
 0x44a   : > { %10221 = vmatprep.subr.bf16.mxu1 %v10220_v35 }
 0x44c   : > { %9451 = vmatmul.mubr.f32.gmra.mrb[4].mxu1 %v13219_v48  ;;  %v13240_v48 = vld [vmem:[#allocation34_spill] sm:$0xff] }
 0x44d   : > { %9453 = vmatprep.mubr.f32.mxu1 %v13220_v60  ;;  %10223 = vmatpush3.bf16.msra.mxu1 %v10220_v35  ;;  %v13231_v35 = vld [vmem:[#allocation25_spill] sm:$0xff] }
 0x44e   : > { %10225 = vmatprep.subr.bf16.mxu1 %v10224_v3  ;;  %v12893_v60 = vld [vmem:[#allocation2 + $0x209] sm:$0xff] }
 0x450   : > { %9454 = vmatmul.mubr.f32.gmra.mrb[6].mxu1 %v13221_v1  ;;  %v10248_v1 = vpack.c.bf16 %v7395_v5, %v7394_v2  ;;  %v5848_v2 = vld [vmem:[#allocation2 + $0x128] sm:$0xff]  ;;  %v5849_v5 = vld [vmem:[#allocation2 + $0x130] sm:$0xff] }
 0x451   : > { %9456 = vmatprep.mubr.f32.mxu1 %v13222_v49  ;;  %10227 = vmatpush3.bf16.msra.mxu1 %v10224_v3  ;;  %v13237_v3 = vld [vmem:[#allocation31_spill] sm:$0xff]  ;;  %v7397_v49 = vld [vmem:[%s13114_s4 + $0x3a8] sm:$0xff] }
 0x452   : > { %10229 = vmatprep.subr.bf16.mxu1 %v10228_v59 }
 0x454   : > { %9457 = vmatmul.mubr.f32.gmra.mrb[8].mxu1 %v13223_v62  ;;  %v7403_v62 = vld [vmem:[%s13114_s4 + $0x3d8] sm:$0xff] }
 0x455   : > { %9459 = vmatprep.mubr.f32.mxu1 %v13224_v63  ;;  %10231 = vmatpush3.bf16.msra.mxu1 %v10228_v59  ;;  %v12896_v59 = vld [vmem:[#allocation2 + $0x211] sm:$0xff]  ;;  %v7405_v63 = vld [vmem:[%s13114_s4 + $0x3e8] sm:$0xff] }
 0x456   : > { %10233 = vmatprep.subr.bf16.mxu1 %v10232_v24 }
 0x458   : > { %9460 = vmatmul.mubr.f32.gmra.mrb[10].mxu1 %v13225_v22  ;;  %v5839_v22 = vld [vmem:[#allocation2 + $0x90] sm:$0xff] }
 0x459   : > { %9462 = vmatprep.mubr.f32.mxu1 %v12593_v17  ;;  %10235 = vmatpush3.bf16.msra.mxu1 %v10232_v24  ;;  %v13228_v17 = vld [vmem:[#allocation22_spill] sm:$0xff] }
 0x45a   : > { %10237 = vmatprep.subr.bf16.mxu1 %v10236_v50 }
 0x45c   : > { %9463 = vmatmul.mubr.f32.gmra.mrb[12].mxu1 %v12596_v18  ;;  %v13233_v18 = vld [vmem:[#allocation27_spill] sm:$0xff] }
 0x45d   : > { %9465 = vmatprep.mubr.f32.mxu1 %v13226_v25  ;;  %10239 = vmatpush3.bf16.msra.mxu1 %v10236_v50  ;;  %v7407_v50 = vld [vmem:[%s13114_s4 + $0x3f8] sm:$0xff]  ;;  %v5841_v25 = vld [vmem:[#allocation2 + $0xb0] sm:$0xff] }
 0x45e   : > { %10241 = vmatprep.subr.bf16.mxu1 %v10240_v43 }
 0x460   : > { %9466 = vmatmul.mubr.f32.gmra.mrb[14].mxu1 %v13227_v0  ;;  %v7419_v0 = vld [vmem:[%s13114_s4 + $0x458] sm:$0xff] }
 0x461   : > { %9468 = vmatprep.mubr.f32.mxu1 %v13228_v17  ;;  %10243 = vmatpush3.bf16.msra.mxu1 %v10240_v43  ;;  %v7416_v43 = vld [vmem:[%s13114_s4 + $0x440] sm:$0xff]  ;;  %v5842_v17 = vld [vmem:[#allocation2 + $0xc8] sm:$0xff] }
 0x462   : > { %10245 = vmatprep.subr.bf16.mxu1 %v10244_v41 }
 0x464   : > { %9469 = vmatmul.mubr.f32.gmra.mrb[16].mxu1 %v13229_v58 }
 0x465   : > { %9471 = vmatprep.mubr.f32.mxu1 %v13230_v61  ;;  %v5843_v61 = vld [vmem:[#allocation2 + $0xd0] sm:$0xff] }
 0x468   : > { %9472 = vmatmul.mubr.f32.gmra.mrb[18].mxu1 %v13231_v35  ;;  %v7420_v35 = vld [vmem:[%s13114_s4 + $0x460] sm:$0xff] }
 0x469   : > { %9474 = vmatprep.mubr.f32.mxu1 %v13232_v8  ;;  %v7421_v8 = vld [vmem:[%s13114_s4 + $0x468] sm:$0xff] }
 0x46c   : > { %9475 = vmatmul.mubr.f32.gmra.mrb[20].mxu1 %v13233_v18  ;;  %v5844_v18 = vld [vmem:[#allocation2 + $0xe8] sm:$0xff] }
 0x46d   : > { %9477 = vmatprep.mubr.f32.mxu1 %v13234_v13  ;;  %v10300_v13 = vpack.c.bf16 %v7421_v8, %v7420_v35 }
 0x470   : > { %9478 = vmatmul.mubr.f32.gmra.mrb[22].mxu1 %v13235_v11  ;;  %v5845_v11 = vld [vmem:[#allocation2 + $0xf0] sm:$0xff] }
 0x471   : > { %9480 = vmatprep.mubr.f32.mxu1 %v13236_v26  ;;  %v7422_v26 = vld [vmem:[%s13114_s4 + $0x470] sm:$0xff] }
 0x474   : > { %9481 = vmatmul.mubr.f32.gmra.mrb[24].mxu1 %v13237_v3  ;;  %v7423_v3 = vld [vmem:[%s13114_s4 + $0x478] sm:$0xff] }
 0x475   : > { %9483 = vmatprep.mubr.f32.mxu1 %v13238_v29  ;;  %v5846_v29 = vld [vmem:[#allocation2 + $0x108] sm:$0xff] }
 0x478   : > { %9484 = vmatmul.mubr.f32.gmra.mrb[26].mxu1 %v13239_v10  ;;  %v10304_v10 = vpack.c.bf16 %v7423_v3, %v7422_v26 }
 0x479   : > { %9486 = vmatprep.mubr.f32.mxu1 %v13240_v48  ;;  %v5847_v48 = vld [vmem:[#allocation2 + $0x110] sm:$0xff] }
 0x47c   : > { %9487 = vmatmul.mubr.f32.gmra.mrb[28].mxu1 %v12644_v55  ;;  %v7396_v55 = vld [vmem:[%s13114_s4 + $0x3a0] sm:$0xff] }
 0x47d   : > { %9489 = vmatprep.mubr.f32.mxu1 %v12893_v60  ;;  %v10252_v24 = vpack.c.bf16 %v7397_v49, %v7396_v55  ;;  %v5851_v55 = vld [vmem:[#allocation2 + $0x150] sm:$0xff]  ;;  %v5852_v49 = vld [vmem:[#allocation2 + $0x168] sm:$0xff] }
 0x480   : > { %9490 = vmatmul.mubr.f32.gmra.mrb[30].mxu1 %v12896_v59 }
 0x481   : > { %9524 = vmatprep.mubr.f32.mxu1 %v12395_v6  ;;  %v7398_v6 = vld [vmem:[%s13114_s4 + $0x3b0] sm:$0xff] }
 0x484   : > { %9525 = vmatmul.mubr.f32.vlgmr.msra.gmra.mrb[0].mxu1 %v12398_v28  ;;  %v10256_v28 = vpack.c.bf16 %v7399_v30, %v7398_v6  ;;  %v5854_v6 = vld [vmem:[#allocation2 + $0x188] sm:$0xff]  ;;  %v5855_v30 = vld [vmem:[#allocation2 + $0x190] sm:$0xff] }
 0x485   : > { %9527 = vmatprep.mubr.f32.mxu1 %v12407_v4  ;;  %10247 = vmatpush3.bf16.msra.mxu1 %v10244_v41  ;;  %v7400_v4 = vld [vmem:[%s13114_s4 + $0x3c0] sm:$0xff]  ;;  %v7418_v41 = vld [vmem:[%s13114_s4 + $0x450] sm:$0xff] }
 0x486   : > { %10249 = vmatprep.subr.bf16.mxu1 %v10248_v1  ;;  %v10296_v58 = vpack.c.bf16 %v7419_v0, %v7418_v41  ;;  %v13027_v41 = vld [vmem:[%s13115_s5] ss:$0 sm:$0xff] }
 0x488   : > { %9528 = vmatmul.mubr.f32.gmra.mrb[2].mxu1 %v12410_v34  ;;  %v10260_v34 = vpack.c.bf16 %v7401_v57, %v7400_v4  ;;  %v5857_v4 = vld [vmem:[#allocation2 + $0x1b0] sm:$0xff]  ;;  %v5858_v57 = vld [vmem:[#allocation2 + $0x1c8] sm:$0xff] }
 0x489   : > { %9530 = vmatprep.mubr.f32.mxu1 %v12419_v52  ;;  %10251 = vmatpush3.bf16.msra.mxu1 %v10248_v1  ;;  %v7402_v52 = vld [vmem:[%s13114_s4 + $0x3d0] sm:$0xff]  ;;  %v5850_v1 = vld [vmem:[#allocation2 + $0x148] sm:$0xff] }
 0x48a   : > { %10253 = vmatprep.subr.bf16.mxu1 %v10252_v24 }
 0x48c   : > { %9531 = vmatmul.mubr.f32.gmra.mrb[4].mxu1 %v12422_v40  ;;  %v10264_v40 = vpack.c.bf16 %v7403_v62, %v7402_v52  ;;  %v5860_v52 = vld [vmem:[#allocation2 + $0x1e8] sm:$0xff]  ;;  %v5861_v62 = vld [vmem:[#allocation2 + $0x1f0] sm:$0xff] }
 0x48d   : > { %9533 = vmatprep.mubr.f32.mxu1 %v12431_v33  ;;  %10255 = vmatpush3.bf16.msra.mxu1 %v10252_v24  ;;  %v7404_v33 = vld [vmem:[%s13114_s4 + $0x3e0] sm:$0xff]  ;;  %v5853_v24 = vld [vmem:[#allocation2 + $0x170] sm:$0xff] }
 0x48e   : > { %10257 = vmatprep.subr.bf16.mxu1 %v10256_v28 }
 0x490   : > { %9534 = vmatmul.mubr.f32.gmra.mrb[6].mxu1 %v12434_v36  ;;  %v10268_v36 = vpack.c.bf16 %v7405_v63, %v7404_v33  ;;  %v5863_v33 = vld [vmem:[#allocation2 + $0x210] sm:$0xff]  ;;  %v10830_v63 = vld [vmem:[#allocation2] sm:$0xff] }
 0x491   : > { %9536 = vmatprep.mubr.f32.mxu1 %v12443_v12  ;;  %10259 = vmatpush3.bf16.msra.mxu1 %v10256_v28  ;;  %v7406_v12 = vld [vmem:[%s13114_s4 + $0x3f0] sm:$0xff]  ;;  %v5856_v28 = vld [vmem:[#allocation2 + $0x1a8] sm:$0xff] }
 0x492   : > { %10261 = vmatprep.subr.bf16.mxu1 %v10260_v34 }
 0x494   : > { %9537 = vmatmul.mubr.f32.gmra.mrb[8].mxu1 %v12446_v9  ;;  %v10272_v9 = vpack.c.bf16 %v7407_v50, %v7406_v12  ;;  %v6141_v12 = vld [vmem:[#allocation2 + $0x51] sm:$0xff]  ;;  %v6142_v50 = vld [vmem:[#allocation2 + $0x69] sm:$0xff] }
 0x495   : > { %9539 = vmatprep.mubr.f32.mxu1 %v12455_v16  ;;  %10263 = vmatpush3.bf16.msra.mxu1 %v10260_v34  ;;  %v7408_v16 = vld [vmem:[%s13114_s4 + $0x400] sm:$0xff]  ;;  %v5859_v34 = vld [vmem:[#allocation2 + $0x1d0] sm:$0xff] }
 0x496   : > { %10265 = vmatprep.subr.bf16.mxu1 %v10264_v40 }
 0x498   : > { %9540 = vmatmul.mubr.f32.gmra.mrb[10].mxu1 %v12458_v19  ;;  %v10276_v19 = vpack.c.bf16 %v7409_v23, %v7408_v16  ;;  %v6144_v16 = vld [vmem:[#allocation2 + $0x89] sm:$0xff]  ;;  %v6145_v23 = vld [vmem:[#allocation2 + $0x91] sm:$0xff] }
 0x499   : > { %9542 = vmatprep.mubr.f32.mxu1 %v12461_v47  ;;  %10267 = vmatpush3.bf16.msra.mxu1 %v10264_v40  ;;  %v13241_v47 = vld [vmem:[#allocation7_spill] sm:$0xff]  ;;  %v5862_v40 = vld [vmem:[#allocation2 + $0x208] sm:$0xff] }
 0x49a   : > { %10269 = vmatprep.subr.bf16.mxu1 %v10268_v36 }
 0x49c   : > { %9543 = vmatmul.mubr.f32.gmra.mrb[12].mxu1 %v12464_v27  ;;  %v13242_v27 = vld [vmem:[#allocation8_spill] sm:$0xff] }
 0x49d   : > { %9545 = vmatprep.mubr.f32.mxu1 %v12467_v44  ;;  %10271 = vmatpush3.bf16.msra.mxu1 %v10268_v36  ;;  %v13243_v44 = vld [vmem:[#allocation35_spill] sm:$0xff]  ;;  %v6140_v36 = vld [vmem:[#allocation2 + $0x49] sm:$0xff] }
 0x49e   : > { %10273 = vmatprep.subr.bf16.mxu1 %v10272_v9 }
 0x4a0   : > { %9546 = vmatmul.mubr.f32.gmra.mrb[14].mxu1 %v12470_v39  ;;  %v5558_v39 = vld [vmem:[#allocation2 + $0x227] sm:$0xff] }
 0x4a1   : > { %9548 = vmatprep.mubr.f32.mxu1 %v12473_v15  ;;  %10275 = vmatpush3.bf16.msra.mxu1 %v10272_v9  ;;  %v13244_v15 = vld [vmem:[#allocation36_spill] sm:$0xff]  ;;  %v6143_v9 = vld [vmem:[#allocation2 + $0x71] sm:$0xff] }
 0x4a2   : > { %10277 = vmatprep.subr.bf16.mxu1 %v10276_v19 }
 0x4a4   : > { %9549 = vmatmul.mubr.f32.gmra.mrb[16].mxu1 %v12476_v56  ;;  %v5559_v56 = vld [vmem:[#allocation2 + $0x22f] sm:$0xff] }
 0x4a5   : > { %9551 = vmatprep.mubr.f32.mxu1 %v12479_v21  ;;  %v7410_v21 = vld [vmem:[%s13114_s4 + $0x410] sm:$0xff] }
 0x4a8   : > { %9552 = vmatmul.mubr.f32.gmra.mrb[18].mxu1 %v12482_v31  ;;  %v7411_v31 = vld [vmem:[%s13114_s4 + $0x418] sm:$0xff] }
 0x4a9   : > { %9554 = vmatprep.mubr.f32.mxu1 %v12485_v51  ;;  %v10280_v51 = vpack.c.bf16 %v7411_v31, %v7410_v21  ;;  %v6153_v21 = vld [vmem:[#allocation2 + $0x111] sm:$0xff]  ;;  %v6154_v31 = vld [vmem:[#allocation2 + $0x129] sm:$0xff] }
 0x4ac   : > { %9555 = vmatmul.mubr.f32.gmra.mrb[20].mxu1 %v12488_v53  ;;  %v7412_v53 = vld [vmem:[%s13114_s4 + $0x420] sm:$0xff] }
 0x4ad   : > { %9557 = vmatprep.mubr.f32.mxu1 %v12491_v7  ;;  %v7413_v7 = vld [vmem:[%s13114_s4 + $0x428] sm:$0xff] }
 0x4b0   : > { %9558 = vmatmul.mubr.f32.gmra.mrb[22].mxu1 %v12494_v45  ;;  %v5836_v45 = vld [vmem:[#allocation2 + $0x68] sm:$0xff] }
 0x4b1   : > { %9560 = vmatprep.mubr.f32.mxu1 %v12497_v46  ;;  %v10284_v46 = vpack.c.bf16 %v7413_v7, %v7412_v53  ;;  %v6156_v53 = vld [vmem:[#allocation2 + $0x149] sm:$0xff]  ;;  %v6157_v7 = vld [vmem:[#allocation2 + $0x151] sm:$0xff] }
 0x4b4   : > { %9561 = vmatmul.mubr.f32.gmra.mrb[24].mxu1 %v12500_v38  ;;  %v7414_v38 = vld [vmem:[%s13114_s4 + $0x430] sm:$0xff] }
 0x4b5   : > { %9563 = vmatprep.mubr.f32.mxu1 %v13241_v47  ;;  %v6147_v47 = vld [vmem:[#allocation2 + $0xb1] sm:$0xff] }
 0x4b8   : > { %9564 = vmatmul.mubr.f32.gmra.mrb[26].mxu1 %v13242_v27  ;;  %v6148_v27 = vld [vmem:[#allocation2 + $0xc9] sm:$0xff] }
 0x4b9   : > { %9566 = vmatprep.mubr.f32.mxu1 %v13243_v44  ;;  %v6149_v44 = vld [vmem:[#allocation2 + $0xd1] sm:$0xff] }
 0x4bc   : > { %9567 = vmatmul.mubr.f32.gmra.mrb[28].mxu1 %v13244_v15  ;;  %v6151_v15 = vld [vmem:[#allocation2 + $0xf1] sm:$0xff] }
 0x4bd   : > { %9569 = vmatprep.mubr.f32.mxu1 %v5558_v39  ;;  %v6150_v39 = vld [vmem:[#allocation2 + $0xe9] sm:$0xff] }
 0x4c0   : > { %9570 = vmatmul.mubr.f32.gmra.mrb[30].mxu1 %v5559_v56  ;;  %v6152_v56 = vld [vmem:[#allocation2 + $0x109] sm:$0xff] }
 0x4c1   : > { %9604 = vmatprep.mubr.f32.mxu1 %v12743_v14  ;;  %v7415_v14 = vld [vmem:[%s13114_s4 + $0x438] sm:$0xff] }
 0x4c4   : > { %9605 = vmatmul.mubr.f32.vlgmr.msra.gmra.mrb[0].mxu1 %v12746_v32  ;;  %v10288_v32 = vpack.c.bf16 %v7415_v14, %v7414_v38  ;;  %v6160_v38 = vld [vmem:[#allocation2 + $0x189] sm:$0xff]  ;;  %v6161_v14 = vld [vmem:[#allocation2 + $0x191] sm:$0xff] }
 0x4c5   : > { %9607 = vmatprep.mubr.f32.mxu1 %v5836_v45  ;;  %10279 = vmatpush3.bf16.msra.mxu1 %v10276_v19  ;;  %v6146_v19 = vld [vmem:[#allocation2 + $0xa9] sm:$0xff] }
 0x4c6   : > { %10281 = vmatprep.subr.bf16.mxu1 %v10280_v51  ;;  %v6158_v45 = vld [vmem:[#allocation2 + $0x169] sm:$0xff] }
 0x4c8   : > { %9608 = vmatmul.mubr.f32.gmra.mrb[2].mxu1 %v12756_v54  ;;  %v10292_v54 = vpack.c.bf16 %v7417_v42, %v7416_v43  ;;  %v6165_v43 = vld [vmem:[#allocation2 + $0x1d1] sm:$0xff]  ;;  %v6166_v42 = vld [vmem:[#allocation2 + $0x1e9] sm:$0xff] }
 0x4c9   : > { %9610 = vmatprep.mubr.f32.mxu1 %v5838_v20  ;;  %10283 = vmatpush3.bf16.msra.mxu1 %v10280_v51  ;;  %v6155_v51 = vld [vmem:[#allocation2 + $0x131] sm:$0xff]  ;;  %v6162_v20 = vld [vmem:[#allocation2 + $0x1a9] sm:$0xff] }
 0x4ca   : > { %10285 = vmatprep.subr.bf16.mxu1 %v10284_v46 }
 0x4cc   : > { %9611 = vmatmul.mubr.f32.gmra.mrb[4].mxu1 %v5839_v22  ;;  %v6164_v22 = vld [vmem:[#allocation2 + $0x1c9] sm:$0xff] }
 0x4cd   : > { %9613 = vmatprep.mubr.f32.mxu1 %v5840_v37  ;;  %10287 = vmatpush3.bf16.msra.mxu1 %v10284_v46  ;;  %v6159_v46 = vld [vmem:[#allocation2 + $0x171] sm:$0xff] }
 0x4ce   : > { %10289 = vmatprep.subr.bf16.mxu1 %v10288_v32  ;;  %v6167_v37 = vld [vmem:[#allocation2 + $0x1f1] sm:$0xff] }
 0x4d0   : > { %9614 = vmatmul.mubr.f32.gmra.mrb[6].mxu1 %v5841_v25  ;;  %v6171_v25 = vld [vmem:[#allocation2 + $0x231] sm:$0xff] }
 0x4d1   : > { %9616 = vmatprep.mubr.f32.mxu1 %v5842_v17  ;;  %10291 = vmatpush3.bf16.msra.mxu1 %v10288_v32  ;;  %v6163_v32 = vld [vmem:[#allocation2 + $0x1b1] sm:$0xff] }
 0x4d2   : > { %10293 = vmatprep.subr.bf16.mxu1 %v10292_v54 }
 0x4d4   : > { %9617 = vmatmul.mubr.f32.gmra.mrb[8].mxu1 %v5843_v61 }
 0x4d5   : > { %9619 = vmatprep.mubr.f32.mxu1 %v5844_v18  ;;  %10295 = vmatpush3.bf16.msra.mxu1 %v10292_v54  ;;  %v6170_v54 = vld [vmem:[#allocation2 + $0x229] sm:$0xff] }
 0x4d6   : > { %10297 = vmatprep.subr.bf16.mxu1 %v10296_v58 }
 0x4d8   : > { %9620 = vmatmul.mubr.f32.gmra.mrb[10].mxu1 %v5845_v11 }
 0x4d9   : > { %9622 = vmatprep.mubr.f32.mxu1 %v5846_v29  ;;  %10299 = vmatpush3.bf16.msra.mxu1 %v10296_v58 }
 0x4da   : > { %10301 = vmatprep.subr.bf16.mxu1 %v10300_v13 }
 0x4dc   : > { %9623 = vmatmul.mubr.f32.gmra.mrb[12].mxu1 %v5847_v48 }
 0x4dd   : > { %9625 = vmatprep.mubr.f32.mxu1 %v5848_v2  ;;  %10303 = vmatpush3.bf16.msra.mxu1 %v10300_v13 }
 0x4de   : > { %10305 = vmatprep.subr.bf16.mxu1 %v10304_v10 }
 0x4e0   : > { %9626 = vmatmul.mubr.f32.gmra.mrb[14].mxu1 %v5849_v5 }
 0x4e1   : > { %9628 = vmatprep.mubr.f32.mxu1 %v5850_v1  ;;  %10307 = vmatpush3.bf16.msra.mxu1 %v10304_v10 }
 0x4e4   : > { %9629 = vmatmul.mubr.f32.gmra.mrb[16].mxu1 %v5851_v55 }
 0x4e5   : > { %9631 = vmatprep.mubr.f32.mxu1 %v5852_v49 }
 0x4e8   : > { %9632 = vmatmul.mubr.f32.gmra.mrb[18].mxu1 %v5853_v24 }
 0x4e9   : > { %9634 = vmatprep.mubr.f32.mxu1 %v5854_v6 }
 0x4ec   : > { %9635 = vmatmul.mubr.f32.gmra.mrb[20].mxu1 %v5855_v30 }
 0x4ed   : > { %9637 = vmatprep.mubr.f32.mxu1 %v5856_v28 }
 0x4f0   : > { %9638 = vmatmul.mubr.f32.gmra.mrb[22].mxu1 %v5857_v4 }
 0x4f1   : > { %9640 = vmatprep.mubr.f32.mxu1 %v5858_v57 }
 0x4f4   : > { %9641 = vmatmul.mubr.f32.gmra.mrb[24].mxu1 %v5859_v34 }
 0x4f5   : > { %9643 = vmatprep.mubr.f32.mxu1 %v5860_v52 }
 0x4f8   : > { %9644 = vmatmul.mubr.f32.gmra.mrb[26].mxu1 %v5861_v62 }
 0x4f9   : > { %9646 = vmatprep.mubr.f32.mxu1 %v5862_v40 }
 0x4fc   : > { %9647 = vmatmul.mubr.f32.gmra.mrb[28].mxu1 %v5863_v33 }
 0x4fd   : > { %9649 = vmatprep.mubr.f32.mxu1 %v10830_v63 }
 0x500   : > { %9650 = vmatmul.mubr.f32.gmra.mrb[30].mxu1 %v10830_v63 }
 0x501   : > { %9684 = vmatprep.mubr.f32.mxu1 %v6140_v36 }
 0x504   : > { %9685 = vmatmul.mubr.f32.vlgmr.msra.gmra.mrb[0].mxu1 %v6141_v12 }
 0x505   : > { %9687 = vmatprep.mubr.f32.mxu1 %v6142_v50 }
 0x508   : > { %9688 = vmatmul.mubr.f32.gmra.mrb[2].mxu1 %v6143_v9 }
 0x509   : > { %9690 = vmatprep.mubr.f32.mxu1 %v6144_v16 }
 0x50c   : > { %9691 = vmatmul.mubr.f32.gmra.mrb[4].mxu1 %v6145_v23 }
 0x50d   : > { %9693 = vmatprep.mubr.f32.mxu1 %v6146_v19 }
 0x510   : > { %9694 = vmatmul.mubr.f32.gmra.mrb[6].mxu1 %v6147_v47 }
 0x511   : > { %9696 = vmatprep.mubr.f32.mxu1 %v6148_v27 }
 0x514   : > { %9697 = vmatmul.mubr.f32.gmra.mrb[8].mxu1 %v6149_v44 }
 0x515   : > { %9699 = vmatprep.mubr.f32.mxu1 %v6150_v39 }
 0x518   : > { %9700 = vmatmul.mubr.f32.gmra.mrb[10].mxu1 %v6151_v15 }
 0x519   : > { %9702 = vmatprep.mubr.f32.mxu1 %v6152_v56 }
 0x51c   : > { %9703 = vmatmul.mubr.f32.gmra.mrb[12].mxu1 %v6153_v21 }
 0x51d   : > { %9705 = vmatprep.mubr.f32.mxu1 %v6154_v31 }
 0x520   : > { %9706 = vmatmul.mubr.f32.gmra.mrb[14].mxu1 %v6155_v51 }
 0x521   : > { %9708 = vmatprep.mubr.f32.mxu1 %v6156_v53 }
 0x524   : > { %9709 = vmatmul.mubr.f32.gmra.mrb[16].mxu1 %v6157_v7 }
 0x525   : > { %9711 = vmatprep.mubr.f32.mxu1 %v6158_v45 }
 0x528   : > { %9712 = vmatmul.mubr.f32.gmra.mrb[18].mxu1 %v6159_v46 }
 0x529   : > { %9714 = vmatprep.mubr.f32.mxu1 %v6160_v38 }
 0x52c   : > { %9715 = vmatmul.mubr.f32.gmra.mrb[20].mxu1 %v6161_v14 }
 0x52d   : > { %9717 = vmatprep.mubr.f32.mxu1 %v6162_v20 }
 0x530   : > { %9718 = vmatmul.mubr.f32.gmra.mrb[22].mxu1 %v6163_v32 }
 0x531   : > { %9720 = vmatprep.mubr.f32.mxu1 %v6164_v22 }
 0x534   : > { %9721 = vmatmul.mubr.f32.gmra.mrb[24].mxu1 %v6165_v43 }
 0x535   : > { %9723 = vmatprep.mubr.f32.mxu1 %v6166_v42 }
 0x538   : > { %9724 = vmatmul.mubr.f32.gmra.mrb[26].mxu1 %v6167_v37 }
 0x539   : > { %9726 = vmatprep.mubr.f32.mxu1 %v12893_v60 }
 0x53c   : > { %9727 = vmatmul.mubr.f32.gmra.mrb[28].mxu1 %v12896_v59 }
 0x53d   : > { %9729 = vmatprep.mubr.f32.mxu1 %v6170_v54 }
 0x540   : > { %9730 = vmatmul.mubr.f32.gmra.mrb[30].mxu1 %v6171_v25 }
 0x5d7   : > { %v9686_v0 = vpop.f32.mrb[0].mxu1 }
 0x5d8   : > { %v6454_v17 = vadd.f32 %v9686_v0, %v13027_v41  ;;  %v6255_v58 = vpop.f32.mrb[1].mxu1 }
 0x5d9   : > { %v6453_v60 = vadd.f32 %v13027_v41, %v6255_v58 }
 0x5da   : > { %v6486_v59 = vmax.f32 %v6454_v17, 0.0 }
 0x5db   : > { %v6485_v61 = vmax.f32 %v6453_v60, 0.0  ;;  %v9689_v35 = vpop.f32.mrb[2].mxu1 }
 0x5dc   : > { %6518 = vst [vmem:[%s13034_s30 + $0x8] sm:$0xff] %v6486_v59  ;;  %v6588_v8 = vmul.f32 %v6486_v59, %v6486_v59  ;;  %v6456_v18 = vadd.f32 %v9689_v35, %v13027_v41  ;;  %v6265_v13 = vpop.f32.mrb[3].mxu1 }
 0x5dd   : > { %6517 = vst [vmem:[%s13034_s30] sm:$0xff] %v6485_v61  ;;  %v6549_v11 = vadd.f32 %v6486_v59, %v6485_v61  ;;  %v6587_v26 = vmul.f32 %v6485_v61, %v6485_v61  ;;  %v6455_v3 = vadd.f32 %v13027_v41, %v6265_v13 }
 0x5de   : > { %v6488_v29 = vmax.f32 %v6456_v18, 0.0 }
 0x5df   : > { %v6619_v10 = vadd.f32 %v6588_v8, %v6587_v26  ;;  %v6487_v48 = vmax.f32 %v6455_v3, 0.0  ;;  %v9692_v2 = vpop.f32.mrb[4].mxu1 }
 0x5e0   : > { %6520 = vst [vmem:[%s13034_s30 + $0x18] sm:$0xff] %v6488_v29  ;;  %v6458_v5 = vadd.f32 %v9692_v2, %v13027_v41  ;;  %v6275_v1 = vpop.f32.mrb[5].mxu1  ;;  %v6590_v30 = vmul.f32 %v6488_v29, %v6488_v29 }
 0x5e1   : > { %6519 = vst [vmem:[%s13034_s30 + $0x10] sm:$0xff] %v6487_v48  ;;  %v6550_v55 = vadd.f32 %v6549_v11, %v6487_v48  ;;  %v6589_v49 = vmul.f32 %v6487_v48, %v6487_v48  ;;  %v6457_v24 = vadd.f32 %v13027_v41, %v6275_v1 }
 0x5e2   : > { %v6490_v6 = vmax.f32 %v6458_v5, 0.0 }
 0x5e3   : > { %v6620_v28 = vadd.f32 %v6619_v10, %v6589_v49  ;;  %v6489_v4 = vmax.f32 %v6457_v24, 0.0  ;;  %v6551_v57 = vadd.f32 %v6550_v55, %v6488_v29  ;;  %v9695_v34 = vpop.f32.mrb[6].mxu1 }
 0x5e4   : > { %6522 = vst [vmem:[%s13034_s30 + $0x28] sm:$0xff] %v6490_v6  ;;  %v6460_v52 = vadd.f32 %v9695_v34, %v13027_v41  ;;  %v6285_v62 = vpop.f32.mrb[7].mxu1  ;;  %v6592_v50 = vmul.f32 %v6490_v6, %v6490_v6 }
 0x5e5   : > { %6521 = vst [vmem:[%s13034_s30 + $0x20] sm:$0xff] %v6489_v4  ;;  %v6552_v40 = vadd.f32 %v6551_v57, %v6489_v4  ;;  %v6591_v33 = vmul.f32 %v6489_v4, %v6489_v4  ;;  %v6621_v63 = vadd.f32 %v6620_v28, %v6590_v30  ;;  %v6459_v36 = vadd.f32 %v13027_v41, %v6285_v62 }
 0x5e6   : > { %v6492_v12 = vmax.f32 %v6460_v52, 0.0 }
 0x5e7   : > { %v6622_v9 = vadd.f32 %v6621_v63, %v6591_v33  ;;  %v6491_v16 = vmax.f32 %v6459_v36, 0.0  ;;  %v6553_v23 = vadd.f32 %v6552_v40, %v6490_v6  ;;  %v9698_v19 = vpop.f32.mrb[8].mxu1 }
 0x5e8   : > { %6524 = vst [vmem:[%s13034_s30 + $0x38] sm:$0xff] %v6492_v12  ;;  %v6462_v47 = vadd.f32 %v9698_v19, %v13027_v41  ;;  %v6295_v27 = vpop.f32.mrb[9].mxu1  ;;  %v6594_v31 = vmul.f32 %v6492_v12, %v6492_v12 }
 0x5e9   : > { %6523 = vst [vmem:[%s13034_s30 + $0x30] sm:$0xff] %v6491_v16  ;;  %v6554_v44 = vadd.f32 %v6553_v23, %v6491_v16  ;;  %v6593_v39 = vmul.f32 %v6491_v16, %v6491_v16  ;;  %v6623_v15 = vadd.f32 %v6622_v9, %v6592_v50  ;;  %v6461_v56 = vadd.f32 %v13027_v41, %v6295_v27 }
 0x5ea   : > { %v6494_v21 = vmax.f32 %v6462_v47, 0.0 }
 0x5eb   : > { %v6624_v51 = vadd.f32 %v6623_v15, %v6593_v39  ;;  %v6493_v53 = vmax.f32 %v6461_v56, 0.0  ;;  %v6555_v7 = vadd.f32 %v6554_v44, %v6492_v12  ;;  %v9701_v45 = vpop.f32.mrb[10].mxu1 }
 0x5ec   : > { %6526 = vst [vmem:[%s13034_s30 + $0x48] sm:$0xff] %v6494_v21  ;;  %v6464_v46 = vadd.f32 %v9701_v45, %v13027_v41  ;;  %v6305_v38 = vpop.f32.mrb[11].mxu1  ;;  %v6596_v42 = vmul.f32 %v6494_v21, %v6494_v21 }
 0x5ed   : > { %6525 = vst [vmem:[%s13034_s30 + $0x40] sm:$0xff] %v6493_v53  ;;  %v6556_v14 = vadd.f32 %v6555_v7, %v6493_v53  ;;  %v6595_v20 = vmul.f32 %v6493_v53, %v6493_v53  ;;  %v6625_v32 = vadd.f32 %v6624_v51, %v6594_v31  ;;  %v6463_v22 = vadd.f32 %v13027_v41, %v6305_v38 }
 0x5ee   : > { %v6496_v43 = vmax.f32 %v6464_v46, 0.0 }
 0x5ef   : > { %v6626_v37 = vadd.f32 %v6625_v32, %v6595_v20  ;;  %v6495_v54 = vmax.f32 %v6463_v22, 0.0  ;;  %v6557_v25 = vadd.f32 %v6556_v14, %v6494_v21  ;;  %v9704_v0 = vpop.f32.mrb[12].mxu1 }
 0x5f0   : > { %6528 = vst [vmem:[%s13034_s30 + $0x58] sm:$0xff] %v6496_v43  ;;  %v6466_v17 = vadd.f32 %v9704_v0, %v13027_v41  ;;  %v6315_v58 = vpop.f32.mrb[13].mxu1  ;;  %v6598_v18 = vmul.f32 %v6496_v43, %v6496_v43 }
 0x5f1   : > { %6527 = vst [vmem:[%s13034_s30 + $0x50] sm:$0xff] %v6495_v54  ;;  %v6558_v60 = vadd.f32 %v6557_v25, %v6495_v54  ;;  %v6597_v59 = vmul.f32 %v6495_v54, %v6495_v54  ;;  %v6627_v61 = vadd.f32 %v6626_v37, %v6596_v42  ;;  %v6465_v35 = vadd.f32 %v13027_v41, %v6315_v58 }
 0x5f2   : > { %v6498_v8 = vmax.f32 %v6466_v17, 0.0 }
 0x5f3   : > { %v6628_v13 = vadd.f32 %v6627_v61, %v6597_v59  ;;  %v6497_v11 = vmax.f32 %v6465_v35, 0.0  ;;  %v6559_v26 = vadd.f32 %v6558_v60, %v6496_v43  ;;  %v9707_v3 = vpop.f32.mrb[14].mxu1 }
 0x5f4   : > { %6530 = vst [vmem:[%s13034_s30 + $0x68] sm:$0xff] %v6498_v8  ;;  %v6468_v29 = vadd.f32 %v9707_v3, %v13027_v41  ;;  %v6325_v10 = vpop.f32.mrb[15].mxu1  ;;  %v6600_v49 = vmul.f32 %v6498_v8, %v6498_v8 }
 0x5f5   : > { %6529 = vst [vmem:[%s13034_s30 + $0x60] sm:$0xff] %v6497_v11  ;;  %v6560_v48 = vadd.f32 %v6559_v26, %v6497_v11  ;;  %v6599_v2 = vmul.f32 %v6497_v11, %v6497_v11  ;;  %v6629_v5 = vadd.f32 %v6628_v13, %v6598_v18  ;;  %v6467_v1 = vadd.f32 %v13027_v41, %v6325_v10 }
 0x5f6   : > { %v6500_v55 = vmax.f32 %v6468_v29, 0.0 }
 0x5f7   : > { %v6630_v24 = vadd.f32 %v6629_v5, %v6599_v2  ;;  %v6499_v6 = vmax.f32 %v6467_v1, 0.0  ;;  %v6561_v30 = vadd.f32 %v6560_v48, %v6498_v8  ;;  %v9710_v28 = vpop.f32.mrb[16].mxu1 }
 0x5f8   : > { %6532 = vst [vmem:[%s13034_s30 + $0x78] sm:$0xff] %v6500_v55  ;;  %v6470_v4 = vadd.f32 %v9710_v28, %v13027_v41  ;;  %v6335_v57 = vpop.f32.mrb[17].mxu1  ;;  %v6602_v63 = vmul.f32 %v6500_v55, %v6500_v55 }
 0x5f9   : > { %6531 = vst [vmem:[%s13034_s30 + $0x70] sm:$0xff] %v6499_v6  ;;  %v6562_v34 = vadd.f32 %v6561_v30, %v6499_v6  ;;  %v6601_v52 = vmul.f32 %v6499_v6, %v6499_v6  ;;  %v6631_v62 = vadd.f32 %v6630_v24, %v6600_v49  ;;  %v6469_v40 = vadd.f32 %v13027_v41, %v6335_v57 }
 0x5fa   : > { %v6502_v33 = vmax.f32 %v6470_v4, 0.0 }
 0x5fb   : > { %v6632_v36 = vadd.f32 %v6631_v62, %v6601_v52  ;;  %v6501_v12 = vmax.f32 %v6469_v40, 0.0  ;;  %v6563_v50 = vadd.f32 %v6562_v34, %v6500_v55  ;;  %v9713_v9 = vpop.f32.mrb[18].mxu1 }
 0x5fc   : > { %6534 = vst [vmem:[%s13034_s30 + $0x88] sm:$0xff] %v6502_v33  ;;  %v6472_v16 = vadd.f32 %v9713_v9, %v13027_v41  ;;  %v6345_v23 = vpop.f32.mrb[19].mxu1  ;;  %v6604_v15 = vmul.f32 %v6502_v33, %v6502_v33 }
 0x5fd   : > { %6533 = vst [vmem:[%s13034_s30 + $0x80] sm:$0xff] %v6501_v12  ;;  %v6564_v19 = vadd.f32 %v6563_v50, %v6501_v12  ;;  %v6603_v47 = vmul.f32 %v6501_v12, %v6501_v12  ;;  %v6633_v27 = vadd.f32 %v6632_v36, %v6602_v63  ;;  %v6471_v44 = vadd.f32 %v13027_v41, %v6345_v23 }
 0x5fe   : > { %v6504_v39 = vmax.f32 %v6472_v16, 0.0 }
 0x5ff   : > { %v6634_v56 = vadd.f32 %v6633_v27, %v6603_v47  ;;  %v6503_v21 = vmax.f32 %v6471_v44, 0.0  ;;  %v6565_v31 = vadd.f32 %v6564_v19, %v6502_v33  ;;  %v9716_v51 = vpop.f32.mrb[20].mxu1 }
 0x600   : > { %6536 = vst [vmem:[%s13034_s30 + $0x98] sm:$0xff] %v6504_v39  ;;  %v6474_v53 = vadd.f32 %v9716_v51, %v13027_v41  ;;  %v6355_v7 = vpop.f32.mrb[21].mxu1  ;;  %v6606_v32 = vmul.f32 %v6504_v39, %v6504_v39 }
 0x601   : > { %6535 = vst [vmem:[%s13034_s30 + $0x90] sm:$0xff] %v6503_v21  ;;  %v6566_v45 = vadd.f32 %v6565_v31, %v6503_v21  ;;  %v6605_v46 = vmul.f32 %v6503_v21, %v6503_v21  ;;  %v6635_v38 = vadd.f32 %v6634_v56, %v6604_v15  ;;  %v6473_v14 = vadd.f32 %v13027_v41, %v6355_v7 }
 0x602   : > { %v6506_v20 = vmax.f32 %v6474_v53, 0.0 }
 0x603   : > { %v6636_v22 = vadd.f32 %v6635_v38, %v6605_v46  ;;  %v6505_v43 = vmax.f32 %v6473_v14, 0.0  ;;  %v6567_v42 = vadd.f32 %v6566_v45, %v6504_v39  ;;  %v9719_v37 = vpop.f32.mrb[22].mxu1 }
 0x604   : > { %6538 = vst [vmem:[%s13034_s30 + $0xa8] sm:$0xff] %v6506_v20  ;;  %v6476_v54 = vadd.f32 %v9719_v37, %v13027_v41  ;;  %v6365_v25 = vpop.f32.mrb[23].mxu1  ;;  %v6608_v61 = vmul.f32 %v6506_v20, %v6506_v20 }
 0x605   : > { %6537 = vst [vmem:[%s13034_s30 + $0xa0] sm:$0xff] %v6505_v43  ;;  %v6568_v0 = vadd.f32 %v6567_v42, %v6505_v43  ;;  %v6607_v17 = vmul.f32 %v6505_v43, %v6505_v43  ;;  %v6637_v58 = vadd.f32 %v6636_v22, %v6606_v32  ;;  %v6475_v60 = vadd.f32 %v13027_v41, %v6365_v25 }
 0x606   : > { %v6508_v59 = vmax.f32 %v6476_v54, 0.0 }
 0x607   : > { %v6638_v35 = vadd.f32 %v6637_v58, %v6607_v17  ;;  %v6507_v8 = vmax.f32 %v6475_v60, 0.0  ;;  %v6569_v18 = vadd.f32 %v6568_v0, %v6506_v20  ;;  %v9722_v13 = vpop.f32.mrb[24].mxu1 }
 0x608   : > { %6540 = vst [vmem:[%s13034_s30 + $0xb8] sm:$0xff] %v6508_v59  ;;  %v6478_v11 = vadd.f32 %v9722_v13, %v13027_v41  ;;  %v6375_v26 = vpop.f32.mrb[25].mxu1  ;;  %v6610_v5 = vmul.f32 %v6508_v59, %v6508_v59 }
 0x609   : > { %6539 = vst [vmem:[%s13034_s30 + $0xb0] sm:$0xff] %v6507_v8  ;;  %v6570_v3 = vadd.f32 %v6569_v18, %v6507_v8  ;;  %v6609_v29 = vmul.f32 %v6507_v8, %v6507_v8  ;;  %v6639_v10 = vadd.f32 %v6638_v35, %v6608_v61  ;;  %v6477_v48 = vadd.f32 %v13027_v41, %v6375_v26 }
 0x60a   : > { %v6510_v2 = vmax.f32 %v6478_v11, 0.0 }
 0x60b   : > { %v6640_v1 = vadd.f32 %v6639_v10, %v6609_v29  ;;  %v6509_v55 = vmax.f32 %v6477_v48, 0.0  ;;  %v6571_v49 = vadd.f32 %v6570_v3, %v6508_v59  ;;  %v9725_v24 = vpop.f32.mrb[26].mxu1 }
 0x60c   : > { %6542 = vst [vmem:[%s13034_s30 + $0xc8] sm:$0xff] %v6510_v2  ;;  %v6480_v6 = vadd.f32 %v9725_v24, %v13027_v41  ;;  %v6385_v30 = vpop.f32.mrb[27].mxu1  ;;  %v6612_v62 = vmul.f32 %v6510_v2, %v6510_v2 }
 0x60d   : > { %6541 = vst [vmem:[%s13034_s30 + $0xc0] sm:$0xff] %v6509_v55  ;;  %v6572_v28 = vadd.f32 %v6571_v49, %v6509_v55  ;;  %v6611_v4 = vmul.f32 %v6509_v55, %v6509_v55  ;;  %v6641_v57 = vadd.f32 %v6640_v1, %v6610_v5  ;;  %v6479_v34 = vadd.f32 %v13027_v41, %v6385_v30 }
 0x60e   : > { %v6512_v52 = vmax.f32 %v6480_v6, 0.0 }
 0x60f   : > { %v6642_v40 = vadd.f32 %v6641_v57, %v6611_v4  ;;  %v6511_v33 = vmax.f32 %v6479_v34, 0.0  ;;  %v6573_v63 = vadd.f32 %v6572_v28, %v6510_v2  ;;  %v9728_v36 = vpop.f32.mrb[28].mxu1 }
 0x610   : > { %6544 = vst [vmem:[%s13034_s30 + $0xd8] sm:$0xff] %v6512_v52  ;;  %v6482_v12 = vadd.f32 %v9728_v36, %v13027_v41  ;;  %v6395_v50 = vpop.f32.mrb[29].mxu1  ;;  %v6614_v27 = vmul.f32 %v6512_v52, %v6512_v52 }
 0x611   : > { %6543 = vst [vmem:[%s13034_s30 + $0xd0] sm:$0xff] %v6511_v33  ;;  %v6574_v9 = vadd.f32 %v6573_v63, %v6511_v33  ;;  %v6613_v16 = vmul.f32 %v6511_v33, %v6511_v33  ;;  %v6643_v23 = vadd.f32 %v6642_v40, %v6612_v62  ;;  %v6481_v19 = vadd.f32 %v13027_v41, %v6395_v50 }
 0x612   : > { %v6514_v47 = vmax.f32 %v6482_v12, 0.0 }
 0x613   : > { %v6644_v44 = vadd.f32 %v6643_v23, %v6613_v16  ;;  %v6513_v39 = vmax.f32 %v6481_v19, 0.0  ;;  %v6575_v15 = vadd.f32 %v6574_v9, %v6512_v52  ;;  %v9731_v56 = vpop.f32.mrb[30].mxu1 }
 0x614   : > { %6546 = vst [vmem:[%s13034_s30 + $0xe8] sm:$0xff] %v6514_v47  ;;  %v6484_v21 = vadd.f32 %v9731_v56, %v13027_v41  ;;  %v6405_v31 = vpop.f32.mrb[31].mxu1  ;;  %v6616_v38 = vmul.f32 %v6514_v47, %v6514_v47 }
 0x615   : > { %6545 = vst [vmem:[%s13034_s30 + $0xe0] sm:$0xff] %v6513_v39  ;;  %v6576_v51 = vadd.f32 %v6575_v15, %v6513_v39  ;;  %v6615_v53 = vmul.f32 %v6513_v39, %v6513_v39  ;;  %v6645_v7 = vadd.f32 %v6644_v44, %v6614_v27  ;;  %v6483_v45 = vadd.f32 %v13027_v41, %v6405_v31 }
 0x616   : > { %v6516_v46 = vmax.f32 %v6484_v21, 0.0 }
 0x617   : > { %v6646_v14 = vadd.f32 %v6645_v7, %v6615_v53  ;;  %v6515_v20 = vmax.f32 %v6483_v45, 0.0  ;;  %v6577_v32 = vadd.f32 %v6576_v51, %v6514_v47 }
 0x618   : > { %6548 = vst [vmem:[%s13034_s30 + $0xf8] sm:$0xff] %v6516_v46  ;;  %v6618_v37 = vmul.f32 %v6516_v46, %v6516_v46 }
 0x619   : > { %6547 = vst [vmem:[%s13034_s30 + $0xf0] sm:$0xff] %v6515_v20  ;;  %v6578_v22 = vadd.f32 %v6577_v32, %v6515_v20  ;;  %v6617_v43 = vmul.f32 %v6515_v20, %v6515_v20  ;;  %v6647_v42 = vadd.f32 %v6646_v14, %v6616_v38 }
 0x61b   : > { %v6579_v54 = vadd.f32 %v6578_v22, %v6516_v46  ;;  %v6648_v25 = vadd.f32 %v6647_v42, %v6617_v43 }
 0x61d   : > { %v6580_v0 = vrot.slane %v6579_v54, 4  ;;  %v6649_v17 = vadd.f32 %v6648_v25, %v6618_v37 }
 0x61f   : > { %v6581_v58 = vadd.f32 %v6580_v0, %v6579_v54  ;;  %v6650_v60 = vrot.slane %v6649_v17, 4 }
 0x621   : > { %v6582_v41 = vrot.slane %v6581_v58, 2  ;;  %v6651_v59 = vadd.f32 %v6650_v60, %v6649_v17 }
 0x623   : > { %v6583_v61 = vadd.f32 %v6582_v41, %v6581_v58  ;;  %v6652_v35 = vrot.slane %v6651_v59, 2 }
 0x625   : > { %v6584_v8 = vrot.slane %v6583_v61, 1  ;;  %v6653_v18 = vadd.f32 %v6652_v35, %v6651_v59 }
 0x627   : > { %v6585_v13 = vadd.f32 %v6584_v8, %v6583_v61  ;;  %v6654_v11 = vrot.slane %v6653_v18, 1 }
 0x629   : > { %6586 = vst [vmem:[%s339_s12] sm:$0x1] %v6585_v13  ;;  %v6655_v26 = vadd.f32 %v6654_v11, %v6653_v18 }
 0x62b   : > { %6656 = vst [vmem:[%s342_s15] sm:$0x1] %v6655_v26 }
 0x62c PF: > { %s19_s27 = sadd.s32 1, %s10837_s27  }
 0x62d   : > { %p16_p4 = scmp.ge.s32.totalorder %s19_s27, 4  }
 0x62f   :  { %18 = sbr.rel (!%p16_p4) target bundleno = 1 (0x1), region = 123 }

</bundles_post_ra>
